<compile_context>
chip_gen: v6e
topology: v6e:2x2x1
jax: 0.10.0
libtpu: 0.0.40
codegen_flags: <defaults>
</compile_context>

<pallas_src>
import jax
import jax.numpy as jnp
from jax.experimental import pallas as pl
from jax.experimental.pallas import tpu as pltpu

CHANNEL = 3
NUM_CLASS = 5
C_IN = CHANNEL + NUM_CLASS                  # 8
CONV_DIMS = [C_IN, 64, 64, 64, 128, 1024]   # conv1..conv5
FC_DIMS = [1024, 512, 256, 3]               # fc1..fc3
BN_EPS = 1e-5
FEAT = CONV_DIMS[-1]                        # 1024


# --------------------------------------------------------------------------
# Fused kernel: point MLP + argmax + max-pool + FC head.
# --------------------------------------------------------------------------
def _cloudpose_kernel(x_ref,
                      w1, b1, w2, b2, w3, b3, w4, b4, w5, b5,
                      w6, b6, w7, b7, w8, b8,
                      pose_ref, argmax_ref, feat_sc):
    n = pl.program_id(1)

    def layer(inp, w, b):
        acc = jnp.dot(w[...], inp, preferred_element_type=jnp.float32) + b[...]
        return jnp.maximum(acc, 0.0)

    # Input block is the raw f32 (C_IN, tile_n) slice; cast to bf16 in-kernel.
    x = x_ref[0].astype(jnp.bfloat16)              # (C_IN, tile_n)
    h = layer(x, w1, b1)
    h = layer(h.astype(jnp.bfloat16), w2, b2)
    h = layer(h.astype(jnp.bfloat16), w3, b3)
    h = layer(h.astype(jnp.bfloat16), w4, b4)
    h = layer(h.astype(jnp.bfloat16), w5, b5)      # (FEAT, tile_n) f32

    feat, tile_n = h.shape

    # Per-point argmax over channels.  Channels sit on the sublane axis, so
    # both the max and the tie-breaking min-index reduce land directly as
    # lane-dense (1, tile_n) rows -- no relayout, no extra MXU push.
    # First-index tie-break matches torch.argmax (all-zero ReLU rows -> 0).
    col_max = jnp.max(h, axis=0, keepdims=True)                        # (1, tile_n)
    ch_iota = jax.lax.broadcasted_iota(jnp.int32, h.shape, 0).astype(jnp.float32)
    masked_idx = jnp.where(h == col_max, ch_iota, jnp.float32(feat))
    argmax_ref[0] = jnp.min(masked_idx, axis=0, keepdims=True).astype(jnp.int32)

    # Global max-pool over points: fold the lane (point) axis 128 lanes at a
    # time (pure VPU elementwise max, no per-tile cross-lane XLU pass) and
    # accumulate into the resident scratch across the point-tile grid axis.
    chunk_w = feat_sc.shape[1]
    part = h[:, 0:chunk_w]
    for j in range(1, tile_n // chunk_w):
        part = jnp.maximum(part, h[:, j * chunk_w:(j + 1) * chunk_w])

    @pl.when(n == 0)
    def _():
        feat_sc[...] = part

    @pl.when(n > 0)
    def _():
        feat_sc[...] = jnp.maximum(feat_sc[...], part)

    # Fused FC head (fc1+bn6+relu, fc2+bn7+relu, fc3), once per batch element
    # on the last point tile, in column orientation (out,in) @ (in,1).
    @pl.when(n == pl.num_programs(1) - 1)
    def _():
        g = jnp.max(feat_sc[...], axis=1, keepdims=True)               # (FEAT, 1)
        t = jnp.maximum(
            jnp.dot(w6[...], g.astype(jnp.bfloat16),
                    preferred_element_type=jnp.float32) + b6[...], 0.0)
        t = jnp.maximum(
            jnp.dot(w7[...], t.astype(jnp.bfloat16),
                    preferred_element_type=jnp.float32) + b7[...], 0.0)
        pose = jnp.dot(w8[...], t.astype(jnp.bfloat16),
                       preferred_element_type=jnp.float32) + b8[...]
        pose_ref[0] = pose                                             # (3, 1)


# --------------------------------------------------------------------------
# Wrapper
# --------------------------------------------------------------------------
def _full_spec(arr):
    # Weights/biases are resident (constant index map).  pl.Buffered(1) would
    # halve their VMEM footprint (only matters near the v7x 64 MiB limit); the
    # default buffering is kept to stay on the validated lowering path.
    nd = arr.ndim
    return pl.BlockSpec(arr.shape, lambda b, n, _nd=nd: (0,) * _nd)


def _pick_tile_n(n_points, cap=1024):
    """Largest point tile that is a multiple of 128, divides N, and is <= cap."""
    best = None
    t = 128
    while t <= min(n_points, cap):
        if n_points % t == 0:
            best = t
        t += 128
    return best if best is not None else n_points


def cloudpose_rot_forward(point_cloud, params, tile_n=None, tile_cap=1024):
    """point_cloud: (B, C_IN, N) f32 in PyTorch Conv1d layout.

    Returns (pose (B, 3) f32, max_indices (B, N) int32)."""
    B, C, N = point_cloud.shape
    assert C == C_IN, f"expected {C_IN} input channels, got {C}"
    if tile_n is None:
        # tile_cap=1024 is safe on v7x's 64 MiB VMEM; on v5e/v6e (128 MiB)
        # callers with large N can pass tile_cap=2048 to halve the step count.
        tile_n = _pick_tile_n(N, cap=tile_cap)
    assert N % tile_n == 0, "N must be divisible by tile_n"
    n_tiles = N // tile_n
    chunk_w = 128 if tile_n % 128 == 0 else tile_n

    in_specs = [pl.BlockSpec((1, C_IN, tile_n), lambda b, n: (b, 0, n))]
    args = [point_cloud]
    for i in range(1, 9):
        w, bias = params[f"w{i}"], params[f"b{i}"]
        in_specs += [_full_spec(w), _full_spec(bias)]
        args += [w, bias]

    # Scale the scoped-VMEM request with the tile instead of a flat 48 MiB so
    # the same code leaves headroom on v7x's 64 MiB VMEM.
    vmem_limit = int(min(48 * 1024 * 1024,
                         12 * 1024 * 1024 + 6 * FEAT * tile_n * 4))

    pose, argmax = pl.pallas_call(
        _cloudpose_kernel,
        out_shape=(jax.ShapeDtypeStruct((B, 3, 1), jnp.float32),
                   jax.ShapeDtypeStruct((B, 1, N), jnp.int32)),
        grid_spec=pltpu.PrefetchScalarGridSpec(
            num_scalar_prefetch=0,
            grid=(B, n_tiles),
            in_specs=in_specs,
            out_specs=(pl.BlockSpec((1, 3, 1), lambda b, n: (b, 0, 0)),
                       pl.BlockSpec((1, 1, tile_n), lambda b, n: (b, 0, n))),
            scratch_shapes=[pltpu.VMEM((FEAT, chunk_w), jnp.float32)],
        ),
        compiler_params=pltpu.CompilerParams(
            dimension_semantics=("parallel", "arbitrary"),
            vmem_limit_bytes=vmem_limit),
    )(*args)

    return pose.reshape(B, 3), argmax.reshape(B, N)


# --------------------------------------------------------------------------
# Deterministic parameter init (BN folded into matmul weights/bias, eval mode)
# Weights are kept in PyTorch layout: (C_out, C_in) / (out_features, in_features).
# --------------------------------------------------------------------------
def init_params(key):
    params = {}
    layer_dims = list(zip(CONV_DIMS[:-1], CONV_DIMS[1:])) + \
                 list(zip(FC_DIMS[:-1], FC_DIMS[1:]))
    keys = jax.random.split(key, 4 * len(layer_dims))
    it = iter(keys)
    for i, (fan_in, fan_out) in enumerate(layer_dims, start=1):
        bound = 1.0 / jnp.sqrt(fan_in)
        w = jax.random.uniform(next(it), (fan_out, fan_in), jnp.float32, -bound, bound)
        b = jax.random.uniform(next(it), (fan_out,), jnp.float32, -bound, bound)
        if i <= 7:   # bn1..bn5 follow conv1..conv5; bn6, bn7 follow fc1, fc2
            gamma = 1.0 + 0.1 * jax.random.normal(next(it), (fan_out,), jnp.float32)
            beta = 0.1 * jax.random.normal(next(it), (fan_out,), jnp.float32)
            mean = 0.05 * jnp.arange(fan_out, dtype=jnp.float32) / fan_out
            var = 1.0 + 0.01 * jnp.arange(fan_out, dtype=jnp.float32) / fan_out
            scale = gamma / jnp.sqrt(var + BN_EPS)
            w = w * scale[:, None]
            b = (b - mean) * scale + beta
        else:
            next(it); next(it)
        params[f"w{i}"] = w.astype(jnp.bfloat16)   # MXU runs bf16 x bf16 -> f32
        params[f"b{i}"] = b.reshape(fan_out, 1)    # bias stays f32 (f32 accumulator)
    return params


# --------------------------------------------------------------------------
# Pure-JAX reference (same bf16-matmul / f32-accumulate numerics and the same
# channel-major contraction orientation as the kernel)
# --------------------------------------------------------------------------
def reference_forward(point_cloud, params):
    x = point_cloud.astype(jnp.bfloat16)                 # (B, C_IN, N)
    h = None
    for i in range(1, 6):
        w, b = params[f"w{i}"], params[f"b{i}"]
        h = jnp.maximum(
            jnp.matmul(w, x, preferred_element_type=jnp.float32) + b[None], 0.0)
        x = h.astype(jnp.bfloat16)
    max_indices = jnp.argmax(h, axis=1).astype(jnp.int32)   # (B, N)
    g = jnp.max(h, axis=2)                                   # (B, FEAT)
    t = g.astype(jnp.bfloat16)
    for i in (6, 7):
        w, b = params[f"w{i}"], params[f"b{i}"]
        hh = jnp.maximum(
            jnp.matmul(t, w.T, preferred_element_type=jnp.float32)
            + b[:, 0][None], 0.0)
        t = hh.astype(jnp.bfloat16)
    pose = jnp.matmul(t, params["w8"].T, preferred_element_type=jnp.float32) \
           + params["b8"][:, 0][None]
    return pose, max_indices


if __name__ == "__main__":
    key = jax.random.PRNGKey(0)
    k_param, k_data = jax.random.split(key)

    B, N = 2, 256
    params = init_params(k_param)
    point_cloud = jax.random.normal(k_data, (B, C_IN, N), jnp.float32)

    pose, max_indices = cloudpose_rot_forward(point_cloud, params)
    pose = jax.block_until_ready(pose)
    max_indices = jax.block_until_ready(max_indices)

    ref_pose, ref_idx = reference_forward(point_cloud, params)
    assert pose.shape == (B, 3) and pose.dtype == jnp.float32
    assert max_indices.shape == (B, N) and max_indices.dtype == jnp.int32
    assert jnp.allclose(pose, ref_pose, atol=2e-2, rtol=2e-2), "pose mismatch"
    agreement = jnp.mean((max_indices == ref_idx).astype(jnp.float32))
    assert agreement >= 0.99, f"argmax agreement too low: {agreement}"

    print("KERNEL_OK")
</pallas_src>

<mosaic_0001>
module attributes {stable_mosaic.version = 11 : i64} {
  func.func @_cloudpose_kernel(%arg0: i32, %arg1: i32, %arg2: memref<1x8x256xf32, #tpu.memory_space<vmem>>, %arg3: memref<64x8xbf16, #tpu.memory_space<vmem>>, %arg4: memref<64x1xf32, #tpu.memory_space<vmem>>, %arg5: memref<64x64xbf16, #tpu.memory_space<vmem>>, %arg6: memref<64x1xf32, #tpu.memory_space<vmem>>, %arg7: memref<64x64xbf16, #tpu.memory_space<vmem>>, %arg8: memref<64x1xf32, #tpu.memory_space<vmem>>, %arg9: memref<128x64xbf16, #tpu.memory_space<vmem>>, %arg10: memref<128x1xf32, #tpu.memory_space<vmem>>, %arg11: memref<1024x128xbf16, #tpu.memory_space<vmem>>, %arg12: memref<1024x1xf32, #tpu.memory_space<vmem>>, %arg13: memref<512x1024xbf16, #tpu.memory_space<vmem>>, %arg14: memref<512x1xf32, #tpu.memory_space<vmem>>, %arg15: memref<256x512xbf16, #tpu.memory_space<vmem>>, %arg16: memref<256x1xf32, #tpu.memory_space<vmem>>, %arg17: memref<3x256xbf16, #tpu.memory_space<vmem>>, %arg18: memref<3x1xf32, #tpu.memory_space<vmem>>, %arg19: memref<1x3x1xf32, #tpu.memory_space<vmem>>, %arg20: memref<1x1x256xi32, #tpu.memory_space<vmem>>, %arg21: memref<1024x128xf32, #tpu.memory_space<vmem>>) attributes {dimension_semantics = [#tpu.dimension_semantics<parallel>, #tpu.dimension_semantics<arbitrary>], iteration_bounds = array<i64: 2, 1>, scalar_prefetch = 0 : i64, scratch_operands = 1 : i64, tpu.core_type = #tpu.core_type<tc>, window_params = [{transform_indices = @transform_0, window_bounds = array<i64: 1, 8, 256>}, {pipeline_mode = #tpu.pipeline_mode<synchronous>, transform_indices = @transform_1, window_bounds = array<i64: 64, 8>}, {pipeline_mode = #tpu.pipeline_mode<synchronous>, transform_indices = @transform_2, window_bounds = array<i64: 64, 1>}, {pipeline_mode = #tpu.pipeline_mode<synchronous>, transform_indices = @transform_3, window_bounds = array<i64: 64, 64>}, {pipeline_mode = #tpu.pipeline_mode<synchronous>, transform_indices = @transform_4, window_bounds = array<i64: 64, 1>}, {pipeline_mode = #tpu.pipeline_mode<synchronous>, transform_indices = @transform_5, window_bounds = array<i64: 64, 64>}, {pipeline_mode = #tpu.pipeline_mode<synchronous>, transform_indices = @transform_6, window_bounds = array<i64: 64, 1>}, {pipeline_mode = #tpu.pipeline_mode<synchronous>, transform_indices = @transform_7, window_bounds = array<i64: 128, 64>}, {pipeline_mode = #tpu.pipeline_mode<synchronous>, transform_indices = @transform_8, window_bounds = array<i64: 128, 1>}, {pipeline_mode = #tpu.pipeline_mode<synchronous>, transform_indices = @transform_9, window_bounds = array<i64: 1024, 128>}, {pipeline_mode = #tpu.pipeline_mode<synchronous>, transform_indices = @transform_10, window_bounds = array<i64: 1024, 1>}, {pipeline_mode = #tpu.pipeline_mode<synchronous>, transform_indices = @transform_11, window_bounds = array<i64: 512, 1024>}, {pipeline_mode = #tpu.pipeline_mode<synchronous>, transform_indices = @transform_12, window_bounds = array<i64: 512, 1>}, {pipeline_mode = #tpu.pipeline_mode<synchronous>, transform_indices = @transform_13, window_bounds = array<i64: 256, 512>}, {pipeline_mode = #tpu.pipeline_mode<synchronous>, transform_indices = @transform_14, window_bounds = array<i64: 256, 1>}, {pipeline_mode = #tpu.pipeline_mode<synchronous>, transform_indices = @transform_15, window_bounds = array<i64: 3, 256>}, {pipeline_mode = #tpu.pipeline_mode<synchronous>, transform_indices = @transform_16, window_bounds = array<i64: 3, 1>}, {transform_indices = @transform_17, window_bounds = array<i64: 1, 3, 1>}, {transform_indices = @transform_18, window_bounds = array<i64: 1, 1, 256>}]} {
    %c0 = arith.constant 0 : index
    %c0_0 = arith.constant 0 : index
    %c0_1 = arith.constant 0 : index
    %0 = vector.load %arg2[%c0, %c0_0, %c0_1] : memref<1x8x256xf32, #tpu.memory_space<vmem>>, vector<1x8x256xf32>
    %1 = vector.shape_cast %0 : vector<1x8x256xf32> to vector<8x256xf32>
    %2 = arith.truncf %1 : vector<8x256xf32> to vector<8x256xbf16>
    %c0_2 = arith.constant 0 : index
    %c0_3 = arith.constant 0 : index
    %3 = vector.load %arg3[%c0_2, %c0_3] : memref<64x8xbf16, #tpu.memory_space<vmem>>, vector<64x8xbf16>
    %cst = arith.constant dense<0.000000e+00> : vector<64x256xf32>
    %4 = tpu.matmul %3, %2, %cst {dimension_numbers = #tpu.dot_dimension_numbers<[1], [0], [0], [1], [0, 0, 1, 1], [], []>} : vector<64x8xbf16>, vector<8x256xbf16>, vector<64x256xf32> -> vector<64x256xf32>
    %c0_4 = arith.constant 0 : index
    %c0_5 = arith.constant 0 : index
    %5 = vector.load %arg4[%c0_4, %c0_5] : memref<64x1xf32, #tpu.memory_space<vmem>>, vector<64x1xf32>
    %6 = vector.broadcast %5 : vector<64x1xf32> to vector<64x256xf32>
    %7 = arith.addf %4, %6 : vector<64x256xf32>
    %cst_6 = arith.constant 0.000000e+00 : f32
    %8 = vector.broadcast %cst_6 : f32 to vector<64x256xf32>
    %9 = arith.maximumf %7, %8 : vector<64x256xf32>
    %10 = arith.truncf %9 : vector<64x256xf32> to vector<64x256xbf16>
    %c0_7 = arith.constant 0 : index
    %c0_8 = arith.constant 0 : index
    %11 = vector.load %arg5[%c0_7, %c0_8] : memref<64x64xbf16, #tpu.memory_space<vmem>>, vector<64x64xbf16>
    %cst_9 = arith.constant dense<0.000000e+00> : vector<64x256xf32>
    %12 = tpu.matmul %11, %10, %cst_9 {dimension_numbers = #tpu.dot_dimension_numbers<[1], [0], [0], [1], [0, 0, 1, 1], [], []>} : vector<64x64xbf16>, vector<64x256xbf16>, vector<64x256xf32> -> vector<64x256xf32>
    %c0_10 = arith.constant 0 : index
    %c0_11 = arith.constant 0 : index
    %13 = vector.load %arg6[%c0_10, %c0_11] : memref<64x1xf32, #tpu.memory_space<vmem>>, vector<64x1xf32>
    %14 = vector.broadcast %13 : vector<64x1xf32> to vector<64x256xf32>
    %15 = arith.addf %12, %14 : vector<64x256xf32>
    %cst_12 = arith.constant 0.000000e+00 : f32
    %16 = vector.broadcast %cst_12 : f32 to vector<64x256xf32>
    %17 = arith.maximumf %15, %16 : vector<64x256xf32>
    %18 = arith.truncf %17 : vector<64x256xf32> to vector<64x256xbf16>
    %c0_13 = arith.constant 0 : index
    %c0_14 = arith.constant 0 : index
    %19 = vector.load %arg7[%c0_13, %c0_14] : memref<64x64xbf16, #tpu.memory_space<vmem>>, vector<64x64xbf16>
    %cst_15 = arith.constant dense<0.000000e+00> : vector<64x256xf32>
    %20 = tpu.matmul %19, %18, %cst_15 {dimension_numbers = #tpu.dot_dimension_numbers<[1], [0], [0], [1], [0, 0, 1, 1], [], []>} : vector<64x64xbf16>, vector<64x256xbf16>, vector<64x256xf32> -> vector<64x256xf32>
    %c0_16 = arith.constant 0 : index
    %c0_17 = arith.constant 0 : index
    %21 = vector.load %arg8[%c0_16, %c0_17] : memref<64x1xf32, #tpu.memory_space<vmem>>, vector<64x1xf32>
    %22 = vector.broadcast %21 : vector<64x1xf32> to vector<64x256xf32>
    %23 = arith.addf %20, %22 : vector<64x256xf32>
    %cst_18 = arith.constant 0.000000e+00 : f32
    %24 = vector.broadcast %cst_18 : f32 to vector<64x256xf32>
    %25 = arith.maximumf %23, %24 : vector<64x256xf32>
    %26 = arith.truncf %25 : vector<64x256xf32> to vector<64x256xbf16>
    %c0_19 = arith.constant 0 : index
    %c0_20 = arith.constant 0 : index
    %27 = vector.load %arg9[%c0_19, %c0_20] : memref<128x64xbf16, #tpu.memory_space<vmem>>, vector<128x64xbf16>
    %cst_21 = arith.constant dense<0.000000e+00> : vector<128x256xf32>
    %28 = tpu.matmul %27, %26, %cst_21 {dimension_numbers = #tpu.dot_dimension_numbers<[1], [0], [0], [1], [0, 0, 1, 1], [], []>} : vector<128x64xbf16>, vector<64x256xbf16>, vector<128x256xf32> -> vector<128x256xf32>
    %c0_22 = arith.constant 0 : index
    %c0_23 = arith.constant 0 : index
    %29 = vector.load %arg10[%c0_22, %c0_23] : memref<128x1xf32, #tpu.memory_space<vmem>>, vector<128x1xf32>
    %30 = vector.broadcast %29 : vector<128x1xf32> to vector<128x256xf32>
    %31 = arith.addf %28, %30 : vector<128x256xf32>
    %cst_24 = arith.constant 0.000000e+00 : f32
    %32 = vector.broadcast %cst_24 : f32 to vector<128x256xf32>
    %33 = arith.maximumf %31, %32 : vector<128x256xf32>
    %34 = arith.truncf %33 : vector<128x256xf32> to vector<128x256xbf16>
    %c0_25 = arith.constant 0 : index
    %c0_26 = arith.constant 0 : index
    %35 = vector.load %arg11[%c0_25, %c0_26] : memref<1024x128xbf16, #tpu.memory_space<vmem>>, vector<1024x128xbf16>
    %cst_27 = arith.constant dense<0.000000e+00> : vector<1024x256xf32>
    %36 = tpu.matmul %35, %34, %cst_27 {dimension_numbers = #tpu.dot_dimension_numbers<[1], [0], [0], [1], [0, 0, 1, 1], [], []>} : vector<1024x128xbf16>, vector<128x256xbf16>, vector<1024x256xf32> -> vector<1024x256xf32>
    %c0_28 = arith.constant 0 : index
    %c0_29 = arith.constant 0 : index
    %37 = vector.load %arg12[%c0_28, %c0_29] : memref<1024x1xf32, #tpu.memory_space<vmem>>, vector<1024x1xf32>
    %38 = vector.broadcast %37 : vector<1024x1xf32> to vector<1024x256xf32>
    %39 = arith.addf %36, %38 : vector<1024x256xf32>
    %cst_30 = arith.constant 0.000000e+00 : f32
    %40 = vector.broadcast %cst_30 : f32 to vector<1024x256xf32>
    %41 = arith.maximumf %39, %40 : vector<1024x256xf32>
    %cst_31 = arith.constant dense<0xFF800000> : vector<256xf32>
    %42 = vector.multi_reduction <maximumf>, %41, %cst_31 [0] : vector<1024x256xf32> to vector<256xf32>
    %43 = vector.shape_cast %42 : vector<256xf32> to vector<1x256xf32>
    %44 = tpu.iota {dimensions = array<i32: 0>} : vector<1024x256xi32>
    %45 = arith.sitofp %44 : vector<1024x256xi32> to vector<1024x256xf32>
    %46 = vector.broadcast %43 : vector<1x256xf32> to vector<1024x256xf32>
    %47 = arith.cmpf oeq, %41, %46 : vector<1024x256xf32>
    %cst_32 = arith.constant 1.024000e+03 : f32
    %48 = vector.broadcast %cst_32 : f32 to vector<1024x256xf32>
    %49 = arith.select %47, %45, %48 : vector<1024x256xi1>, vector<1024x256xf32>
    %cst_33 = arith.constant dense<0x7F800000> : vector<256xf32>
    %50 = vector.multi_reduction <minimumf>, %49, %cst_33 [0] : vector<1024x256xf32> to vector<256xf32>
    %51 = vector.shape_cast %50 : vector<256xf32> to vector<1x256xf32>
    %52 = arith.fptosi %51 : vector<1x256xf32> to vector<1x256xi32>
    %c0_34 = arith.constant 0 : index
    %c0_35 = arith.constant 0 : index
    %c0_36 = arith.constant 0 : index
    %53 = vector.load %arg20[%c0_34, %c0_35, %c0_36] : memref<1x1x256xi32, #tpu.memory_space<vmem>>, vector<1x1x256xi32>
    %54 = vector.shape_cast %53 : vector<1x1x256xi32> to vector<1x256xi32>
    %55 = vector.shape_cast %52 : vector<1x256xi32> to vector<1x1x256xi32>
    tpu.vector_store %arg20[%c0_34, %c0_35, %c0_36], %55 {strides = array<i32>} : memref<1x1x256xi32, #tpu.memory_space<vmem>>, vector<1x1x256xi32>,
    %56 = vector.extract_strided_slice %41 {offsets = [0, 0], sizes = [1024, 128], strides = [1, 1]} : vector<1024x256xf32> to vector<1024x128xf32>
    %57 = vector.extract_strided_slice %41 {offsets = [0, 128], sizes = [1024, 128], strides = [1, 1]} : vector<1024x256xf32> to vector<1024x128xf32>
    %58 = arith.maximumf %56, %57 : vector<1024x128xf32>
    %c0_i32 = arith.constant 0 : i32
    %59 = arith.cmpi eq, %arg1, %c0_i32 : i32
    %60 = arith.extui %59 : i1 to i32
    %c0_i32_37 = arith.constant 0 : i32
    %61 = arith.cmpi ne, %60, %c0_i32_37 : i32
    scf.if %61 {
      %c0_42 = arith.constant 0 : index
      %c0_43 = arith.constant 0 : index
      %68 = vector.load %arg21[%c0_42, %c0_43] : memref<1024x128xf32, #tpu.memory_space<vmem>>, vector<1024x128xf32>
      tpu.vector_store %arg21[%c0_42, %c0_43], %58 {strides = array<i32>} : memref<1024x128xf32, #tpu.memory_space<vmem>>, vector<1024x128xf32>,
    } else {
    }
    %c0_i32_38 = arith.constant 0 : i32
    %62 = arith.cmpi sgt, %arg1, %c0_i32_38 : i32
    %63 = arith.extui %62 : i1 to i32
    %c0_i32_39 = arith.constant 0 : i32
    %64 = arith.cmpi ne, %63, %c0_i32_39 : i32
    scf.if %64 {
      %c0_42 = arith.constant 0 : index
      %c0_43 = arith.constant 0 : index
      %68 = vector.load %arg21[%c0_42, %c0_43] : memref<1024x128xf32, #tpu.memory_space<vmem>>, vector<1024x128xf32>
      %69 = arith.maximumf %68, %58 : vector<1024x128xf32>
      %c0_44 = arith.constant 0 : index
      %c0_45 = arith.constant 0 : index
      %70 = vector.load %arg21[%c0_44, %c0_45] : memref<1024x128xf32, #tpu.memory_space<vmem>>, vector<1024x128xf32>
      tpu.vector_store %arg21[%c0_44, %c0_45], %69 {strides = array<i32>} : memref<1024x128xf32, #tpu.memory_space<vmem>>, vector<1024x128xf32>,
    } else {
    }
    %c0_i32_40 = arith.constant 0 : i32
    %65 = arith.cmpi eq, %arg1, %c0_i32_40 : i32
    %66 = arith.extui %65 : i1 to i32
    %c0_i32_41 = arith.constant 0 : i32
    %67 = arith.cmpi ne, %66, %c0_i32_41 : i32
    scf.if %67 {
      %c0_42 = arith.constant 0 : index
      %c0_43 = arith.constant 0 : index
      %68 = vector.load %arg21[%c0_42, %c0_43] : memref<1024x128xf32, #tpu.memory_space<vmem>>, vector<1024x128xf32>
      %cst_44 = arith.constant dense<0xFF800000> : vector<1024xf32>
      %69 = vector.multi_reduction <maximumf>, %68, %cst_44 [1] : vector<1024x128xf32> to vector<1024xf32>
      %70 = vector.shape_cast %69 : vector<1024xf32> to vector<1024x1xf32>
      %c0_45 = arith.constant 0 : index
      %c0_46 = arith.constant 0 : index
      %71 = vector.load %arg13[%c0_45, %c0_46] : memref<512x1024xbf16, #tpu.memory_space<vmem>>, vector<512x1024xbf16>
      %72 = arith.truncf %70 : vector<1024x1xf32> to vector<1024x1xbf16>
      %cst_47 = arith.constant dense<0.000000e+00> : vector<512x1xf32>
      %73 = tpu.matmul %71, %72, %cst_47 {dimension_numbers = #tpu.dot_dimension_numbers<[1], [0], [0], [1], [0, 0, 1, 1], [], []>} : vector<512x1024xbf16>, vector<1024x1xbf16>, vector<512x1xf32> -> vector<512x1xf32>
      %c0_48 = arith.constant 0 : index
      %c0_49 = arith.constant 0 : index
      %74 = vector.load %arg14[%c0_48, %c0_49] : memref<512x1xf32, #tpu.memory_space<vmem>>, vector<512x1xf32>
      %75 = arith.addf %73, %74 : vector<512x1xf32>
      %cst_50 = arith.constant 0.000000e+00 : f32
      %76 = vector.broadcast %cst_50 : f32 to vector<512x1xf32>
      %77 = arith.maximumf %75, %76 : vector<512x1xf32>
      %c0_51 = arith.constant 0 : index
      %c0_52 = arith.constant 0 : index
      %78 = vector.load %arg15[%c0_51, %c0_52] : memref<256x512xbf16, #tpu.memory_space<vmem>>, vector<256x512xbf16>
      %79 = arith.truncf %77 : vector<512x1xf32> to vector<512x1xbf16>
      %cst_53 = arith.constant dense<0.000000e+00> : vector<256x1xf32>
      %80 = tpu.matmul %78, %79, %cst_53 {dimension_numbers = #tpu.dot_dimension_numbers<[1], [0], [0], [1], [0, 0, 1, 1], [], []>} : vector<256x512xbf16>, vector<512x1xbf16>, vector<256x1xf32> -> vector<256x1xf32>
      %c0_54 = arith.constant 0 : index
      %c0_55 = arith.constant 0 : index
      %81 = vector.load %arg16[%c0_54, %c0_55] : memref<256x1xf32, #tpu.memory_space<vmem>>, vector<256x1xf32>
      %82 = arith.addf %80, %81 : vector<256x1xf32>
      %cst_56 = arith.constant 0.000000e+00 : f32
      %83 = vector.broadcast %cst_56 : f32 to vector<256x1xf32>
      %84 = arith.maximumf %82, %83 : vector<256x1xf32>
      %c0_57 = arith.constant 0 : index
      %c0_58 = arith.constant 0 : index
      %85 = vector.load %arg17[%c0_57, %c0_58] : memref<3x256xbf16, #tpu.memory_space<vmem>>, vector<3x256xbf16>
      %86 = arith.truncf %84 : vector<256x1xf32> to vector<256x1xbf16>
      %cst_59 = arith.constant dense<0.000000e+00> : vector<3x1xf32>
      %87 = tpu.matmul %85, %86, %cst_59 {dimension_numbers = #tpu.dot_dimension_numbers<[1], [0], [0], [1], [0, 0, 1, 1], [], []>} : vector<3x256xbf16>, vector<256x1xbf16>, vector<3x1xf32> -> vector<3x1xf32>
      %c0_60 = arith.constant 0 : index
      %c0_61 = arith.constant 0 : index
      %88 = vector.load %arg18[%c0_60, %c0_61] : memref<3x1xf32, #tpu.memory_space<vmem>>, vector<3x1xf32>
      %89 = arith.addf %87, %88 : vector<3x1xf32>
      %c0_62 = arith.constant 0 : index
      %c0_63 = arith.constant 0 : index
      %c0_64 = arith.constant 0 : index
      %90 = vector.load %arg19[%c0_62, %c0_63, %c0_64] : memref<1x3x1xf32, #tpu.memory_space<vmem>>, vector<1x3x1xf32>
      %91 = vector.shape_cast %90 : vector<1x3x1xf32> to vector<3x1xf32>
      %92 = vector.shape_cast %89 : vector<3x1xf32> to vector<1x3x1xf32>
      tpu.vector_store %arg19[%c0_62, %c0_63, %c0_64], %92 {strides = array<i32>} : memref<1x3x1xf32, #tpu.memory_space<vmem>>, vector<1x3x1xf32>,
    } else {
    }
    return
  }
  func.func @transform_0(%arg0: i32, %arg1: i32) -> (i32, i32, i32) {
    %c0_i32 = arith.constant 0 : i32
    %c0_i32_0 = arith.constant 0 : i32
    return %arg0, %c0_i32, %arg1 : i32, i32, i32
  }
  func.func @transform_1(%arg0: i32, %arg1: i32) -> (i32, i32) {
    %c0_i32 = arith.constant 0 : i32
    %c0_i32_0 = arith.constant 0 : i32
    %c0_i32_1 = arith.constant 0 : i32
    return %c0_i32, %c0_i32_0 : i32, i32
  }
  func.func @transform_2(%arg0: i32, %arg1: i32) -> (i32, i32) {
    %c0_i32 = arith.constant 0 : i32
    %c0_i32_0 = arith.constant 0 : i32
    %c0_i32_1 = arith.constant 0 : i32
    return %c0_i32, %c0_i32_0 : i32, i32
  }
  func.func @transform_3(%arg0: i32, %arg1: i32) -> (i32, i32) {
    %c0_i32 = arith.constant 0 : i32
    %c0_i32_0 = arith.constant 0 : i32
    %c0_i32_1 = arith.constant 0 : i32
    return %c0_i32, %c0_i32_0 : i32, i32
  }
  func.func @transform_4(%arg0: i32, %arg1: i32) -> (i32, i32) {
    %c0_i32 = arith.constant 0 : i32
    %c0_i32_0 = arith.constant 0 : i32
    %c0_i32_1 = arith.constant 0 : i32
    return %c0_i32, %c0_i32_0 : i32, i32
  }
  func.func @transform_5(%arg0: i32, %arg1: i32) -> (i32, i32) {
    %c0_i32 = arith.constant 0 : i32
    %c0_i32_0 = arith.constant 0 : i32
    %c0_i32_1 = arith.constant 0 : i32
    return %c0_i32, %c0_i32_0 : i32, i32
  }
  func.func @transform_6(%arg0: i32, %arg1: i32) -> (i32, i32) {
    %c0_i32 = arith.constant 0 : i32
    %c0_i32_0 = arith.constant 0 : i32
    %c0_i32_1 = arith.constant 0 : i32
    return %c0_i32, %c0_i32_0 : i32, i32
  }
  func.func @transform_7(%arg0: i32, %arg1: i32) -> (i32, i32) {
    %c0_i32 = arith.constant 0 : i32
    %c0_i32_0 = arith.constant 0 : i32
    %c0_i32_1 = arith.constant 0 : i32
    return %c0_i32, %c0_i32_0 : i32, i32
  }
  func.func @transform_8(%arg0: i32, %arg1: i32) -> (i32, i32) {
    %c0_i32 = arith.constant 0 : i32
    %c0_i32_0 = arith.constant 0 : i32
    %c0_i32_1 = arith.constant 0 : i32
    return %c0_i32, %c0_i32_0 : i32, i32
  }
  func.func @transform_9(%arg0: i32, %arg1: i32) -> (i32, i32) {
    %c0_i32 = arith.constant 0 : i32
    %c0_i32_0 = arith.constant 0 : i32
    %c0_i32_1 = arith.constant 0 : i32
    return %c0_i32, %c0_i32_0 : i32, i32
  }
  func.func @transform_10(%arg0: i32, %arg1: i32) -> (i32, i32) {
    %c0_i32 = arith.constant 0 : i32
    %c0_i32_0 = arith.constant 0 : i32
    %c0_i32_1 = arith.constant 0 : i32
    return %c0_i32, %c0_i32_0 : i32, i32
  }
  func.func @transform_11(%arg0: i32, %arg1: i32) -> (i32, i32) {
    %c0_i32 = arith.constant 0 : i32
    %c0_i32_0 = arith.constant 0 : i32
    %c0_i32_1 = arith.constant 0 : i32
    return %c0_i32, %c0_i32_0 : i32, i32
  }
  func.func @transform_12(%arg0: i32, %arg1: i32) -> (i32, i32) {
    %c0_i32 = arith.constant 0 : i32
    %c0_i32_0 = arith.constant 0 : i32
    %c0_i32_1 = arith.constant 0 : i32
    return %c0_i32, %c0_i32_0 : i32, i32
  }
  func.func @transform_13(%arg0: i32, %arg1: i32) -> (i32, i32) {
    %c0_i32 = arith.constant 0 : i32
    %c0_i32_0 = arith.constant 0 : i32
    %c0_i32_1 = arith.constant 0 : i32
    return %c0_i32, %c0_i32_0 : i32, i32
  }
  func.func @transform_14(%arg0: i32, %arg1: i32) -> (i32, i32) {
    %c0_i32 = arith.constant 0 : i32
    %c0_i32_0 = arith.constant 0 : i32
    %c0_i32_1 = arith.constant 0 : i32
    return %c0_i32, %c0_i32_0 : i32, i32
  }
  func.func @transform_15(%arg0: i32, %arg1: i32) -> (i32, i32) {
    %c0_i32 = arith.constant 0 : i32
    %c0_i32_0 = arith.constant 0 : i32
    %c0_i32_1 = arith.constant 0 : i32
    return %c0_i32, %c0_i32_0 : i32, i32
  }
  func.func @transform_16(%arg0: i32, %arg1: i32) -> (i32, i32) {
    %c0_i32 = arith.constant 0 : i32
    %c0_i32_0 = arith.constant 0 : i32
    %c0_i32_1 = arith.constant 0 : i32
    return %c0_i32, %c0_i32_0 : i32, i32
  }
  func.func @transform_17(%arg0: i32, %arg1: i32) -> (i32, i32, i32) {
    %c0_i32 = arith.constant 0 : i32
    %c0_i32_0 = arith.constant 0 : i32
    %c0_i32_1 = arith.constant 0 : i32
    return %arg0, %c0_i32, %c0_i32_0 : i32, i32, i32
  }
  func.func @transform_18(%arg0: i32, %arg1: i32) -> (i32, i32, i32) {
    %c0_i32 = arith.constant 0 : i32
    %c0_i32_0 = arith.constant 0 : i32
    return %arg0, %c0_i32, %arg1 : i32, i32, i32
  }
}

</mosaic_0001>

<bundles_post_ra>
// kernel: tpu_custom_call.1
= control target key start
LH: loop header
LB: loop body
LE: loop exit
PB: predicated region body
PF: predicated region fallthrough
CT: control target
= control target key end

     0   :  { %s18417_s0 = inlined_call_operand.vmem [shape: f32[2,8,256], index: 0, kind: input, shape index: {}]   ;;  %s18418_s1 = inlined_call_operand.vmem [shape: bf16[64,8], index: 1, kind: input, shape index: {}]   ;;  %s18419_s2 = inlined_call_operand.vmem [shape: f32[64,1], index: 2, kind: input, shape index: {}]   ;;  %s18420_s3 = inlined_call_operand.vmem [shape: bf16[64,64], index: 3, kind: input, shape index: {}]   ;;  %s18421_s4 = inlined_call_operand.vmem [shape: f32[64,1], index: 4, kind: input, shape index: {}]   ;;  %s18422_s5 = inlined_call_operand.vmem [shape: bf16[64,64], index: 5, kind: input, shape index: {}]   ;;  %s18423_s6 = inlined_call_operand.vmem [shape: f32[64,1], index: 6, kind: input, shape index: {}]   ;;  %s18424_s7 = inlined_call_operand.vmem [shape: bf16[128,64], index: 7, kind: input, shape index: {}]   ;;  %s18425_s8 = inlined_call_operand.vmem [shape: f32[128,1], index: 8, kind: input, shape index: {}]   ;;  %s18426_s9 = inlined_call_operand.hbm [shape: bf16[1024,128], index: 9, kind: input, shape index: {}]   ;;  %s18427_s10 = inlined_call_operand.vmem [shape: f32[1024,1], index: 10, kind: input, shape index: {}]   ;;  %s18428_s11 = inlined_call_operand.vmem [shape: bf16[512,1024], index: 11, kind: input, shape index: {}]   ;;  %s18429_s12 = inlined_call_operand.vmem [shape: f32[512,1], index: 12, kind: input, shape index: {}]   ;;  %s18430_s13 = inlined_call_operand.hbm [shape: bf16[256,512], index: 13, kind: input, shape index: {}]   ;;  %s18431_s14 = inlined_call_operand.vmem [shape: f32[256,1], index: 14, kind: input, shape index: {}]   ;;  %s18432_s15 = inlined_call_operand.vmem [shape: bf16[3,256], index: 15, kind: input, shape index: {}]   ;;  %s18433_s16 = inlined_call_operand.vmem [shape: f32[3,1], index: 16, kind: input, shape index: {}]   ;;  %s18434_s17 = inlined_call_operand.vmem [shape: f32[2,3,1], index: 17, kind: output, shape index: {0}]   ;;  %s18435_s18 = inlined_call_operand.hbm [shape: s32[2,1,256], index: 18, kind: output, shape index: {1}]  }
   0x1   :  { %19037 = sst [smem:[#allocation334_spill]] %s18417_s0 }
   0x2   :  { %19038 = sst [smem:[#allocation335_spill]] %s18418_s1 }
   0x3   :  { %19039 = sst [smem:[#allocation336_spill]] %s18419_s2 }
   0x4   :  { %19040 = sst [smem:[#allocation337_spill]] %s18420_s3 }
   0x5   :  { %19041 = sst [smem:[#allocation338_spill]] %s18421_s4 }
   0x6   :  { %19042 = sst [smem:[#allocation339_spill]] %s18433_s16 }
   0x7   :  { %19043 = sst [smem:[#allocation340_spill]] %s18434_s17 }
   0x8   :  { %24 = vsyncpa [#allocation4], 0 }
   0x9   :  { %25 = vsyncpa [#allocation7], 0 }
   0xa   :  { %26 = vsyncpa [#allocation5], 0 }
   0xb   :  { %28 = vsyncpa [#allocation5 + $0x1], 0  ;;  %s11232_s27 = smov 0   ;;  %s11234_s28 = smov 0  }
   0xc   :  { %s11236_s29 = smov 0   ;;  %s11238_s30 = smov 0  }
   0xd   :  { %s11240_s0 = smov 0   ;;  %s11242_s19 = smov 0  }
   0xe LB: > { %19044 = sst [smem:[#allocation12_spill]] %s11106_s27  ;;  %s10022_s1 = sadd.s32 4294967295, %s11126_s19   ;;  %s11126_s19 = sphi %s11242_s19, %s34_s19   ;;  %s11122_s0 = sphi %s11240_s0, %s20494_s0   ;;  %s11118_s30 = sphi %s11238_s30, %s20497_s30   ;;  %s11114_s29 = sphi %s11236_s29, %s20492_s29   ;;  %s11110_s28 = sphi %s11234_s28, %s20496_s28   ;;  %s11106_s27 = sphi %s11232_s27, %s20495_s27  }
   0xf   : > { %19045 = sst [smem:[#allocation13_spill]] %s11114_s29  ;;  %s10023_s20 = sadd.s32 4294967294, %s11126_s19  }
  0x10   : > { %19046 = sst [smem:[#allocation14_spill]] %s11122_s0  ;;  %s46_s21 = sadd.s32 1, %s11122_s0 }
  0x11   : > { %19047 = sst [smem:[#allocation15_spill]] %s11126_s19  ;;  %s445_s22 = sadd.s32 1, %s11114_s29 }
  0x12   : > { %p48_p0 = scmp.ge.s32.totalorder %s46_s21, 2  ;;  %p455_p1 = scmp.ne.s32.totalorder %s11114_s29, %s11110_s28 }
  0x13   : > { %p456_p2 = scmp.eq.s32.totalorder %s10022_s1, 1  ;;  %p461_p3 = scmp.ne.s32.totalorder %s11110_s28, %s11106_s27 }
  0x14   : > { %s20499_s21 = smov (%p48_p0, %s46_s21), 0  ;;  %p462_p5 = scmp.eq.s32.totalorder %s10023_s20, 1 }
  0x15   : > { %19048 = sst [smem:[#allocation16_spill]] %s20499_s21  ;;  %p11272_p4 = por %p456_p2, %p455_p1 }
  0x16   : > { %s440_s23 = ssub.s32 %s11122_s0, %s20499_s21  ;;  %p10024_p6 = scmp.ge.s32.totalorder %s11126_s19, 1 }
  0x17   : > { %s19049_s2 = scalar_select %p11272_p4, 1, 0 }
  0x18   : > { %p443_p7 = scmp.eq.s32.totalorder %s440_s23, 0  ;;  %p11279_p8 = por %p462_p5, %p461_p3 }
  0x19   : > { %p469_p9 = scmp.lt.s32.totalorder %s11126_s19, 3  ;;  %p11291_p11 = scmp.eq.s32.totalorder %s10022_s1, 0 }
  0x1a   : > { %s19050_s24 = scalar_select %p11279_p8, 1, 0 }
  0x1b   : > { %s11285_s25 = scalar_select %p443_p7, %s11114_s29, %s445_s22  }
  0x1c   : > { %19051 = sst [smem:[#allocation17_spill]] %s19050_s24  ;;  %p11287_p10 = pnand %p10024_p6, %p469_p9 }
  0x1d   : > { %19052 = sst [smem:[#allocation18_spill]] %s11285_s25  ;;  %s11128_s20 = smov [#allocation3]  }
  0x1e   : > { %p10736_p12 = pneg %p11287_p10  ;;  %s505_s23 = sshll.u32 %s11128_s20, 4  ;;  %s506_s23 = int_to_ptr.vmem [resolvable:$true] %s505_s23 }
  0x1f   : > { %s11129_s22 = smov [#allocation6]   ;;  %s11001_s1 = scalar_lea.vmem %s506_s23, 8192 }
  0x20   : > { %p11299_p13 = pnand %p11291_p11, %p10736_p12  ;;  %s527_s0 = sshll.u32 %s11129_s22, 4  ;;  %s528_s0 = int_to_ptr.vmem [resolvable:$true] %s527_s0 }
  0x21   : > { %p11002_p1 = scmp.ne.s32.totalorder %s506_s23, %s11001_s1  ;;  %p11009_p5 = scmp.lt.s32.totalorder %s506_s23, %s506_s23 }
  0x22   : > { %p10992_p0 = pneg %p11299_p13  ;;  %p11010_p6 = scmp.lt.s32.totalorder %s11001_s1, %s11001_s1 }
  0x24   : > { %p11004_p2 = pnand %p11002_p1, %p10992_p0  ;;  %p11011_p7 = por %p11010_p6, %p11009_p5 }
  0x26   : > { %p11005_p3 = pneg %p11004_p2 }
  0x28   : > { %p11012_p9 = pnand %p11011_p7, %p11005_p3 }
  0x2a   : > { %11015 = shalt.err (!%p11012_p9)
}
  0x2b   : > { %s11130_s20 = smov 64   ;;  %s11131_s25 = smov 4  }
  0x2c   : > { %10739 = dma.hbm_to_vmem [thread:$0]  (!%p11299_p13), %s18426_s9, 8192, %s506_s23, [#allocation4], %s11130_s20, %s11130_s20, %s11131_s25  }
  0x2d   : > { %s11027_s24 = scalar_lea.vmem %s528_s0, 8192  ;;  %p11035_p8 = scmp.lt.s32.totalorder %s528_s0, %s528_s0 }
  0x2e   : > { %p11028_p12 = scmp.ne.s32.totalorder %s528_s0, %s11027_s24  ;;  %p11036_p4 = scmp.lt.s32.totalorder %s11027_s24, %s11027_s24 }
  0x30   : > { %p11030_p1 = pnand %p11028_p12, %p10992_p0  ;;  %p11037_p5 = por %p11036_p4, %p11035_p8 }
  0x32   : > { %p11031_p2 = pneg %p11030_p1 }
  0x34   : > { %p11038_p3 = pnand %p11037_p5, %p11031_p2 }
  0x36   : > { %11041 = shalt.err (!%p11038_p3)
}
  0x37   : > { %s11132_s1 = smov 256   ;;  %s11133_s19 = smov 16  }
  0x38   : > { %10742 = dma.hbm_to_vmem [thread:$0]  (!%p11299_p13), %s18430_s13, 8192, %s528_s0, [#allocation7], %s11132_s1, %s11132_s1, %s11133_s19  }
  0x39   : > { %565 = sbr.rel (%p11287_p10) target bundleno = 3419 (0xd5b), region = 88 }
  0x3e   : > { %11093 = dma.done.wait (%p11291_p11), [#allocation4], 8192  }
  0x3f   : > { %11095 = vsyncadd (%p11291_p11), [#allocation4], 4294959104 }
  0x40   : > { %11097 = dma.done.wait (%p11291_p11), [#allocation7], 8192  }
  0x41   : > { %11099 = vsyncadd (%p11291_p11), [#allocation7], 4294959104  ;;  %p632_p4 = scmp.lt.s32.totalorder %s11118_s30, 1  ;;  %v18486_v0 = vmov 0   ;;  %s19056_s27 = sld [smem:[#allocation334_spill]]  ;;  %vm740_vm0 = vcmask 1043456  }
  0x42   : > { %10809 = vset.pattern.permute.xlu1 %v18486_v0  ;;  %10808 = vset.pattern.permute.xlu0 %v18486_v0  ;;  %s19057_s25 = sld [smem:[#allocation336_spill]]  ;;  %vm727_vm1 = vcmask 64512   ;;  %v1044_v26 = vld [vmem:[%s18423_s6 + $0x30] sm:$0xff]  ;;  %v1045_v27 = vld [vmem:[%s18423_s6 + $0x38] sm:$0xff]  ;;  %v1042_v28 = vld [vmem:[%s18423_s6 + $0x20] sm:$0xff]  ;;  %vm920_vm2 = vcmask 523264  }
  0x43   : > { %s11335_s16 = scalar_select %p632_p4, %s11118_s30, 1  ;;  %779 = vmatprep.mubr.bf16.mxu0 %v18486_v0  ;;  %985 = vmatprep.mubr.bf16.mxu1 %v18486_v0  ;;  %v1043_v29 = vld [vmem:[%s18423_s6 + $0x28] sm:$0xff]  ;;  %v1040_v30 = vld [vmem:[%s18423_s6 + $0x10] sm:$0xff]  ;;  %v1041_v31 = vld [vmem:[%s18423_s6 + $0x18] sm:$0xff] }
  0x44   : > { %s19060_s4 = sld [smem:[#allocation338_spill]]  ;;  %v1038_v32 = vld [vmem:[%s18423_s6] sm:$0xff]  ;;  %v1039_v33 = vld [vmem:[%s18423_s6 + $0x8] sm:$0xff]  ;;  %v1245_v34 = vld [vmem:[%s18425_s8 + $0x70] sm:$0xff]  ;;  %s19034_s23 = sand.u32 1, %s11110_s28  }
  0x45   : > { %s10466_s17 = sshll.u32 %s11335_s16, 4  ;;  %v1246_v35 = vld [vmem:[%s18425_s8 + $0x78] sm:$0xff]  ;;  %v1243_v36 = vld [vmem:[%s18425_s8 + $0x60] sm:$0xff]  ;;  %v1244_v37 = vld [vmem:[%s18425_s8 + $0x68] sm:$0xff]  ;;  %s19061_s3 = sld [smem:[#allocation337_spill]] }
  0x46   : > { %v1241_v38 = vld [vmem:[%s18425_s8 + $0x50] sm:$0xff]  ;;  %v1242_v39 = vld [vmem:[%s18425_s8 + $0x58] sm:$0xff]  ;;  %v1239_v40 = vld [vmem:[%s18425_s8 + $0x40] sm:$0xff]  ;;  %s17231_s20 = sshll.u32 %s19034_s23, 1  ;;  %s10467_s22 = sshll.u32 %s11118_s30, 5 }
  0x47   : > { %s639_s19 = scalar_lea.vmem %s19056_s27, %s10466_s17  ;;  %s19058_s27 = sld [smem:[#allocation335_spill]]  ;;  %v1240_v41 = vld [vmem:[%s18425_s8 + $0x48] sm:$0xff]  ;;  %v1237_v42 = vld [vmem:[%s18425_s8 + $0x30] sm:$0xff]  ;;  %v1238_v43 = vld [vmem:[%s18425_s8 + $0x38] sm:$0xff] }
  0x48   : > { %v665_v1 = vld [vmem:[%s19057_s25 + $0x30] sm:$0xff]  ;;  %v663_v2 = vld [vmem:[%s19057_s25 + $0x20] sm:$0xff]  ;;  %v648_v3 = vld [vmem:[%s639_s19 + $0x8] sm:$0xff]  ;;  %s19035_s26 = scalar_lea.vmem [#allocation8], %s17231_s20  ;;  %s9898_s29 = scalar_lea.hbm %s18435_s18, %s10467_s22 }
  0x49   : > { %699 = vperm.xlu0 %10808, %v665_v1   ;;  %689 = vperm.xlu1 %10809, %v663_v2   ;;  %v650_v4 = vpack.c.bf16 %v648_v3, %v648_v3  ;;  %v647_v5 = vld [vmem:[%s639_s19] sm:$0xff]  ;;  %v666_v7 = vld [vmem:[%s19057_s25 + $0x38] sm:$0xff]  ;;  %v664_v8 = vld [vmem:[%s19057_s25 + $0x28] sm:$0xff]  ;;  %s20482_s0 = scalar_lea.vmem [#allocation8], %s17231_s20  ;;  %s20483_s23 = sand.u32 1, %s11110_s28  }
  0x4a   : > { %v649_v6 = vpack.c.bf16 %v647_v5, %v647_v5  ;;  %v661_v11 = vld [vmem:[%s19057_s25 + $0x10] sm:$0xff]  ;;  %v662_v12 = vld [vmem:[%s19057_s25 + $0x18] sm:$0xff]  ;;  %v659_v13 = vld [vmem:[%s19057_s25] sm:$0xff]  ;;  %p20484_p10 = scmp.ne.s32.totalorder %s19049_s2, 0  ;;  %s11136_s24 = smov [#allocation8]  }
  0x4b   : > { %10039 = vmatprep.subr.msk.bf16.mxu0 %vm740_vm0, %v650_v4  ;;  %v660_v14 = vld [vmem:[%s19057_s25 + $0x8] sm:$0xff]  ;;  %v858_v16 = vld [vmem:[%s19060_s4 + $0x30] sm:$0xff]  ;;  %v859_v17 = vld [vmem:[%s19060_s4 + $0x38] sm:$0xff] }
  0x4c   : > { %v742_v9 = vsel %vm740_vm0, %v649_v6, 0  ;;  %v856_v18 = vld [vmem:[%s19060_s4 + $0x20] sm:$0xff]  ;;  %v857_v19 = vld [vmem:[%s19060_s4 + $0x28] sm:$0xff]  ;;  %v854_v21 = vld [vmem:[%s19060_s4 + $0x10] sm:$0xff] }
  0x4d   : > { %s19059_s21 = smov %s19058_s27  ;;  %v10810_v10 = vld [vmem:[%s19058_s27] sm:$0xff]   ;;  %762 = vmatpush1.bf16.msra.mxu0 %v742_v9  ;;  %704 = vperm.xlu0 %10808, %v666_v7   ;;  %v855_v22 = vld [vmem:[%s19060_s4 + $0x18] sm:$0xff]  ;;  %v853_v24 = vld [vmem:[%s19060_s4 + $0x8] sm:$0xff]  ;;  %s9900_s27 = sshll.u32 %s20482_s0, 4  ;;  %s9901_s27 = int_to_ptr.vmem [resolvable:$true] %s9900_s27 }
  0x4e   : > { %694 = vperm.xlu1 %10809, %v664_v8   ;;  %v10811_v15 = vld [vmem:[%s19059_s21 + $0x8] sm:$0xff]   ;;  %v10812_v20 = vld [vmem:[%s19059_s21 + $0x10] sm:$0xff]   ;;  %v852_v23 = vld [vmem:[%s19060_s4] sm:$0xff]  ;;  %s11042_s19 = scalar_lea.vmem %s9901_s27, 32 }
  0x4f   : > { %v10813_v25 = vld [vmem:[%s19059_s21 + $0x18] sm:$0xff]   ;;  %v1235_v44 = vld [vmem:[%s18425_s8 + $0x20] sm:$0xff]  ;;  %v1236_v45 = vld [vmem:[%s18425_s8 + $0x28] sm:$0xff]  ;;  %p11043_p8 = scmp.ne.s32.totalorder %s9901_s27, %s11042_s19 }
  0x50   : > { %10040 = vmatmul.mubr.msk.bf16.vlgmr.msra.gmra.mxu0 %vm727_vm1, %v10810_v10  ;;  %v1233_v46 = vld [vmem:[%s18425_s8 + $0x10] sm:$0xff]  ;;  %v1234_v47 = vld [vmem:[%s18425_s8 + $0x18] sm:$0xff]  ;;  %v1231_v48 = vld [vmem:[%s18425_s8] sm:$0xff] }
  0x51   : > { %679 = vperm.xlu0 %10808, %v661_v11   ;;  %789 = vmatprep.mubr.bf16.mxu0 %v18486_v0  ;;  %v1232_v49 = vld [vmem:[%s18425_s8 + $0x8] sm:$0xff]  ;;  %v1694_v50 = vld [vmem:[%s18427_s10 + $0x70] sm:$0xff]  ;;  %v1695_v51 = vld [vmem:[%s18427_s10 + $0x78] sm:$0xff]  ;;  %p11044_p11 = pnand %p11043_p8, %p20484_p10 }
  0x52   : > { %684 = vperm.xlu1 %10809, %v662_v12   ;;  %v1692_v52 = vld [vmem:[%s18427_s10 + $0x60] sm:$0xff]  ;;  %v1693_v53 = vld [vmem:[%s18427_s10 + $0x68] sm:$0xff]  ;;  %v1690_v54 = vld [vmem:[%s18427_s10 + $0x50] sm:$0xff] }
  0x53   : > { %v1691_v55 = vld [vmem:[%s18427_s10 + $0x58] sm:$0xff]  ;;  %v1688_v56 = vld [vmem:[%s18427_s10 + $0x40] sm:$0xff]  ;;  %v1689_v57 = vld [vmem:[%s18427_s10 + $0x48] sm:$0xff]  ;;  %p11045_p13 = pneg %p11044_p11 }
  0x54   : > { %v1686_v58 = vld [vmem:[%s18427_s10 + $0x30] sm:$0xff]  ;;  %v1687_v59 = vld [vmem:[%s18427_s10 + $0x38] sm:$0xff]  ;;  %v1684_v60 = vld [vmem:[%s18427_s10 + $0x20] sm:$0xff] }
  0x55   : > { %669 = vperm.xlu0 %10808, %v659_v13   ;;  %v1685_v61 = vld [vmem:[%s18427_s10 + $0x28] sm:$0xff]  ;;  %v1682_v62 = vld [vmem:[%s18427_s10 + $0x10] sm:$0xff]  ;;  %v1683_v63 = vld [vmem:[%s18427_s10 + $0x18] sm:$0xff] }
  0x56   : > { %674 = vperm.xlu1 %10809, %v660_v14   ;;  %v1680_v1 = vld [vmem:[%s18427_s10] sm:$0xff]  ;;  %v1681_v2 = vld [vmem:[%s18427_s10 + $0x8] sm:$0xff]  ;;  %v1710_v3 = vld [vmem:[%s18427_s10 + $0xf0] sm:$0xff] }
  0x57   : > { %v1711_v4 = vld [vmem:[%s18427_s10 + $0xf8] sm:$0xff]  ;;  %v1708_v5 = vld [vmem:[%s18427_s10 + $0xe0] sm:$0xff]  ;;  %v1709_v6 = vld [vmem:[%s18427_s10 + $0xe8] sm:$0xff] }
  0x58   : > { %10041 = vmatmul.mubr.msk.bf16.gmra.mxu0 %vm727_vm1, %v10811_v15  ;;  %v1706_v7 = vld [vmem:[%s18427_s10 + $0xd0] sm:$0xff]  ;;  %v1707_v8 = vld [vmem:[%s18427_s10 + $0xd8] sm:$0xff]  ;;  %v1704_v9 = vld [vmem:[%s18427_s10 + $0xc0] sm:$0xff] }
  0x59   : > { %892 = vperm.xlu0 %10808, %v858_v16   ;;  %799 = vmatprep.mubr.bf16.mxu0 %v18486_v0  ;;  %v1705_v10 = vld [vmem:[%s18427_s10 + $0xc8] sm:$0xff]  ;;  %v1702_v11 = vld [vmem:[%s18427_s10 + $0xb0] sm:$0xff]  ;;  %v1703_v12 = vld [vmem:[%s18427_s10 + $0xb8] sm:$0xff] }
  0x5a   : > { %897 = vperm.xlu1 %10809, %v859_v17   ;;  %v1700_v13 = vld [vmem:[%s18427_s10 + $0xa0] sm:$0xff]  ;;  %v1701_v14 = vld [vmem:[%s18427_s10 + $0xa8] sm:$0xff]  ;;  %v1698_v15 = vld [vmem:[%s18427_s10 + $0x90] sm:$0xff] }
  0x5b   : > { %v1699_v16 = vld [vmem:[%s18427_s10 + $0x98] sm:$0xff]  ;;  %v1696_v17 = vld [vmem:[%s18427_s10 + $0x80] sm:$0xff] }
  0x5d   : > { %882 = vperm.xlu0 %10808, %v856_v18   ;;  %v1697_v18 = vld [vmem:[%s18427_s10 + $0x88] sm:$0xff] }
  0x5e   : > { %887 = vperm.xlu1 %10809, %v857_v19  }
  0x60   : > { %10042 = vmatmul.mubr.msk.bf16.gmra.mxu0 %vm727_vm1, %v10812_v20 }
  0x61   : > { %872 = vperm.xlu0 %10808, %v854_v21   ;;  %809 = vmatprep.mubr.bf16.mxu0 %v18486_v0 }
  0x62   : > { %877 = vperm.xlu1 %10809, %v855_v22  }
  0x65   : > { %862 = vperm.xlu0 %10808, %v852_v23  }
  0x66   : > { %867 = vperm.xlu1 %10809, %v853_v24  }
  0x68   : > { %10043 = vmatmul.mubr.msk.bf16.gmra.mxu0 %vm727_vm1, %v10813_v25 }
  0x69   : > { %1078 = vperm.xlu0 %10808, %v1044_v26   ;;  %965 = vmatprep.mubr.bf16.mxu0 %v18486_v0 }
  0x6a   : > { %1083 = vperm.xlu1 %10809, %v1045_v27  }
  0x6d   : > { %1068 = vperm.xlu0 %10808, %v1042_v28  }
  0x6e   : > { %1073 = vperm.xlu1 %10809, %v1043_v29  }
  0x71   : > { %1058 = vperm.xlu0 %10808, %v1040_v30  }
  0x72   : > { %1063 = vperm.xlu1 %10809, %v1041_v31  }
  0x75   : > { %1048 = vperm.xlu0 %10808, %v1038_v32  }
  0x76   : > { %1053 = vperm.xlu1 %10809, %v1039_v33  }
  0x79   : > { %1319 = vperm.xlu0 %10808, %v1245_v34  }
  0x7a   : > { %1324 = vperm.xlu1 %10809, %v1246_v35  }
  0x7d   : > { %1309 = vperm.xlu0 %10808, %v1243_v36  }
  0x7e   : > { %1314 = vperm.xlu1 %10809, %v1244_v37  }
  0x81   : > { %1299 = vperm.xlu0 %10808, %v1241_v38  }
  0x82   : > { %1304 = vperm.xlu1 %10809, %v1242_v39  }
  0x85   : > { %1289 = vperm.xlu0 %10808, %v1239_v40  }
  0x86   : > { %1294 = vperm.xlu1 %10809, %v1240_v41  }
  0x89   : > { %1279 = vperm.xlu0 %10808, %v1237_v42  }
  0x8a   : > { %1284 = vperm.xlu1 %10809, %v1238_v43  }
  0x8d   : > { %1269 = vperm.xlu0 %10808, %v1235_v44  }
  0x8e   : > { %1274 = vperm.xlu1 %10809, %v1236_v45  }
  0x91   : > { %1259 = vperm.xlu0 %10808, %v1233_v46  }
  0x92   : > { %1264 = vperm.xlu1 %10809, %v1234_v47  }
  0x95   : > { %1249 = vperm.xlu0 %10808, %v1231_v48  }
  0x96   : > { %1254 = vperm.xlu1 %10809, %v1232_v49  }
  0x99   : > { %1880 = vperm.xlu0 %10808, %v1694_v50  }
  0x9a   : > { %1885 = vperm.xlu1 %10809, %v1695_v51  }
  0x9d   : > { %1870 = vperm.xlu0 %10808, %v1692_v52  }
  0x9e   : > { %1875 = vperm.xlu1 %10809, %v1693_v53  }
  0xa1   : > { %1860 = vperm.xlu0 %10808, %v1690_v54  }
  0xa2   : > { %1865 = vperm.xlu1 %10809, %v1691_v55  }
  0xa5   : > { %1850 = vperm.xlu0 %10808, %v1688_v56  }
  0xa6   : > { %1855 = vperm.xlu1 %10809, %v1689_v57  }
  0xa9   : > { %1840 = vperm.xlu0 %10808, %v1686_v58  }
  0xaa   : > { %1845 = vperm.xlu1 %10809, %v1687_v59  }
  0xad   : > { %1830 = vperm.xlu0 %10808, %v1684_v60  }
  0xae   : > { %1835 = vperm.xlu1 %10809, %v1685_v61  }
  0xb1   : > { %1820 = vperm.xlu0 %10808, %v1682_v62  }
  0xb2   : > { %1825 = vperm.xlu1 %10809, %v1683_v63  }
  0xb5   : > { %1810 = vperm.xlu0 %10808, %v1680_v1  }
  0xb6   : > { %1815 = vperm.xlu1 %10809, %v1681_v2  }
  0xb9   : > { %1960 = vperm.xlu0 %10808, %v1710_v3  }
  0xba   : > { %1965 = vperm.xlu1 %10809, %v1711_v4  }
  0xbd   : > { %1950 = vperm.xlu0 %10808, %v1708_v5  }
  0xbe   : > { %1955 = vperm.xlu1 %10809, %v1709_v6  }
  0xc1   : > { %1940 = vperm.xlu0 %10808, %v1706_v7  }
  0xc2   : > { %1945 = vperm.xlu1 %10809, %v1707_v8  }
  0xc4   : > { %v690_v28 = vpop.permute.xlu1 %689  ;;  %v700_v30 = vpop.permute.xlu0 %699 }
  0xc5   : > { %1930 = vperm.xlu0 %10808, %v1704_v9  }
  0xc6   : > { %1935 = vperm.xlu1 %10809, %v1705_v10  }
  0xc8   : > { %v705_v35 = vpop.permute.xlu0 %704 }
  0xc9   : > { %1920 = vperm.xlu0 %10808, %v1702_v11   ;;  %v695_v33 = vpop.permute.xlu1 %694 }
  0xca   : > { %1925 = vperm.xlu1 %10809, %v1703_v12  }
  0xcc   : > { %v680_v46 = vpop.permute.xlu0 %679 }
  0xcd   : > { %1910 = vperm.xlu0 %10808, %v1700_v13   ;;  %v685_v41 = vpop.permute.xlu1 %684 }
  0xce   : > { %1915 = vperm.xlu1 %10809, %v1701_v14  }
  0xd0   : > { %v670_v2 = vpop.permute.xlu0 %669 }
  0xd1   : > { %1900 = vperm.xlu0 %10808, %v1698_v15   ;;  %v675_v58 = vpop.permute.xlu1 %674 }
  0xd2   : > { %1905 = vperm.xlu1 %10809, %v1699_v16  }
  0xd5   : > { %1890 = vperm.xlu0 %10808, %v1696_v17  }
  0xd6   : > { %1895 = vperm.xlu1 %10809, %v1697_v18  }
 0x110   : > { %v781_v19 = vpop.f32.mrf.mxu0 }
 0x111   : > { %v782_v12 = vadd.f32 %v781_v19, %v670_v2  ;;  %v10815_v19 = vld [vmem:[%s19061_s3 + $0x10] sm:$0xff]  }
 0x112   : > { %v783_v20 = vpop.f32.mrf.mxu0 }
 0x113   : > { %v784_v5 = vadd.f32 %v783_v20, %v670_v2  ;;  %v820_v18 = vmax.f32 %v782_v12, 0.0 }
 0x114   : > { %v785_v21 = vpop.f32.mrf.mxu0 }
 0x115   : > { %v786_v7 = vadd.f32 %v785_v21, %v675_v58  ;;  %v821_v14 = vmax.f32 %v784_v5, 0.0  ;;  %v10814_v21 = vld [vmem:[%s19061_s3] sm:$0xff]  }
 0x116   : > { %v787_v22 = vpop.f32.mrf.mxu0 }
 0x117   : > { %v788_v62 = vadd.f32 %v787_v22, %v675_v58  ;;  %v822_v15 = vmax.f32 %v786_v7, 0.0  ;;  %v10816_v22 = vld [vmem:[%s19061_s3 + $0x8] sm:$0xff]  }
 0x118   : > { %v791_v23 = vpop.f32.mrf.mxu0 }
 0x119   : > { %v792_v3 = vadd.f32 %v791_v23, %v680_v46  ;;  %v823_v10 = vmax.f32 %v788_v62, 0.0  ;;  %v836_v20 = vpack.c.bf16 %v822_v15, %v820_v18  ;;  %v10817_v23 = vld [vmem:[%s19061_s3 + $0x18] sm:$0xff]   ;;  %s11046_s3 = sshll.u32 %s11136_s24, 4  ;;  %s11047_s3 = int_to_ptr.vmem [resolvable:$false] %s11046_s3 }
 0x11a   : > { %v793_v24 = vpop.f32.mrf.mxu0  ;;  %s11048_s4 = scalar_lea.vmem %s11047_s3, 64  ;;  %p11049_p0 = scmp.lt.s32.totalorder %s9901_s27, %s11047_s3 }
 0x11b   : > { %v794_v55 = vadd.f32 %v793_v24, %v680_v46  ;;  %v824_v13 = vmax.f32 %v792_v3, 0.0  ;;  %v837_v17 = vpack.c.bf16 %v823_v10, %v821_v14  ;;  %p11050_p6 = scmp.lt.s32.totalorder %s11048_s4, %s11042_s19 }
 0x11c   : > { %v795_v25 = vpop.f32.mrf.mxu0 }
 0x11d   : > { %v796_v59 = vadd.f32 %v795_v25, %v685_v41  ;;  %v825_v6 = vmax.f32 %v794_v55, 0.0  ;;  %p11051_p7 = por %p11050_p6, %p11049_p0 }
 0x11e   : > { %v797_v26 = vpop.f32.mrf.mxu0 }
 0x11f   : > { %v798_v49 = vadd.f32 %v797_v26, %v685_v41  ;;  %v826_v8 = vmax.f32 %v796_v59, 0.0  ;;  %v898_v26 = vpop.permute.xlu1 %897  ;;  %p11052_p9 = pnand %p11051_p7, %p11045_p13 }
 0x120   : > { %v801_v27 = vpop.f32.mrf.mxu0 }
 0x121   : > { %v802_v53 = vadd.f32 %v801_v27, %v690_v28  ;;  %v827_v63 = vmax.f32 %v798_v49, 0.0  ;;  %v838_v16 = vpack.c.bf16 %v826_v8, %v824_v13 }
 0x122   : > { %v803_v29 = vpop.f32.mrf.mxu0 }
 0x123   : > { %v804_v44 = vadd.f32 %v803_v29, %v690_v28  ;;  %v828_v4 = vmax.f32 %v802_v53, 0.0  ;;  %v839_v11 = vpack.c.bf16 %v827_v63, %v825_v6  ;;  %v893_v29 = vpop.permute.xlu0 %892 }
 0x124   : > { %v805_v31 = vpop.f32.mrf.mxu0 }
 0x125   : > { %v806_v47 = vadd.f32 %v805_v31, %v695_v33  ;;  %v829_v56 = vmax.f32 %v804_v44, 0.0 }
 0x126   : > { %v807_v32 = vpop.f32.mrf.mxu0 }
 0x127   : > { %v808_v38 = vadd.f32 %v807_v32, %v695_v33  ;;  %v830_v60 = vmax.f32 %v806_v47, 0.0 }
 0x128   : > { %v811_v34 = vpop.f32.mrf.mxu0 }
 0x129   : > { %v812_v42 = vadd.f32 %v811_v34, %v700_v30  ;;  %v831_v50 = vmax.f32 %v808_v38, 0.0  ;;  %v840_v9 = vpack.c.bf16 %v830_v60, %v828_v4  ;;  %v888_v34 = vpop.permute.xlu1 %887 }
 0x12a   : > { %v813_v36 = vpop.f32.mrf.mxu0 }
 0x12b   : > { %v814_v39 = vadd.f32 %v813_v36, %v700_v30  ;;  %v832_v54 = vmax.f32 %v812_v42, 0.0  ;;  %v841_v1 = vpack.c.bf16 %v831_v50, %v829_v56 }
 0x12c   : > { %v815_v37 = vpop.f32.mrf.mxu0 }
 0x12d   : > { %v816_v40 = vadd.f32 %v815_v37, %v705_v35  ;;  %v833_v51 = vmax.f32 %v814_v39, 0.0  ;;  %v883_v37 = vpop.permute.xlu0 %882  ;;  %v878_v42 = vpop.permute.xlu1 %877 }
 0x12e   : > { %v817_v43 = vpop.f32.mrf.mxu0 }
 0x12f   : > { %v818_v45 = vadd.f32 %v817_v43, %v705_v35  ;;  %v834_v48 = vmax.f32 %v816_v40, 0.0 }
 0x131   : > { %v835_v52 = vmax.f32 %v818_v45, 0.0  ;;  %v842_v61 = vpack.c.bf16 %v834_v48, %v832_v54  ;;  %v868_v63 = vpop.permute.xlu1 %867 }
 0x133   : > { %v843_v57 = vpack.c.bf16 %v835_v52, %v833_v51  ;;  %v873_v51 = vpop.permute.xlu0 %872 }
 0x135   : > { %941 = vmatprep.subr.bf16.mxu0 %v843_v57  ;;  %10714 = vmatprep.subr.bf16.mxu1 %v843_v57 }
 0x136   : > { %942 = vmatpush1.bf16.msra.mxu0 %v842_v61  ;;  %10718 = vmatpush1.bf16.msra.mxu1 %v842_v61 }
 0x137   : > { %943 = vmatprep.subr.bf16.mxu0 %v841_v1  ;;  %10715 = vmatprep.subr.bf16.mxu1 %v841_v1  ;;  %v863_v7 = vpop.permute.xlu0 %862 }
 0x13a   : > { %944 = vmatpush1.bf16.msra.mxu0 %v840_v9  ;;  %10719 = vmatpush1.bf16.msra.mxu1 %v840_v9 }
 0x13b   : > { %945 = vmatprep.subr.bf16.mxu0 %v839_v11  ;;  %10716 = vmatprep.subr.bf16.mxu1 %v839_v11 }
 0x13e   : > { %946 = vmatpush1.bf16.msra.mxu0 %v838_v16  ;;  %10720 = vmatpush1.bf16.msra.mxu1 %v838_v16 }
 0x13f   : > { %947 = vmatprep.subr.bf16.mxu0 %v837_v17  ;;  %10717 = vmatprep.subr.bf16.mxu1 %v837_v17 }
 0x142   : > { %948 = vmatpush1.bf16.msra.mxu0 %v836_v20  ;;  %10721 = vmatpush1.bf16.msra.mxu1 %v836_v20 }
 0x145   : > { %10048 = vmatmul.mubr.msk.bf16.vlgmr.msra.gmra.mxu0 %vm920_vm2, %v10814_v21  ;;  %10050 = vmatmul.mubr.msk.bf16.vlgmr.msra.gmra.mxu1 %vm920_vm2, %v10815_v19 }
 0x146   : > { %975 = vmatprep.mubr.bf16.mxu0 %v18486_v0  ;;  %995 = vmatprep.mubr.bf16.mxu1 %v18486_v0 }
 0x14d   : > { %10049 = vmatmul.mubr.msk.bf16.gmra.mxu0 %vm920_vm2, %v10816_v22  ;;  %10051 = vmatmul.mubr.msk.bf16.gmra.mxu1 %vm920_vm2, %v10817_v23 }
 0x14e   : > { %1150 = vmatprep.mubr.bf16.mxu0 %v18486_v0  ;;  %1423 = vmatprep.mubr.bf16.mxu1 %v18486_v0 }
 0x205   : > { %v967_v24 = vpop.f32.mrf.mxu0  ;;  %v987_v25 = vpop.f32.mrf.mxu1 }
 0x206   : > { %v988_v58 = vadd.f32 %v987_v25, %v883_v37  ;;  %v968_v17 = vadd.f32 %v967_v24, %v863_v7  ;;  %v10819_v24 = vld [vmem:[%s18422_s5 + $0x8] sm:$0xff]  }
 0x207   : > { %v969_v27 = vpop.f32.mrf.mxu0  ;;  %v989_v28 = vpop.f32.mrf.mxu1 }
 0x208   : > { %v990_v49 = vadd.f32 %v989_v28, %v883_v37  ;;  %v1014_v8 = vmax.f32 %v988_v58, 0.0  ;;  %v970_v10 = vadd.f32 %v969_v27, %v863_v7  ;;  %v1006_v23 = vmax.f32 %v968_v17, 0.0  ;;  %v10820_v27 = vld [vmem:[%s18422_s5 + $0x10] sm:$0xff]   ;;  %v10821_v28 = vld [vmem:[%s18422_s5 + $0x18] sm:$0xff]  }
 0x209   : > { %v971_v30 = vpop.f32.mrf.mxu0  ;;  %v991_v31 = vpop.f32.mrf.mxu1 }
 0x20a   : > { %v992_v52 = vadd.f32 %v991_v31, %v888_v34  ;;  %v1015_v60 = vmax.f32 %v990_v49, 0.0  ;;  %v972_v12 = vadd.f32 %v971_v30, %v868_v63  ;;  %v1007_v20 = vmax.f32 %v970_v10, 0.0 }
 0x20b   : > { %v973_v32 = vpop.f32.mrf.mxu0  ;;  %v993_v33 = vpop.f32.mrf.mxu1 }
 0x20c   : > { %v994_v43 = vadd.f32 %v993_v33, %v888_v34  ;;  %v1016_v1 = vmax.f32 %v992_v52, 0.0  ;;  %v974_v4 = vadd.f32 %v973_v32, %v868_v63  ;;  %v1008_v21 = vmax.f32 %v972_v12, 0.0 }
 0x20d   : > { %v977_v35 = vpop.f32.mrf.mxu0  ;;  %v997_v36 = vpop.f32.mrf.mxu1 }
 0x20e   : > { %v998_v46 = vadd.f32 %v997_v36, %v893_v29  ;;  %v1017_v54 = vmax.f32 %v994_v43, 0.0  ;;  %v978_v9 = vadd.f32 %v977_v35, %v873_v51  ;;  %v1026_v13 = vpack.c.bf16 %v1016_v1, %v1014_v8 }
 0x20f   : > { %v979_v38 = vpop.f32.mrf.mxu0  ;;  %v999_v39 = vpop.f32.mrf.mxu1  ;;  %v1009_v15 = vmax.f32 %v974_v4, 0.0  ;;  %v1022_v25 = vpack.c.bf16 %v1008_v21, %v1006_v23 }
 0x210   : > { %v1000_v44 = vadd.f32 %v999_v39, %v893_v29  ;;  %v1018_v59 = vmax.f32 %v998_v46, 0.0  ;;  %v980_v61 = vadd.f32 %v979_v38, %v873_v51  ;;  %v1027_v6 = vpack.c.bf16 %v1017_v54, %v1015_v60  ;;  %v1084_v38 = vpop.permute.xlu1 %1083 }
 0x211   : > { %v981_v40 = vpop.f32.mrf.mxu0  ;;  %v1001_v41 = vpop.f32.mrf.mxu1  ;;  %v1010_v18 = vmax.f32 %v978_v9, 0.0  ;;  %v1023_v22 = vpack.c.bf16 %v1009_v15, %v1007_v20 }
 0x212   : > { %v1002_v45 = vadd.f32 %v1001_v41, %v898_v26  ;;  %v1019_v55 = vmax.f32 %v1000_v44, 0.0  ;;  %v982_v2 = vadd.f32 %v981_v40, %v878_v42  ;;  %v1011_v11 = vmax.f32 %v980_v61, 0.0  ;;  %v1079_v40 = vpop.permute.xlu0 %1078 }
 0x213   : > { %v983_v47 = vpop.f32.mrf.mxu0  ;;  %v1003_v48 = vpop.f32.mrf.mxu1 }
 0x214   : > { %v1004_v50 = vadd.f32 %v1003_v48, %v898_v26  ;;  %v1020_v53 = vmax.f32 %v1002_v45, 0.0  ;;  %v984_v56 = vadd.f32 %v983_v47, %v878_v42  ;;  %v1012_v14 = vmax.f32 %v982_v2, 0.0  ;;  %v10818_v26 = vld [vmem:[%s18422_s5] sm:$0xff]   ;;  %v1074_v43 = vpop.permute.xlu1 %1073 }
 0x216   : > { %v1021_v57 = vmax.f32 %v1004_v50, 0.0  ;;  %v1028_v3 = vpack.c.bf16 %v1020_v53, %v1018_v59  ;;  %v1013_v5 = vmax.f32 %v984_v56, 0.0  ;;  %v1024_v19 = vpack.c.bf16 %v1012_v14, %v1010_v18  ;;  %v1069_v45 = vpop.permute.xlu0 %1068 }
 0x218   : > { %v1029_v62 = vpack.c.bf16 %v1021_v57, %v1019_v55  ;;  %v1025_v16 = vpack.c.bf16 %v1013_v5, %v1011_v11  ;;  %v1064_v51 = vpop.permute.xlu1 %1063 }
 0x21a   : > { %1126 = vmatprep.subr.bf16.mxu0 %v1029_v62  ;;  %v1059_v56 = vpop.permute.xlu0 %1058 }
 0x21b   : > { %1127 = vmatpush1.bf16.msra.mxu0 %v1028_v3 }
 0x21c   : > { %1128 = vmatprep.subr.bf16.mxu0 %v1027_v6  ;;  %v1054_v5 = vpop.permute.xlu1 %1053 }
 0x21e   : > { %v1049_v12 = vpop.permute.xlu0 %1048 }
 0x21f   : > { %1129 = vmatpush1.bf16.msra.mxu0 %v1026_v13 }
 0x220   : > { %1130 = vmatprep.subr.bf16.mxu0 %v1025_v16 }
 0x223   : > { %1131 = vmatpush1.bf16.msra.mxu0 %v1024_v19 }
 0x224   : > { %1132 = vmatprep.subr.bf16.mxu0 %v1023_v22 }
 0x227   : > { %1133 = vmatpush1.bf16.msra.mxu0 %v1022_v25 }
 0x22a   : > { %10056 = vmatmul.mubr.msk.bf16.vlgmr.msra.gmra.mxu0 %vm920_vm2, %v10818_v26 }
 0x22b   : > { %1160 = vmatprep.mubr.bf16.mxu0 %v18486_v0 }
 0x232   : > { %10057 = vmatmul.mubr.msk.bf16.gmra.mxu0 %vm920_vm2, %v10819_v24 }
 0x233   : > { %1170 = vmatprep.mubr.bf16.mxu0 %v18486_v0 }
 0x23a   : > { %10058 = vmatmul.mubr.msk.bf16.gmra.mxu0 %vm920_vm2, %v10820_v27 }
 0x23b   : > { %1180 = vmatprep.mubr.bf16.mxu0 %v18486_v0 }
 0x242   : > { %10059 = vmatmul.mubr.msk.bf16.gmra.mxu0 %vm920_vm2, %v10821_v28 }
 0x243   : > { %2864 = vmatprep.mubr.bf16.mxu0 %v18486_v0 }
 0x2ea   : > { %v1152_v29 = vpop.f32.mrf.mxu0 }
 0x2eb   : > { %v1153_v22 = vadd.f32 %v1152_v29, %v1049_v12  ;;  %v10823_v29 = vld [vmem:[%s18424_s7 + $0x8] sm:$0xff]  }
 0x2ec   : > { %v1154_v30 = vpop.f32.mrf.mxu0 }
 0x2ed   : > { %v1155_v15 = vadd.f32 %v1154_v30, %v1049_v12  ;;  %v1191_v28 = vmax.f32 %v1153_v22, 0.0  ;;  %v10822_v30 = vld [vmem:[%s18424_s7] sm:$0xff]  }
 0x2ee   : > { %v1156_v31 = vpop.f32.mrf.mxu0 }
 0x2ef   : > { %v1157_v17 = vadd.f32 %v1156_v31, %v1054_v5  ;;  %v1192_v25 = vmax.f32 %v1155_v15, 0.0  ;;  %v10824_v31 = vld [vmem:[%s18424_s7 + $0x10] sm:$0xff]  }
 0x2f0   : > { %v1158_v32 = vpop.f32.mrf.mxu0 }
 0x2f1   : > { %v1159_v9 = vadd.f32 %v1158_v32, %v1054_v5  ;;  %v1193_v26 = vmax.f32 %v1157_v17, 0.0 }
 0x2f2   : > { %v1162_v33 = vpop.f32.mrf.mxu0 }
 0x2f3   : > { %v1163_v13 = vadd.f32 %v1162_v33, %v1059_v56  ;;  %v1194_v21 = vmax.f32 %v1159_v9, 0.0  ;;  %v1207_v32 = vpack.c.bf16 %v1193_v26, %v1191_v28  ;;  %v10825_v33 = vld [vmem:[%s18424_s7 + $0x18] sm:$0xff]  }
 0x2f4   : > { %v1164_v34 = vpop.f32.mrf.mxu0 }
 0x2f5   : > { %v1165_v2 = vadd.f32 %v1164_v34, %v1059_v56  ;;  %v1195_v23 = vmax.f32 %v1163_v13, 0.0  ;;  %v1208_v27 = vpack.c.bf16 %v1194_v21, %v1192_v25  ;;  %v10826_v34 = vld [vmem:[%s18424_s7 + $0x20] sm:$0xff]  }
 0x2f6   : > { %v1166_v35 = vpop.f32.mrf.mxu0 }
 0x2f7   : > { %v1167_v6 = vadd.f32 %v1166_v35, %v1064_v51  ;;  %v1196_v16 = vmax.f32 %v1165_v2, 0.0  ;;  %v10827_v35 = vld [vmem:[%s18424_s7 + $0x28] sm:$0xff]  }
 0x2f8   : > { %v1168_v36 = vpop.f32.mrf.mxu0 }
 0x2f9   : > { %v1169_v59 = vadd.f32 %v1168_v36, %v1064_v51  ;;  %v1197_v18 = vmax.f32 %v1167_v6, 0.0  ;;  %v10828_v36 = vld [vmem:[%s18424_s7 + $0x30] sm:$0xff]  }
 0x2fa   : > { %v1172_v37 = vpop.f32.mrf.mxu0 }
 0x2fb   : > { %v1173_v63 = vadd.f32 %v1172_v37, %v1069_v45  ;;  %v1198_v10 = vmax.f32 %v1169_v59, 0.0  ;;  %v1209_v24 = vpack.c.bf16 %v1197_v18, %v1195_v23  ;;  %v10829_v37 = vld [vmem:[%s18424_s7 + $0x38] sm:$0xff]  }
 0x2fc   : > { %v1174_v39 = vpop.f32.mrf.mxu0 }
 0x2fd   : > { %v1175_v54 = vadd.f32 %v1174_v39, %v1069_v45  ;;  %v1199_v14 = vmax.f32 %v1173_v63, 0.0  ;;  %v1210_v19 = vpack.c.bf16 %v1198_v10, %v1196_v16  ;;  %v1325_v39 = vpop.permute.xlu1 %1324 }
 0x2fe   : > { %v1176_v41 = vpop.f32.mrf.mxu0 }
 0x2ff   : > { %v1177_v57 = vadd.f32 %v1176_v41, %v1074_v43  ;;  %v1200_v3 = vmax.f32 %v1175_v54, 0.0 }
 0x300   : > { %v1178_v42 = vpop.f32.mrf.mxu0 }
 0x301   : > { %v1179_v48 = vadd.f32 %v1178_v42, %v1074_v43  ;;  %v1201_v7 = vmax.f32 %v1177_v57, 0.0  ;;  %v1315_v41 = vpop.permute.xlu1 %1314 }
 0x302   : > { %v1182_v44 = vpop.f32.mrf.mxu0 }
 0x303   : > { %v1183_v52 = vadd.f32 %v1182_v44, %v1079_v40  ;;  %v1202_v60 = vmax.f32 %v1179_v48, 0.0  ;;  %v1211_v20 = vpack.c.bf16 %v1201_v7, %v1199_v14 }
 0x304   : > { %v1184_v46 = vpop.f32.mrf.mxu0 }
 0x305   : > { %v1185_v49 = vadd.f32 %v1184_v46, %v1079_v40  ;;  %v1203_v1 = vmax.f32 %v1183_v52, 0.0  ;;  %v1212_v11 = vpack.c.bf16 %v1202_v60, %v1200_v3  ;;  %v11663_v43 = vpop.permute.xlu1 %1304 }
 0x306   : > { %v1186_v47 = vpop.f32.mrf.mxu0 }
 0x307   : > { %v1187_v50 = vadd.f32 %v1186_v47, %v1084_v38  ;;  %v1204_v61 = vmax.f32 %v1185_v49, 0.0 }
 0x308   : > { %v1188_v53 = vpop.f32.mrf.mxu0 }
 0x309   : > { %v1189_v55 = vadd.f32 %v1188_v53, %v1084_v38  ;;  %v1205_v58 = vmax.f32 %v1187_v50, 0.0  ;;  %v1320_v38 = vpop.permute.xlu0 %1319  ;;  %v11667_v45 = vpop.permute.xlu1 %1294 }
 0x30b   : > { %v1206_v62 = vmax.f32 %v1189_v55, 0.0  ;;  %v1213_v8 = vpack.c.bf16 %v1205_v58, %v1203_v1 }
 0x30d   : > { %v1214_v4 = vpack.c.bf16 %v1206_v62, %v1204_v61  ;;  %v11659_v40 = vpop.permute.xlu0 %1309  ;;  %v11671_v47 = vpop.permute.xlu1 %1284 }
 0x30f   : > { %1399 = vmatprep.subr.bf16.mxu1 %v1214_v4 }
 0x310   : > { %1400 = vmatpush1.bf16.msra.mxu1 %v1213_v8 }
 0x311   : > { %1401 = vmatprep.subr.bf16.mxu1 %v1212_v11  ;;  %v11661_v42 = vpop.permute.xlu0 %1299  ;;  %v11675_v49 = vpop.permute.xlu1 %1274 }
 0x314   : > { %1402 = vmatpush1.bf16.msra.mxu1 %v1211_v20 }
 0x315   : > { %1403 = vmatprep.subr.bf16.mxu1 %v1210_v19  ;;  %v11665_v44 = vpop.permute.xlu0 %1289  ;;  %v11679_v51 = vpop.permute.xlu1 %1264 }
 0x318   : > { %1404 = vmatpush1.bf16.msra.mxu1 %v1209_v24 }
 0x319   : > { %1405 = vmatprep.subr.bf16.mxu1 %v1208_v27  ;;  %v11669_v46 = vpop.permute.xlu0 %1279  ;;  %v11686_v56 = vpop.permute.xlu1 %1254 }
 0x31c   : > { %1406 = vmatpush1.bf16.msra.mxu1 %v1207_v32 }
 0x31d   : > { %7783 = vmatprep.subr.bf16.mxu1 %v18486_v0  ;;  %v11673_v48 = vpop.permute.xlu0 %1269 }
 0x31f   : > { %10068 = vmatmul.mubr.msk.bf16.vlgmr.msra.gmra.mxu1 %vm920_vm2, %v10822_v30 }
 0x320   : > { %1433 = vmatprep.mubr.bf16.mxu1 %v18486_v0 }
 0x321   : > { %v11677_v50 = vpop.permute.xlu0 %1259 }
 0x325   : > { %v11681_v53 = vpop.permute.xlu0 %1249 }
 0x327   : > { %10069 = vmatmul.mubr.msk.bf16.gmra.mxu1 %vm920_vm2, %v10823_v29 }
 0x328   : > { %1443 = vmatprep.mubr.bf16.mxu1 %v18486_v0 }
 0x32f   : > { %10070 = vmatmul.mubr.msk.bf16.gmra.mxu1 %vm920_vm2, %v10824_v31 }
 0x330   : > { %1453 = vmatprep.mubr.bf16.mxu1 %v18486_v0 }
 0x337   : > { %10071 = vmatmul.mubr.msk.bf16.gmra.mxu1 %vm920_vm2, %v10825_v33 }
 0x338   : > { %1463 = vmatprep.mubr.bf16.mxu1 %v18486_v0 }
 0x33f   : > { %10072 = vmatmul.mubr.msk.bf16.gmra.mxu1 %vm920_vm2, %v10826_v34 }
 0x340   : > { %1473 = vmatprep.mubr.bf16.mxu1 %v18486_v0 }
 0x347   : > { %10073 = vmatmul.mubr.msk.bf16.gmra.mxu1 %vm920_vm2, %v10827_v35 }
 0x348   : > { %1483 = vmatprep.mubr.bf16.mxu1 %v18486_v0 }
 0x34f   : > { %10074 = vmatmul.mubr.msk.bf16.gmra.mxu1 %vm920_vm2, %v10828_v36 }
 0x350   : > { %1493 = vmatprep.mubr.bf16.mxu1 %v18486_v0 }
 0x357   : > { %10075 = vmatmul.mubr.msk.bf16.gmra.mxu1 %vm920_vm2, %v10829_v37 }
 0x3df   : > { %v1425_v52 = vpop.f32.mrf.mxu1 }
 0x3e0   : > { %v1426_v55 = vadd.f32 %v1425_v52, %v11681_v53 }
 0x3e1   : > { %v11683_v54 = vpop.f32.mrf.mxu1 }
 0x3e2   : > { %v1504_v60 = vmax.f32 %v1426_v55, 0.0 }
 0x3e3   : > { %v1429_v57 = vpop.f32.mrf.mxu1 }
 0x3e4   : > { %v1430_v58 = vadd.f32 %v1429_v57, %v11686_v56 }
 0x3e5   : > { %v11689_v59 = vpop.f32.mrf.mxu1 }
 0x3e6   : > { %v1506_v61 = vmax.f32 %v1430_v58, 0.0 }
 0x3e7   : > { %v1435_v62 = vpop.f32.mrf.mxu1 }
 0x3e8   : > { %v11691_v63 = vpack.c.bf16 %v1506_v61, %v1504_v60  ;;  %v1436_v2 = vadd.f32 %v1435_v62, %v11677_v50 }
 0x3e9   : > { %v11693_v1 = vpop.f32.mrf.mxu1 }
 0x3ea   : > { %v1508_v6 = vmax.f32 %v1436_v2, 0.0 }
 0x3eb   : > { %v1439_v3 = vpop.f32.mrf.mxu1 }
 0x3ec   : > { %v1440_v4 = vadd.f32 %v1439_v3, %v11679_v51 }
 0x3ed   : > { %v11697_v5 = vpop.f32.mrf.mxu1 }
 0x3ee   : > { %v1510_v7 = vmax.f32 %v1440_v4, 0.0 }
 0x3ef   : > { %v11699_v8 = vpop.f32.mrf.mxu1 }
 0x3f0   : > { %v11701_v9 = vpack.c.bf16 %v1510_v7, %v1508_v6 }
 0x3f1   : > { %v11703_v10 = vpop.f32.mrf.mxu1 }
 0x3f3   : > { %v11705_v11 = vpop.f32.mrf.mxu1 }
 0x3f5   : > { %v11707_v12 = vpop.f32.mrf.mxu1 }
 0x3f7   : > { %v11709_v13 = vpop.f32.mrf.mxu1 }
 0x3f9   : > { %v1457_v14 = vpop.f32.mrf.mxu1 }
 0x3fb   : > { %v1459_v15 = vpop.f32.mrf.mxu1 }
 0x3fd   : > { %v1461_v16 = vpop.f32.mrf.mxu1 }
 0x3ff   : > { %v1465_v17 = vpop.f32.mrf.mxu1 }
 0x401   : > { %v1467_v18 = vpop.f32.mrf.mxu1 }
 0x403   : > { %v1469_v20 = vpop.f32.mrf.mxu1 }
 0x405   : > { %v1471_v21 = vpop.f32.mrf.mxu1 }
 0x407   : > { %v1475_v19 = vpop.f32.mrf.mxu1 }
 0x409   : > { %v1477_v22 = vpop.f32.mrf.mxu1 }
 0x40a   : > { %v1478_v4 = vadd.f32 %v1477_v22, %v11661_v42  ;;  %v1470_v22 = vadd.f32 %v1469_v20, %v11667_v45 }
 0x40b   : > { %v1479_v23 = vpop.f32.mrf.mxu1 }
 0x40d   : > { %v1481_v25 = vpop.f32.mrf.mxu1 }
 0x40e   : > { %v1482_v58 = vadd.f32 %v1481_v25, %v11663_v43  ;;  %v1476_v25 = vadd.f32 %v1475_v19, %v11661_v42  ;;  %v1458_v42 = vadd.f32 %v1457_v14, %v11669_v46 }
 0x40f   : > { %v1485_v26 = vpop.f32.mrf.mxu1 }
 0x410   : > { %v1486_v2 = vadd.f32 %v1485_v26, %v11659_v40  ;;  %v1525_v26 = vmax.f32 %v1478_v4, 0.0  ;;  %v1517_v14 = vmax.f32 %v1458_v42, 0.0  ;;  %v10837_v4 = vld [vmem:[#allocation3 + $0x38] sm:$0xff]   ;;  %v10855_v42 = vld [vmem:[#allocation3 + $0xc8] sm:$0xff]  }
 0x411   : > { %v1487_v24 = vpop.f32.mrf.mxu1 }
 0x412   : > { %v1488_v37 = vadd.f32 %v1487_v24, %v11659_v40  ;;  %v1468_v40 = vadd.f32 %v1467_v18, %v11665_v44  ;;  %v1460_v18 = vadd.f32 %v1459_v15, %v11671_v47 }
 0x413   : > { %v1489_v27 = vpop.f32.mrf.mxu1 }
 0x414   : > { %v1490_v55 = vadd.f32 %v1489_v27, %v1315_v41  ;;  %v1529_v6 = vmax.f32 %v1488_v37, 0.0  ;;  %v1528_v27 = vmax.f32 %v1486_v2, 0.0  ;;  %v1521_v19 = vmax.f32 %v1468_v40, 0.0  ;;  %v10848_v40 = vld [vmem:[#allocation3 + $0x90] sm:$0xff]  }
 0x415   : > { %v1491_v28 = vpop.f32.mrf.mxu1  ;;  %v1518_v15 = vmax.f32 %v1460_v18, 0.0 }
 0x416   : > { %v1492_v31 = vadd.f32 %v1491_v28, %v1315_v41  ;;  %v1530_v28 = vmax.f32 %v1490_v55, 0.0  ;;  %v1527_v41 = vmax.f32 %v1482_v58, 0.0 }
 0x417   : > { %v1495_v32 = vpop.f32.mrf.mxu1 }
 0x418   : > { %v1496_v35 = vadd.f32 %v1495_v32, %v1320_v38  ;;  %v1531_v60 = vmax.f32 %v1492_v31, 0.0  ;;  %v1547_v31 = vpack.c.bf16 %v1527_v41, %v1525_v26  ;;  %v10844_v41 = vld [vmem:[#allocation3 + $0x70] sm:$0xff]   ;;  %v10849_v26 = vld [vmem:[#allocation3 + $0x98] sm:$0xff]  }
 0x419   : > { %v1497_v30 = vpop.f32.mrf.mxu1 }
 0x41a   : > { %v1498_v33 = vadd.f32 %v1497_v30, %v1320_v38  ;;  %v1532_v3 = vmax.f32 %v1496_v35, 0.0  ;;  %v1480_v38 = vadd.f32 %v1479_v23, %v11663_v43  ;;  %v1549_v24 = vpack.c.bf16 %v1531_v60, %v1529_v6  ;;  %v10838_v6 = vld [vmem:[#allocation3 + $0x40] sm:$0xff]  }
 0x41b   : > { %v1499_v29 = vpop.f32.mrf.mxu1  ;;  %v1462_v43 = vadd.f32 %v1461_v16, %v11671_v47  ;;  %v1456_v16 = vadd.f32 %v11709_v13, %v11669_v46  ;;  %v1450_v47 = vadd.f32 %v11705_v11, %v11675_v49  ;;  %v1446_v46 = vadd.f32 %v11699_v8, %v11673_v48 }
 0x41c   : > { %v1500_v34 = vadd.f32 %v1499_v29, %v1325_v39  ;;  %v1533_v61 = vmax.f32 %v1498_v33, 0.0  ;;  %v1526_v30 = vmax.f32 %v1480_v38, 0.0  ;;  %v1548_v29 = vpack.c.bf16 %v1530_v28, %v1528_v27  ;;  %v10840_v38 = vld [vmem:[#allocation3 + $0x50] sm:$0xff]   ;;  %v10841_v28 = vld [vmem:[#allocation3 + $0x58] sm:$0xff]   ;;  %v10847_v27 = vld [vmem:[#allocation3 + $0x88] sm:$0xff]  }
 0x41d   : > { %v1501_v36 = vpop.f32.mrf.mxu1  ;;  %v1524_v33 = vmax.f32 %v1476_v25, 0.0  ;;  %v1519_v20 = vmax.f32 %v1462_v43, 0.0  ;;  %v1516_v13 = vmax.f32 %v1456_v16, 0.0  ;;  %v1514_v58 = vmax.f32 %v1450_v47, 0.0  ;;  %v10846_v25 = vld [vmem:[#allocation3 + $0x80] sm:$0xff]   ;;  %v10853_v43 = vld [vmem:[#allocation3 + $0xb8] sm:$0xff]  }
 0x41e   : > { %v1502_v52 = vadd.f32 %v1501_v36, %v1325_v39  ;;  %v1534_v57 = vmax.f32 %v1500_v34, 0.0  ;;  %v1472_v39 = vadd.f32 %v1471_v21, %v11667_v45  ;;  %v1466_v21 = vadd.f32 %v1465_v17, %v11665_v44 }
 0x41f   : > { %v1522_v34 = vmax.f32 %v1470_v22, 0.0  ;;  %v1546_v35 = vpack.c.bf16 %v1526_v30, %v1524_v33  ;;  %v1452_v45 = vadd.f32 %v11707_v12, %v11675_v49  ;;  %v1448_v44 = vadd.f32 %v11703_v10, %v11673_v48  ;;  %v10850_v22 = vld [vmem:[#allocation3 + $0xa0] sm:$0xff]   ;;  %v10851_v30 = vld [vmem:[#allocation3 + $0xa8] sm:$0xff]  }
 0x420   : > { %v1535_v62 = vmax.f32 %v1502_v52, 0.0  ;;  %v1550_v32 = vpack.c.bf16 %v1534_v57, %v1532_v3  ;;  %v1523_v23 = vmax.f32 %v1472_v39, 0.0  ;;  %v1520_v37 = vmax.f32 %v1466_v21, 0.0  ;;  %v10836_v3 = vld [vmem:[#allocation3 + $0x30] sm:$0xff]   ;;  %v10843_v39 = vld [vmem:[#allocation3 + $0x68] sm:$0xff]  }
 0x421   : > { %v1442_v12 = vadd.f32 %v11697_v5, %v11679_v51  ;;  %v1515_v52 = vmax.f32 %v1452_v45, 0.0  ;;  %v1543_v55 = vpack.c.bf16 %v1519_v20, %v1517_v14  ;;  %v1438_v10 = vadd.f32 %v11693_v1, %v11677_v50  ;;  %v10856_v45 = vld [vmem:[#allocation3 + $0xd0] sm:$0xff]  }
 0x422   : > { %v1551_v7 = vpack.c.bf16 %v1535_v62, %v1533_v61  ;;  %v1545_v36 = vpack.c.bf16 %v1523_v23, %v1521_v19  ;;  %v1544_v17 = vpack.c.bf16 %v1522_v34, %v1520_v37  ;;  %v1513_v57 = vmax.f32 %v1448_v44, 0.0  ;;  %v10854_v23 = vld [vmem:[#allocation3 + $0xc0] sm:$0xff]   ;;  %v10857_v44 = vld [vmem:[#allocation3 + $0xd8] sm:$0xff]  }
 0x423   : > { %v1542_v60 = vpack.c.bf16 %v1518_v15, %v1516_v13  ;;  %v1432_v49 = vadd.f32 %v11689_v59, %v11686_v56  ;;  %v1511_v11 = vmax.f32 %v1442_v12, 0.0  ;;  %v1512_v51 = vmax.f32 %v1446_v46, 0.0  ;;  %v10830_v56 = vld [vmem:[#allocation3] sm:$0xff]   ;;  %v10833_v59 = vld [vmem:[#allocation3 + $0x18] sm:$0xff]  }
 0x424   : > { %2832 = vmatprep.subr.bf16.mxu0 %v1551_v7  ;;  %v1541_v61 = vpack.c.bf16 %v1515_v52, %v1513_v57  ;;  %v1428_v5 = vadd.f32 %v11683_v54, %v11681_v53  ;;  %v1509_v48 = vmax.f32 %v1438_v10, 0.0  ;;  %v10831_v53 = vld [vmem:[#allocation3 + $0x8] sm:$0xff]   ;;  %v10832_v54 = vld [vmem:[#allocation3 + $0x10] sm:$0xff]   ;;  %v10858_v12 = vld [vmem:[#allocation3 + $0xe0] sm:$0xff]  }
 0x425   : > { %2833 = vmatpush1.bf16.msra.mxu0 %v1550_v32  ;;  %v1540_v8 = vpack.c.bf16 %v1514_v58, %v1512_v51  ;;  %v1507_v62 = vmax.f32 %v1432_v49, 0.0  ;;  %v10839_v7 = vld [vmem:[#allocation3 + $0x48] sm:$0xff]   ;;  %v10842_v32 = vld [vmem:[#allocation3 + $0x60] sm:$0xff]   ;;  %v1881_v58 = vpop.permute.xlu0 %1880  ;;  %v10860_v51 = vld [vmem:[#allocation3 + $0xf0] sm:$0xff]  }
 0x426   : > { %2834 = vmatprep.subr.bf16.mxu0 %v1549_v24  ;;  %v1539_v2 = vpack.c.bf16 %v1511_v11, %v1509_v48  ;;  %v1505_v50 = vmax.f32 %v1428_v5, 0.0  ;;  %v10845_v24 = vld [vmem:[#allocation3 + $0x78] sm:$0xff]   ;;  %v10859_v10 = vld [vmem:[#allocation3 + $0xe8] sm:$0xff]   ;;  %v1886_v11 = vpop.permute.xlu1 %1885 }
 0x428   : > { %v1537_v1 = vpack.c.bf16 %v1507_v62, %v1505_v50 }
 0x429   : > { %2835 = vmatpush1.bf16.msra.mxu0 %v1548_v29  ;;  %v10852_v29 = vld [vmem:[#allocation3 + $0xb0] sm:$0xff]   ;;  %v1871_v5 = vpop.permute.xlu0 %1870 }
 0x42a   : > { %2836 = vmatprep.subr.bf16.mxu0 %v1547_v31  ;;  %v1876_v62 = vpop.permute.xlu1 %1875 }
 0x42d   : > { %2837 = vmatpush1.bf16.msra.mxu0 %v1546_v35  ;;  %v1861_v50 = vpop.permute.xlu0 %1860 }
 0x42e   : > { %2838 = vmatprep.subr.bf16.mxu0 %v1545_v36 }
 0x431   : > { %2839 = vmatpush1.bf16.msra.mxu0 %v1544_v17 }
 0x432   : > { %2840 = vmatprep.subr.bf16.mxu0 %v1543_v55 }
 0x435   : > { %2841 = vmatpush1.bf16.msra.mxu0 %v1542_v60 }
 0x436   : > { %2842 = vmatprep.subr.bf16.mxu0 %v1541_v61 }
 0x439   : > { %2843 = vmatpush1.bf16.msra.mxu0 %v1540_v8 }
 0x43a   : > { %2844 = vmatprep.subr.bf16.mxu0 %v1539_v2 }
 0x43d   : > { %2845 = vmatpush1.bf16.msra.mxu0 %v11701_v9  ;;  %v10834_v9 = vld [vmem:[#allocation3 + $0x20] sm:$0xff]  }
 0x43e   : > { %2846 = vmatprep.subr.bf16.mxu0 %v1537_v1 }
 0x441   : > { %2847 = vmatpush1.bf16.msra.mxu0 %v11691_v63  ;;  %v10835_v63 = vld [vmem:[#allocation3 + $0x28] sm:$0xff]  }
 0x442   : > { %8361 = vmatprep.subr.bf16.mxu0 %v18486_v0 }
 0x444   : > { %2865 = vmatmul.mubr.bf16.vlgmr.msra.gmra.mxu0 %v10830_v56  ;;  %v10861_v56 = vld [vmem:[#allocation3 + $0xf8] sm:$0xff]  }
 0x445   : > { %2874 = vmatprep.mubr.bf16.mxu0 %v18486_v0 }
 0x44c   : > { %2875 = vmatmul.mubr.bf16.gmra.mxu0 %v10831_v53 }
 0x44d   : > { %2884 = vmatprep.mubr.bf16.mxu0 %v18486_v0 }
 0x454   : > { %2885 = vmatmul.mubr.bf16.gmra.mxu0 %v10832_v54  ;;  %v1866_v54 = vpop.permute.xlu1 %1865 }
 0x455   : > { %2894 = vmatprep.mubr.bf16.mxu0 %v18486_v0 }
 0x45c   : > { %2895 = vmatmul.mubr.bf16.gmra.mxu0 %v10833_v59 }
 0x45d   : > { %2904 = vmatprep.mubr.bf16.mxu0 %v18486_v0 }
 0x464   : > { %2905 = vmatmul.mubr.bf16.gmra.mxu0 %v10834_v9  ;;  %v1851_v9 = vpop.permute.xlu0 %1850 }
 0x465   : > { %2914 = vmatprep.mubr.bf16.mxu0 %v18486_v0 }
 0x46c   : > { %2915 = vmatmul.mubr.bf16.gmra.mxu0 %v10835_v63 }
 0x46d   : > { %2924 = vmatprep.mubr.bf16.mxu0 %v18486_v0 }
 0x474   : > { %2925 = vmatmul.mubr.bf16.gmra.mxu0 %v10836_v3 }
 0x475   : > { %2934 = vmatprep.mubr.bf16.mxu0 %v18486_v0 }
 0x47c   : > { %2935 = vmatmul.mubr.bf16.gmra.mxu0 %v10837_v4 }
 0x47d   : > { %2944 = vmatprep.mubr.bf16.mxu0 %v18486_v0 }
 0x484   : > { %2945 = vmatmul.mubr.bf16.gmra.mxu0 %v10838_v6 }
 0x485   : > { %2954 = vmatprep.mubr.bf16.mxu0 %v18486_v0 }
 0x48c   : > { %2955 = vmatmul.mubr.bf16.gmra.mxu0 %v10839_v7 }
 0x48d   : > { %2964 = vmatprep.mubr.bf16.mxu0 %v18486_v0 }
 0x494   : > { %2965 = vmatmul.mubr.bf16.gmra.mxu0 %v10840_v38  ;;  %v10862_v38 = vld [vmem:[#allocation3 + $0x100] sm:$0xff]  }
 0x495   : > { %2974 = vmatprep.mubr.bf16.mxu0 %v18486_v0 }
 0x49c   : > { %2975 = vmatmul.mubr.bf16.gmra.mxu0 %v10841_v28 }
 0x49d   : > { %2984 = vmatprep.mubr.bf16.mxu0 %v18486_v0 }
 0x4a4   : > { %2985 = vmatmul.mubr.bf16.gmra.mxu0 %v10842_v32 }
 0x4a5   : > { %2994 = vmatprep.mubr.bf16.mxu0 %v18486_v0 }
 0x4ac   : > { %2995 = vmatmul.mubr.bf16.gmra.mxu0 %v10843_v39 }
 0x4ad   : > { %3004 = vmatprep.mubr.bf16.mxu0 %v18486_v0 }
 0x4b4   : > { %3005 = vmatmul.mubr.bf16.gmra.mxu0 %v10844_v41 }
 0x4b5   : > { %3014 = vmatprep.mubr.bf16.mxu0 %v18486_v0 }
 0x4bc   : > { %3015 = vmatmul.mubr.bf16.gmra.mxu0 %v10845_v24  ;;  %v1856_v24 = vpop.permute.xlu1 %1855 }
 0x4bd   : > { %3024 = vmatprep.mubr.bf16.mxu0 %v18486_v0 }
 0x4c4   : > { %3025 = vmatmul.mubr.bf16.gmra.mxu0 %v10846_v25 }
 0x4c5   : > { %3034 = vmatprep.mubr.bf16.mxu0 %v18486_v0 }
 0x4cc   : > { %3035 = vmatmul.mubr.bf16.gmra.mxu0 %v10847_v27 }
 0x4cd   : > { %3044 = vmatprep.mubr.bf16.mxu0 %v18486_v0 }
 0x4d4   : > { %3045 = vmatmul.mubr.bf16.gmra.mxu0 %v10848_v40  ;;  %v1841_v40 = vpop.permute.xlu0 %1840 }
 0x4d5   : > { %3054 = vmatprep.mubr.bf16.mxu0 %v18486_v0 }
 0x4dc   : > { %3055 = vmatmul.mubr.bf16.gmra.mxu0 %v10849_v26 }
 0x4dd   : > { %3064 = vmatprep.mubr.bf16.mxu0 %v18486_v0 }
 0x4e4   : > { %3065 = vmatmul.mubr.bf16.gmra.mxu0 %v10850_v22 }
 0x4e5   : > { %3074 = vmatprep.mubr.bf16.mxu0 %v18486_v0 }
 0x4ec   : > { %3075 = vmatmul.mubr.bf16.gmra.mxu0 %v10851_v30 }
 0x4ed   : > { %3084 = vmatprep.mubr.bf16.mxu0 %v18486_v0 }
 0x4f4   : > { %3085 = vmatmul.mubr.bf16.gmra.mxu0 %v10852_v29 }
 0x4f5   : > { %3094 = vmatprep.mubr.bf16.mxu0 %v18486_v0 }
 0x4fc   : > { %3095 = vmatmul.mubr.bf16.gmra.mxu0 %v10853_v43 }
 0x4fd   : > { %3104 = vmatprep.mubr.bf16.mxu0 %v18486_v0 }
 0x504   : > { %v11769_v31 = vpop.f32.mrf.mxu0  ;;  %3105 = vmatmul.mubr.bf16.gmra.mxu0 %v10854_v23 }
 0x505   : > { %3114 = vmatprep.mubr.bf16.mxu0 %v18486_v0 }
 0x506   : > { %v11772_v21 = vpop.f32.mrf.mxu0 }
 0x508   : > { %v11774_v33 = vpop.f32.mrf.mxu0 }
 0x50a   : > { %v11776_v19 = vpop.f32.mrf.mxu0 }
 0x50c   : > { %v11778_v18 = vpop.f32.mrf.mxu0  ;;  %3115 = vmatmul.mubr.bf16.gmra.mxu0 %v10855_v42 }
 0x50d   : > { %3124 = vmatprep.mubr.bf16.mxu0 %v18486_v0 }
 0x50e   : > { %v11781_v34 = vpop.f32.mrf.mxu0 }
 0x510   : > { %v11783_v35 = vpop.f32.mrf.mxu0 }
 0x512   : > { %v11785_v20 = vpop.f32.mrf.mxu0 }
 0x514   : > { %v11787_v36 = vpop.f32.mrf.mxu0  ;;  %3125 = vmatmul.mubr.bf16.gmra.mxu0 %v10856_v45 }
 0x515   : > { %3134 = vmatprep.mubr.bf16.mxu0 %v18486_v0 }
 0x516   : > { %v11790_v16 = vpop.f32.mrf.mxu0 }
 0x518   : > { %v11792_v37 = vpop.f32.mrf.mxu0 }
 0x51a   : > { %v11794_v14 = vpop.f32.mrf.mxu0 }
 0x51c   : > { %v11796_v47 = vpop.f32.mrf.mxu0  ;;  %3135 = vmatmul.mubr.bf16.gmra.mxu0 %v10857_v44 }
 0x51d   : > { %3144 = vmatprep.mubr.bf16.mxu0 %v18486_v0 }
 0x51e   : > { %v11799_v15 = vpop.f32.mrf.mxu0 }
 0x520   : > { %v11801_v17 = vpop.f32.mrf.mxu0 }
 0x522   : > { %v11803_v52 = vpop.f32.mrf.mxu0 }
 0x524   : > { %v11805_v55 = vpop.f32.mrf.mxu0  ;;  %3145 = vmatmul.mubr.bf16.gmra.mxu0 %v10858_v12 }
 0x525   : > { %3154 = vmatprep.mubr.bf16.mxu0 %v18486_v0 }
 0x526   : > { %v2908_v46 = vpop.f32.mrf.mxu0 }
 0x528   : > { %v11808_v13 = vpop.f32.mrf.mxu0 }
 0x52a   : > { %v11810_v57 = vpop.f32.mrf.mxu0 }
 0x52c   : > { %v2916_v60 = vpop.f32.mrf.mxu0  ;;  %3155 = vmatmul.mubr.bf16.gmra.mxu0 %v10859_v10  ;;  %v2909_v10 = vadd.f32 %v2908_v46, %v1851_v9  ;;  %v2907_v46 = vadd.f32 %v11805_v55, %v1851_v9  ;;  %v2897_v9 = vadd.f32 %v11796_v47, %v1841_v40 }
 0x52d   : > { %3164 = vmatprep.mubr.bf16.mxu0 %v18486_v0  ;;  %v2917_v43 = vadd.f32 %v2916_v60, %v1861_v50 }
 0x52e   : > { %v2918_v49 = vpop.f32.mrf.mxu0 }
 0x52f   : > { %v2919_v25 = vadd.f32 %v2918_v49, %v1861_v50  ;;  %v1831_v50 = vpop.permute.xlu0 %1830 }
 0x530   : > { %v2920_v61 = vpop.f32.mrf.mxu0 }
 0x532   : > { %v2922_v48 = vpop.f32.mrf.mxu0 }
 0x534   : > { %v2926_v8 = vpop.f32.mrf.mxu0  ;;  %3165 = vmatmul.mubr.bf16.gmra.mxu0 %v10860_v51 }
 0x535   : > { %3174 = vmatprep.mubr.bf16.mxu0 %v18486_v0  ;;  %v2927_v28 = vadd.f32 %v2926_v8, %v1871_v5  ;;  %v1846_v8 = vpop.permute.xlu1 %1845 }
 0x536   : > { %v2928_v2 = vpop.f32.mrf.mxu0  ;;  %v2903_v47 = vadd.f32 %v11803_v52, %v1846_v8 }
 0x537   : > { %v2929_v4 = vadd.f32 %v2928_v2, %v1871_v5  ;;  %v11825_v42 = vmax.f32 %v2927_v28, 0.0  ;;  %v10863_v2 = vld [vmem:[#allocation3 + $0x108] sm:$0xff]  }
 0x538   : > { %v2930_v1 = vpop.f32.mrf.mxu0 }
 0x539   : > { %v11819_v26 = vmax.f32 %v2929_v4, 0.0  ;;  %19065 = vst [vmem:[#allocation22_spill] sm:$0xff] %v11825_v42  ;;  %v2931_v45 = vadd.f32 %v2930_v1, %v1876_v62  ;;  %v11845_v1 = vmax.f32 %v2917_v43, 0.0 }
 0x53a   : > { %v2932_v53 = vpop.f32.mrf.mxu0 }
 0x53b   : > { %19064 = vst [vmem:[#allocation21_spill] sm:$0xff] %v11819_v26  ;;  %v2933_v22 = vadd.f32 %v2932_v53, %v1876_v62  ;;  %v5096_v5 = vmax.f32 %v11825_v42, %v11819_v26  ;;  %19070 = vst [vmem:[#allocation27_spill] sm:$0xff] %v11845_v1  ;;  %v11847_v53 = vmax.f32 %v2931_v45, 0.0  ;;  %v10869_v42 = vld [vmem:[#allocation3 + $0x138] sm:$0xff]  }
 0x53c   : > { %v2936_v59 = vpop.f32.mrf.mxu0  ;;  %3175 = vmatmul.mubr.bf16.gmra.mxu0 %v10861_v56  ;;  %v2921_v56 = vadd.f32 %v2920_v61, %v1866_v54 }
 0x53d   : > { %v2937_v63 = vadd.f32 %v2936_v59, %v1881_v58  ;;  %3184 = vmatprep.mubr.bf16.mxu0 %v18486_v0  ;;  %v11836_v60 = vmax.f32 %v2933_v22, 0.0  ;;  %19071 = vst [vmem:[#allocation28_spill] sm:$0xff] %v11847_v53  ;;  %v11850_v59 = vmax.f32 %v2909_v10, 0.0  ;;  %v2887_v22 = vadd.f32 %v11787_v36, %v1831_v50 }
 0x53e   : > { %v2938_v3 = vpop.f32.mrf.mxu0 }
 0x53f   : > { %v2939_v6 = vadd.f32 %v2938_v3, %v1881_v58  ;;  %v11815_v32 = vmax.f32 %v2937_v63, 0.0  ;;  %v11832_v58 = vmax.f32 %v2919_v25, 0.0  ;;  %19069 = vst [vmem:[#allocation26_spill] sm:$0xff] %v11836_v60  ;;  %19072 = vst [vmem:[#allocation29_spill] sm:$0xff] %v11850_v59  ;;  %v2913_v3 = vadd.f32 %v11810_v57, %v1856_v24  ;;  %v1836_v57 = vpop.permute.xlu1 %1835  ;;  %v1821_v25 = vpop.permute.xlu0 %1820 }
 0x540   : > { %v2940_v7 = vpop.f32.mrf.mxu0  ;;  %v5097_v55 = vmax.f32 %v11847_v53, %v11836_v60  ;;  %v2879_v52 = vadd.f32 %v11781_v34, %v1821_v25  ;;  %v2877_v34 = vadd.f32 %v11778_v18, %v1821_v25 }
 0x541   : > { %19062 = vst [vmem:[#allocation19_spill] sm:$0xff] %v11815_v32  ;;  %v11817_v39 = vmax.f32 %v2939_v6, 0.0  ;;  %v2941_v41 = vadd.f32 %v2940_v7, %v1886_v11  ;;  %19068 = vst [vmem:[#allocation25_spill] sm:$0xff] %v11832_v58  ;;  %v5094_v61 = vmax.f32 %v11845_v1, %v11832_v58  ;;  %v2911_v6 = vadd.f32 %v11808_v13, %v1856_v24 }
 0x542   : > { %v2942_v27 = vpop.f32.mrf.mxu0  ;;  %v11867_v7 = vmax.f32 %v2921_v56, 0.0 }
 0x543   : > { %19063 = vst [vmem:[#allocation20_spill] sm:$0xff] %v11817_v39  ;;  %v2943_v30 = vadd.f32 %v2942_v27, %v1886_v11  ;;  %v5098_v29 = vmax.f32 %v11815_v32, %v11817_v39  ;;  %v11827_v44 = vmax.f32 %v2941_v41, 0.0  ;;  %v2923_v11 = vadd.f32 %v2922_v48, %v1866_v54 }
 0x544   : > { %v11823_v23 = vpop.f32.mrf.mxu0  ;;  %3185 = vmatmul.mubr.bf16.gmra.mxu0 %v10862_v38  ;;  %v2899_v48 = vadd.f32 %v11799_v15, %v1841_v40  ;;  %v11864_v15 = vmax.f32 %v2907_v46, 0.0  ;;  %19075 = vst [vmem:[#allocation32_spill] sm:$0xff] %v11867_v7  ;;  %v2889_v38 = vadd.f32 %v11790_v16, %v1831_v50  ;;  %v11876_v27 = vmax.f32 %v2913_v3, 0.0  ;;  %v10864_v16 = vld [vmem:[#allocation3 + $0x110] sm:$0xff]  }
 0x545   : > { %19066 = vst [vmem:[#allocation23_spill] sm:$0xff] %v11827_v44  ;;  %v11829_v12 = vmax.f32 %v2943_v30, 0.0  ;;  %5891 = vmax.xlane.f32.xlu0 %v5098_v29  ;;  %3194 = vmatprep.mubr.bf16.mxu0 %v18486_v0  ;;  %v11855_v4 = vmax.f32 %v2923_v11, 0.0  ;;  %v11885_v30 = vmax.f32 %v2897_v9, 0.0  ;;  %v2901_v29 = vadd.f32 %v11801_v17, %v1846_v8 }
 0x546   : > { %v11834_v49 = vpop.f32.mrf.mxu0  ;;  %19074 = vst [vmem:[#allocation31_spill] sm:$0xff] %v11864_v15  ;;  %v11870_v28 = vmax.f32 %v2899_v48, 0.0  ;;  %19077 = vst [vmem:[#allocation34_spill] sm:$0xff] %v11876_v27  ;;  %v5092_v24 = vmax.f32 %v11864_v15, %v11850_v59  ;;  %v11888_v43 = vmax.f32 %v2911_v6, 0.0  ;;  %v11891_v45 = vmax.f32 %v2889_v38, 0.0  ;;  %v10865_v6 = vld [vmem:[#allocation3 + $0x118] sm:$0xff]  }
 0x547   : > { %19067 = vst [vmem:[#allocation24_spill] sm:$0xff] %v11829_v12  ;;  %v5099_v51 = vmax.f32 %v11827_v44, %v11829_v12  ;;  %19073 = vst [vmem:[#allocation30_spill] sm:$0xff] %v11855_v4  ;;  %v5095_v13 = vmax.f32 %v11867_v7, %v11855_v4  ;;  %v2893_v11 = vadd.f32 %v11794_v14, %v1836_v57  ;;  %v11905_v50 = vmax.f32 %v2887_v22, 0.0 }
 0x548   : > { %v11842_v62 = vpop.f32.mrf.mxu0  ;;  %19076 = vst [vmem:[#allocation33_spill] sm:$0xff] %v11870_v28  ;;  %19078 = vst [vmem:[#allocation35_spill] sm:$0xff] %v11885_v30  ;;  %v5093_v36 = vmax.f32 %v11888_v43, %v11876_v27  ;;  %v5090_v17 = vmax.f32 %v11885_v30, %v11870_v28  ;;  %v2891_v46 = vadd.f32 %v11792_v37, %v1836_v57  ;;  %v11908_v14 = vmax.f32 %v2901_v29, 0.0 }
 0x549   : > { %5893 = vmax.xlane.f32.xlu1 %v5099_v51  ;;  %5887 = vmax.xlane.f32.xlu0 %v5096_v5  ;;  %19079 = vst [vmem:[#allocation36_spill] sm:$0xff] %v11888_v43  ;;  %19080 = vst [vmem:[#allocation37_spill] sm:$0xff] %v11891_v45  ;;  %v11896_v51 = vmax.f32 %v2903_v47, 0.0  ;;  %v1826_v5 = vpop.permute.xlu1 %1825  ;;  %v11911_v48 = vmax.f32 %v2879_v52, 0.0  ;;  %v5088_v37 = vmax.f32 %v11905_v50, %v11891_v45  ;;  %v11926_v57 = vmax.f32 %v2877_v34, 0.0  ;;  %v10866_v34 = vld [vmem:[#allocation3 + $0x120] sm:$0xff]  }
 0x54a   : > { %v11852_v63 = vpop.f32.mrf.mxu0  ;;  %19082 = vst [vmem:[#allocation39_spill] sm:$0xff] %v11905_v50  ;;  %19083 = vst [vmem:[#allocation40_spill] sm:$0xff] %v11908_v14  ;;  %v2881_v38 = vadd.f32 %v11783_v35, %v1826_v5  ;;  %v11929_v25 = vmax.f32 %v2891_v46, 0.0 }
 0x54b   : > { %19081 = vst [vmem:[#allocation38_spill] sm:$0xff] %v11896_v51  ;;  %19084 = vst [vmem:[#allocation41_spill] sm:$0xff] %v11911_v48  ;;  %v5091_v18 = vmax.f32 %v11908_v14, %v11896_v51  ;;  %v5086_v22 = vmax.f32 %v11926_v57, %v11911_v48  ;;  %v10881_v14 = vld [vmem:[#allocation3 + $0x198] sm:$0xff]   ;;  %v1732_v48 = vld [vmem:[%s18427_s10 + $0x1a0] sm:$0xff] }
 0x54c   : > { %v11861_v54 = vpop.f32.mrf.mxu0  ;;  %3195 = vmatmul.mubr.bf16.gmra.mxu0 %v10863_v2  ;;  %v1811_v2 = vpop.permute.xlu0 %1810  ;;  %19086 = vst [vmem:[#allocation43_spill] sm:$0xff] %v11926_v57  ;;  %19087 = vst [vmem:[#allocation44_spill] sm:$0xff] %v11929_v25  ;;  %v1728_v57 = vld [vmem:[%s18427_s10 + $0x180] sm:$0xff] }
 0x54d   : > { %5889 = vmax.xlane.f32.xlu0 %v5097_v55  ;;  %5883 = vmax.xlane.f32.xlu1 %v5094_v61  ;;  %v2869_v56 = vadd.f32 %v11772_v21, %v1811_v2  ;;  %v2883_v55 = vadd.f32 %v11785_v20, %v1826_v5  ;;  %v11917_v61 = vmax.f32 %v2893_v11, 0.0  ;;  %v2867_v21 = vadd.f32 %v11769_v31, %v1811_v2  ;;  %v1816_v20 = vpop.permute.xlu1 %1815 }
 0x54e   : > { %v11872_v41 = vpop.f32.mrf.mxu0  ;;  %3204 = vmatprep.mubr.bf16.mxu0 %v18486_v0  ;;  %v2871_v52 = vadd.f32 %v11774_v33, %v1816_v20  ;;  %v11947_v11 = vmax.f32 %v2881_v38, 0.0 }
 0x54f   : > { %19085 = vst [vmem:[#allocation42_spill] sm:$0xff] %v11917_v61  ;;  %v11931_v47 = vmax.f32 %v2869_v56, 0.0  ;;  %v5089_v31 = vmax.f32 %v11929_v25, %v11917_v61  ;;  %v11944_v29 = vmax.f32 %v2867_v21, 0.0  ;;  %v10867_v21 = vld [vmem:[#allocation3 + $0x128] sm:$0xff]  }
 0x550   : > { %v11882_v40 = vpop.f32.mrf.mxu0  ;;  %19091 = vst [vmem:[#allocation48_spill] sm:$0xff] %v11947_v11  ;;  %v11960_v33 = vmax.f32 %v2871_v52, 0.0 }
 0x551   : > { %5885 = vmax.xlane.f32.xlu0 %v5095_v13  ;;  %5879 = vmax.xlane.f32.xlu1 %v5092_v24  ;;  %19088 = vst [vmem:[#allocation45_spill] sm:$0xff] %v11931_v47  ;;  %v2873_v24 = vadd.f32 %v11776_v19, %v1816_v20  ;;  %19090 = vst [vmem:[#allocation47_spill] sm:$0xff] %v11944_v29  ;;  %v5084_v5 = vmax.f32 %v11944_v29, %v11931_v47  ;;  %v11962_v56 = vpop.permute.xlu1 %1965 }
 0x552   : > { %v11893_v10 = vpop.f32.mrf.mxu0  ;;  %19093 = vst [vmem:[#allocation50_spill] sm:$0xff] %v11960_v33 }
 0x554   : > { %v11902_v8 = vpop.f32.mrf.mxu0  ;;  %3205 = vmatmul.mubr.bf16.gmra.mxu0 %v10864_v16  ;;  %v11936_v16 = vmax.f32 %v2883_v55, 0.0 }
 0x555   : > { %5881 = vmax.xlane.f32.xlu0 %v5093_v36  ;;  %5875 = vmax.xlane.f32.xlu1 %v5090_v17  ;;  %v11952_v36 = vmax.f32 %v2873_v24, 0.0  ;;  %v1956_v38 = vpop.permute.xlu1 %1955  ;;  %v1961_v24 = vpop.permute.xlu0 %1960 }
 0x556   : > { %v11913_v3 = vpop.f32.mrf.mxu0  ;;  %3214 = vmatprep.mubr.bf16.mxu0 %v18486_v0  ;;  %19089 = vst [vmem:[#allocation46_spill] sm:$0xff] %v11936_v16  ;;  %v5087_v17 = vmax.f32 %v11947_v11, %v11936_v16  ;;  %v1756_v11 = vld [vmem:[%s18427_s10 + $0x260] sm:$0xff] }
 0x557   : > { %19092 = vst [vmem:[#allocation49_spill] sm:$0xff] %v11952_v36  ;;  %v5085_v55 = vmax.f32 %v11960_v33, %v11952_v36  ;;  %v10883_v36 = vld [vmem:[#allocation3 + $0x1a8] sm:$0xff]   ;;  %v1759_v33 = vld [vmem:[%s18427_s10 + $0x278] sm:$0xff] }
 0x558   : > { %v11923_v9 = vpop.f32.mrf.mxu0 }
 0x559   : > { %5877 = vmax.xlane.f32.xlu0 %v5091_v18  ;;  %5871 = vmax.xlane.f32.xlu1 %v5088_v37  ;;  %v1946_v52 = vpop.permute.xlu1 %1945  ;;  %v1951_v39 = vpop.permute.xlu0 %1950 }
 0x55a   : > { %v11933_v13 = vpop.f32.mrf.mxu0 }
 0x55c   : > { %v11942_v35 = vpop.f32.mrf.mxu0  ;;  %3215 = vmatmul.mubr.bf16.gmra.mxu0 %v10865_v6 }
 0x55d   : > { %5873 = vmax.xlane.f32.xlu0 %v5089_v31  ;;  %5867 = vmax.xlane.f32.xlu1 %v5086_v22  ;;  %v1936_v32 = vpop.permute.xlu1 %1935  ;;  %v1941_v26 = vpop.permute.xlu0 %1940 }
 0x55e   : > { %v11949_v19 = vpop.f32.mrf.mxu0  ;;  %3224 = vmatprep.mubr.bf16.mxu0 %v18486_v0 }
 0x560   : > { %v11958_v2 = vpop.f32.mrf.mxu0 }
 0x561   : > { %5869 = vmax.xlane.f32.xlu0 %v5087_v17  ;;  %5863 = vmax.xlane.f32.xlu1 %v5084_v5  ;;  %v10868_v5 = vld [vmem:[#allocation3 + $0x130] sm:$0xff]   ;;  %v1931_v59 = vpop.permute.xlu0 %1930 }
 0x562   : > { %v2982_v46 = vpop.f32.mrf.mxu0 }
 0x564   : > { %v11966_v18 = vpop.f32.mrf.mxu0  ;;  %3225 = vmatmul.mubr.bf16.gmra.mxu0 %v10866_v34 }
 0x565   : > { %5865 = vmax.xlane.f32.xlu0 %v5085_v55  ;;  %3234 = vmatprep.mubr.bf16.mxu0 %v18486_v0 }
 0x566   : > { %v11969_v37 = vpop.f32.mrf.mxu0 }
 0x568   : > { %v2990_v6 = vpop.f32.mrf.mxu0 }
 0x56a   : > { %v2992_v20 = vpop.f32.mrf.mxu0 }
 0x56b   : > { %v2993_v28 = vadd.f32 %v2992_v20, %v1936_v32 }
 0x56c   : > { %v2996_v31 = vpop.f32.mrf.mxu0  ;;  %3235 = vmatmul.mubr.bf16.gmra.mxu0 %v10867_v21  ;;  %v1926_v21 = vpop.permute.xlu1 %1925 }
 0x56d   : > { %3244 = vmatprep.mubr.bf16.mxu0 %v18486_v0  ;;  %v11990_v20 = vmax.f32 %v2993_v28, 0.0  ;;  %v2997_v28 = vadd.f32 %v2996_v31, %v1941_v26 }
 0x56e   : > { %v2998_v22 = vpop.f32.mrf.mxu0 }
 0x56f   : > { %19100 = vst [vmem:[#allocation57_spill] sm:$0xff] %v11990_v20 }
 0x570   : > { %v3000_v17 = vpop.f32.mrf.mxu0 }
 0x571   : > { %v3001_v7 = vadd.f32 %v3000_v17, %v1946_v52 }
 0x572   : > { %v3002_v34 = vpop.f32.mrf.mxu0 }
 0x573   : > { %v3003_v53 = vadd.f32 %v3002_v34, %v1946_v52  ;;  %v10870_v52 = vld [vmem:[#allocation3 + $0x140] sm:$0xff]   ;;  %v11984_v17 = vmax.f32 %v3001_v7, 0.0 }
 0x574   : > { %v3006_v55 = vpop.f32.mrf.mxu0  ;;  %3245 = vmatmul.mubr.bf16.gmra.mxu0 %v10868_v5 }
 0x575   : > { %3254 = vmatprep.mubr.bf16.mxu0 %v18486_v0  ;;  %v11978_v30 = vmax.f32 %v3003_v53, 0.0  ;;  %19097 = vst [vmem:[#allocation54_spill] sm:$0xff] %v11984_v17  ;;  %v2983_v53 = vadd.f32 %v2982_v46, %v1926_v21 }
 0x576   : > { %v3008_v12 = vpop.f32.mrf.mxu0 }
 0x577   : > { %19096 = vst [vmem:[#allocation53_spill] sm:$0xff] %v11978_v30 }
 0x578   : > { %v3010_v44 = vpop.f32.mrf.mxu0 }
 0x579   : > { %v3011_v60 = vadd.f32 %v3010_v44, %v1956_v38  ;;  %v3009_v44 = vadd.f32 %v3008_v12, %v1951_v39 }
 0x57a   : > { %v3012_v58 = vpop.f32.mrf.mxu0 }
 0x57b   : > { %v3013_v1 = vadd.f32 %v3012_v58, %v1956_v38  ;;  %v11973_v15 = vmax.f32 %v3011_v60, 0.0  ;;  %v2991_v38 = vadd.f32 %v2990_v6, %v1936_v32  ;;  %v1916_v60 = vpop.permute.xlu1 %1915  ;;  %v11994_v32 = vmax.f32 %v3009_v44, 0.0 }
 0x57c   : > { %v3016_v4 = vpop.f32.mrf.mxu0  ;;  %3255 = vmatmul.mubr.bf16.gmra.mxu0 %v10869_v42  ;;  %v5111_v6 = vmax.f32 %v11984_v17, %v11978_v30 }
 0x57d   : > { %19094 = vst [vmem:[#allocation51_spill] sm:$0xff] %v11973_v15  ;;  %v11975_v27 = vmax.f32 %v3013_v1, 0.0  ;;  %v3017_v5 = vadd.f32 %v3016_v4, %v1961_v24  ;;  %3264 = vmatprep.mubr.bf16.mxu0 %v18486_v0  ;;  %v3007_v1 = vadd.f32 %v3006_v55, %v1951_v39  ;;  %19101 = vst [vmem:[#allocation58_spill] sm:$0xff] %v11994_v32  ;;  %v12003_v46 = vmax.f32 %v2991_v38, 0.0 }
 0x57e   : > { %v3018_v43 = vpop.f32.mrf.mxu0  ;;  %v2971_v38 = vadd.f32 %v11923_v9, %v1916_v60 }
 0x57f   : > { %19095 = vst [vmem:[#allocation52_spill] sm:$0xff] %v11975_v27  ;;  %v3019_v51 = vadd.f32 %v3018_v43, %v1961_v24  ;;  %v5113_v58 = vmax.f32 %v11973_v15, %v11975_v27  ;;  %v11986_v4 = vmax.f32 %v3017_v5, 0.0  ;;  %v1921_v43 = vpop.permute.xlu0 %1920  ;;  %v2999_v24 = vadd.f32 %v2998_v22, %v1941_v26  ;;  %19102 = vst [vmem:[#allocation59_spill] sm:$0xff] %v12003_v46  ;;  %v10876_v15 = vld [vmem:[#allocation3 + $0x170] sm:$0xff]  }
 0x580   : > { %v11982_v42 = vpop.f32.mrf.mxu0  ;;  %v12005_v55 = vmax.f32 %v3007_v1, 0.0  ;;  %v2973_v22 = vadd.f32 %v11933_v13, %v1916_v60  ;;  %v12008_v5 = vmax.f32 %v2983_v53, 0.0  ;;  %v5109_v26 = vmax.f32 %v12003_v46, %v11990_v20  ;;  %v10871_v13 = vld [vmem:[#allocation3 + $0x148] sm:$0xff]  }
 0x581   : > { %19098 = vst [vmem:[#allocation55_spill] sm:$0xff] %v11986_v4  ;;  %v11988_v34 = vmax.f32 %v3019_v51, 0.0  ;;  %5921 = vmax.xlane.f32.xlu0 %v5113_v58  ;;  %v2981_v51 = vadd.f32 %v11958_v2, %v1926_v21  ;;  %v1906_v58 = vpop.permute.xlu1 %1905  ;;  %v2987_v53 = vadd.f32 %v11966_v18, %v1931_v59 }
 0x582   : > { %v11992_v12 = vpop.f32.mrf.mxu0  ;;  %19103 = vst [vmem:[#allocation60_spill] sm:$0xff] %v12005_v55  ;;  %19104 = vst [vmem:[#allocation61_spill] sm:$0xff] %v12008_v5  ;;  %v5112_v2 = vmax.f32 %v12005_v55, %v11994_v32 }
 0x583   : > { %19099 = vst [vmem:[#allocation56_spill] sm:$0xff] %v11988_v34  ;;  %v5114_v39 = vmax.f32 %v11986_v4, %v11988_v34  ;;  %v12014_v34 = vmax.f32 %v2999_v24, 0.0  ;;  %v1911_v21 = vpop.permute.xlu0 %1910  ;;  %v12023_v1 = vmax.f32 %v2981_v51, 0.0  ;;  %v12029_v24 = vmax.f32 %v2973_v22, 0.0 }
 0x584   : > { %v12000_v7 = vpop.f32.mrf.mxu0  ;;  %3265 = vmatmul.mubr.bf16.gmra.mxu0 %v10870_v52  ;;  %v2989_v52 = vadd.f32 %v11969_v37, %v1931_v59  ;;  %v2963_v37 = vadd.f32 %v11893_v10, %v1906_v58  ;;  %v2961_v10 = vadd.f32 %v11882_v40, %v1906_v58  ;;  %v12043_v51 = vmax.f32 %v2971_v38, 0.0 }
 0x585   : > { %5917 = vmax.xlane.f32.xlu0 %v5111_v6  ;;  %5923 = vmax.xlane.f32.xlu1 %v5114_v39  ;;  %19105 = vst [vmem:[#allocation62_spill] sm:$0xff] %v12014_v34  ;;  %19106 = vst [vmem:[#allocation63_spill] sm:$0xff] %v12023_v1  ;;  %v12026_v6 = vmax.f32 %v2997_v28, 0.0  ;;  %v5107_v9 = vmax.f32 %v12023_v1, %v12008_v5  ;;  %v1896_v60 = vpop.permute.xlu1 %1895  ;;  %v2977_v28 = vadd.f32 %v11942_v35, %v1921_v43 }
 0x586   : > { %v12010_v44 = vpop.f32.mrf.mxu0  ;;  %3274 = vmatprep.mubr.bf16.mxu0 %v18486_v0  ;;  %19108 = vst [vmem:[#allocation65_spill] sm:$0xff] %v12029_v24  ;;  %v2979_v0 = vadd.f32 %v11949_v19, %v1921_v43  ;;  %v12034_v4 = vmax.f32 %v2989_v52, 0.0  ;;  %19110 = vst [vmem:[#allocation67_spill] sm:$0xff] %v12043_v51  ;;  %v12046_v22 = vmax.f32 %v2987_v53, 0.0  ;;  %v2953_v19 = vadd.f32 %v11852_v63, %v1896_v60  ;;  %v10872_v63 = vld [vmem:[#allocation3 + $0x150] sm:$0xff]  }
 0x587   : > { %19107 = vst [vmem:[#allocation64_spill] sm:$0xff] %v12026_v6  ;;  %v5110_v59 = vmax.f32 %v12026_v6, %v12014_v34  ;;  %v12049_v52 = vmax.f32 %v2963_v37, 0.0  ;;  %v2969_v32 = vadd.f32 %v11913_v3, %v1911_v21  ;;  %v5105_v35 = vmax.f32 %v12043_v51, %v12029_v24  ;;  %v1727_v34 = vld [vmem:[%s18427_s10 + $0x178] sm:$0xff] }
 0x588   : > { %v12020_v31 = vpop.f32.mrf.mxu0  ;;  %19109 = vst [vmem:[#allocation66_spill] sm:$0xff] %v12034_v4  ;;  %19111 = vst [vmem:[#allocation68_spill] sm:$0xff] %v12046_v22  ;;  %v12055_v40 = vmax.f32 %v2979_v0, 0.0  ;;  %v5108_v43 = vmax.f32 %v12046_v22, %v12034_v4  ;;  %v2951_v38 = vadd.f32 %v11842_v62, %v1896_v60  ;;  %v12064_v53 = vmax.f32 %v2961_v10, 0.0  ;;  %v1722_v4 = vld [vmem:[%s18427_s10 + $0x150] sm:$0xff]  ;;  %v10877_v22 = vld [vmem:[#allocation3 + $0x178] sm:$0xff]  }
 0x589   : > { %5913 = vmax.xlane.f32.xlu0 %v5109_v26  ;;  %5919 = vmax.xlane.f32.xlu1 %v5112_v2  ;;  %19112 = vst [vmem:[#allocation69_spill] sm:$0xff] %v12049_v52  ;;  %v19113_v2 = vmov 0   ;;  %v2967_v37 = vadd.f32 %v11902_v8, %v1911_v21  ;;  %v12069_v0 = vmax.f32 %v2953_v19, 0.0  ;;  %v12074_v55 = vmax.f32 %v2969_v32, 0.0 }
 0x58a   : > { %v12031_v39 = vpop.f32.mrf.mxu0  ;;  %19114 = vst [vmem:[#allocation70_spill] sm:$0xff] %v12055_v40  ;;  %19115 = vst [vmem:[#allocation71_spill] sm:$0xff] %v12064_v53  ;;  %v3023_v27 = vadd.f32 %v11992_v12, %v11962_v56  ;;  %v5103_v62 = vmax.f32 %v12064_v53, %v12049_v52  ;;  %v12084_v10 = vmax.f32 %v2951_v38, 0.0  ;;  %v3021_v32 = vadd.f32 %v11982_v42, %v11962_v56  ;;  %v10873_v56 = vld [vmem:[#allocation3 + $0x158] sm:$0xff]   ;;  %v10880_v52 = vld [vmem:[#allocation3 + $0x190] sm:$0xff]  }
 0x58b   : > { %19117 = vst [vmem:[#allocation73_spill] sm:$0xff] %v12069_v0  ;;  %19118 = vst [vmem:[#allocation74_spill] sm:$0xff] %v12074_v55 }
 0x58c   : > { %v12040_v18 = vpop.f32.mrf.mxu0  ;;  %3275 = vmatmul.mubr.bf16.gmra.mxu0 %v10871_v13  ;;  %v1901_v13 = vpop.permute.xlu0 %1900  ;;  %19119 = vst [vmem:[#allocation75_spill] sm:$0xff] %v12084_v10  ;;  %v12108_v38 = vmax.f32 %v3021_v32, 0.0 }
 0x58d   : > { %5909 = vmax.xlane.f32.xlu0 %v5107_v9  ;;  %5915 = vmax.xlane.f32.xlu1 %v5110_v59  ;;  %v12067_v9 = vmax.f32 %v2977_v28, 0.0  ;;  %v2959_v3 = vadd.f32 %v11872_v41, %v1901_v13  ;;  %v2957_v41 = vadd.f32 %v11861_v54, %v1901_v13  ;;  %v12087_v28 = vmax.f32 %v2967_v37, 0.0 }
 0x58e   : > { %v12051_v26 = vpop.f32.mrf.mxu0  ;;  %3284 = vmatprep.mubr.bf16.mxu0 %v19113_v2  ;;  %v5101_v54 = vmax.f32 %v12084_v10, %v12069_v0  ;;  %19124 = vst [vmem:[#allocation80_spill] sm:$0xff] %v12108_v38  ;;  %v1738_v10 = vld [vmem:[%s18427_s10 + $0x1d0] sm:$0xff] }
 0x58f   : > { %19116 = vst [vmem:[#allocation72_spill] sm:$0xff] %v12067_v9  ;;  %v5106_v8 = vmax.f32 %v12067_v9, %v12055_v40  ;;  %19120 = vst [vmem:[#allocation76_spill] sm:$0xff] %v12087_v28  ;;  %v5104_v13 = vmax.f32 %v12087_v28, %v12074_v55  ;;  %v1718_v40 = vld [vmem:[%s18427_s10 + $0x130] sm:$0xff]  ;;  %v10878_v9 = vld [vmem:[#allocation3 + $0x180] sm:$0xff]  }
 0x590   : > { %v12061_v58 = vpop.f32.mrf.mxu0  ;;  %v1891_v60 = vpop.permute.xlu0 %1890  ;;  %v1714_v55 = vld [vmem:[%s18427_s10 + $0x110] sm:$0xff]  ;;  %v10879_v28 = vld [vmem:[#allocation3 + $0x188] sm:$0xff]  }
 0x591   : > { %5905 = vmax.xlane.f32.xlu0 %v5105_v35  ;;  %5911 = vmax.xlane.f32.xlu1 %v5108_v43  ;;  %v2949_v12 = vadd.f32 %v11834_v49, %v1891_v60  ;;  %v12095_v35 = vmax.f32 %v2959_v3, 0.0  ;;  %v12097_v43 = vmax.f32 %v3023_v27, 0.0  ;;  %v2947_v42 = vadd.f32 %v11823_v23, %v1891_v60 }
 0x592   : > { %v12072_v59 = vpop.f32.mrf.mxu0  ;;  %v12106_v49 = vmax.f32 %v2957_v41, 0.0 }
 0x593   : > { %19121 = vst [vmem:[#allocation77_spill] sm:$0xff] %v12095_v35  ;;  %19122 = vst [vmem:[#allocation78_spill] sm:$0xff] %v12097_v43  ;;  %v12112_v27 = vmax.f32 %v2949_v12, 0.0  ;;  %v5115_v3 = vmax.f32 %v12108_v38, %v12097_v43  ;;  %v12120_v23 = vmax.f32 %v2947_v42, 0.0  ;;  %v10874_v12 = vld [vmem:[#allocation3 + $0x160] sm:$0xff]  }
 0x594   : > { %v12082_v21 = vpop.f32.mrf.mxu0  ;;  %3285 = vmatmul.mubr.bf16.gmra.mxu0 %v10872_v63  ;;  %19123 = vst [vmem:[#allocation79_spill] sm:$0xff] %v12106_v49 }
 0x595   : > { %5901 = vmax.xlane.f32.xlu0 %v5103_v62  ;;  %5907 = vmax.xlane.f32.xlu1 %v5106_v8  ;;  %19125 = vst [vmem:[#allocation81_spill] sm:$0xff] %v12112_v27  ;;  %v5102_v62 = vmax.f32 %v12106_v49, %v12095_v35  ;;  %19126 = vst [vmem:[#allocation82_spill] sm:$0xff] %v12120_v23  ;;  %v5100_v41 = vmax.f32 %v12120_v23, %v12112_v27  ;;  %v1742_v35 = vld [vmem:[%s18427_s10 + $0x1f0] sm:$0xff] }
 0x596   : > { %v12092_v19 = vpop.f32.mrf.mxu0  ;;  %3294 = vmatprep.mubr.bf16.mxu0 %v19113_v2 }
 0x598   : > { %v12103_v63 = vpop.f32.mrf.mxu0 }
 0x599   : > { %5897 = vmax.xlane.f32.xlu0 %v5101_v54  ;;  %5903 = vmax.xlane.f32.xlu1 %v5104_v13 }
 0x59a   : > { %v12110_v37 = vpop.f32.mrf.mxu0 }
 0x59c   : > { %v12118_v8 = vpop.f32.mrf.mxu0  ;;  %3295 = vmatmul.mubr.bf16.gmra.mxu0 %v10873_v56 }
 0x59d   : > { %5925 = vmax.xlane.f32.xlu0 %v5115_v3  ;;  %5899 = vmax.xlane.f32.xlu1 %v5102_v62  ;;  %v10875_v3 = vld [vmem:[#allocation3 + $0x168] sm:$0xff]  }
 0x59e   : > { %v12122_v60 = vpop.f32.mrf.mxu0  ;;  %3304 = vmatprep.mubr.bf16.mxu0 %v19113_v2 }
 0x5a0   : > { %v12127_v32 = vpop.f32.mrf.mxu0 }
 0x5a1   : > { %5895 = vmax.xlane.f32.xlu1 %v5100_v41 }
 0x5a2   : > { %v12129_v54 = vpop.f32.mrf.mxu0 }
 0x5a4   : > { %v12131_v13 = vpop.f32.mrf.mxu0  ;;  %3305 = vmatmul.mubr.bf16.gmra.mxu0 %v10874_v12  ;;  %v1726_v12 = vld [vmem:[%s18427_s10 + $0x170] sm:$0xff] }
 0x5a5   : > { %3314 = vmatprep.mubr.bf16.mxu0 %v19113_v2 }
 0x5a6   : > { %v12134_v56 = vpop.f32.mrf.mxu0 }
 0x5a8   : > { %v12136_v42 = vpop.f32.mrf.mxu0 }
 0x5aa   : > { %v12138_v62 = vpop.f32.mrf.mxu0 }
 0x5ac   : > { %v12140_v43 = vpop.f32.mrf.mxu0  ;;  %3315 = vmatmul.mubr.bf16.gmra.mxu0 %v10875_v3  ;;  %v1724_v3 = vld [vmem:[%s18427_s10 + $0x160] sm:$0xff] }
 0x5ad   : > { %3324 = vmatprep.mubr.bf16.mxu0 %v19113_v2 }
 0x5ae   : > { %v12143_v41 = vpop.f32.mrf.mxu0 }
 0x5b0   : > { %v12148_v38 = vpop.f32.mrf.mxu0 }
 0x5b2   : > { %v12153_v6 = vpop.f32.mrf.mxu0  ;;  %2040 = vperm.xlu1 %10809, %v1726_v12  }
 0x5b3   : > { %2045 = vperm.xlu0 %10808, %v1727_v34   ;;  %v1725_v34 = vld [vmem:[%s18427_s10 + $0x168] sm:$0xff] }
 0x5b4   : > { %v12158_v30 = vpop.f32.mrf.mxu0  ;;  %3325 = vmatmul.mubr.bf16.gmra.mxu0 %v10876_v15  ;;  %v1720_v15 = vld [vmem:[%s18427_s10 + $0x140] sm:$0xff] }
 0x5b5   : > { %3334 = vmatprep.mubr.bf16.mxu0 %v19113_v2 }
 0x5b6   : > { %v12164_v17 = vpop.f32.mrf.mxu0  ;;  %2030 = vperm.xlu1 %10809, %v1724_v3   ;;  %v1723_v3 = vld [vmem:[%s18427_s10 + $0x158] sm:$0xff] }
 0x5b7   : > { %2020 = vperm.xlu0 %10808, %v1722_v4  }
 0x5b8   : > { %v12169_v12 = vpop.f32.mrf.mxu0 }
 0x5ba   : > { %v12174_v20 = vpop.f32.mrf.mxu0  ;;  %2035 = vperm.xlu1 %10809, %v1725_v34   ;;  %v1721_v34 = vld [vmem:[%s18427_s10 + $0x148] sm:$0xff] }
 0x5bb   : > { %2010 = vperm.xlu0 %10808, %v1720_v15  }
 0x5bc   : > { %v12179_v4 = vpop.f32.mrf.mxu0  ;;  %3335 = vmatmul.mubr.bf16.gmra.mxu0 %v10877_v22  ;;  %v1716_v22 = vld [vmem:[%s18427_s10 + $0x120] sm:$0xff] }
 0x5bd   : > { %3344 = vmatprep.mubr.bf16.mxu0 %v19113_v2 }
 0x5be   : > { %v12185_v46 = vpop.f32.mrf.mxu0  ;;  %2025 = vperm.xlu1 %10809, %v1723_v3   ;;  %v1719_v3 = vld [vmem:[%s18427_s10 + $0x138] sm:$0xff] }
 0x5bf   : > { %2000 = vperm.xlu0 %10808, %v1718_v40  }
 0x5c0   : > { %v12190_v15 = vpop.f32.mrf.mxu0 }
 0x5c2   : > { %v12195_v5 = vpop.f32.mrf.mxu0  ;;  %2015 = vperm.xlu1 %10809, %v1721_v34   ;;  %v1717_v34 = vld [vmem:[%s18427_s10 + $0x128] sm:$0xff] }
 0x5c3   : > { %1990 = vperm.xlu0 %10808, %v1716_v22  }
 0x5c4   : > { %v12200_v40 = vpop.f32.mrf.mxu0  ;;  %3345 = vmatmul.mubr.bf16.gmra.mxu0 %v10878_v9  ;;  %v1712_v9 = vld [vmem:[%s18427_s10 + $0x100] sm:$0xff] }
 0x5c5   : > { %3354 = vmatprep.mubr.bf16.mxu0 %v19113_v2 }
 0x5c6   : > { %v12206_v1 = vpop.f32.mrf.mxu0  ;;  %2005 = vperm.xlu1 %10809, %v1719_v3   ;;  %v1715_v3 = vld [vmem:[%s18427_s10 + $0x118] sm:$0xff] }
 0x5c7   : > { %1980 = vperm.xlu0 %10808, %v1714_v55  }
 0x5c8   : > { %v12211_v22 = vpop.f32.mrf.mxu0 }
 0x5c9   : > { %19127 = vst [vmem:[#allocation83_spill] sm:$0xff] %v12211_v22 }
 0x5ca   : > { %v12216_v24 = vpop.f32.mrf.mxu0  ;;  %1995 = vperm.xlu1 %10809, %v1717_v34   ;;  %v1713_v34 = vld [vmem:[%s18427_s10 + $0x108] sm:$0xff] }
 0x5cb   : > { %19128 = vst [vmem:[#allocation84_spill] sm:$0xff] %v12216_v24  ;;  %1970 = vperm.xlu0 %10808, %v1712_v9  }
 0x5cc   : > { %v12221_v55 = vpop.f32.mrf.mxu0  ;;  %3355 = vmatmul.mubr.bf16.gmra.mxu0 %v10879_v28  ;;  %v1740_v28 = vld [vmem:[%s18427_s10 + $0x1e0] sm:$0xff] }
 0x5cd   : > { %3364 = vmatprep.mubr.bf16.mxu0 %v19113_v2 }
 0x5ce   : > { %v12227_v51 = vpop.f32.mrf.mxu0  ;;  %v5892_v49 = vpop.xlane.xlu0 %5891  ;;  %1985 = vperm.xlu1 %10809, %v1715_v3  }
 0x5cf   : > { %2120 = vperm.xlu0 %10808, %v1742_v35   ;;  %v1743_v35 = vld [vmem:[%s18427_s10 + $0x1f8] sm:$0xff] }
 0x5d0   : > { %v12232_v9 = vpop.f32.mrf.mxu0 }
 0x5d1   : > { %19129 = vst [vmem:[#allocation85_spill] sm:$0xff] %v12232_v9 }
 0x5d2   : > { %v12237_v27 = vpop.f32.mrf.mxu0  ;;  %v5894_v53 = vpop.xlane.xlu1 %5893  ;;  %1975 = vperm.xlu1 %10809, %v1713_v34  }
 0x5d3   : > { %19130 = vst [vmem:[#allocation86_spill] sm:$0xff] %v12237_v27  ;;  %v6382_v23 = vpack.c.bf16 %v5894_v53, %v5892_v49  ;;  %v5888_v0 = vpop.xlane.xlu0 %5887  ;;  %2110 = vperm.xlu0 %10808, %v1740_v28   ;;  %v1741_v49 = vld [vmem:[%s18427_s10 + $0x1e8] sm:$0xff] }
 0x5d4   : > { %v12242_v3 = vpop.f32.mrf.mxu0  ;;  %3365 = vmatmul.mubr.bf16.gmra.mxu0 %v10880_v52 }
 0x5d5   : > { %19131 = vst [vmem:[#allocation87_spill] sm:$0xff] %v12242_v3  ;;  %7784 = vmatpush1.bf16.msra.mxu1 %v6382_v23  ;;  %3374 = vmatprep.mubr.bf16.mxu0 %v19113_v2  ;;  %v1736_v23 = vld [vmem:[%s18427_s10 + $0x1c0] sm:$0xff] }
 0x5d6   : > { %v12248_v45 = vpop.f32.mrf.mxu0  ;;  %v5884_v34 = vpop.xlane.xlu1 %5883  ;;  %2125 = vperm.xlu1 %10809, %v1743_v35   ;;  %7785 = vmatprep.subr.bf16.mxu1 %v19113_v2 }
 0x5d7   : > { %19132 = vst [vmem:[#allocation88_spill] sm:$0xff] %v12248_v45  ;;  %v5890_v53 = vpop.xlane.xlu0 %5889  ;;  %2100 = vperm.xlu0 %10808, %v1738_v10  }
 0x5d8   : > { %v6381_v52 = vpack.c.bf16 %v5890_v53, %v5888_v0  ;;  %v12254_v28 = vpop.f32.mrf.mxu0  ;;  %v1739_v0 = vld [vmem:[%s18427_s10 + $0x1d8] sm:$0xff] }
 0x5d9   : > { %19133 = vst [vmem:[#allocation89_spill] sm:$0xff] %v12254_v28 }
 0x5da   : > { %7786 = vmatpush1.bf16.msra.mxu1 %v6381_v52  ;;  %v12259_v50 = vpop.f32.mrf.mxu0  ;;  %v5880_v35 = vpop.xlane.xlu1 %5879  ;;  %2115 = vperm.xlu1 %10809, %v1741_v49   ;;  %v1734_v52 = vld [vmem:[%s18427_s10 + $0x1b0] sm:$0xff] }
 0x5db   : > { %19134 = vst [vmem:[#allocation90_spill] sm:$0xff] %v12259_v50  ;;  %v5886_v61 = vpop.xlane.xlu0 %5885  ;;  %2090 = vperm.xlu0 %10808, %v1736_v23   ;;  %7787 = vmatprep.subr.bf16.mxu1 %v19113_v2 }
 0x5dc   : > { %v6380_v10 = vpack.c.bf16 %v5886_v61, %v5884_v34  ;;  %v12265_v53 = vpop.f32.mrf.mxu0  ;;  %3375 = vmatmul.mubr.bf16.gmra.mxu0 %v10881_v14  ;;  %v1737_v61 = vld [vmem:[%s18427_s10 + $0x1c8] sm:$0xff] }
 0x5dd   : > { %19135 = vst [vmem:[#allocation91_spill] sm:$0xff] %v12265_v53  ;;  %3384 = vmatprep.mubr.bf16.mxu0 %v19113_v2  ;;  %v10891_v53 = vld [vmem:[#allocation3 + $0x1e8] sm:$0xff]  }
 0x5de   : > { %7788 = vmatpush1.bf16.msra.mxu1 %v6380_v10  ;;  %v12271_v49 = vpop.f32.mrf.mxu0  ;;  %v5876_v23 = vpop.xlane.xlu1 %5875  ;;  %2105 = vperm.xlu1 %10809, %v1739_v0   ;;  %v10882_v10 = vld [vmem:[#allocation3 + $0x1a0] sm:$0xff]  }
 0x5df   : > { %19136 = vst [vmem:[#allocation92_spill] sm:$0xff] %v12271_v49  ;;  %v5882_v47 = vpop.xlane.xlu0 %5881  ;;  %2080 = vperm.xlu0 %10808, %v1734_v52   ;;  %7789 = vmatprep.subr.bf16.mxu1 %v19113_v2 }
 0x5e0   : > { %v6379_v14 = vpack.c.bf16 %v5882_v47, %v5880_v35  ;;  %v12277_v34 = vpop.f32.mrf.mxu0  ;;  %v1735_v47 = vld [vmem:[%s18427_s10 + $0x1b8] sm:$0xff] }
 0x5e1   : > { %19137 = vst [vmem:[#allocation93_spill] sm:$0xff] %v12277_v34  ;;  %v10887_v34 = vld [vmem:[#allocation3 + $0x1c8] sm:$0xff]  }
 0x5e2   : > { %7790 = vmatpush1.bf16.msra.mxu1 %v6379_v14  ;;  %v12282_v25 = vpop.f32.mrf.mxu0  ;;  %2095 = vperm.xlu1 %10809, %v1737_v61   ;;  %v5872_v52 = vpop.xlane.xlu1 %5871  ;;  %v1730_v14 = vld [vmem:[%s18427_s10 + $0x190] sm:$0xff] }
 0x5e3   : > { %19138 = vst [vmem:[#allocation94_spill] sm:$0xff] %v12282_v25  ;;  %v5878_v0 = vpop.xlane.xlu0 %5877  ;;  %2070 = vperm.xlu0 %10808, %v1732_v48   ;;  %7791 = vmatprep.subr.bf16.mxu1 %v19113_v2 }
 0x5e4   : > { %v6378_v35 = vpack.c.bf16 %v5878_v0, %v5876_v23  ;;  %v12288_v29 = vpop.f32.mrf.mxu0  ;;  %3385 = vmatmul.mubr.bf16.gmra.mxu0 %v10882_v10  ;;  %v1733_v23 = vld [vmem:[%s18427_s10 + $0x1a8] sm:$0xff] }
 0x5e5   : > { %19139 = vst [vmem:[#allocation95_spill] sm:$0xff] %v12288_v29  ;;  %3394 = vmatprep.mubr.bf16.mxu0 %v19113_v2 }
 0x5e6   : > { %7792 = vmatpush1.bf16.msra.mxu1 %v6378_v35  ;;  %v12294_v61 = vpop.f32.mrf.mxu0  ;;  %2085 = vperm.xlu1 %10809, %v1735_v47   ;;  %v5868_v35 = vpop.xlane.xlu1 %5867 }
 0x5e7   : > { %19140 = vst [vmem:[#allocation96_spill] sm:$0xff] %v12294_v61  ;;  %v5874_v48 = vpop.xlane.xlu0 %5873  ;;  %2060 = vperm.xlu0 %10808, %v1730_v14   ;;  %7793 = vmatprep.subr.bf16.mxu1 %v19113_v2  ;;  %v10890_v61 = vld [vmem:[#allocation3 + $0x1e0] sm:$0xff]  }
 0x5e8   : > { %v6377_v0 = vpack.c.bf16 %v5874_v48, %v5872_v52  ;;  %v12300_v10 = vpop.f32.mrf.mxu0  ;;  %v1731_v52 = vld [vmem:[%s18427_s10 + $0x198] sm:$0xff] }
 0x5e9   : > { %19141 = vst [vmem:[#allocation97_spill] sm:$0xff] %v12300_v10 }
 0x5ea   : > { %7794 = vmatpush1.bf16.msra.mxu1 %v6377_v0  ;;  %v12305_v16 = vpop.f32.mrf.mxu0  ;;  %2075 = vperm.xlu1 %10809, %v1733_v23  }
 0x5eb   : > { %19142 = vst [vmem:[#allocation98_spill] sm:$0xff] %v12305_v16  ;;  %v5870_v47 = vpop.xlane.xlu0 %5869  ;;  %2050 = vperm.xlu0 %10808, %v1728_v57   ;;  %7795 = vmatprep.subr.bf16.mxu1 %v19113_v2  ;;  %v5864_v57 = vpop.xlane.xlu1 %5863 }
 0x5ec   : > { %v6376_v14 = vpack.c.bf16 %v5870_v47, %v5868_v35  ;;  %v12311_v48 = vpop.f32.mrf.mxu0  ;;  %3395 = vmatmul.mubr.bf16.gmra.mxu0 %v10883_v36  ;;  %v1729_v35 = vld [vmem:[%s18427_s10 + $0x188] sm:$0xff] }
 0x5ed   : > { %19143 = vst [vmem:[#allocation99_spill] sm:$0xff] %v12311_v48  ;;  %3404 = vmatprep.mubr.bf16.mxu0 %v19113_v2 }
 0x5ee   : > { %7796 = vmatpush1.bf16.msra.mxu1 %v6376_v14  ;;  %v12317_v23 = vpop.f32.mrf.mxu0  ;;  %2065 = vperm.xlu1 %10809, %v1731_v52   ;;  %v10884_v14 = vld [vmem:[#allocation3 + $0x1b0] sm:$0xff]  }
 0x5ef   : > { %19144 = vst [vmem:[#allocation100_spill] sm:$0xff] %v12317_v23  ;;  %v5866_v0 = vpop.xlane.xlu0 %5865  ;;  %2205 = vperm.xlu0 %10808, %v1759_v33   ;;  %7797 = vmatprep.subr.bf16.mxu1 %v19113_v2  ;;  %v1758_v33 = vld [vmem:[%s18427_s10 + $0x270] sm:$0xff] }
 0x5f0   : > { %v6375_v36 = vpack.c.bf16 %v5866_v0, %v5864_v57  ;;  %v12323_v47 = vpop.f32.mrf.mxu0  ;;  %v1788_v57 = vld [vmem:[%s18427_s10 + $0x360] sm:$0xff] }
 0x5f1   : > { %19145 = vst [vmem:[#allocation101_spill] sm:$0xff] %v12323_v47 }
 0x5f2   : > { %7798 = vmatpush1.bf16.msra.mxu1 %v6375_v36  ;;  %v12328_v16 = vpop.f32.mrf.mxu0  ;;  %2055 = vperm.xlu1 %10809, %v1729_v35   ;;  %v10885_v36 = vld [vmem:[#allocation3 + $0x1b8] sm:$0xff]  }
 0x5f3   : > { %19146 = vst [vmem:[#allocation102_spill] sm:$0xff] %v12328_v16  ;;  %2190 = vperm.xlu0 %10808, %v1756_v11   ;;  %7799 = vmatprep.subr.bf16.mxu1 %v19113_v2  ;;  %v1790_v11 = vld [vmem:[%s18427_s10 + $0x370] sm:$0xff] }
 0x5f4   : > { %v12334_v52 = vpop.f32.mrf.mxu0  ;;  %3405 = vmatmul.mubr.bf16.gmra.mxu0 %v10884_v14  ;;  %v1791_v14 = vld [vmem:[%s18427_s10 + $0x378] sm:$0xff] }
 0x5f5   : > { %19147 = vst [vmem:[#allocation103_spill] sm:$0xff] %v12334_v52  ;;  %3414 = vmatprep.mubr.bf16.mxu0 %v19113_v2 }
 0x5f6   : > { %v12340_v0 = vpop.f32.mrf.mxu0  ;;  %2200 = vperm.xlu1 %10809, %v1758_v33  }
 0x5f7   : > { %19148 = vst [vmem:[#allocation104_spill] sm:$0xff] %v12340_v0  ;;  %2350 = vperm.xlu0 %10808, %v1788_v57   ;;  %v1757_v57 = vld [vmem:[%s18427_s10 + $0x268] sm:$0xff] }
 0x5f8   : > { %v12345_v35 = vpop.f32.mrf.mxu0 }
 0x5f9   : > { %19149 = vst [vmem:[#allocation105_spill] sm:$0xff] %v12345_v35 }
 0x5fa   : > { %v12347_v16 = vpop.f32.mrf.mxu0  ;;  %2360 = vperm.xlu1 %10809, %v1790_v11   ;;  %v12365_v11 = vld [vmem:[%s18428_s11] sm:$0xff] }
 0x5fb   : > { %19150 = vst [vmem:[#allocation106_spill] sm:$0xff] %v12347_v16  ;;  %v10886_v16 = vld [vmem:[#allocation3 + $0x1c0] sm:$0xff]  }
 0x5fc   : > { %v12352_v47 = vpop.f32.mrf.mxu0  ;;  %3415 = vmatmul.mubr.bf16.gmra.mxu0 %v10885_v36  ;;  %v12370_v36 = vld [vmem:[%s18428_s11 + $0x20] sm:$0xff] }
 0x5fd   : > { %19151 = vst [vmem:[#allocation107_spill] sm:$0xff] %v12352_v47  ;;  %3424 = vmatprep.mubr.bf16.mxu0 %v19113_v2 }
 0x5fe   : > { %v12355_v33 = vpop.f32.mrf.mxu0  ;;  %2365 = vperm.xlu1 %10809, %v1791_v14   ;;  %v10141_v14 = vcombine.high %v12365_v11, %v12370_v36 }
 0x5ff   : > { %19152 = vst [vmem:[#allocation108_spill] sm:$0xff] %v12355_v33 }
 0x600   : > { %v12360_v35 = vpop.f32.mrf.mxu0  ;;  %7815 = vmatprep.mubr.bf16.mxu1 %v10141_v14 }
 0x601   : > { %19153 = vst [vmem:[#allocation109_spill] sm:$0xff] %v12360_v35 }
 0x602   : > { %v12374_v10 = vpop.f32.mrf.mxu0  ;;  %2195 = vperm.xlu1 %10809, %v1757_v57  }
 0x603   : > { %19154 = vst [vmem:[#allocation110_spill] sm:$0xff] %v12374_v10 }
 0x604   : > { %v12378_v33 = vpop.f32.mrf.mxu0  ;;  %3425 = vmatmul.mubr.bf16.gmra.mxu0 %v10886_v16 }
 0x605   : > { %19155 = vst [vmem:[#allocation111_spill] sm:$0xff] %v12378_v33  ;;  %3434 = vmatprep.mubr.bf16.mxu0 %v19113_v2  ;;  %v10888_v33 = vld [vmem:[#allocation3 + $0x1d0] sm:$0xff]  }
 0x606   : > { %v12381_v47 = vpop.f32.mrf.mxu0 }
 0x607   : > { %19156 = vst [vmem:[#allocation112_spill] sm:$0xff] %v12381_v47 }
 0x608   : > { %v12383_v25 = vpop.f32.mrf.mxu0 }
 0x609   : > { %19157 = vst [vmem:[#allocation113_spill] sm:$0xff] %v12383_v25 }
 0x60a   : > { %v12385_v0 = vpop.f32.mrf.mxu0  ;;  %v5922_v52 = vpop.xlane.xlu0 %5921 }
 0x60b   : > { %19158 = vst [vmem:[#allocation114_spill] sm:$0xff] %v12385_v0 }
 0x60c   : > { %v12387_v50 = vpop.f32.mrf.mxu0  ;;  %3435 = vmatmul.mubr.bf16.gmra.mxu0 %v10887_v34 }
 0x60d   : > { %19159 = vst [vmem:[#allocation115_spill] sm:$0xff] %v12387_v50  ;;  %3444 = vmatprep.mubr.bf16.mxu0 %v19113_v2 }
 0x60e   : > { %v12390_v57 = vpop.f32.mrf.mxu0  ;;  %v5918_v14 = vpop.xlane.xlu0 %5917 }
 0x60f   : > { %19160 = vst [vmem:[#allocation116_spill] sm:$0xff] %v12390_v57  ;;  %v5924_v35 = vpop.xlane.xlu1 %5923  ;;  %v10889_v57 = vld [vmem:[#allocation3 + $0x1d8] sm:$0xff]  }
 0x610   : > { %v12392_v16 = vpop.f32.mrf.mxu0 }
 0x611   : > { %19161 = vst [vmem:[#allocation117_spill] sm:$0xff] %v12392_v16 }
 0x612   : > { %v12394_v10 = vpop.f32.mrf.mxu0  ;;  %v5914_v47 = vpop.xlane.xlu0 %5913 }
 0x613   : > { %19162 = vst [vmem:[#allocation118_spill] sm:$0xff] %v12394_v10  ;;  %v5920_v25 = vpop.xlane.xlu1 %5919 }
 0x614   : > { %v12396_v28 = vpop.f32.mrf.mxu0  ;;  %3445 = vmatmul.mubr.bf16.gmra.mxu0 %v10888_v33 }
 0x615   : > { %19163 = vst [vmem:[#allocation119_spill] sm:$0xff] %v12396_v28  ;;  %3454 = vmatprep.mubr.bf16.mxu0 %v19113_v2 }
 0x616   : > { %v12399_v50 = vpop.f32.mrf.mxu0  ;;  %v5910_v34 = vpop.xlane.xlu0 %5909 }
 0x617   : > { %19164 = vst [vmem:[#allocation120_spill] sm:$0xff] %v12399_v50  ;;  %v5916_v0 = vpop.xlane.xlu1 %5915 }
 0x618   : > { %v12401_v23 = vpop.f32.mrf.mxu0 }
 0x619   : > { %19165 = vst [vmem:[#allocation121_spill] sm:$0xff] %v12401_v23 }
 0x61a   : > { %v12403_v48 = vpop.f32.mrf.mxu0  ;;  %v12405_v16 = vpop.xlane.xlu0 %5905 }
 0x61b   : > { %19166 = vst [vmem:[#allocation122_spill] sm:$0xff] %v12403_v48  ;;  %v5912_v27 = vpop.xlane.xlu1 %5911 }
 0x61c   : > { %v12407_v10 = vpop.f32.mrf.mxu0  ;;  %3455 = vmatmul.mubr.bf16.gmra.mxu0 %v10889_v57 }
 0x61d   : > { %19167 = vst [vmem:[#allocation123_spill] sm:$0xff] %v12407_v10  ;;  %3464 = vmatprep.mubr.bf16.mxu0 %v19113_v2 }
 0x61e   : > { %v12410_v33 = vpop.f32.mrf.mxu0  ;;  %v12412_v28 = vpop.xlane.xlu0 %5901 }
 0x61f   : > { %19168 = vst [vmem:[#allocation124_spill] sm:$0xff] %v12410_v33  ;;  %v5908_v50 = vpop.xlane.xlu1 %5907 }
 0x620   : > { %v12414_v9 = vpop.f32.mrf.mxu0 }
 0x621   : > { %19169 = vst [vmem:[#allocation125_spill] sm:$0xff] %v12414_v9 }
 0x622   : > { %v12416_v23 = vpop.f32.mrf.mxu0  ;;  %v12418_v29 = vpop.xlane.xlu0 %5897 }
 0x623   : > { %19170 = vst [vmem:[#allocation126_spill] sm:$0xff] %v12416_v23  ;;  %v5904_v48 = vpop.xlane.xlu1 %5903  ;;  %v6389_v23 = vpack.c.bf16 %v5922_v52, %v5920_v25 }
 0x624   : > { %v12420_v24 = vpop.f32.mrf.mxu0  ;;  %3465 = vmatmul.mubr.bf16.gmra.mxu0 %v10890_v61 }
 0x625   : > { %19171 = vst [vmem:[#allocation127_spill] sm:$0xff] %v12420_v24  ;;  %3474 = vmatprep.mubr.bf16.mxu0 %v19113_v2  ;;  %v10892_v24 = vld [vmem:[#allocation3 + $0x1f0] sm:$0xff]  }
 0x626   : > { %v12423_v57 = vpop.f32.mrf.mxu0  ;;  %v5926_v10 = vpop.xlane.xlu0 %5925 }
 0x627   : > { %19172 = vst [vmem:[#allocation128_spill] sm:$0xff] %v12423_v57  ;;  %v6390_v33 = vpack.c.bf16 %v5926_v10, %v5924_v35  ;;  %v5900_v22 = vpop.xlane.xlu1 %5899  ;;  %v6388_v35 = vpack.c.bf16 %v5918_v14, %v5916_v0 }
 0x628   : > { %v12425_v49 = vpop.f32.mrf.mxu0 }
 0x629   : > { %19173 = vst [vmem:[#allocation129_spill] sm:$0xff] %v12425_v49  ;;  %7800 = vmatpush2.bf16.msra.mxu1 %v6390_v33 }
 0x62a   : > { %v12427_v9 = vpop.f32.mrf.mxu0  ;;  %7801 = vmatprep.subr.bf16.mxu1 %v19113_v2 }
 0x62b   : > { %19174 = vst [vmem:[#allocation130_spill] sm:$0xff] %v12427_v9  ;;  %v5896_v45 = vpop.xlane.xlu1 %5895 }
 0x62c   : > { %v12430_v3 = vpop.f32.mrf.mxu0  ;;  %3475 = vmatmul.mubr.bf16.gmra.mxu0 %v10891_v53  ;;  %v6387_v53 = vpack.c.bf16 %v5914_v47, %v5912_v27  ;;  %v10893_v27 = vld [vmem:[#allocation3 + $0x1f8] sm:$0xff]  }
 0x62d   : > { %19175 = vst [vmem:[#allocation131_spill] sm:$0xff] %v12430_v3  ;;  %7802 = vmatpush2.bf16.msra.mxu1 %v6389_v23  ;;  %3484 = vmatprep.mubr.bf16.mxu0 %v19113_v2 }
 0x62e   : > { %v12433_v61 = vpop.f32.mrf.mxu0  ;;  %v12435_v10 = vpop.permute.xlu0 %2045  ;;  %7803 = vmatprep.subr.bf16.mxu1 %v19113_v2 }
 0x62f   : > { %19176 = vst [vmem:[#allocation132_spill] sm:$0xff] %v12433_v61  ;;  %v12438_v33 = vpop.permute.xlu1 %2040 }
 0x630   : > { %v12440_v57 = vpop.f32.mrf.mxu0 }
 0x631   : > { %19177 = vst [vmem:[#allocation133_spill] sm:$0xff] %v12440_v57  ;;  %7804 = vmatpush2.bf16.msra.mxu1 %v6388_v35  ;;  %v6386_v35 = vpack.c.bf16 %v5910_v34, %v5908_v50 }
 0x632   : > { %v12442_v25 = vpop.f32.mrf.mxu0  ;;  %v12444_v52 = vpop.permute.xlu0 %2020  ;;  %7805 = vmatprep.subr.bf16.mxu1 %v19113_v2 }
 0x633   : > { %19178 = vst [vmem:[#allocation134_spill] sm:$0xff] %v12442_v25  ;;  %v12447_v23 = vpop.permute.xlu1 %2030 }
 0x634   : > { %v12449_v9 = vpop.f32.mrf.mxu0  ;;  %3485 = vmatmul.mubr.bf16.gmra.mxu0 %v10892_v24  ;;  %v6385_v24 = vpack.c.bf16 %v12405_v16, %v5904_v48  ;;  %v6127_v16 = vld [vmem:[%s18428_s11 + $0x40] sm:$0xff] }
 0x635   : > { %19179 = vst [vmem:[#allocation135_spill] sm:$0xff] %v12449_v9  ;;  %7806 = vmatpush2.bf16.msra.mxu1 %v6387_v53  ;;  %3494 = vmatprep.mubr.bf16.mxu0 %v19113_v2 }
 0x636   : > { %v12452_v0 = vpop.f32.mrf.mxu0  ;;  %v12454_v14 = vpop.permute.xlu0 %2010  ;;  %7807 = vmatprep.subr.bf16.mxu1 %v19113_v2 }
 0x637   : > { %19180 = vst [vmem:[#allocation136_spill] sm:$0xff] %v12452_v0  ;;  %v12457_v49 = vpop.permute.xlu1 %2035 }
 0x638   : > { %v12459_v61 = vpop.f32.mrf.mxu0 }
 0x639   : > { %19181 = vst [vmem:[#allocation137_spill] sm:$0xff] %v12459_v61  ;;  %7808 = vmatpush2.bf16.msra.mxu1 %v6386_v35  ;;  %v6384_v35 = vpack.c.bf16 %v12412_v28, %v5900_v22  ;;  %v6383_v22 = vpack.c.bf16 %v12418_v29, %v5896_v45 }
 0x63a   : > { %v12461_v47 = vpop.f32.mrf.mxu0  ;;  %v2001_v3 = vpop.permute.xlu0 %2000  ;;  %7809 = vmatprep.subr.bf16.mxu1 %v19113_v2 }
 0x63b   : > { %19182 = vst [vmem:[#allocation138_spill] sm:$0xff] %v12461_v47  ;;  %v12465_v53 = vpop.permute.xlu1 %2025 }
 0x63c   : > { %v12467_v25 = vpop.f32.mrf.mxu0  ;;  %3495 = vmatmul.mubr.bf16.gmra.mxu0 %v10893_v27  ;;  %v6131_v27 = vld [vmem:[%s18428_s11 + $0x60] sm:$0xff] }
 0x63d   : > { %19183 = vst [vmem:[#allocation139_spill] sm:$0xff] %v12467_v25  ;;  %7810 = vmatpush2.bf16.msra.mxu1 %v6385_v24 }
 0x63e   : > { %v12469_v50 = vpop.f32.mrf.mxu0  ;;  %v1991_v34 = vpop.permute.xlu0 %1990  ;;  %7811 = vmatprep.subr.bf16.mxu1 %v19113_v2 }
 0x63f   : > { %19184 = vst [vmem:[#allocation140_spill] sm:$0xff] %v12469_v50  ;;  %v12473_v57 = vpop.permute.xlu1 %2015 }
 0x640   : > { %v12475_v47 = vpop.f32.mrf.mxu0 }
 0x641   : > { %19185 = vst [vmem:[#allocation141_spill] sm:$0xff] %v12475_v47  ;;  %7812 = vmatpush2.bf16.msra.mxu1 %v6384_v35  ;;  %v10149_v35 = vcombine.high %v6127_v16, %v6131_v27 }
 0x642   : > { %v12477_v61 = vpop.f32.mrf.mxu0  ;;  %v1981_v48 = vpop.permute.xlu0 %1980  ;;  %7813 = vmatprep.subr.bf16.mxu1 %v19113_v2 }
 0x643   : > { %19186 = vst [vmem:[#allocation142_spill] sm:$0xff] %v12477_v61  ;;  %v12487_v28 = vpop.permute.xlu1 %2005  ;;  %v3037_v0 = vadd.f32 %v12040_v18, %v1981_v48  ;;  %v3039_v9 = vadd.f32 %v12051_v26, %v1981_v48  ;;  %v3047_v26 = vadd.f32 %v12082_v21, %v1991_v34 }
 0x644   : > { %v12489_v24 = vpop.f32.mrf.mxu0 }
 0x645   : > { %19187 = vst [vmem:[#allocation143_spill] sm:$0xff] %v12489_v24  ;;  %7814 = vmatpush2.bf16.msra.mxu1 %v6383_v22  ;;  %v19190_v22 = vcombine.low %v12365_v11, %v12370_v36  ;;  %v3049_v11 = vadd.f32 %v12092_v19, %v1991_v34  ;;  %v12523_v36 = vmax.f32 %v3037_v0, 0.0  ;;  %v12539_v0 = vmax.f32 %v3047_v26, 0.0 }
 0x646   : > { %v12491_v50 = vpop.f32.mrf.mxu0  ;;  %v1971_v25 = vpop.permute.xlu0 %1970  ;;  %8072 = vmatprep.subr.bf16.mxu1 %v19113_v2  ;;  %v3069_v26 = vadd.f32 %v12134_v56, %v12454_v14 }
 0x647   : > { %19188 = vst [vmem:[#allocation144_spill] sm:$0xff] %v12491_v50  ;;  %v3027_v61 = vadd.f32 %v12000_v7, %v1971_v25  ;;  %v3029_v47 = vadd.f32 %v12010_v44, %v1971_v25  ;;  %v1996_v45 = vpop.permute.xlu1 %1995  ;;  %v12514_v7 = vld [vmem:[%s18428_s11 + $0x80] sm:$0xff]  ;;  %19194 = vst [vmem:[#allocation149_spill] sm:$0xff] %v12523_v36  ;;  %v12541_v34 = vmax.f32 %v3049_v11, 0.0 }
 0x648   : > { %v12498_v29 = vpop.f32.mrf.mxu0  ;;  %7816 = vmatmul.mubr.bf16.vlgmr.msra.gmra.mxu1 %v19190_v22  ;;  %v12519_v44 = vld [vmem:[%s18428_s11 + $0xa0] sm:$0xff]  ;;  %19198 = vst [vmem:[#allocation153_spill] sm:$0xff] %v12539_v0 }
 0x649   : > { %19189 = vst [vmem:[#allocation145_spill] sm:$0xff] %v12498_v29  ;;  %v12503_v24 = vmax.f32 %v3027_v61, 0.0  ;;  %v12505_v50 = vmax.f32 %v3029_v47, 0.0  ;;  %7823 = vmatprep.mubr.bf16.mxu1 %v10149_v35  ;;  %v12525_v61 = vmax.f32 %v3039_v9, 0.0  ;;  %v10148_v35 = vcombine.low %v6127_v16, %v6131_v27  ;;  %19199 = vst [vmem:[#allocation154_spill] sm:$0xff] %v12541_v34  ;;  %v12568_v11 = vld [vmem:[%s18428_s11 + $0xc0] sm:$0xff] }
 0x64a   : > { %v12507_v2 = vpop.f32.mrf.mxu0  ;;  %v12509_v18 = vpop.permute.xlu0 %2120  ;;  %v10157_v22 = vcombine.high %v12514_v7, %v12519_v44  ;;  %v3059_v9 = vadd.f32 %v12122_v60, %v2001_v3  ;;  %v10156_v60 = vcombine.low %v12514_v7, %v12519_v44  ;;  %v3051_v7 = vadd.f32 %v12103_v63, %v1996_v45 }
 0x64b   : > { %19191 = vst [vmem:[#allocation146_spill] sm:$0xff] %v12503_v24  ;;  %19192 = vst [vmem:[#allocation147_spill] sm:$0xff] %v12505_v50  ;;  %v1986_v25 = vpop.permute.xlu1 %1985  ;;  %v5116_v48 = vmax.f32 %v12503_v24, %v12505_v50  ;;  %v5118_v16 = vmax.f32 %v12523_v36, %v12525_v61  ;;  %v3077_v63 = vadd.f32 %v12140_v43, %v12444_v52 }
 0x64c   : > { %19193 = vst [vmem:[#allocation148_spill] sm:$0xff] %v12507_v2  ;;  %19195 = vst [vmem:[#allocation150_spill] sm:$0xff] %v12525_v61  ;;  %v12527_v47 = vpop.f32.mrf.mxu0  ;;  %v3057_v2 = vadd.f32 %v12118_v8, %v2001_v3  ;;  %v3041_v27 = vadd.f32 %v12061_v58, %v1986_v25  ;;  %v3043_v29 = vadd.f32 %v12072_v59, %v1986_v25 }
 0x64d   : > { %19196 = vst [vmem:[#allocation151_spill] sm:$0xff] %v12527_v47  ;;  %5927 = vmax.xlane.f32.xlu1 %v5116_v48  ;;  %v3067_v3 = vadd.f32 %v12131_v13, %v12454_v14  ;;  %v12573_v13 = vld [vmem:[%s18428_s11 + $0xe0] sm:$0xff]  ;;  %v12577_v14 = vmax.f32 %v3059_v9, 0.0  ;;  %v5120_v25 = vmax.f32 %v12539_v0, %v12541_v34 }
 0x64e   : > { %v12534_v21 = vpop.f32.mrf.mxu0  ;;  %v12536_v19 = vpop.permute.xlu0 %2110  ;;  %v12575_v56 = vmax.f32 %v3057_v2, 0.0  ;;  %v10165_v9 = vcombine.high %v12568_v11, %v12573_v13 }
 0x64f   : > { %19197 = vst [vmem:[#allocation152_spill] sm:$0xff] %v12534_v21  ;;  %v1976_v47 = vpop.permute.xlu1 %1975  ;;  %19205 = vst [vmem:[#allocation160_spill] sm:$0xff] %v12577_v14 }
 0x650   : > { %v3031_v8 = vadd.f32 %v12020_v31, %v1976_v47  ;;  %v3033_v48 = vadd.f32 %v12031_v39, %v1976_v47  ;;  %v12549_v21 = vpop.f32.mrf.mxu0  ;;  %7824 = vmatmul.mubr.bf16.gmra.mxu1 %v10148_v35  ;;  %19204 = vst [vmem:[#allocation159_spill] sm:$0xff] %v12575_v56  ;;  %v3053_v47 = vadd.f32 %v12110_v37, %v1996_v45  ;;  %v12585_v35 = vmax.f32 %v3041_v27, 0.0 }
 0x651   : > { %19200 = vst [vmem:[#allocation155_spill] sm:$0xff] %v12549_v21  ;;  %7831 = vmatprep.mubr.bf16.mxu1 %v10157_v22  ;;  %5931 = vmax.xlane.f32.xlu1 %v5118_v16  ;;  %v12587_v22 = vmax.f32 %v3043_v29, 0.0  ;;  %v12603_v29 = vmax.f32 %v3067_v3, 0.0  ;;  %v12605_v27 = vmax.f32 %v3069_v26, 0.0  ;;  %v5122_v43 = vmax.f32 %v12575_v56, %v12577_v14 }
 0x652   : > { %v12557_v58 = vmax.f32 %v3031_v8, 0.0  ;;  %v12559_v59 = vmax.f32 %v3033_v48, 0.0  ;;  %v12561_v31 = vpop.f32.mrf.mxu0  ;;  %v12563_v39 = vpop.permute.xlu0 %2100  ;;  %19206 = vst [vmem:[#allocation161_spill] sm:$0xff] %v12585_v35  ;;  %v3079_v8 = vadd.f32 %v12143_v41, %v12444_v52  ;;  %v3061_v48 = vadd.f32 %v12127_v32, %v12487_v28 }
 0x653   : > { %19203 = vst [vmem:[#allocation158_spill] sm:$0xff] %v12561_v31  ;;  %v12580_v44 = vpop.permute.xlu1 %2125  ;;  %19207 = vst [vmem:[#allocation162_spill] sm:$0xff] %v12587_v22  ;;  %v3063_v41 = vadd.f32 %v12129_v54, %v12487_v28  ;;  %v12615_v52 = vmax.f32 %v3051_v7, 0.0  ;;  %v5119_v3 = vmax.f32 %v12585_v35, %v12587_v22  ;;  %v3101_v32 = vadd.f32 %v12190_v15, %v12435_v10  ;;  %v6155_v15 = vld [vmem:[%s18428_s11 + $0x120] sm:$0xff] }
 0x654   : > { %19201 = vst [vmem:[#allocation156_spill] sm:$0xff] %v12557_v58  ;;  %19202 = vst [vmem:[#allocation157_spill] sm:$0xff] %v12559_v59  ;;  %v12589_v16 = vpop.f32.mrf.mxu0  ;;  %v5117_v2 = vmax.f32 %v12557_v58, %v12559_v59  ;;  %v3103_v26 = vadd.f32 %v12195_v5, %v12435_v10  ;;  %v10164_v7 = vcombine.low %v12568_v11, %v12573_v13  ;;  %v12641_v5 = vmax.f32 %v3079_v8, 0.0  ;;  %v19253_v58 = vld [vmem:[#allocation84_spill] sm:$0xff] }
 0x655   : > { %19208 = vst [vmem:[#allocation163_spill] sm:$0xff] %v12589_v16  ;;  %5935 = vmax.xlane.f32.xlu1 %v5120_v25  ;;  %19210 = vst [vmem:[#allocation165_spill] sm:$0xff] %v12603_v29  ;;  %v12617_v25 = vmax.f32 %v3053_v47, 0.0  ;;  %v12639_v47 = vmax.f32 %v3077_v63, 0.0  ;;  %v3071_v10 = vadd.f32 %v12136_v42, %v12473_v57  ;;  %v5124_v11 = vmax.f32 %v12603_v29, %v12605_v27 }
 0x656   : > { %5929 = vmax.xlane.f32.xlu0 %v5117_v2  ;;  %v12599_v37 = vpop.f32.mrf.mxu0  ;;  %v12601_v45 = vpop.permute.xlu0 %2090  ;;  %19211 = vst [vmem:[#allocation166_spill] sm:$0xff] %v12605_v27  ;;  %19212 = vst [vmem:[#allocation167_spill] sm:$0xff] %v12615_v52  ;;  %v3073_v13 = vadd.f32 %v12138_v62, %v12473_v57  ;;  %v12661_v21 = vmax.f32 %v3101_v32, 0.0  ;;  %v3081_v62 = vadd.f32 %v12148_v38, %v12465_v53 }
 0x657   : > { %19209 = vst [vmem:[#allocation164_spill] sm:$0xff] %v12599_v37  ;;  %v12609_v16 = vpop.permute.xlu1 %2115  ;;  %19213 = vst [vmem:[#allocation168_spill] sm:$0xff] %v12617_v25  ;;  %v5121_v63 = vmax.f32 %v12615_v52, %v12617_v25  ;;  %v3087_v38 = vadd.f32 %v12158_v30, %v12447_v23 }
 0x658   : > { %v12619_v2 = vpop.f32.mrf.mxu0  ;;  %7832 = vmatmul.mubr.bf16.gmra.mxu1 %v10156_v60  ;;  %v6151_v60 = vld [vmem:[%s18428_s11 + $0x100] sm:$0xff]  ;;  %19216 = vst [vmem:[#allocation171_spill] sm:$0xff] %v12639_v47  ;;  %19217 = vst [vmem:[#allocation172_spill] sm:$0xff] %v12641_v5 }
 0x659   : > { %19214 = vst [vmem:[#allocation169_spill] sm:$0xff] %v12619_v2  ;;  %7839 = vmatprep.mubr.bf16.mxu1 %v10165_v9  ;;  %5939 = vmax.xlane.f32.xlu1 %v5122_v43  ;;  %v12651_v43 = vmax.f32 %v3061_v48, 0.0  ;;  %v10173_v8 = vcombine.high %v6151_v60, %v6155_v15  ;;  %19222 = vst [vmem:[#allocation177_spill] sm:$0xff] %v12661_v21  ;;  %v5126_v48 = vmax.f32 %v12639_v47, %v12641_v5 }
 0x65a   : > { %5933 = vmax.xlane.f32.xlu0 %v5119_v3  ;;  %v12627_v54 = vpop.f32.mrf.mxu0  ;;  %v12629_v28 = vpop.permute.xlu0 %2080  ;;  %v12653_v3 = vmax.f32 %v3063_v41, 0.0  ;;  %v3083_v41 = vadd.f32 %v12153_v6, %v12465_v53  ;;  %v12688_v6 = vld [vmem:[%s18428_s11 + $0x140] sm:$0xff]  ;;  %v10172_v30 = vcombine.low %v6151_v60, %v6155_v15  ;;  %v3091_v15 = vadd.f32 %v12169_v12, %v12457_v49 }
 0x65b   : > { %19215 = vst [vmem:[#allocation170_spill] sm:$0xff] %v12627_v54  ;;  %v12645_v9 = vpop.permute.xlu1 %2105  ;;  %19218 = vst [vmem:[#allocation173_spill] sm:$0xff] %v12651_v43  ;;  %v12663_v54 = vmax.f32 %v3103_v26, 0.0  ;;  %v6163_v53 = vld [vmem:[%s18428_s11 + $0x160] sm:$0xff] }
 0x65c   : > { %19219 = vst [vmem:[#allocation174_spill] sm:$0xff] %v12653_v3  ;;  %v12655_v37 = vpop.f32.mrf.mxu0  ;;  %v5123_v32 = vmax.f32 %v12651_v43, %v12653_v3 }
 0x65d   : > { %19220 = vst [vmem:[#allocation175_spill] sm:$0xff] %v12655_v37  ;;  %5943 = vmax.xlane.f32.xlu1 %v5124_v11  ;;  %19223 = vst [vmem:[#allocation178_spill] sm:$0xff] %v12663_v54  ;;  %v12673_v11 = vmax.f32 %v3071_v10, 0.0 }
 0x65e   : > { %5937 = vmax.xlane.f32.xlu0 %v5121_v63  ;;  %v12659_v42 = vpop.f32.mrf.mxu0  ;;  %v2071_v31 = vpop.permute.xlu0 %2070  ;;  %v12675_v63 = vmax.f32 %v3073_v13, 0.0  ;;  %v12697_v13 = vmax.f32 %v3081_v62, 0.0 }
 0x65f   : > { %19221 = vst [vmem:[#allocation176_spill] sm:$0xff] %v12659_v42  ;;  %v12667_v57 = vpop.permute.xlu1 %2095  ;;  %19224 = vst [vmem:[#allocation179_spill] sm:$0xff] %v12673_v11 }
 0x660   : > { %19225 = vst [vmem:[#allocation180_spill] sm:$0xff] %v12675_v63  ;;  %v12677_v42 = vpop.f32.mrf.mxu0  ;;  %7840 = vmatmul.mubr.bf16.gmra.mxu1 %v10164_v7  ;;  %v3089_v7 = vadd.f32 %v12164_v17, %v12447_v23  ;;  %19228 = vst [vmem:[#allocation183_spill] sm:$0xff] %v12697_v13  ;;  %v5125_v2 = vmax.f32 %v12673_v11, %v12675_v63 }
 0x661   : > { %19226 = vst [vmem:[#allocation181_spill] sm:$0xff] %v12677_v42  ;;  %7847 = vmatprep.mubr.bf16.mxu1 %v10173_v8  ;;  %5947 = vmax.xlane.f32.xlu1 %v5126_v48  ;;  %v12699_v8 = vmax.f32 %v3083_v41, 0.0  ;;  %v12708_v42 = vmax.f32 %v3087_v38, 0.0  ;;  %v3093_v38 = vadd.f32 %v12174_v20, %v12457_v49  ;;  %v3099_v20 = vadd.f32 %v12185_v46, %v12438_v33  ;;  %v6167_v49 = vld [vmem:[%s18428_s11 + $0x180] sm:$0xff] }
 0x662   : > { %5941 = vmax.xlane.f32.xlu0 %v5123_v32  ;;  %v12683_v26 = vpop.f32.mrf.mxu0  ;;  %v2061_v37 = vpop.permute.xlu0 %2060  ;;  %v5131_v32 = vmax.f32 %v12661_v21, %v12663_v54  ;;  %v12712_v60 = vmax.f32 %v3089_v7, 0.0 }
 0x663   : > { %19227 = vst [vmem:[#allocation182_spill] sm:$0xff] %v12683_v26  ;;  %v12695_v10 = vpop.permute.xlu1 %2085  ;;  %19229 = vst [vmem:[#allocation184_spill] sm:$0xff] %v12699_v8  ;;  %v10181_v26 = vcombine.high %v12688_v6, %v6163_v53  ;;  %v5127_v7 = vmax.f32 %v12697_v13, %v12699_v8 }
 0x664   : > { %v12701_v48 = vpop.f32.mrf.mxu0  ;;  %19231 = vst [vmem:[#allocation186_spill] sm:$0xff] %v12708_v42  ;;  %19233 = vst [vmem:[#allocation188_spill] sm:$0xff] %v12712_v60 }
 0x665   : > { %19230 = vst [vmem:[#allocation185_spill] sm:$0xff] %v12701_v48  ;;  %5957 = vmax.xlane.f32.xlu1 %v5131_v32  ;;  %v3117_v32 = vadd.f32 %v12221_v55, %v2061_v37 }
 0x666   : > { %5945 = vmax.xlane.f32.xlu0 %v5125_v2  ;;  %v12710_v17 = vpop.f32.mrf.mxu0  ;;  %v2051_v23 = vpop.permute.xlu0 %2050  ;;  %v3119_v2 = vadd.f32 %v12227_v51, %v2061_v37  ;;  %v10180_v51 = vcombine.low %v12688_v6, %v6163_v53  ;;  %v6171_v37 = vld [vmem:[%s18428_s11 + $0x1a0] sm:$0xff] }
 0x667   : > { %19232 = vst [vmem:[#allocation187_spill] sm:$0xff] %v12710_v17  ;;  %v3107_v62 = vadd.f32 %v12200_v40, %v2051_v23  ;;  %v3109_v41 = vadd.f32 %v12206_v1, %v2051_v23  ;;  %v12718_v48 = vpop.permute.xlu1 %2075  ;;  %v3097_v1 = vadd.f32 %v12179_v4, %v12438_v33  ;;  %v19240_v23 = vld [vmem:[#allocation88_spill] sm:$0xff]  ;;  %v5128_v33 = vmax.f32 %v12708_v42, %v12712_v60 }
 0x668   : > { %v12724_v17 = vpop.f32.mrf.mxu0  ;;  %7848 = vmatmul.mubr.bf16.gmra.mxu1 %v10172_v30  ;;  %v19239_v30 = vld [vmem:[#allocation87_spill] sm:$0xff]  ;;  %v12753_v6 = vmax.f32 %v3117_v32, 0.0  ;;  %v12755_v53 = vmax.f32 %v3119_v2, 0.0  ;;  %v19249_v2 = vld [vmem:[#allocation92_spill] sm:$0xff] }
 0x669   : > { %19234 = vst [vmem:[#allocation189_spill] sm:$0xff] %v12724_v17  ;;  %v12728_v12 = vmax.f32 %v3107_v62, 0.0  ;;  %v12730_v40 = vmax.f32 %v3109_v41, 0.0  ;;  %7855 = vmatprep.mubr.bf16.mxu1 %v10181_v26  ;;  %v12745_v26 = vmax.f32 %v3091_v15, 0.0  ;;  %v3127_v4 = vadd.f32 %v19239_v30, %v2071_v31 }
 0x66a   : > { %5949 = vmax.xlane.f32.xlu0 %v5127_v7  ;;  %v12736_v55 = vpop.f32.mrf.mxu0  ;;  %v3129_v62 = vadd.f32 %v19240_v23, %v2071_v31  ;;  %v12751_v41 = vmax.f32 %v3093_v38, 0.0  ;;  %19242 = vst [vmem:[#allocation88_spill] sm:$0xff] %v12753_v6  ;;  %19243 = vst [vmem:[#allocation194_spill] sm:$0xff] %v12755_v53  ;;  %v12761_v17 = vmax.f32 %v3097_v1, 0.0  ;;  %v12763_v30 = vmax.f32 %v3099_v20, 0.0  ;;  %v19248_v38 = vld [vmem:[#allocation91_spill] sm:$0xff] }
 0x66b   : > { %19235 = vst [vmem:[#allocation190_spill] sm:$0xff] %v12728_v12  ;;  %19236 = vst [vmem:[#allocation191_spill] sm:$0xff] %v12730_v40  ;;  %v2066_v46 = vpop.permute.xlu1 %2065  ;;  %v5132_v15 = vmax.f32 %v12728_v12, %v12730_v40  ;;  %v3137_v32 = vadd.f32 %v19248_v38, %v12629_v28  ;;  %v3139_v23 = vadd.f32 %v19249_v2, %v12629_v28  ;;  %v12771_v59 = vmax.f32 %v3127_v4, 0.0  ;;  %v19252_v12 = vld [vmem:[#allocation83_spill] sm:$0xff] }
 0x66c   : > { %19237 = vst [vmem:[#allocation192_spill] sm:$0xff] %v12736_v55  ;;  %19238 = vst [vmem:[#allocation193_spill] sm:$0xff] %v12745_v26  ;;  %v12757_v7 = vpop.f32.mrf.mxu0  ;;  %v10189_v55 = vcombine.high %v6167_v49, %v6171_v37  ;;  %v19255_v28 = vld [vmem:[#allocation95_spill] sm:$0xff] }
 0x66d   : > { %19241 = vst [vmem:[#allocation87_spill] sm:$0xff] %v12751_v41  ;;  %19244 = vst [vmem:[#allocation195_spill] sm:$0xff] %v12757_v7  ;;  %5959 = vmax.xlane.f32.xlu1 %v5132_v15  ;;  %v12773_v7 = vmax.f32 %v3129_v62, 0.0  ;;  %v5129_v15 = vmax.f32 %v12745_v26, %v12751_v41  ;;  %v3147_v4 = vadd.f32 %v19255_v28, %v12601_v45  ;;  %v12797_v2 = vmax.f32 %v3137_v32, 0.0  ;;  %v19260_v28 = vld [vmem:[#allocation85_spill] sm:$0xff] }
 0x66e   : > { %19245 = vst [vmem:[#allocation196_spill] sm:$0xff] %v12761_v17  ;;  %19246 = vst [vmem:[#allocation197_spill] sm:$0xff] %v12763_v30  ;;  %5951 = vmax.xlane.f32.xlu0 %v5128_v33  ;;  %v12765_v31 = vpop.f32.mrf.mxu0  ;;  %v5134_v33 = vmax.f32 %v12753_v6, %v12755_v53 }
 0x66f   : > { %19247 = vst [vmem:[#allocation198_spill] sm:$0xff] %v12765_v31  ;;  %19250 = vst [vmem:[#allocation91_spill] sm:$0xff] %v12771_v59  ;;  %v2056_v40 = vpop.permute.xlu1 %2055 }
 0x670   : > { %19251 = vst [vmem:[#allocation92_spill] sm:$0xff] %v12773_v7  ;;  %v3111_v1 = vadd.f32 %v19252_v12, %v2056_v40  ;;  %v3113_v20 = vadd.f32 %v19253_v58, %v2056_v40  ;;  %v12777_v22 = vpop.f32.mrf.mxu0  ;;  %7856 = vmatmul.mubr.bf16.gmra.mxu1 %v10180_v51  ;;  %v5130_v58 = vmax.f32 %v12761_v17, %v12763_v30  ;;  %v6175_v40 = vld [vmem:[%s18428_s11 + $0x1c0] sm:$0xff]  ;;  %19258 = vst [vmem:[#allocation95_spill] sm:$0xff] %v12797_v2 }
 0x671   : > { %19254 = vst [vmem:[#allocation83_spill] sm:$0xff] %v12777_v22  ;;  %7863 = vmatprep.mubr.bf16.mxu1 %v10189_v55  ;;  %5963 = vmax.xlane.f32.xlu1 %v5134_v33  ;;  %v10188_v12 = vcombine.low %v6167_v49, %v6171_v37  ;;  %v6179_v51 = vld [vmem:[%s18428_s11 + $0x1e0] sm:$0xff]  ;;  %v19257_v55 = vld [vmem:[#allocation96_spill] sm:$0xff]  ;;  %v12799_v33 = vmax.f32 %v3139_v23, 0.0  ;;  %v3121_v49 = vadd.f32 %v19260_v28, %v2066_v46  ;;  %v12817_v28 = vmax.f32 %v3147_v4, 0.0 }
 0x672   : > { %5953 = vmax.xlane.f32.xlu0 %v5129_v15  ;;  %v12785_v62 = vpop.f32.mrf.mxu0  ;;  %v3149_v38 = vadd.f32 %v19257_v55, %v12601_v45  ;;  %v5136_v15 = vmax.f32 %v12771_v59, %v12773_v7  ;;  %v19261_v37 = vld [vmem:[#allocation86_spill] sm:$0xff]  ;;  %v12807_v22 = vmax.f32 %v3113_v20, 0.0  ;;  %v10197_v6 = vcombine.high %v6175_v40, %v6179_v51  ;;  %v19265_v45 = vld [vmem:[#allocation99_spill] sm:$0xff]  ;;  %v19266_v23 = vld [vmem:[#allocation100_spill] sm:$0xff] }
 0x673   : > { %19256 = vst [vmem:[#allocation84_spill] sm:$0xff] %v12785_v62  ;;  %19259 = vst [vmem:[#allocation96_spill] sm:$0xff] %v12799_v33  ;;  %v3123_v31 = vadd.f32 %v19261_v37, %v2066_v46  ;;  %v12805_v62 = vmax.f32 %v3111_v1, 0.0  ;;  %v3157_v32 = vadd.f32 %v19265_v45, %v12563_v39  ;;  %v3159_v55 = vadd.f32 %v19266_v23, %v12563_v39  ;;  %v19270_v1 = vld [vmem:[#allocation89_spill] sm:$0xff]  ;;  %v19276_v23 = vld [vmem:[#allocation104_spill] sm:$0xff] }
 0x674   : > { %19263 = vst [vmem:[#allocation86_spill] sm:$0xff] %v12807_v22  ;;  %v12809_v53 = vpop.f32.mrf.mxu0  ;;  %19268 = vst [vmem:[#allocation100_spill] sm:$0xff] %v12817_v28  ;;  %v12819_v46 = vmax.f32 %v3149_v38, 0.0  ;;  %v3131_v20 = vadd.f32 %v19270_v1, %v12718_v48  ;;  %v5138_v37 = vmax.f32 %v12797_v2, %v12799_v33  ;;  %v12827_v59 = vmax.f32 %v3121_v49, 0.0  ;;  %v19275_v38 = vld [vmem:[#allocation103_spill] sm:$0xff]  ;;  %v19324_v2 = vld [vmem:[#allocation40_spill] sm:$0xff] }
 0x675   : > { %19262 = vst [vmem:[#allocation85_spill] sm:$0xff] %v12805_v62  ;;  %19264 = vst [vmem:[#allocation199_spill] sm:$0xff] %v12809_v53  ;;  %5967 = vmax.xlane.f32.xlu1 %v5136_v15  ;;  %v19271_v53 = vld [vmem:[#allocation90_spill] sm:$0xff]  ;;  %v12829_v39 = vmax.f32 %v3123_v31, 0.0  ;;  %v5133_v4 = vmax.f32 %v12805_v62, %v12807_v22  ;;  %v3167_v15 = vadd.f32 %v19275_v38, %v12536_v19  ;;  %v12849_v49 = vmax.f32 %v3159_v55, 0.0  ;;  %v19280_v38 = vld [vmem:[#allocation93_spill] sm:$0xff] }
 0x676   : > { %5955 = vmax.xlane.f32.xlu0 %v5130_v58  ;;  %v12815_v7 = vpop.f32.mrf.mxu0  ;;  %19269 = vst [vmem:[#allocation200_spill] sm:$0xff] %v12819_v46  ;;  %v3133_v45 = vadd.f32 %v19271_v53, %v12718_v48  ;;  %19272 = vst [vmem:[#allocation89_spill] sm:$0xff] %v12827_v59  ;;  %v3169_v1 = vadd.f32 %v19276_v23, %v12536_v19  ;;  %v10196_v53 = vcombine.low %v6175_v40, %v6179_v51  ;;  %v6183_v31 = vld [vmem:[%s18428_s11 + $0x200] sm:$0xff] }
 0x677   : > { %19267 = vst [vmem:[#allocation99_spill] sm:$0xff] %v12815_v7  ;;  %19273 = vst [vmem:[#allocation90_spill] sm:$0xff] %v12829_v39  ;;  %v3141_v19 = vadd.f32 %v19280_v38, %v12695_v10  ;;  %v19281_v40 = vld [vmem:[#allocation94_spill] sm:$0xff]  ;;  %v19286_v38 = vld [vmem:[#allocation108_spill] sm:$0xff] }
 0x678   : > { %v12831_v58 = vpop.f32.mrf.mxu0  ;;  %7864 = vmatmul.mubr.bf16.gmra.mxu1 %v10188_v12  ;;  %v6187_v12 = vld [vmem:[%s18428_s11 + $0x220] sm:$0xff]  ;;  %19279 = vst [vmem:[#allocation202_spill] sm:$0xff] %v12849_v49  ;;  %v3143_v51 = vadd.f32 %v19281_v40, %v12695_v10  ;;  %v12859_v23 = vmax.f32 %v3133_v45, 0.0  ;;  %v3179_v22 = vadd.f32 %v19286_v38, %v12509_v18  ;;  %v12871_v10 = vmax.f32 %v3167_v15, 0.0  ;;  %v19290_v45 = vld [vmem:[#allocation97_spill] sm:$0xff] }
 0x679   : > { %19274 = vst [vmem:[#allocation201_spill] sm:$0xff] %v12831_v58  ;;  %7871 = vmatprep.mubr.bf16.mxu1 %v10197_v6  ;;  %5971 = vmax.xlane.f32.xlu1 %v5138_v37  ;;  %v12847_v6 = vmax.f32 %v3157_v32, 0.0  ;;  %v5140_v37 = vmax.f32 %v12817_v28, %v12819_v46  ;;  %v5135_v32 = vmax.f32 %v12827_v59, %v12829_v39  ;;  %v19291_v39 = vld [vmem:[#allocation98_spill] sm:$0xff]  ;;  %v12881_v59 = vmax.f32 %v3141_v19, 0.0 }
 0x67a   : > { %5961 = vmax.xlane.f32.xlu0 %v5133_v4  ;;  %v12839_v48 = vpop.f32.mrf.mxu0  ;;  %v12857_v4 = vmax.f32 %v3131_v20, 0.0  ;;  %19283 = vst [vmem:[#allocation94_spill] sm:$0xff] %v12859_v23  ;;  %v10205_v55 = vcombine.high %v6183_v31, %v6187_v12  ;;  %19288 = vst [vmem:[#allocation108_spill] sm:$0xff] %v12871_v10  ;;  %v12873_v20 = vmax.f32 %v3169_v1, 0.0  ;;  %v3151_v40 = vadd.f32 %v19290_v45, %v12667_v57 }
 0x67b   : > { %19277 = vst [vmem:[#allocation103_spill] sm:$0xff] %v12839_v48  ;;  %19278 = vst [vmem:[#allocation104_spill] sm:$0xff] %v12847_v6  ;;  %v19285_v48 = vld [vmem:[#allocation107_spill] sm:$0xff] }
 0x67c   : > { %19282 = vst [vmem:[#allocation93_spill] sm:$0xff] %v12857_v4  ;;  %v12861_v7 = vpop.f32.mrf.mxu0  ;;  %v3177_v58 = vadd.f32 %v19285_v48, %v12509_v18  ;;  %19289 = vst [vmem:[#allocation204_spill] sm:$0xff] %v12873_v20  ;;  %v3153_v48 = vadd.f32 %v19291_v39, %v12667_v57  ;;  %v12883_v18 = vmax.f32 %v3143_v51, 0.0  ;;  %v5137_v15 = vmax.f32 %v12857_v4, %v12859_v23  ;;  %v6191_v57 = vld [vmem:[%s18428_s11 + $0x240] sm:$0xff] }
 0x67d   : > { %19284 = vst [vmem:[#allocation203_spill] sm:$0xff] %v12861_v7  ;;  %5975 = vmax.xlane.f32.xlu1 %v5140_v37  ;;  %v5142_v7 = vmax.f32 %v12847_v6, %v12849_v49  ;;  %19292 = vst [vmem:[#allocation97_spill] sm:$0xff] %v12881_v59  ;;  %v6195_v39 = vld [vmem:[%s18428_s11 + $0x260] sm:$0xff]  ;;  %v12899_v51 = vmax.f32 %v3179_v22, 0.0  ;;  %v12907_v38 = vmax.f32 %v3151_v40, 0.0 }
 0x67e   : > { %5965 = vmax.xlane.f32.xlu0 %v5135_v32  ;;  %v12869_v62 = vpop.f32.mrf.mxu0  ;;  %19293 = vst [vmem:[#allocation98_spill] sm:$0xff] %v12883_v18  ;;  %v10204_v32 = vcombine.low %v6183_v31, %v6187_v12  ;;  %v12897_v19 = vmax.f32 %v3177_v58, 0.0  ;;  %v19299_v31 = vld [vmem:[#allocation102_spill] sm:$0xff]  ;;  %v12909_v45 = vmax.f32 %v3153_v48, 0.0  ;;  %v5139_v58 = vmax.f32 %v12881_v59, %v12883_v18  ;;  %v19317_v23 = vld [vmem:[#allocation47_spill] sm:$0xff] }
 0x67f   : > { %19287 = vst [vmem:[#allocation107_spill] sm:$0xff] %v12869_v62  ;;  %19297 = vst [vmem:[#allocation208_spill] sm:$0xff] %v12899_v51  ;;  %v3163_v12 = vadd.f32 %v19299_v31, %v12645_v9  ;;  %v10213_v22 = vcombine.high %v6191_v57, %v6195_v39 }
 0x680   : > { %v12885_v37 = vpop.f32.mrf.mxu0  ;;  %7872 = vmatmul.mubr.bf16.gmra.mxu1 %v10196_v53  ;;  %19296 = vst [vmem:[#allocation207_spill] sm:$0xff] %v12897_v19  ;;  %v19298_v53 = vld [vmem:[#allocation101_spill] sm:$0xff]  ;;  %19301 = vst [vmem:[#allocation102_spill] sm:$0xff] %v12909_v45 }
 0x681   : > { %19294 = vst [vmem:[#allocation205_spill] sm:$0xff] %v12885_v37  ;;  %7879 = vmatprep.mubr.bf16.mxu1 %v10205_v55  ;;  %5979 = vmax.xlane.f32.xlu1 %v5142_v7  ;;  %v3161_v55 = vadd.f32 %v19298_v53, %v12645_v9  ;;  %v5144_v7 = vmax.f32 %v12871_v10, %v12873_v20  ;;  %19300 = vst [vmem:[#allocation101_spill] sm:$0xff] %v12907_v38  ;;  %v19303_v53 = vld [vmem:[#allocation105_spill] sm:$0xff]  ;;  %v19304_v9 = vld [vmem:[#allocation106_spill] sm:$0xff]  ;;  %v12923_v48 = vmax.f32 %v3163_v12, 0.0 }
 0x682   : > { %5969 = vmax.xlane.f32.xlu0 %v5137_v15  ;;  %v12889_v1 = vpop.f32.mrf.mxu0  ;;  %v3171_v62 = vadd.f32 %v19303_v53, %v12609_v16  ;;  %v3173_v40 = vadd.f32 %v19304_v9, %v12609_v16  ;;  %v5141_v37 = vmax.f32 %v12907_v38, %v12909_v45  ;;  %v6203_v16 = vld [vmem:[%s18428_s11 + $0x2a0] sm:$0xff]  ;;  %v19312_v9 = vld [vmem:[#allocation48_spill] sm:$0xff] }
 0x683   : > { %19295 = vst [vmem:[#allocation206_spill] sm:$0xff] %v12889_v1  ;;  %v5146_v1 = vmax.f32 %v12897_v19, %v12899_v51  ;;  %v12921_v31 = vmax.f32 %v3161_v55, 0.0  ;;  %19306 = vst [vmem:[#allocation106_spill] sm:$0xff] %v12923_v48  ;;  %v19322_v45 = vld [vmem:[#allocation42_spill] sm:$0xff] }
 0x684   : > { %v12911_v15 = vpop.f32.mrf.mxu0  ;;  %v12935_v55 = vmax.f32 %v3171_v62, 0.0  ;;  %v12937_v12 = vmax.f32 %v3173_v40, 0.0  ;;  %v19313_v62 = vld [vmem:[#allocation50_spill] sm:$0xff] }
 0x685   : > { %19302 = vst [vmem:[#allocation209_spill] sm:$0xff] %v12911_v15  ;;  %5983 = vmax.xlane.f32.xlu1 %v5144_v7  ;;  %19305 = vst [vmem:[#allocation105_spill] sm:$0xff] %v12921_v31  ;;  %v6199_v7 = vld [vmem:[%s18428_s11 + $0x280] sm:$0xff] }
 0x686   : > { %5973 = vmax.xlane.f32.xlu0 %v5139_v58  ;;  %v12925_v15 = vpop.f32.mrf.mxu0  ;;  %19308 = vst [vmem:[#allocation211_spill] sm:$0xff] %v12935_v55  ;;  %19309 = vst [vmem:[#allocation212_spill] sm:$0xff] %v12937_v12  ;;  %v5145_v53 = vmax.f32 %v12935_v55, %v12937_v12  ;;  %v6207_v40 = vld [vmem:[%s18428_s11 + $0x2c0] sm:$0xff]  ;;  %v19325_v55 = vld [vmem:[#allocation37_spill] sm:$0xff] }
 0x687   : > { %19307 = vst [vmem:[#allocation210_spill] sm:$0xff] %v12925_v15  ;;  %v3762_v15 = vmax.f32 %v19313_v62, %v19312_v9  ;;  %v10220_v9 = vcombine.low %v6199_v7, %v6203_v16  ;;  %v19321_v62 = vld [vmem:[#allocation45_spill] sm:$0xff] }
 0x688   : > { %7880 = vmatmul.mubr.bf16.gmra.mxu1 %v10204_v32  ;;  %v12939_v58 = vpop.f32.mrf.mxu0  ;;  %v5143_v32 = vmax.f32 %v12921_v31, %v12923_v48  ;;  %v19323_v31 = vld [vmem:[#allocation39_spill] sm:$0xff] }
 0x689   : > { %7887 = vmatprep.mubr.bf16.mxu1 %v10213_v22  ;;  %5987 = vmax.xlane.f32.xlu1 %v5146_v1  ;;  %19310 = vst [vmem:[#allocation213_spill] sm:$0xff] %v12939_v58  ;;  %v10212_v22 = vcombine.low %v6191_v57, %v6195_v39  ;;  %v10221_v1 = vcombine.high %v6199_v7, %v6203_v16  ;;  %v6211_v57 = vld [vmem:[%s18428_s11 + $0x2e0] sm:$0xff]  ;;  %v1789_v7 = vld [vmem:[%s18427_s10 + $0x368] sm:$0xff]  ;;  %v19330_v16 = vld [vmem:[#allocation33_spill] sm:$0xff] }
 0x68a   : > { %5977 = vmax.xlane.f32.xlu0 %v5141_v37  ;;  %v12943_v37 = vpop.f32.mrf.mxu0  ;;  %v19314_v39 = vld [vmem:[#allocation46_spill] sm:$0xff]  ;;  %v19316_v58 = vld [vmem:[#allocation43_spill] sm:$0xff]  ;;  %v10229_v48 = vcombine.high %v6207_v40, %v6211_v57 }
 0x68b   : > { %19311 = vst [vmem:[#allocation214_spill] sm:$0xff] %v12943_v37  ;;  %v3761_v4 = vmax.f32 %v19317_v23, %v19316_v58  ;;  %v19327_v58 = vld [vmem:[#allocation35_spill] sm:$0xff] }
 0x68c   : > { %v12960_v18 = vpop.f32.mrf.mxu0 }
 0x68d   : > { %19319 = vst [vmem:[#allocation215_spill] sm:$0xff] %v12960_v18  ;;  %v3763_v33 = vmax.f32 %v3761_v4, %v19323_v31  ;;  %v19331_v4 = vld [vmem:[#allocation34_spill] sm:$0xff] }
 0x68e   : > { %5981 = vmax.xlane.f32.xlu0 %v5143_v32  ;;  %v19315_v32 = vld [vmem:[#allocation49_spill] sm:$0xff]  ;;  %v12971_v18 = vpop.f32.mrf.mxu0 }
 0x68f   : > { %v3895_v37 = vmax.f32 %v19315_v32, %v19314_v39  ;;  %v19326_v32 = vld [vmem:[#allocation38_spill] sm:$0xff]  ;;  %v3765_v23 = vmax.f32 %v3763_v33, %v19327_v58  ;;  %19329 = vst [vmem:[#allocation216_spill] sm:$0xff] %v12971_v18  ;;  %v19346_v18 = vld [vmem:[#allocation75_spill] sm:$0xff] }
 0x690   : > { %7888 = vmatmul.mubr.bf16.gmra.mxu1 %v10212_v22  ;;  %v19318_v22 = vld [vmem:[#allocation44_spill] sm:$0xff]  ;;  %v6215_v33 = vld [vmem:[%s18428_s11 + $0x300] sm:$0xff] }
 0x691   : > { %7895 = vmatprep.mubr.bf16.mxu1 %v10221_v1  ;;  %v3764_v1 = vmax.f32 %v3762_v15, %v19318_v22  ;;  %v3897_v38 = vmax.f32 %v3895_v37, %v19322_v45  ;;  %v19328_v15 = vld [vmem:[#allocation36_spill] sm:$0xff]  ;;  %v19340_v58 = vld [vmem:[#allocation26_spill] sm:$0xff] }
 0x692   : > { %5985 = vmax.xlane.f32.xlu0 %v5145_v53  ;;  %v19320_v53 = vld [vmem:[#allocation41_spill] sm:$0xff] }
 0x693   : > { %v3894_v59 = vmax.f32 %v19321_v62, %v19320_v53  ;;  %v3766_v12 = vmax.f32 %v3764_v1, %v19324_v2  ;;  %v3899_v46 = vmax.f32 %v3897_v38, %v19326_v32  ;;  %v19332_v1 = vld [vmem:[#allocation31_spill] sm:$0xff]  ;;  %v19333_v62 = vld [vmem:[#allocation32_spill] sm:$0xff] }
 0x695   : > { %v3896_v39 = vmax.f32 %v3894_v59, %v19325_v55  ;;  %v3768_v22 = vmax.f32 %v3766_v12, %v19328_v15  ;;  %v3901_v53 = vmax.f32 %v3899_v46, %v19331_v4  ;;  %v3767_v59 = vmax.f32 %v3765_v23, %v19332_v1  ;;  %v6219_v12 = vld [vmem:[%s18428_s11 + $0x320] sm:$0xff]  ;;  %v19334_v15 = vld [vmem:[#allocation29_spill] sm:$0xff]  ;;  %v12990_v23 = vpop.f32.mrf.mxu0 }
 0x696   : > { %19338 = vst [vmem:[#allocation217_spill] sm:$0xff] %v12990_v23  ;;  %v19339_v1 = vld [vmem:[#allocation25_spill] sm:$0xff]  ;;  %v10237_v55 = vcombine.high %v6215_v33, %v6219_v12 }
 0x697   : > { %v3898_v37 = vmax.f32 %v3896_v39, %v19330_v16  ;;  %v3770_v38 = vmax.f32 %v3768_v22, %v19333_v62  ;;  %v19336_v39 = vld [vmem:[#allocation27_spill] sm:$0xff]  ;;  %v1755_v22 = vld [vmem:[%s18427_s10 + $0x258] sm:$0xff]  ;;  %v10228_v62 = vcombine.low %v6207_v40, %v6211_v57  ;;  %v13003_v28 = vpop.f32.mrf.mxu0  ;;  %v19348_v40 = vld [vmem:[#allocation20_spill] sm:$0xff] }
 0x698   : > { %7896 = vmatmul.mubr.bf16.gmra.mxu1 %v10220_v9  ;;  %v19335_v9 = vld [vmem:[#allocation30_spill] sm:$0xff]  ;;  %v3769_v46 = vmax.f32 %v3767_v59, %v19336_v39  ;;  %v19344_v39 = vld [vmem:[#allocation24_spill] sm:$0xff]  ;;  %19347 = vst [vmem:[#allocation218_spill] sm:$0xff] %v13003_v28 }
 0x699   : > { %7903 = vmatprep.mubr.bf16.mxu1 %v10229_v48  ;;  %v3900_v32 = vmax.f32 %v3898_v37, %v19334_v15  ;;  %v3903_v2 = vmax.f32 %v3901_v53, %v19335_v9  ;;  %v19337_v48 = vld [vmem:[#allocation28_spill] sm:$0xff]  ;;  %v19341_v37 = vld [vmem:[#allocation22_spill] sm:$0xff]  ;;  %v19342_v53 = vld [vmem:[#allocation23_spill] sm:$0xff] }
 0x69a   : > { %2355 = vperm.xlu1 %10809, %v1789_v7   ;;  %v3772_v4 = vmax.f32 %v3770_v38, %v19337_v48  ;;  %v3771_v15 = vmax.f32 %v3769_v46, %v19341_v37  ;;  %v19343_v9 = vld [vmem:[#allocation21_spill] sm:$0xff]  ;;  %v19345_v48 = vld [vmem:[#allocation19_spill] sm:$0xff]  ;;  %v19363_v37 = vld [vmem:[#allocation72_spill] sm:$0xff] }
 0x69b   : > { %v3902_v16 = vmax.f32 %v3900_v32, %v19339_v1  ;;  %v3905_v45 = vmax.f32 %v3903_v2, %v19340_v58  ;;  %v1787_v2 = vld [vmem:[%s18427_s10 + $0x358] sm:$0xff] }
 0x69c   : > { %v3774_v7 = vmax.f32 %v3772_v4, %v19342_v53  ;;  %v3773_v31 = vmax.f32 %v3771_v15, %v19345_v48  ;;  %v19349_v32 = vld [vmem:[#allocation73_spill] sm:$0xff]  ;;  %v6223_v15 = vld [vmem:[%s18428_s11 + $0x340] sm:$0xff] }
 0x69d   : > { %v3904_v59 = vmax.f32 %v3902_v16, %v19343_v9  ;;  %v3907_v38 = vmax.f32 %v3905_v45, %v19344_v39  ;;  %v19350_v16 = vld [vmem:[#allocation82_spill] sm:$0xff]  ;;  %v19351_v45 = vld [vmem:[#allocation71_spill] sm:$0xff]  ;;  %v19358_v48 = vld [vmem:[#allocation65_spill] sm:$0xff] }
 0x69e   : > { %2185 = vperm.xlu1 %10809, %v1755_v22   ;;  %v3776_v23 = vmax.f32 %v3774_v7, %v19346_v18  ;;  %v3775_v46 = vmax.f32 %v3773_v31, %v19350_v16  ;;  %v6227_v7 = vld [vmem:[%s18428_s11 + $0x360] sm:$0xff]  ;;  %v19352_v18 = vld [vmem:[#allocation81_spill] sm:$0xff]  ;;  %v13022_v31 = vpop.f32.mrf.mxu0 }
 0x69f   : > { %v3906_v57 = vmax.f32 %v3904_v59, %v19348_v40  ;;  %v3909_v4 = vmax.f32 %v3907_v38, %v19349_v32  ;;  %v19354_v59 = vld [vmem:[#allocation79_spill] sm:$0xff]  ;;  %19356 = vst [vmem:[#allocation219_spill] sm:$0xff] %v13022_v31  ;;  %v19357_v16 = vld [vmem:[#allocation77_spill] sm:$0xff] }
 0x6a0   : > { %7904 = vmatmul.mubr.bf16.gmra.mxu1 %v10228_v62  ;;  %v3778_v22 = vmax.f32 %v3776_v23, %v19351_v45  ;;  %v19353_v62 = vld [vmem:[#allocation69_spill] sm:$0xff]  ;;  %v3777_v38 = vmax.f32 %v3775_v46, %v19354_v59  ;;  %v1753_v23 = vld [vmem:[%s18427_s10 + $0x248] sm:$0xff]  ;;  %v10236_v45 = vcombine.low %v6215_v33, %v6219_v12  ;;  %v1744_v31 = vld [vmem:[%s18427_s10 + $0x200] sm:$0xff] }
 0x6a1   : > { %7911 = vmatprep.mubr.bf16.mxu1 %v10237_v55  ;;  %v3908_v39 = vmax.f32 %v3906_v57, %v19352_v18  ;;  %v3911_v53 = vmax.f32 %v3909_v4, %v19353_v62  ;;  %v19355_v55 = vld [vmem:[#allocation67_spill] sm:$0xff]  ;;  %v1754_v57 = vld [vmem:[%s18427_s10 + $0x250] sm:$0xff] }
 0x6a2   : > { %2345 = vperm.xlu1 %10809, %v1787_v2   ;;  %v3780_v32 = vmax.f32 %v3778_v22, %v19355_v55  ;;  %v10245_v2 = vcombine.high %v6223_v15, %v6227_v7  ;;  %v19359_v4 = vld [vmem:[#allocation76_spill] sm:$0xff]  ;;  %v19360_v62 = vld [vmem:[#allocation63_spill] sm:$0xff]  ;;  %v19361_v55 = vld [vmem:[#allocation74_spill] sm:$0xff] }
 0x6a3   : > { %v3910_v40 = vmax.f32 %v3908_v39, %v19357_v16  ;;  %v3913_v58 = vmax.f32 %v3911_v53, %v19358_v48  ;;  %v3779_v46 = vmax.f32 %v3777_v38, %v19359_v4  ;;  %v19362_v18 = vld [vmem:[#allocation61_spill] sm:$0xff]  ;;  %v19364_v12 = vld [vmem:[#allocation59_spill] sm:$0xff]  ;;  %v13038_v16 = vpop.f32.mrf.mxu0  ;;  %v19366_v38 = vld [vmem:[#allocation70_spill] sm:$0xff] }
 0x6a4   : > { %v3782_v22 = vmax.f32 %v3780_v32, %v19360_v62  ;;  %19365 = vst [vmem:[#allocation220_spill] sm:$0xff] %v13038_v16  ;;  %v1785_v53 = vld [vmem:[%s18427_s10 + $0x348] sm:$0xff]  ;;  %v19367_v32 = vld [vmem:[#allocation57_spill] sm:$0xff] }
 0x6a5   : > { %v3912_v59 = vmax.f32 %v3910_v40, %v19361_v55  ;;  %v3915_v9 = vmax.f32 %v3913_v58, %v19362_v18  ;;  %v3781_v33 = vmax.f32 %v3779_v46, %v19363_v37  ;;  %v1786_v58 = vld [vmem:[%s18427_s10 + $0x350] sm:$0xff]  ;;  %v19369_v46 = vld [vmem:[#allocation54_spill] sm:$0xff]  ;;  %v19380_v16 = vld [vmem:[#allocation55_spill] sm:$0xff] }
 0x6a6   : > { %2175 = vperm.xlu1 %10809, %v1753_v23   ;;  %v3784_v39 = vmax.f32 %v3782_v22, %v19364_v12  ;;  %v19368_v40 = vld [vmem:[#allocation68_spill] sm:$0xff] }
 0x6a7   : > { %v3914_v48 = vmax.f32 %v3912_v59, %v19366_v38  ;;  %v3917_v62 = vmax.f32 %v3915_v9, %v19367_v32  ;;  %v3783_v23 = vmax.f32 %v3781_v33, %v19368_v40  ;;  %v19370_v59 = vld [vmem:[#allocation66_spill] sm:$0xff]  ;;  %v19371_v9 = vld [vmem:[#allocation53_spill] sm:$0xff]  ;;  %v19372_v18 = vld [vmem:[#allocation64_spill] sm:$0xff]  ;;  %v13060_v33 = vpop.f32.mrf.mxu0 }
 0x6a8   : > { %2180 = vperm.xlu0 %10808, %v1754_v57   ;;  %7912 = vmatmul.mubr.bf16.gmra.mxu1 %v10236_v45  ;;  %v3786_v22 = vmax.f32 %v3784_v39, %v19369_v46  ;;  %v6231_v57 = vld [vmem:[%s18428_s11 + $0x380] sm:$0xff]  ;;  %v1751_v39 = vld [vmem:[%s18427_s10 + $0x238] sm:$0xff]  ;;  %v10244_v46 = vcombine.low %v6223_v15, %v6227_v7  ;;  %v19375_v4 = vld [vmem:[#allocation52_spill] sm:$0xff] }
 0x6a9   : > { %7919 = vmatprep.mubr.bf16.mxu1 %v10245_v2  ;;  %v6235_v45 = vld [vmem:[%s18428_s11 + $0x3a0] sm:$0xff]  ;;  %v3916_v12 = vmax.f32 %v3914_v48, %v19370_v59  ;;  %v3919_v32 = vmax.f32 %v3917_v62, %v19371_v9  ;;  %v3785_v38 = vmax.f32 %v3783_v23, %v19372_v18  ;;  %v13075_v7 = vpop.f32.mrf.mxu0 }
 0x6aa   : > { %2335 = vperm.xlu1 %10809, %v1785_v53   ;;  %v19373_v2 = vld [vmem:[#allocation51_spill] sm:$0xff]  ;;  %v19374_v40 = vld [vmem:[#allocation62_spill] sm:$0xff]  ;;  %v10253_v62 = vcombine.high %v6231_v57, %v6235_v45  ;;  %v19376_v53 = vld [vmem:[#allocation60_spill] sm:$0xff] }
 0x6ab   : > { %v3788_v37 = vmax.f32 %v3786_v22, %v19373_v2  ;;  %v3918_v55 = vmax.f32 %v3916_v12, %v19374_v40  ;;  %v3921_v1 = vmax.f32 %v3919_v32, %v19375_v4  ;;  %v1752_v48 = vld [vmem:[%s18427_s10 + $0x240] sm:$0xff]  ;;  %v3787_v23 = vmax.f32 %v3785_v38, %v19376_v53  ;;  %v19377_v22 = vld [vmem:[#allocation80_spill] sm:$0xff]  ;;  %v1783_v12 = vld [vmem:[%s18427_s10 + $0x338] sm:$0xff] }
 0x6ac   : > { %2340 = vperm.xlu0 %10808, %v1786_v58   ;;  %v19378_v9 = vld [vmem:[#allocation58_spill] sm:$0xff]  ;;  %v19381_v32 = vld [vmem:[#allocation56_spill] sm:$0xff] }
 0x6ad   : > { %v3790_v2 = vmax.f32 %v3788_v37, %v19377_v22  ;;  %v3920_v58 = vmax.f32 %v3918_v55, %v19378_v9  ;;  %v19379_v18 = vld [vmem:[#allocation78_spill] sm:$0xff]  ;;  %v3789_v15 = vmax.f32 %v3787_v23, %v19380_v16  ;;  %v1746_v16 = vld [vmem:[%s18427_s10 + $0x210] sm:$0xff] }
 0x6ae   : > { %v3923_v59 = vmax.f32 %v3921_v1, %v19379_v18  ;;  %2165 = vperm.xlu1 %10809, %v1751_v39   ;;  %v1784_v37 = vld [vmem:[%s18427_s10 + $0x340] sm:$0xff] }
 0x6af   : > { %v3922_v4 = vmax.f32 %v3920_v58, %v19381_v32  ;;  %v3791_v55 = vmax.f32 %v3789_v15, %v3790_v2  ;;  %v6239_v1 = vld [vmem:[%s18428_s11 + $0x3c0] sm:$0xff]  ;;  %v10252_v2 = vcombine.low %v6231_v57, %v6235_v45  ;;  %v1750_v58 = vld [vmem:[%s18427_s10 + $0x230] sm:$0xff] }
 0x6b0   : > { %2170 = vperm.xlu0 %10808, %v1752_v48   ;;  %7920 = vmatmul.mubr.bf16.gmra.mxu1 %v10244_v46  ;;  %v6243_v38 = vld [vmem:[%s18428_s11 + $0x3e0] sm:$0xff]  ;;  %v13091_v48 = vpop.f32.mrf.mxu0  ;;  %v1782_v45 = vld [vmem:[%s18427_s10 + $0x330] sm:$0xff] }
 0x6b1   : > { %7927 = vmatprep.mubr.bf16.mxu1 %v10253_v62  ;;  %v3924_v39 = vmax.f32 %v3922_v4, %v3923_v59  ;;  %v3793_v46 = vmax.f32 %v3791_v55, %v12661_v21  ;;  %v1749_v62 = vld [vmem:[%s18427_s10 + $0x228] sm:$0xff]  ;;  %v10261_v15 = vcombine.high %v6239_v1, %v6243_v38  ;;  %v6251_v55 = vld [vmem:[%s18428_s11 + $0x420] sm:$0xff] }
 0x6b2   : > { %2325 = vperm.xlu1 %10809, %v1783_v12   ;;  %v13101_v59 = vpop.f32.mrf.mxu0  ;;  %v1781_v12 = vld [vmem:[%s18427_s10 + $0x328] sm:$0xff] }
 0x6b3   : > { %v3926_v23 = vmax.f32 %v3924_v39, %v12663_v54  ;;  %v3795_v4 = vmax.f32 %v3793_v46, %v12761_v17 }
 0x6b4   : > { %2330 = vperm.xlu0 %10808, %v1784_v37   ;;  %v6247_v37 = vld [vmem:[%s18428_s11 + $0x400] sm:$0xff]  ;;  %v13117_v46 = vpop.f32.mrf.mxu0 }
 0x6b5   : > { %v3928_v57 = vmax.f32 %v3926_v23, %v12763_v30  ;;  %v3797_v39 = vmax.f32 %v3795_v4, %v12639_v47  ;;  %v1779_v4 = vld [vmem:[%s18427_s10 + $0x318] sm:$0xff] }
 0x6b6   : > { %2155 = vperm.xlu1 %10809, %v1749_v62   ;;  %v1747_v62 = vld [vmem:[%s18427_s10 + $0x218] sm:$0xff]  ;;  %v13124_v54 = vpop.f32.mrf.mxu0 }
 0x6b7   : > { %v3930_v23 = vmax.f32 %v3928_v57, %v12641_v5 }
 0x6b8   : > { %2160 = vperm.xlu0 %10808, %v1750_v58   ;;  %7928 = vmatmul.mubr.bf16.gmra.mxu1 %v10252_v2  ;;  %v10260_v2 = vcombine.low %v6239_v1, %v6243_v38  ;;  %v10269_v58 = vcombine.high %v6247_v37, %v6251_v55  ;;  %v6255_v1 = vld [vmem:[%s18428_s11 + $0x440] sm:$0xff] }
 0x6b9   : > { %7935 = vmatprep.mubr.bf16.mxu1 %v10261_v15  ;;  %v3792_v15 = vmax.f32 %v12708_v42, %v3797_v39  ;;  %v6259_v38 = vld [vmem:[%s18428_s11 + $0x460] sm:$0xff]  ;;  %v13139_v39 = vpop.f32.mrf.mxu0 }
 0x6ba   : > { %2315 = vperm.xlu1 %10809, %v1781_v12   ;;  %v3925_v12 = vmax.f32 %v12712_v60, %v3930_v23 }
 0x6bb   : > { %v3794_v57 = vmax.f32 %v3792_v15, %v12603_v29  ;;  %v13148_v17 = vpop.f32.mrf.mxu0  ;;  %v1777_v15 = vld [vmem:[%s18427_s10 + $0x308] sm:$0xff] }
 0x6bc   : > { %2320 = vperm.xlu0 %10808, %v1782_v45   ;;  %v13130_v45 = vpop.permute.xlu1 %2200  ;;  %v3927_v23 = vmax.f32 %v3925_v12, %v12605_v27 }
 0x6bd   : > { %v3796_v30 = vmax.f32 %v3794_v57, %v12745_v26  ;;  %v13161_v57 = vpop.f32.mrf.mxu0  ;;  %v13169_v26 = vpop.permute.xlu0 %2205 }
 0x6be   : > { %2145 = vperm.xlu1 %10809, %v1747_v62   ;;  %v1745_v62 = vld [vmem:[%s18427_s10 + $0x208] sm:$0xff] }
 0x6bf   : > { %v3798_v12 = vmax.f32 %v3796_v30, %v12575_v56  ;;  %v1807_v30 = vld [vmem:[%s18427_s10 + $0x3f8] sm:$0xff] }
 0x6c0   : > { %7936 = vmatmul.mubr.bf16.gmra.mxu1 %v10260_v2  ;;  %v10268_v2 = vcombine.low %v6247_v37, %v6251_v55  ;;  %v13145_v21 = vpop.permute.xlu1 %2360  ;;  %v6263_v37 = vld [vmem:[%s18428_s11 + $0x480] sm:$0xff] }
 0x6c1   : > { %7943 = vmatprep.mubr.bf16.mxu1 %v10269_v58  ;;  %v10277_v58 = vcombine.high %v6255_v1, %v6259_v38  ;;  %v6267_v55 = vld [vmem:[%s18428_s11 + $0x4a0] sm:$0xff]  ;;  %v3799_v60 = vmax.f32 %v12697_v13, %v3798_v12  ;;  %v13201_v47 = vpop.permute.xlu0 %2190 }
 0x6c2   : > { %2305 = vperm.xlu1 %10809, %v1779_v4   ;;  %v3929_v4 = vmax.f32 %v3927_v23, %v12751_v41  ;;  %v10285_v41 = vcombine.high %v6263_v37, %v6267_v55  ;;  %v6271_v12 = vld [vmem:[%s18428_s11 + $0x4c0] sm:$0xff] }
 0x6c4   : > { %v3931_v23 = vmax.f32 %v3929_v4, %v12577_v14  ;;  %v19383_v4 = vld [vmem:[#allocation110_spill] sm:$0xff] }
 0x6c5   : > { %v3183_v5 = vadd.f32 %v19383_v4, %v12580_v44 }
 0x6c6   : > { %2135 = vperm.xlu1 %10809, %v1745_v62   ;;  %v1775_v62 = vld [vmem:[%s18427_s10 + $0x2f8] sm:$0xff]  ;;  %v3932_v42 = vmax.f32 %v12699_v8, %v3931_v23 }
 0x6c7   : > { %v13199_v8 = vmax.f32 %v3183_v5, 0.0 }
 0x6c8   : > { %7944 = vmatmul.mubr.bf16.gmra.mxu1 %v10268_v2  ;;  %v10276_v2 = vcombine.low %v6255_v1, %v6259_v38  ;;  %v19382_v1 = vld [vmem:[#allocation109_spill] sm:$0xff] }
 0x6c9   : > { %7951 = vmatprep.mubr.bf16.mxu1 %v10277_v58  ;;  %v13167_v58 = vpop.permute.xlu1 %2365  ;;  %v3181_v38 = vadd.f32 %v19382_v1, %v12580_v44  ;;  %v1773_v44 = vld [vmem:[%s18427_s10 + $0x2e8] sm:$0xff]  ;;  %v3934_v1 = vmax.f32 %v3932_v42, %v12541_v34  ;;  %19385 = vst [vmem:[#allocation110_spill] sm:$0xff] %v13199_v8 }
 0x6ca   : > { %2295 = vperm.xlu1 %10809, %v1777_v15   ;;  %v13172_v15 = vpop.f32.mrf.mxu0 }
 0x6cb   : > { %v13197_v4 = vmax.f32 %v3181_v38, 0.0  ;;  %v3936_v42 = vmax.f32 %v3934_v1, %v12675_v63  ;;  %v6283_v38 = vld [vmem:[%s18428_s11 + $0x520] sm:$0xff] }
 0x6cc   : > { %v13191_v23 = vpop.f32.mrf.mxu0 }
 0x6cd   : > { %v13188_v13 = vpop.permute.xlu1 %2195  ;;  %19384 = vst [vmem:[#allocation109_spill] sm:$0xff] %v13197_v4  ;;  %v5147_v5 = vmax.f32 %v13197_v4, %v13199_v8 }
 0x6ce   : > { %2285 = vperm.xlu1 %10809, %v1775_v62   ;;  %v6275_v62 = vld [vmem:[%s18428_s11 + $0x4e0] sm:$0xff]  ;;  %v13206_v29 = vpop.f32.mrf.mxu0 }
 0x6cf   : > { %v10293_v27 = vcombine.high %v6271_v12, %v6275_v62  ;;  %v10292_v63 = vcombine.low %v6271_v12, %v6275_v62  ;;  %v6287_v12 = vld [vmem:[%s18428_s11 + $0x540] sm:$0xff] }
 0x6d0   : > { %7952 = vmatmul.mubr.bf16.gmra.mxu1 %v10276_v2  ;;  %v3801_v2 = vmax.f32 %v3799_v60, %v12539_v0  ;;  %v13225_v1 = vpop.f32.mrf.mxu0  ;;  %v6291_v62 = vld [vmem:[%s18428_s11 + $0x560] sm:$0xff] }
 0x6d1   : > { %7959 = vmatprep.mubr.bf16.mxu1 %v10285_v41  ;;  %v10284_v41 = vcombine.low %v6263_v37, %v6267_v55  ;;  %v1805_v37 = vld [vmem:[%s18427_s10 + $0x3e8] sm:$0xff]  ;;  %v6279_v55 = vld [vmem:[%s18428_s11 + $0x500] sm:$0xff] }
 0x6d2   : > { %2445 = vperm.xlu1 %10809, %v1807_v30   ;;  %v3803_v60 = vmax.f32 %v3801_v2, %v12673_v11  ;;  %v13220_v2 = vpop.permute.xlu0 %2350  ;;  %v3938_v11 = vmax.f32 %v3936_v42, %v12525_v61  ;;  %v10301_v14 = vcombine.high %v6279_v55, %v6283_v38 }
 0x6d4   : > { %v3940_v0 = vmax.f32 %v3938_v11, %v12653_v3  ;;  %v10300_v11 = vcombine.low %v6279_v55, %v6283_v38  ;;  %v10309_v3 = vcombine.high %v6287_v12, %v6291_v62  ;;  %v6299_v55 = vld [vmem:[%s18428_s11 + $0x5a0] sm:$0xff] }
 0x6d6   : > { %2275 = vperm.xlu1 %10809, %v1773_v44   ;;  %v13203_v30 = vpop.xlane.xlu1 %5927 }
 0x6d8   : > { %7960 = vmatmul.mubr.bf16.gmra.mxu1 %v10284_v41  ;;  %v3805_v41 = vmax.f32 %v3803_v60, %v12523_v36  ;;  %v1803_v60 = vld [vmem:[%s18427_s10 + $0x3d8] sm:$0xff] }
 0x6d9   : > { %7967 = vmatprep.mubr.bf16.mxu1 %v10293_v27  ;;  %v1771_v27 = vld [vmem:[%s18427_s10 + $0x2d8] sm:$0xff] }
 0x6da   : > { %2435 = vperm.xlu1 %10809, %v1805_v37   ;;  %v13222_v44 = vpop.xlane.xlu1 %5931  ;;  %v3807_v37 = vmax.f32 %v3805_v41, %v12651_v43 }
 0x6db   : > { %5989 = vmax.xlane.f32.xlu0 %v5147_v5  ;;  %v13236_v5 = vpop.f32.mrf.mxu0 }
 0x6dd   : > { %v13253_v43 = vpop.f32.mrf.mxu0 }
 0x6de   : > { %2265 = vperm.xlu1 %10809, %v1771_v27   ;;  %v13233_v34 = vpop.xlane.xlu1 %5935  ;;  %v3809_v27 = vmax.f32 %v3807_v37, %v12503_v24  ;;  %v1801_v37 = vld [vmem:[%s18427_s10 + $0x3c8] sm:$0xff] }
 0x6df   : > { %v13231_v56 = vpop.xlane.xlu0 %5929  ;;  %v13264_v18 = vpop.f32.mrf.mxu0 }
 0x6e0   : > { %7968 = vmatmul.mubr.bf16.gmra.mxu1 %v10292_v63  ;;  %v3942_v63 = vmax.f32 %v3940_v0, %v12505_v50  ;;  %v3811_v36 = vmax.f32 %v3809_v27, %v12615_v52  ;;  %v6295_v0 = vld [vmem:[%s18428_s11 + $0x580] sm:$0xff] }
 0x6e1   : > { %7975 = vmatprep.mubr.bf16.mxu1 %v10301_v14  ;;  %v1769_v14 = vld [vmem:[%s18427_s10 + $0x2c8] sm:$0xff]  ;;  %v10317_v52 = vcombine.high %v6295_v0, %v6299_v55 }
 0x6e2   : > { %2425 = vperm.xlu1 %10809, %v1803_v60   ;;  %v13250_v41 = vpop.xlane.xlu1 %5939  ;;  %v3944_v24 = vmax.f32 %v3942_v63, %v12617_v25  ;;  %v3813_v27 = vmax.f32 %v3811_v36, %v12897_v19 }
 0x6e3   : > { %v13248_v42 = vpop.xlane.xlu0 %5933 }
 0x6e4   : > { %v3946_v63 = vmax.f32 %v3944_v24, %v12899_v51  ;;  %v3800_v36 = vmax.f32 %v12585_v35, %v3813_v27  ;;  %v19386_v24 = vld [vmem:[#allocation162_spill] sm:$0xff] }
 0x6e5   : > { %v1780_v51 = vld [vmem:[%s18427_s10 + $0x320] sm:$0xff] }
 0x6e6   : > { %2255 = vperm.xlu1 %10809, %v1769_v14   ;;  %v13261_v60 = vpop.xlane.xlu1 %5943  ;;  %v13279_v14 = vpop.f32.mrf.mxu0  ;;  %v6307_v27 = vld [vmem:[%s18428_s11 + $0x5e0] sm:$0xff] }
 0x6e7   : > { %v13259_v61 = vpop.xlane.xlu0 %5937 }
 0x6e8   : > { %7976 = vmatmul.mubr.bf16.gmra.mxu1 %v10300_v11  ;;  %v1767_v11 = vld [vmem:[%s18427_s10 + $0x2b8] sm:$0xff]  ;;  %v13293_v19 = vpop.f32.mrf.mxu0 }
 0x6e9   : > { %7983 = vmatprep.mubr.bf16.mxu1 %v10309_v3  ;;  %v10308_v3 = vcombine.low %v6287_v12, %v6291_v62  ;;  %v1799_v12 = vld [vmem:[%s18427_s10 + $0x3b8] sm:$0xff]  ;;  %v3933_v62 = vmax.f32 %v19386_v24, %v3946_v63 }
 0x6ea   : > { %2415 = vperm.xlu1 %10809, %v1801_v37   ;;  %v13285_v25 = vpop.xlane.xlu1 %5947  ;;  %v1748_v37 = vld [vmem:[%s18427_s10 + $0x220] sm:$0xff]  ;;  %v13311_v63 = vpop.f32.mrf.mxu0 }
 0x6eb   : > { %v13276_v38 = vpop.xlane.xlu0 %5941  ;;  %v3935_v24 = vmax.f32 %v3933_v62, %v12873_v20  ;;  %v1778_v62 = vld [vmem:[%s18427_s10 + $0x310] sm:$0xff] }
 0x6ec   : > { %v13323_v53 = vpop.f32.mrf.mxu0 }
 0x6ee   : > { %2245 = vperm.xlu1 %10809, %v1767_v11   ;;  %v6303_v11 = vld [vmem:[%s18428_s11 + $0x5c0] sm:$0xff]  ;;  %v5958_v35 = vpop.xlane.xlu1 %5957 }
 0x6ef   : > { %v13290_v50 = vpop.xlane.xlu0 %5945  ;;  %v10325_v32 = vcombine.high %v6303_v11, %v6307_v27 }
 0x6f0   : > { %7984 = vmatmul.mubr.bf16.gmra.mxu1 %v10308_v3  ;;  %v3802_v3 = vmax.f32 %v3800_v36, %v12871_v10  ;;  %v19388_v36 = vld [vmem:[#allocation156_spill] sm:$0xff] }
 0x6f1   : > { %2150 = vperm.xlu0 %10808, %v1748_v37   ;;  %7991 = vmatprep.mubr.bf16.mxu1 %v10317_v52  ;;  %v1765_v52 = vld [vmem:[%s18427_s10 + $0x2a8] sm:$0xff]  ;;  %v10316_v37 = vcombine.low %v6295_v0, %v6299_v55  ;;  %v19389_v55 = vld [vmem:[#allocation157_spill] sm:$0xff] }
 0x6f2   : > { %2405 = vperm.xlu1 %10809, %v1799_v12   ;;  %v3804_v10 = vmax.f32 %v3802_v3, %v19388_v36  ;;  %v1797_v0 = vld [vmem:[%s18427_s10 + $0x3a8] sm:$0xff]  ;;  %v6315_v3 = vld [vmem:[%s18428_s11 + $0x620] sm:$0xff] }
 0x6f3   : > { %v13308_v22 = vpop.xlane.xlu0 %5949 }
 0x6f5   : > { %2310 = vperm.xlu0 %10808, %v1780_v51   ;;  %v3937_v51 = vmax.f32 %v3935_v24, %v19389_v55  ;;  %v3806_v24 = vmax.f32 %v3804_v10, %v12847_v6 }
 0x6f6   : > { %2235 = vperm.xlu1 %10809, %v1765_v52   ;;  %v13320_v12 = vpop.xlane.xlu1 %5959  ;;  %v6311_v52 = vld [vmem:[%s18428_s11 + $0x600] sm:$0xff] }
 0x6f7   : > { %v5952_v9 = vpop.xlane.xlu0 %5951  ;;  %19387 = vst [vmem:[#allocation221_spill] sm:$0xff] %v13320_v12  ;;  %v3939_v55 = vmax.f32 %v3937_v51, %v12849_v49  ;;  %v10333_v40 = vcombine.high %v6311_v52, %v6315_v3  ;;  %v3808_v10 = vmax.f32 %v3806_v24, %v13197_v4  ;;  %v1776_v51 = vld [vmem:[%s18427_s10 + $0x300] sm:$0xff] }
 0x6f8   : > { %7992 = vmatmul.mubr.bf16.gmra.mxu1 %v10316_v37  ;;  %v10324_v37 = vcombine.low %v6303_v11, %v6307_v27  ;;  %v1795_v11 = vld [vmem:[%s18427_s10 + $0x398] sm:$0xff]  ;;  %v6323_v24 = vld [vmem:[%s18428_s11 + $0x660] sm:$0xff] }
 0x6f9   : > { %2140 = vperm.xlu0 %10808, %v1746_v16   ;;  %7999 = vmatprep.mubr.bf16.mxu1 %v10325_v32  ;;  %v13341_v16 = vpop.f32.mrf.mxu0  ;;  %v1763_v32 = vld [vmem:[%s18427_s10 + $0x298] sm:$0xff]  ;;  %v3941_v27 = vmax.f32 %v3939_v55, %v13199_v8  ;;  %v19395_v8 = vld [vmem:[#allocation200_spill] sm:$0xff] }
 0x6fa   : > { %2395 = vperm.xlu1 %10809, %v1797_v0   ;;  %v13338_v36 = vpop.xlane.xlu1 %5963 }
 0x6fb   : > { %v5954_v20 = vpop.xlane.xlu0 %5953  ;;  %19390 = vst [vmem:[#allocation222_spill] sm:$0xff] %v13338_v36  ;;  %v13353_v6 = vpop.f32.mrf.mxu0  ;;  %v3943_v4 = vmax.f32 %v3941_v27, %v19395_v8 }
 0x6fc   : > { %v6397_v55 = vpack.c.bf16 %v5954_v20, %v5952_v9  ;;  %v1774_v20 = vld [vmem:[%s18427_s10 + $0x2f0] sm:$0xff] }
 0x6fd   : > { %2300 = vperm.xlu0 %10808, %v1778_v62   ;;  %v13362_v62 = vpop.f32.mrf.mxu0 }
 0x6fe   : > { %2225 = vperm.xlu1 %10809, %v1763_v32   ;;  %v13350_v12 = vpop.xlane.xlu1 %5967  ;;  %19392 = vst [vmem:[#allocation224_spill] sm:$0xff] %v13362_v62  ;;  %v13386_v62 = vld [vmem:[%s18428_s11 + $0x28] sm:$0xff] }
 0x6ff   : > { %v5956_v0 = vpop.xlane.xlu0 %5955  ;;  %19391 = vst [vmem:[#allocation223_spill] sm:$0xff] %v13350_v12  ;;  %v13391_v9 = vpop.f32.mrf.mxu0 }
 0x700   : > { %v6398_v36 = vpack.c.bf16 %v5958_v35, %v5956_v0  ;;  %8000 = vmatmul.mubr.bf16.gmra.mxu1 %v10324_v37  ;;  %v6319_v35 = vld [vmem:[%s18428_s11 + $0x640] sm:$0xff]  ;;  %v1761_v37 = vld [vmem:[%s18427_s10 + $0x288] sm:$0xff]  ;;  %v10332_v0 = vcombine.low %v6311_v52, %v6315_v3  ;;  %19396 = vst [vmem:[#allocation225_spill] sm:$0xff] %v13391_v9  ;;  %v1806_v3 = vld [vmem:[%s18427_s10 + $0x3f0] sm:$0xff] }
 0x701   : > { %2130 = vperm.xlu0 %10808, %v1744_v31   ;;  %8007 = vmatprep.mubr.bf16.mxu1 %v10333_v40  ;;  %v19393_v31 = vmov 0   ;;  %v19394_v40 = vld [vmem:[#allocation100_spill] sm:$0xff]  ;;  %v10341_v49 = vcombine.high %v6319_v35, %v6323_v24 }
 0x702   : > { %8073 = vmatpush1.bf16.msra.mxu1 %v6398_v36  ;;  %2385 = vperm.xlu1 %10809, %v1795_v11   ;;  %v13370_v32 = vpop.xlane.xlu1 %5971  ;;  %v3810_v36 = vmax.f32 %v3808_v10, %v19394_v40  ;;  %v13381_v11 = vld [vmem:[%s18428_s11 + $0x8] sm:$0xff] }
 0x703   : > { %8074 = vmatprep.subr.bf16.mxu1 %v19393_v31  ;;  %v19397_v10 = vld [vmem:[#allocation211_spill] sm:$0xff] }
 0x704   : > { %v3812_v27 = vmax.f32 %v3810_v36, %v19397_v10  ;;  %v13410_v36 = vpop.f32.mrf.mxu0 }
 0x705   : > { %2290 = vperm.xlu0 %10808, %v1776_v51   ;;  %v6396_v51 = vpack.c.bf16 %v13308_v22, %v13285_v25  ;;  %19400 = vst [vmem:[#allocation227_spill] sm:$0xff] %v13410_v36  ;;  %v6327_v25 = vld [vmem:[%s18428_s11 + $0x680] sm:$0xff] }
 0x706   : > { %8075 = vmatpush1.bf16.msra.mxu1 %v6397_v55  ;;  %2215 = vperm.xlu1 %10809, %v1761_v37   ;;  %v13393_v52 = vpop.xlane.xlu1 %5975  ;;  %v1793_v55 = vld [vmem:[%s18427_s10 + $0x388] sm:$0xff]  ;;  %v6331_v22 = vld [vmem:[%s18428_s11 + $0x6a0] sm:$0xff]  ;;  %v13430_v36 = vpop.f32.mrf.mxu0 }
 0x707   : > { %8076 = vmatprep.subr.bf16.mxu1 %v19393_v31  ;;  %v19399_v37 = vld [vmem:[#allocation212_spill] sm:$0xff]  ;;  %v10349_v9 = vcombine.high %v6327_v25, %v6331_v22  ;;  %19404 = vst [vmem:[#allocation229_spill] sm:$0xff] %v13430_v36 }
 0x708   : > { %v13404_v8 = vpop.f32.mrf.mxu1  ;;  %8008 = vmatmul.mubr.bf16.gmra.mxu1 %v10332_v0  ;;  %v3945_v40 = vmax.f32 %v3943_v4, %v19399_v37  ;;  %v19403_v37 = vld [vmem:[#allocation96_spill] sm:$0xff] }
 0x709   : > { %19398 = vst [vmem:[#allocation226_spill] sm:$0xff] %v13404_v8  ;;  %2280 = vperm.xlu0 %10808, %v1774_v20   ;;  %8015 = vmatprep.mubr.bf16.mxu1 %v10341_v49  ;;  %v19401_v49 = vld [vmem:[#allocation95_spill] sm:$0xff]  ;;  %v6395_v20 = vpack.c.bf16 %v13290_v50, %v13261_v60  ;;  %v19405_v50 = vld [vmem:[#allocation105_spill] sm:$0xff] }
 0x70a   : > { %8077 = vmatpush1.bf16.msra.mxu1 %v6396_v51  ;;  %v7819_v10 = vpop.f32.mrf.mxu1  ;;  %2375 = vperm.xlu1 %10809, %v1793_v55   ;;  %v13418_v4 = vpop.xlane.xlu1 %5979  ;;  %v3814_v0 = vmax.f32 %v3812_v27, %v19401_v49  ;;  %v3947_v8 = vmax.f32 %v3945_v40, %v19403_v37  ;;  %v1772_v55 = vld [vmem:[%s18427_s10 + $0x2e0] sm:$0xff]  ;;  %v1770_v37 = vld [vmem:[%s18427_s10 + $0x2d0] sm:$0xff] }
 0x70b   : > { %8078 = vmatprep.subr.bf16.mxu1 %v19393_v31  ;;  %v10340_v10 = vcombine.low %v6319_v35, %v6323_v24  ;;  %v6394_v35 = vpack.c.bf16 %v13276_v38, %v13250_v41  ;;  %v19407_v40 = vld [vmem:[#allocation106_spill] sm:$0xff]  ;;  %v13444_v27 = vpop.f32.mrf.mxu0 }
 0x70c   : > { %v13424_v51 = vpop.f32.mrf.mxu1  ;;  %v3816_v60 = vmax.f32 %v3814_v0, %v19405_v50  ;;  %19408 = vst [vmem:[#allocation231_spill] sm:$0xff] %v13444_v27  ;;  %v6335_v0 = vld [vmem:[%s18428_s11 + $0x6c0] sm:$0xff] }
 0x70d   : > { %19402 = vst [vmem:[#allocation228_spill] sm:$0xff] %v13424_v51  ;;  %2440 = vperm.xlu0 %10808, %v1806_v3   ;;  %v3949_v3 = vmax.f32 %v3947_v8, %v19407_v40  ;;  %v6339_v41 = vld [vmem:[%s18428_s11 + $0x6e0] sm:$0xff]  ;;  %v13464_v49 = vpop.f32.mrf.mxu0 }
 0x70e   : > { %8079 = vmatpush1.bf16.msra.mxu1 %v6395_v20  ;;  %v7822_v12 = vpop.f32.mrf.mxu1  ;;  %v13432_v28 = vpop.xlane.xlu1 %5983  ;;  %v19409_v8 = vld [vmem:[#allocation91_spill] sm:$0xff]  ;;  %v10357_v50 = vcombine.high %v6335_v0, %v6339_v41  ;;  %19412 = vst [vmem:[#allocation233_spill] sm:$0xff] %v13464_v49 }
 0x70f   : > { %8080 = vmatprep.subr.bf16.mxu1 %v19393_v31  ;;  %v1804_v12 = vld [vmem:[%s18427_s10 + $0x3e0] sm:$0xff] }
 0x710   : > { %v13438_v24 = vpop.f32.mrf.mxu1  ;;  %8016 = vmatmul.mubr.bf16.gmra.mxu1 %v10340_v10  ;;  %v6393_v10 = vpack.c.bf16 %v13259_v61, %v13233_v34  ;;  %v19413_v61 = vld [vmem:[#allocation101_spill] sm:$0xff] }
 0x711   : > { %19406 = vst [vmem:[#allocation230_spill] sm:$0xff] %v13438_v24  ;;  %2270 = vperm.xlu0 %10808, %v1772_v55   ;;  %8023 = vmatprep.mubr.bf16.mxu1 %v10349_v9  ;;  %v3818_v9 = vmax.f32 %v3816_v60, %v19409_v8  ;;  %v19415_v60 = vld [vmem:[#allocation102_spill] sm:$0xff] }
 0x712   : > { %8081 = vmatpush1.bf16.msra.mxu1 %v6394_v35  ;;  %v7827_v20 = vpop.f32.mrf.mxu1  ;;  %v13452_v38 = vpop.xlane.xlu1 %5987  ;;  %v10348_v35 = vcombine.low %v6327_v25, %v6331_v22  ;;  %v6392_v25 = vpack.c.bf16 %v13248_v42, %v13222_v44  ;;  %v6343_v44 = vld [vmem:[%s18428_s11 + $0x700] sm:$0xff] }
 0x713   : > { %8082 = vmatprep.subr.bf16.mxu1 %v19393_v31  ;;  %v19411_v20 = vld [vmem:[#allocation92_spill] sm:$0xff]  ;;  %v3820_v34 = vmax.f32 %v3818_v9, %v19413_v61  ;;  %v6347_v42 = vld [vmem:[%s18428_s11 + $0x720] sm:$0xff] }
 0x714   : > { %v13458_v55 = vpop.f32.mrf.mxu1  ;;  %v3951_v40 = vmax.f32 %v3949_v3, %v19411_v20  ;;  %v10365_v20 = vcombine.high %v6343_v44, %v6347_v42 }
 0x715   : > { %19410 = vst [vmem:[#allocation232_spill] sm:$0xff] %v13458_v55  ;;  %2430 = vperm.xlu0 %10808, %v1804_v12   ;;  %v13475_v12 = vpop.xlane.xlu0 %5961 }
 0x716   : > { %8083 = vmatpush1.bf16.msra.mxu1 %v6393_v10  ;;  %v7830_v24 = vpop.f32.mrf.mxu1  ;;  %v13466_v51 = vpop.permute.xlu1 %2355  ;;  %v3953_v3 = vmax.f32 %v3951_v40, %v19415_v60  ;;  %19416 = vst [vmem:[#allocation235_spill] sm:$0xff] %v13475_v12  ;;  %v1802_v10 = vld [vmem:[%s18427_s10 + $0x3d0] sm:$0xff]  ;;  %v19420_v60 = vld [vmem:[#allocation194_spill] sm:$0xff] }
 0x717   : > { %8084 = vmatprep.subr.bf16.mxu1 %v19393_v31  ;;  %v13477_v24 = vpop.f32.mrf.mxu0  ;;  %v1764_v12 = vld [vmem:[%s18427_s10 + $0x2a0] sm:$0xff] }
 0x718   : > { %v13472_v22 = vpop.f32.mrf.mxu1  ;;  %8024 = vmatmul.mubr.bf16.gmra.mxu1 %v10348_v35  ;;  %19417 = vst [vmem:[#allocation236_spill] sm:$0xff] %v13477_v24  ;;  %v6391_v35 = vpack.c.bf16 %v13231_v56, %v13203_v30  ;;  %v3955_v61 = vmax.f32 %v3953_v3, %v19420_v60  ;;  %v19423_v56 = vld [vmem:[#allocation97_spill] sm:$0xff]  ;;  %v6351_v60 = vld [vmem:[%s18428_s11 + $0x740] sm:$0xff] }
 0x719   : > { %19414 = vst [vmem:[#allocation234_spill] sm:$0xff] %v13472_v22  ;;  %2260 = vperm.xlu0 %10808, %v1770_v37   ;;  %8031 = vmatprep.mubr.bf16.mxu1 %v10357_v50  ;;  %v19418_v37 = vld [vmem:[#allocation88_spill] sm:$0xff]  ;;  %v13497_v8 = vpop.f32.mrf.mxu0  ;;  %v1768_v22 = vld [vmem:[%s18427_s10 + $0x2c0] sm:$0xff]  ;;  %v13502_v49 = vpop.xlane.xlu0 %5965 }
 0x71a   : > { %8085 = vmatpush1.bf16.msra.mxu1 %v6392_v25  ;;  %v7835_v9 = vpop.f32.mrf.mxu1  ;;  %v13488_v40 = vpop.permute.xlu1 %2185  ;;  %v3822_v50 = vmax.f32 %v3820_v34, %v19418_v37  ;;  %19421 = vst [vmem:[#allocation238_spill] sm:$0xff] %v13497_v8  ;;  %19422 = vst [vmem:[#allocation239_spill] sm:$0xff] %v13502_v49  ;;  %v10364_v37 = vcombine.low %v6343_v44, %v6347_v42 }
 0x71b   : > { %8086 = vmatprep.subr.bf16.mxu1 %v19393_v31  ;;  %v10356_v9 = vcombine.low %v6335_v0, %v6339_v41  ;;  %v19425_v41 = vld [vmem:[#allocation98_spill] sm:$0xff] }
 0x71c   : > { %v13494_v25 = vpop.f32.mrf.mxu1  ;;  %v3824_v30 = vmax.f32 %v3822_v50, %v19423_v56  ;;  %v3957_v3 = vmax.f32 %v3955_v61, %v19425_v41  ;;  %v6355_v50 = vld [vmem:[%s18428_s11 + $0x760] sm:$0xff] }
 0x71d   : > { %19419 = vst [vmem:[#allocation237_spill] sm:$0xff] %v13494_v25  ;;  %2420 = vperm.xlu0 %10808, %v1802_v10   ;;  %v13511_v10 = vpop.f32.mrf.mxu0  ;;  %v19427_v61 = vld [vmem:[#allocation190_spill] sm:$0xff]  ;;  %v10373_v36 = vcombine.high %v6351_v60, %v6355_v50 }
 0x71e   : > { %8087 = vmatpush1.bf16.msra.mxu1 %v6391_v35  ;;  %v7838_v55 = vpop.f32.mrf.mxu1  ;;  %v13504_v34 = vpop.permute.xlu1 %2345  ;;  %19426 = vst [vmem:[#allocation241_spill] sm:$0xff] %v13511_v10  ;;  %v19431_v25 = vld [vmem:[#allocation142_spill] sm:$0xff] }
 0x71f   : > { %8088 = vmatprep.subr.bf16.mxu1 %v19393_v31  ;;  %v1800_v55 = vld [vmem:[%s18427_s10 + $0x3c0] sm:$0xff]  ;;  %v3263_v27 = vadd.f32 %v19431_v25, %v13169_v26  ;;  %v13532_v10 = vpop.xlane.xlu0 %5969  ;;  %v13534_v8 = vpop.f32.mrf.mxu0 }
 0x720   : > { %v13508_v0 = vpop.f32.mrf.mxu1  ;;  %8032 = vmatmul.mubr.bf16.gmra.mxu1 %v10356_v9  ;;  %19432 = vst [vmem:[#allocation142_spill] sm:$0xff] %v13532_v10  ;;  %19433 = vst [vmem:[#allocation242_spill] sm:$0xff] %v13534_v8 }
 0x721   : > { %19424 = vst [vmem:[#allocation240_spill] sm:$0xff] %v13508_v0  ;;  %2250 = vperm.xlu0 %10808, %v1768_v22   ;;  %8039 = vmatprep.mubr.bf16.mxu1 %v10365_v20  ;;  %v3826_v22 = vmax.f32 %v3824_v30, %v19427_v61  ;;  %v19428_v20 = vld [vmem:[#allocation141_spill] sm:$0xff]  ;;  %v19430_v0 = vld [vmem:[#allocation191_spill] sm:$0xff] }
 0x722   : > { %v7843_v35 = vpop.f32.mrf.mxu1  ;;  %v13522_v9 = vpop.permute.xlu1 %2175  ;;  %v3261_v41 = vadd.f32 %v19428_v20, %v13169_v26  ;;  %v1766_v30 = vld [vmem:[%s18427_s10 + $0x2b0] sm:$0xff]  ;;  %v19437_v26 = vld [vmem:[#allocation94_spill] sm:$0xff] }
 0x723   : > { %v3959_v35 = vmax.f32 %v3957_v3, %v19430_v0  ;;  %v13549_v0 = vpop.f32.mrf.mxu0  ;;  %v13554_v24 = vpop.xlane.xlu0 %5973 }
 0x724   : > { %v13527_v56 = vpop.f32.mrf.mxu1  ;;  %v13542_v42 = vmax.f32 %v3261_v41, 0.0  ;;  %19439 = vst [vmem:[#allocation246_spill] sm:$0xff] %v13549_v0  ;;  %19440 = vst [vmem:[#allocation247_spill] sm:$0xff] %v13554_v24 }
 0x725   : > { %19429 = vst [vmem:[#allocation141_spill] sm:$0xff] %v13527_v56  ;;  %2410 = vperm.xlu0 %10808, %v1800_v55   ;;  %v19434_v56 = vld [vmem:[#allocation93_spill] sm:$0xff]  ;;  %v3961_v25 = vmax.f32 %v3959_v35, %v19437_v26  ;;  %v13547_v55 = vmax.f32 %v3263_v27, 0.0  ;;  %v6363_v27 = vld [vmem:[%s18428_s11 + $0x7a0] sm:$0xff]  ;;  %v13572_v0 = vpop.f32.mrf.mxu0 }
 0x726   : > { %v7846_v61 = vpop.f32.mrf.mxu1  ;;  %v13539_v20 = vpop.permute.xlu1 %2335  ;;  %v3828_v44 = vmax.f32 %v3826_v22, %v19434_v56  ;;  %19435 = vst [vmem:[#allocation243_spill] sm:$0xff] %v13542_v42  ;;  %v19441_v22 = vld [vmem:[#allocation135_spill] sm:$0xff]  ;;  %v19443_v56 = vld [vmem:[#allocation136_spill] sm:$0xff] }
 0x727   : > { %19438 = vst [vmem:[#allocation245_spill] sm:$0xff] %v13547_v55  ;;  %v1798_v61 = vld [vmem:[%s18427_s10 + $0x3b0] sm:$0xff]  ;;  %v3247_v35 = vadd.f32 %v19441_v22, %v13201_v47  ;;  %v3963_v26 = vmax.f32 %v3961_v25, %v13547_v55  ;;  %19444 = vst [vmem:[#allocation136_spill] sm:$0xff] %v13572_v0 }
 0x728   : > { %v13544_v3 = vpop.f32.mrf.mxu1  ;;  %8040 = vmatmul.mubr.bf16.gmra.mxu1 %v10364_v37  ;;  %v6359_v37 = vld [vmem:[%s18428_s11 + $0x780] sm:$0xff] }
 0x729   : > { %19436 = vst [vmem:[#allocation244_spill] sm:$0xff] %v13544_v3  ;;  %2240 = vperm.xlu0 %10808, %v1766_v30   ;;  %8047 = vmatprep.mubr.bf16.mxu1 %v10373_v36  ;;  %v3830_v36 = vmax.f32 %v3828_v44, %v13542_v42  ;;  %v3249_v3 = vadd.f32 %v19443_v56, %v13201_v47  ;;  %v19445_v42 = vld [vmem:[#allocation89_spill] sm:$0xff]  ;;  %v13578_v22 = vmax.f32 %v3247_v35, 0.0  ;;  %v13585_v47 = vpop.xlane.xlu0 %5977  ;;  %v6367_v35 = vld [vmem:[%s18428_s11 + $0x7c0] sm:$0xff] }
 0x72a   : > { %v7851_v8 = vpop.f32.mrf.mxu1  ;;  %v13556_v41 = vpop.permute.xlu1 %2165  ;;  %v10381_v44 = vcombine.high %v6359_v37, %v6363_v27 }
 0x72b   : > { %v10372_v8 = vcombine.low %v6351_v60, %v6355_v50  ;;  %v3815_v10 = vmax.f32 %v19445_v42, %v3830_v36  ;;  %19446 = vst [vmem:[#allocation248_spill] sm:$0xff] %v13578_v22  ;;  %v19448_v60 = vld [vmem:[#allocation90_spill] sm:$0xff]  ;;  %v13583_v25 = vmax.f32 %v3249_v3, 0.0  ;;  %v10380_v42 = vcombine.low %v6359_v37, %v6363_v27 }
 0x72c   : > { %v13567_v30 = vpop.f32.mrf.mxu1  ;;  %v3948_v50 = vmax.f32 %v19448_v60, %v3963_v26  ;;  %v6371_v3 = vld [vmem:[%s18428_s11 + $0x7e0] sm:$0xff] }
 0x72d   : > { %19442 = vst [vmem:[#allocation135_spill] sm:$0xff] %v13567_v30  ;;  %2400 = vperm.xlu0 %10808, %v1798_v61   ;;  %19449 = vst [vmem:[#allocation250_spill] sm:$0xff] %v13583_v25  ;;  %v13589_v61 = vpop.f32.mrf.mxu0  ;;  %v3817_v26 = vmax.f32 %v3815_v10, %v13578_v22  ;;  %v1762_v10 = vld [vmem:[%s18427_s10 + $0x290] sm:$0xff]  ;;  %v13617_v27 = vpop.xlane.xlu0 %5981 }
 0x72e   : > { %v7854_v49 = vpop.f32.mrf.mxu1  ;;  %v13587_v56 = vpop.permute.xlu1 %2325  ;;  %19450 = vst [vmem:[#allocation251_spill] sm:$0xff] %v13589_v61  ;;  %v19454_v61 = vld [vmem:[#allocation137_spill] sm:$0xff] }
 0x72f   : > { %v1796_v49 = vld [vmem:[%s18427_s10 + $0x3a0] sm:$0xff]  ;;  %v3251_v0 = vadd.f32 %v19454_v61, %v13188_v13  ;;  %v13610_v55 = vpop.f32.mrf.mxu0  ;;  %v3407_v61 = vadd.f32 %v13253_v43, %v13220_v2  ;;  %v1794_v43 = vld [vmem:[%s18427_s10 + $0x390] sm:$0xff] }
 0x730   : > { %v13580_v30 = vpop.f32.mrf.mxu1  ;;  %8048 = vmatmul.mubr.bf16.gmra.mxu1 %v10372_v8 }
 0x731   : > { %19447 = vst [vmem:[#allocation249_spill] sm:$0xff] %v13580_v30  ;;  %2230 = vperm.xlu0 %10808, %v1764_v12   ;;  %8055 = vmatprep.mubr.bf16.mxu1 %v10381_v44  ;;  %v19451_v12 = vld [vmem:[#allocation139_spill] sm:$0xff]  ;;  %v3950_v30 = vmax.f32 %v3948_v50, %v13583_v25  ;;  %v19453_v44 = vld [vmem:[#allocation140_spill] sm:$0xff]  ;;  %v19460_v25 = vld [vmem:[#allocation86_spill] sm:$0xff] }
 0x732   : > { %v7859_v36 = vpop.f32.mrf.mxu1  ;;  %v3257_v8 = vadd.f32 %v19451_v12, %v13130_v45  ;;  %19455 = vst [vmem:[#allocation140_spill] sm:$0xff] %v13610_v55  ;;  %v10389_v12 = vcombine.high %v6367_v35, %v6371_v3  ;;  %v13619_v50 = vpop.permute.xlu1 %2155 }
 0x733   : > { %v3259_v36 = vadd.f32 %v19453_v44, %v13130_v45  ;;  %v19457_v45 = vld [vmem:[#allocation85_spill] sm:$0xff] }
 0x734   : > { %v13603_v60 = vpop.f32.mrf.mxu1  ;;  %v13622_v44 = vmax.f32 %v3257_v8, 0.0 }
 0x735   : > { %19452 = vst [vmem:[#allocation139_spill] sm:$0xff] %v13603_v60  ;;  %2390 = vperm.xlu0 %10808, %v1796_v49   ;;  %v19456_v60 = vld [vmem:[#allocation138_spill] sm:$0xff]  ;;  %v3819_v49 = vmax.f32 %v3817_v26, %v19457_v45  ;;  %v13629_v24 = vmax.f32 %v3259_v36, 0.0  ;;  %v3417_v26 = vadd.f32 %v13311_v63, %v13145_v21  ;;  %v13644_v36 = vpop.f32.mrf.mxu0  ;;  %v3421_v63 = vadd.f32 %v13341_v16, %v13167_v58 }
 0x736   : > { %v7862_v22 = vpop.f32.mrf.mxu1  ;;  %v3253_v37 = vadd.f32 %v19456_v60, %v13188_v13  ;;  %19458 = vst [vmem:[#allocation137_spill] sm:$0xff] %v13622_v44  ;;  %v3409_v13 = vadd.f32 %v13264_v18, %v13220_v2  ;;  %v13633_v60 = vmax.f32 %v3251_v0, 0.0  ;;  %19464 = vst [vmem:[#allocation255_spill] sm:$0xff] %v13644_v36  ;;  %v13647_v2 = vmax.f32 %v3407_v61, 0.0 }
 0x737   : > { %v3952_v22 = vmax.f32 %v3950_v30, %v19460_v25  ;;  %19461 = vst [vmem:[#allocation252_spill] sm:$0xff] %v13629_v24  ;;  %v3419_v30 = vadd.f32 %v13323_v53, %v13145_v21  ;;  %v3821_v18 = vmax.f32 %v3819_v49, %v13622_v44  ;;  %v13658_v21 = vpop.xlane.xlu0 %5985  ;;  %v13660_v53 = vpop.permute.xlu1 %2315  ;;  %v10143_v49 = vcombine.high %v13381_v11, %v13386_v62 }
 0x738   : > { %v13626_v55 = vpop.f32.mrf.mxu1  ;;  %8056 = vmatmul.mubr.bf16.gmra.mxu1 %v10380_v42  ;;  %19462 = vst [vmem:[#allocation253_spill] sm:$0xff] %v13633_v60  ;;  %v13640_v42 = vmax.f32 %v3253_v37, 0.0  ;;  %19465 = vst [vmem:[#allocation256_spill] sm:$0xff] %v13647_v2  ;;  %v3423_v37 = vadd.f32 %v13353_v6, %v13167_v58  ;;  %v13665_v61 = vmax.f32 %v3417_v26, 0.0 }
 0x739   : > { %19459 = vst [vmem:[#allocation138_spill] sm:$0xff] %v13626_v55  ;;  %2220 = vperm.xlu0 %10808, %v1762_v10   ;;  %8063 = vmatprep.mubr.bf16.mxu1 %v10389_v12  ;;  %v10388_v10 = vcombine.low %v6367_v35, %v6371_v3  ;;  %v13654_v12 = vmax.f32 %v3409_v13, 0.0  ;;  %v3823_v16 = vmax.f32 %v3821_v18, %v13633_v60  ;;  %v1760_v3 = vld [vmem:[%s18427_s10 + $0x280] sm:$0xff]  ;;  %v13680_v18 = vmax.f32 %v3421_v63, 0.0 }
 0x73a   : > { %v7867_v8 = vpop.f32.mrf.mxu1  ;;  %19463 = vst [vmem:[#allocation254_spill] sm:$0xff] %v13640_v42  ;;  %19468 = vst [vmem:[#allocation259_spill] sm:$0xff] %v13665_v61  ;;  %v3411_v35 = vadd.f32 %v13279_v14, %v13466_v51  ;;  %v3413_v13 = vadd.f32 %v13293_v19, %v13466_v51  ;;  %v19472_v14 = vld [vmem:[#allocation133_spill] sm:$0xff] }
 0x73b   : > { %v3954_v8 = vmax.f32 %v3952_v22, %v13629_v24  ;;  %19467 = vst [vmem:[#allocation258_spill] sm:$0xff] %v13654_v12  ;;  %v13673_v22 = vmax.f32 %v3419_v30, 0.0  ;;  %v3825_v26 = vmax.f32 %v3823_v16, %v13647_v2  ;;  %19471 = vst [vmem:[#allocation262_spill] sm:$0xff] %v13680_v18  ;;  %v19475_v30 = vld [vmem:[#allocation134_spill] sm:$0xff]  ;;  %v2181_v19 = vpop.permute.xlu0 %2180  ;;  %v3401_v16 = vadd.f32 %v13225_v1, %v13504_v34  ;;  %v19480_v1 = vld [vmem:[#allocation131_spill] sm:$0xff] }
 0x73c   : > { %v13651_v0 = vpop.f32.mrf.mxu1  ;;  %v3243_v25 = vadd.f32 %v19475_v30, %v13488_v40  ;;  %v13692_v63 = vmax.f32 %v3411_v35, 0.0  ;;  %v3237_v30 = vadd.f32 %v19480_v1, %v2181_v19 }
 0x73d   : > { %19466 = vst [vmem:[#allocation257_spill] sm:$0xff] %v13651_v0  ;;  %2380 = vperm.xlu0 %10808, %v1794_v43   ;;  %v3956_v58 = vmax.f32 %v3954_v8, %v13640_v42  ;;  %19469 = vst [vmem:[#allocation260_spill] sm:$0xff] %v13673_v22  ;;  %v13677_v43 = vpop.f32.mrf.mxu0  ;;  %v3241_v0 = vadd.f32 %v19472_v14, %v13488_v40  ;;  %v13687_v8 = vmax.f32 %v3423_v37, 0.0  ;;  %v13700_v14 = vmax.f32 %v3413_v13, 0.0  ;;  %v19483_v13 = vld [vmem:[#allocation132_spill] sm:$0xff] }
 0x73e   : > { %v7870_v6 = vpop.f32.mrf.mxu1  ;;  %19470 = vst [vmem:[#allocation261_spill] sm:$0xff] %v13677_v43  ;;  %v3827_v51 = vmax.f32 %v3825_v26, %v13665_v61  ;;  %19476 = vst [vmem:[#allocation134_spill] sm:$0xff] %v13692_v63  ;;  %v3403_v40 = vadd.f32 %v13236_v5, %v13504_v34  ;;  %v3239_v45 = vadd.f32 %v19483_v13, %v2181_v19  ;;  %v13719_v34 = vmax.f32 %v3401_v16, 0.0 }
 0x73f   : > { %v3958_v6 = vmax.f32 %v3956_v58, %v13654_v12  ;;  %19474 = vst [vmem:[#allocation263_spill] sm:$0xff] %v13687_v8  ;;  %19477 = vst [vmem:[#allocation264_spill] sm:$0xff] %v13700_v14  ;;  %v13709_v26 = vmax.f32 %v3241_v0, 0.0 }
 0x740   : > { %v13684_v55 = vpop.f32.mrf.mxu1  ;;  %8064 = vmatmul.mubr.bf16.gmra.mxu1 %v10388_v10  ;;  %v1792_v10 = vld [vmem:[%s18427_s10 + $0x380] sm:$0xff]  ;;  %v3829_v35 = vmax.f32 %v3827_v51, %v13680_v18  ;;  %19484 = vst [vmem:[#allocation132_spill] sm:$0xff] %v13719_v34  ;;  %v13722_v0 = vmax.f32 %v3403_v40, 0.0  ;;  %v19490_v40 = vld [vmem:[#allocation129_spill] sm:$0xff] }
 0x741   : > { %19473 = vst [vmem:[#allocation133_spill] sm:$0xff] %v13684_v55  ;;  %2210 = vperm.xlu0 %10808, %v1760_v3   ;;  %8104 = vmatprep.mubr.bf16.mxu1 %v10143_v49  ;;  %v3960_v37 = vmax.f32 %v3958_v6, %v13673_v22  ;;  %v13704_v49 = vpop.f32.mrf.mxu0  ;;  %v13706_v3 = vpop.permute.xlu1 %2145  ;;  %19479 = vst [vmem:[#allocation266_spill] sm:$0xff] %v13709_v26  ;;  %v13715_v6 = vmax.f32 %v3243_v25, 0.0 }
 0x742   : > { %v7875_v58 = vpop.f32.mrf.mxu1  ;;  %19478 = vst [vmem:[#allocation265_spill] sm:$0xff] %v13704_v49  ;;  %v3832_v5 = vmax.f32 %v13692_v63, %v3829_v35  ;;  %19485 = vst [vmem:[#allocation268_spill] sm:$0xff] %v13722_v0  ;;  %v2341_v25 = vpop.permute.xlu0 %2340  ;;  %v3231_v35 = vadd.f32 %v19490_v40, %v13522_v9 }
 0x743   : > { %v3962_v58 = vmax.f32 %v3960_v37, %v13687_v8  ;;  %19482 = vst [vmem:[#allocation267_spill] sm:$0xff] %v13715_v6  ;;  %v13724_v2 = vpop.f32.mrf.mxu0 }
 0x744   : > { %v13712_v55 = vpop.f32.mrf.mxu1  ;;  %19486 = vst [vmem:[#allocation269_spill] sm:$0xff] %v13724_v2  ;;  %v3834_v1 = vmax.f32 %v3832_v5, %v13709_v26  ;;  %v13750_v18 = vmax.f32 %v3231_v35, 0.0  ;;  %v3393_v35 = vadd.f32 %v13172_v15, %v13539_v20 }
 0x745   : > { %19481 = vst [vmem:[#allocation131_spill] sm:$0xff] %v13712_v55  ;;  %2370 = vperm.xlu0 %10808, %v1792_v10   ;;  %v3965_v51 = vmax.f32 %v13700_v14, %v3962_v58  ;;  %v13727_v55 = vmax.f32 %v3237_v30, 0.0  ;;  %v13732_v10 = vmax.f32 %v3239_v45, 0.0  ;;  %v13734_v16 = vpop.permute.xlu1 %2305  ;;  %v19491_v30 = vld [vmem:[#allocation130_spill] sm:$0xff]  ;;  %v13742_v2 = vpop.f32.mrf.mxu0  ;;  %v3397_v45 = vadd.f32 %v13191_v23, %v2341_v25 }
 0x746   : > { %v7878_v49 = vpop.f32.mrf.mxu1  ;;  %v3233_v5 = vadd.f32 %v19491_v30, %v13522_v9  ;;  %19493 = vst [vmem:[#allocation130_spill] sm:$0xff] %v13750_v18  ;;  %v2171_v40 = vpop.permute.xlu0 %2170  ;;  %v13780_v14 = vmax.f32 %v3393_v35, 0.0  ;;  %v19510_v35 = vld [vmem:[#allocation114_spill] sm:$0xff] }
 0x747   : > { %19487 = vst [vmem:[#allocation270_spill] sm:$0xff] %v13727_v55  ;;  %v3967_v19 = vmax.f32 %v3965_v51, %v13715_v6  ;;  %19489 = vst [vmem:[#allocation272_spill] sm:$0xff] %v13732_v10  ;;  %v3836_v49 = vmax.f32 %v3834_v1, %v13719_v34  ;;  %v3399_v1 = vadd.f32 %v13206_v29, %v2341_v25  ;;  %v13754_v8 = vpop.f32.mrf.mxu0 }
 0x748   : > { %v13729_v37 = vpop.f32.mrf.mxu1  ;;  %v3391_v29 = vadd.f32 %v13161_v57, %v13539_v20  ;;  %19503 = vst [vmem:[#allocation278_spill] sm:$0xff] %v13780_v14 }
 0x749   : > { %19488 = vst [vmem:[#allocation271_spill] sm:$0xff] %v13729_v37  ;;  %v3969_v13 = vmax.f32 %v3967_v19, %v13722_v0  ;;  %v3838_v37 = vmax.f32 %v3836_v49, %v13727_v55  ;;  %v13752_v19 = vmax.f32 %v3233_v5, 0.0  ;;  %v2136_v9 = vpop.permute.xlu1 %2135  ;;  %v13757_v49 = vmax.f32 %v3397_v45, 0.0  ;;  %v13768_v5 = vpop.f32.mrf.mxu0 }
 0x74a   : > { %v7883_v58 = vpop.f32.mrf.mxu1  ;;  %19498 = vst [vmem:[#allocation277_spill] sm:$0xff] %v13768_v5  ;;  %v2331_v61 = vpop.permute.xlu0 %2330  ;;  %v13778_v57 = vmax.f32 %v3391_v29, 0.0  ;;  %v19509_v5 = vld [vmem:[#allocation113_spill] sm:$0xff] }
 0x74b   : > { %v3971_v12 = vmax.f32 %v3969_v13, %v13732_v10  ;;  %19494 = vst [vmem:[#allocation273_spill] sm:$0xff] %v13752_v19  ;;  %v3840_v30 = vmax.f32 %v3838_v37, %v13750_v18  ;;  %19495 = vst [vmem:[#allocation274_spill] sm:$0xff] %v13757_v49  ;;  %v13762_v13 = vmax.f32 %v3399_v1, 0.0  ;;  %v19499_v37 = vld [vmem:[#allocation127_spill] sm:$0xff]  ;;  %v19501_v1 = vld [vmem:[#allocation128_spill] sm:$0xff]  ;;  %v13782_v15 = vpop.f32.mrf.mxu0 }
 0x74c   : > { %v13746_v51 = vpop.f32.mrf.mxu1  ;;  %v3227_v45 = vadd.f32 %v19499_v37, %v2171_v40  ;;  %19502 = vst [vmem:[#allocation128_spill] sm:$0xff] %v13778_v57  ;;  %19504 = vst [vmem:[#allocation279_spill] sm:$0xff] %v13782_v15  ;;  %v19511_v15 = vld [vmem:[#allocation126_spill] sm:$0xff] }
 0x74d   : > { %19492 = vst [vmem:[#allocation129_spill] sm:$0xff] %v13746_v51  ;;  %v3973_v51 = vmax.f32 %v3971_v12, %v13752_v19  ;;  %19497 = vst [vmem:[#allocation276_spill] sm:$0xff] %v13762_v13  ;;  %v13776_v63 = vpop.permute.xlu1 %2295 }
 0x74e   : > { %v7886_v58 = vpop.f32.mrf.mxu1  ;;  %v2161_v29 = vpop.permute.xlu0 %2160 }
 0x74f   : > { %v3842_v58 = vmax.f32 %v3840_v30, %v13757_v49  ;;  %v3975_v12 = vmax.f32 %v3973_v51, %v13762_v13  ;;  %v13785_v30 = vmax.f32 %v3227_v45, 0.0  ;;  %v3193_v49 = vadd.f32 %v19510_v35, %v2136_v9  ;;  %v13798_v45 = vpop.f32.mrf.mxu0 }
 0x750   : > { %v13759_v23 = vpop.f32.mrf.mxu1 }
 0x751   : > { %19496 = vst [vmem:[#allocation275_spill] sm:$0xff] %v13759_v23  ;;  %v3229_v23 = vadd.f32 %v19501_v1, %v2171_v40  ;;  %v3844_v20 = vmax.f32 %v3842_v58, %v13778_v57  ;;  %19505 = vst [vmem:[#allocation280_spill] sm:$0xff] %v13785_v30  ;;  %v19508_v40 = vld [vmem:[#allocation125_spill] sm:$0xff]  ;;  %v3223_v58 = vadd.f32 %v19511_v15, %v13556_v41  ;;  %v13800_v34 = vpop.permute.xlu1 %2285  ;;  %v13816_v43 = vmax.f32 %v3193_v49, 0.0  ;;  %v19527_v57 = vld [vmem:[#allocation123_spill] sm:$0xff] }
 0x752   : > { %v7891_v25 = vpop.f32.mrf.mxu1  ;;  %v3221_v1 = vadd.f32 %v19508_v40, %v13556_v41  ;;  %v19515_v41 = vld [vmem:[#allocation118_spill] sm:$0xff]  ;;  %v19522_v49 = vld [vmem:[#allocation121_spill] sm:$0xff] }
 0x753   : > { %v13790_v51 = vmax.f32 %v3229_v23, 0.0  ;;  %v3387_v23 = vadd.f32 %v13139_v39, %v2331_v61  ;;  %v3203_v15 = vadd.f32 %v19515_v41, %v13706_v3  ;;  %19517 = vst [vmem:[#allocation126_spill] sm:$0xff] %v13816_v43  ;;  %v13818_v39 = vmax.f32 %v3223_v58, 0.0  ;;  %v19523_v41 = vld [vmem:[#allocation122_spill] sm:$0xff] }
 0x754   : > { %v13772_v22 = vpop.f32.mrf.mxu1  ;;  %v13807_v0 = vmax.f32 %v3221_v1, 0.0 }
 0x755   : > { %19500 = vst [vmem:[#allocation127_spill] sm:$0xff] %v13772_v22  ;;  %v3977_v22 = vmax.f32 %v3975_v12, %v13780_v14  ;;  %19507 = vst [vmem:[#allocation282_spill] sm:$0xff] %v13790_v51  ;;  %v3846_v12 = vmax.f32 %v3844_v20, %v13785_v30  ;;  %v13823_v1 = vmax.f32 %v3387_v23, 0.0  ;;  %v13834_v58 = vpop.permute.xlu1 %2445  ;;  %v3217_v14 = vadd.f32 %v19527_v57, %v2161_v29 }
 0x756   : > { %v7894_v25 = vpop.f32.mrf.mxu1  ;;  %19513 = vst [vmem:[#allocation113_spill] sm:$0xff] %v13807_v0 }
 0x757   : > { %v3191_v25 = vadd.f32 %v19509_v5, %v2136_v9  ;;  %v3979_v40 = vmax.f32 %v3977_v22, %v13790_v51  ;;  %v3389_v9 = vadd.f32 %v13148_v17, %v2331_v61  ;;  %v3848_v22 = vmax.f32 %v3846_v12, %v13807_v0  ;;  %19519 = vst [vmem:[#allocation118_spill] sm:$0xff] %v13823_v1  ;;  %v2321_v17 = vpop.permute.xlu0 %2320 }
 0x758   : > { %v13787_v37 = vpop.f32.mrf.mxu1  ;;  %v3213_v12 = vadd.f32 %v19523_v41, %v13619_v50 }
 0x759   : > { %19506 = vst [vmem:[#allocation281_spill] sm:$0xff] %v13787_v37  ;;  %v13814_v35 = vmax.f32 %v3191_v25, 0.0  ;;  %v13828_v36 = vmax.f32 %v3389_v9, 0.0  ;;  %v3211_v25 = vadd.f32 %v19522_v49, %v13619_v50  ;;  %v3383_v49 = vadd.f32 %v13124_v54, %v13587_v56 }
 0x75a   : > { %v7899_v13 = vpop.f32.mrf.mxu1 }
 0x75b   : > { %v19514_v13 = vld [vmem:[#allocation117_spill] sm:$0xff]  ;;  %19516 = vst [vmem:[#allocation114_spill] sm:$0xff] %v13814_v35  ;;  %19521 = vst [vmem:[#allocation284_spill] sm:$0xff] %v13828_v36 }
 0x75c   : > { %v13804_v37 = vpop.f32.mrf.mxu1  ;;  %v3201_v5 = vadd.f32 %v19514_v13, %v13706_v3  ;;  %19518 = vst [vmem:[#allocation117_spill] sm:$0xff] %v13818_v39  ;;  %v3981_v13 = vmax.f32 %v3979_v40, %v13818_v39  ;;  %v3381_v3 = vadd.f32 %v13117_v46, %v13587_v56  ;;  %v5149_v40 = vmax.f32 %v13814_v35, %v13816_v43 }
 0x75d   : > { %19512 = vst [vmem:[#allocation125_spill] sm:$0xff] %v13804_v37  ;;  %v13820_v37 = vpop.f32.mrf.mxu0  ;;  %v3850_v46 = vmax.f32 %v3848_v22, %v13823_v1  ;;  %v13859_v22 = vmax.f32 %v3213_v12, 0.0 }
 0x75e   : > { %v7902_v20 = vpop.f32.mrf.mxu1  ;;  %v13838_v23 = vmax.f32 %v3201_v5, 0.0  ;;  %v3983_v5 = vmax.f32 %v3981_v13, %v13828_v36 }
 0x75f   : > { %v13840_v20 = vmax.f32 %v3203_v15, 0.0  ;;  %v13853_v15 = vmax.f32 %v3381_v3, 0.0  ;;  %19532 = vst [vmem:[#allocation287_spill] sm:$0xff] %v13859_v22  ;;  %v13868_v3 = vmax.f32 %v3383_v49, 0.0 }
 0x760   : > { %v13825_v61 = vpop.f32.mrf.mxu1  ;;  %19524 = vst [vmem:[#allocation121_spill] sm:$0xff] %v13838_v23 }
 0x761   : > { %19520 = vst [vmem:[#allocation283_spill] sm:$0xff] %v13825_v61  ;;  %19525 = vst [vmem:[#allocation122_spill] sm:$0xff] %v13840_v20  ;;  %v13844_v61 = vpop.f32.mrf.mxu0  ;;  %v5151_v54 = vmax.f32 %v13838_v23, %v13840_v20  ;;  %v3852_v13 = vmax.f32 %v3850_v46, %v13853_v15 }
 0x762   : > { %v7907_v9 = vpop.f32.mrf.mxu1  ;;  %19526 = vst [vmem:[#allocation285_spill] sm:$0xff] %v13844_v61  ;;  %19529 = vst [vmem:[#allocation286_spill] sm:$0xff] %v13853_v15  ;;  %v13857_v61 = vmax.f32 %v3211_v25, 0.0  ;;  %v3985_v25 = vmax.f32 %v3983_v5, %v13868_v3 }
 0x763   : > { %v19530_v9 = vld [vmem:[#allocation124_spill] sm:$0xff]  ;;  %v13863_v57 = vpop.f32.mrf.mxu0  ;;  %19533 = vst [vmem:[#allocation288_spill] sm:$0xff] %v13868_v3 }
 0x764   : > { %v5990_v55 = vpop.xlane.xlu0 %5989  ;;  %5993 = vmax.xlane.f32.xlu0 %v5149_v40  ;;  %v13850_v50 = vpop.f32.mrf.mxu1  ;;  %v3219_v10 = vadd.f32 %v19530_v9, %v2161_v29  ;;  %19531 = vst [vmem:[#allocation124_spill] sm:$0xff] %v13857_v61  ;;  %v6405_v29 = vpack.c.bf16 %v13658_v21, %v13432_v28  ;;  %v3377_v9 = vadd.f32 %v13091_v48, %v2321_v17 }
 0x765   : > { %19528 = vst [vmem:[#allocation123_spill] sm:$0xff] %v13850_v50  ;;  %v6406_v41 = vpack.c.bf16 %v5990_v55, %v13452_v38  ;;  %v13865_v40 = vpop.permute.xlu1 %2275  ;;  %v13870_v38 = vmax.f32 %v3217_v14, 0.0  ;;  %v13882_v49 = vpop.f32.mrf.mxu0  ;;  %v6404_v21 = vpack.c.bf16 %v13617_v27, %v13418_v4  ;;  %v19548_v50 = vld [vmem:[#allocation223_spill] sm:$0xff] }
 0x766   : > { %v7910_v56 = vpop.f32.mrf.mxu1  ;;  %v13878_v12 = vmax.f32 %v3219_v10, 0.0 }
 0x767   : > { %8089 = vmatpush2.bf16.msra.mxu1 %v6406_v41  ;;  %19534 = vst [vmem:[#allocation289_spill] sm:$0xff] %v13870_v38  ;;  %v5153_v41 = vmax.f32 %v13857_v61, %v13859_v22  ;;  %v3854_v14 = vmax.f32 %v3852_v13, %v13870_v38  ;;  %v3379_v56 = vadd.f32 %v13101_v59, %v2321_v17 }
 0x768   : > { %5997 = vmax.xlane.f32.xlu0 %v5151_v54  ;;  %v13872_v55 = vpop.f32.mrf.mxu1  ;;  %8090 = vmatprep.subr.bf16.mxu1 %v19393_v31  ;;  %19536 = vst [vmem:[#allocation291_spill] sm:$0xff] %v13878_v12  ;;  %v3987_v5 = vmax.f32 %v3985_v25, %v13878_v12  ;;  %v5155_v13 = vmax.f32 %v13807_v0, %v13818_v39 }
 0x769   : > { %19535 = vst [vmem:[#allocation290_spill] sm:$0xff] %v13872_v55  ;;  %v13892_v10 = vpop.permute.xlu1 %2435  ;;  %v6403_v25 = vpack.c.bf16 %v13585_v47, %v13393_v52  ;;  %v13912_v17 = vmax.f32 %v3379_v56, 0.0  ;;  %v3373_v47 = vadd.f32 %v13075_v7, %v13660_v53  ;;  %v19544_v55 = vld [vmem:[#allocation217_spill] sm:$0xff] }
 0x76a   : > { %v7915_v46 = vpop.f32.mrf.mxu1  ;;  %v3989_v59 = vmax.f32 %v3987_v5, %v13859_v22  ;;  %v3361_v7 = vadd.f32 %v19544_v55, %v13734_v16  ;;  %v19560_v22 = vld [vmem:[#allocation111_spill] sm:$0xff] }
 0x76b   : > { %8091 = vmatpush2.bf16.msra.mxu1 %v6405_v29  ;;  %v13899_v29 = vpop.f32.mrf.mxu0  ;;  %v13902_v46 = vmax.f32 %v3377_v9, 0.0  ;;  %19540 = vst [vmem:[#allocation295_spill] sm:$0xff] %v13912_v17 }
 0x76c   : > { %v13886_v54 = vpop.permute.xlu0 %2150  ;;  %6001 = vmax.xlane.f32.xlu0 %v5153_v41  ;;  %v13888_v28 = vpop.f32.mrf.mxu1  ;;  %8092 = vmatprep.subr.bf16.mxu1 %v19393_v31  ;;  %v3856_v41 = vmax.f32 %v3854_v14, %v13857_v61  ;;  %v5157_v14 = vmax.f32 %v13750_v18, %v13752_v19 }
 0x76d   : > { %19537 = vst [vmem:[#allocation292_spill] sm:$0xff] %v13888_v28  ;;  %19538 = vst [vmem:[#allocation293_spill] sm:$0xff] %v13902_v46 }
 0x76e   : > { %v7918_v48 = vpop.f32.mrf.mxu1  ;;  %v3858_v52 = vmax.f32 %v3856_v41, %v13902_v46 }
 0x76f   : > { %8093 = vmatpush2.bf16.msra.mxu1 %v6404_v21  ;;  %v3371_v21 = vadd.f32 %v13060_v33, %v13660_v53  ;;  %v13918_v48 = vpop.f32.mrf.mxu0  ;;  %v19542_v33 = vld [vmem:[#allocation247_spill] sm:$0xff] }
 0x770   : > { %v13904_v4 = vpop.permute.xlu0 %2310  ;;  %6005 = vmax.xlane.f32.xlu0 %v5155_v13  ;;  %v13906_v27 = vpop.f32.mrf.mxu1  ;;  %8094 = vmatprep.subr.bf16.mxu1 %v19393_v31 }
 0x771   : > { %19539 = vst [vmem:[#allocation294_spill] sm:$0xff] %v13906_v27  ;;  %v13920_v13 = vpop.permute.xlu1 %2265  ;;  %v6402_v27 = vpack.c.bf16 %v19542_v33, %v13370_v32  ;;  %v13931_v28 = vmax.f32 %v3371_v21, 0.0  ;;  %v13937_v53 = vpop.f32.mrf.mxu0  ;;  %v19546_v32 = vld [vmem:[#allocation218_spill] sm:$0xff] }
 0x772   : > { %v7923_v9 = vpop.f32.mrf.mxu1  ;;  %v3363_v33 = vadd.f32 %v19546_v32, %v13734_v16  ;;  %v5161_v16 = vmax.f32 %v13633_v60, %v13640_v42  ;;  %v13960_v32 = vmax.f32 %v3361_v7, 0.0  ;;  %v19558_v7 = vld [vmem:[#allocation115_spill] sm:$0xff] }
 0x773   : > { %8095 = vmatpush2.bf16.msra.mxu1 %v6403_v25  ;;  %v3991_v9 = vmax.f32 %v3989_v59, %v13912_v17  ;;  %19543 = vst [vmem:[#allocation247_spill] sm:$0xff] %v13931_v28  ;;  %v5159_v25 = vmax.f32 %v13709_v26, %v13715_v6 }
 0x774   : > { %v2141_v5 = vpop.permute.xlu0 %2140  ;;  %6009 = vmax.xlane.f32.xlu0 %v5157_v14  ;;  %v13925_v56 = vpop.f32.mrf.mxu1  ;;  %8096 = vmatprep.subr.bf16.mxu1 %v19393_v31  ;;  %v3860_v14 = vmax.f32 %v3858_v52, %v13931_v28  ;;  %19552 = vst [vmem:[#allocation223_spill] sm:$0xff] %v13960_v32  ;;  %v13967_v39 = vmax.f32 %v3363_v33, 0.0  ;;  %v19562_v33 = vld [vmem:[#allocation214_spill] sm:$0xff] }
 0x775   : > { %19541 = vst [vmem:[#allocation296_spill] sm:$0xff] %v13925_v56  ;;  %v13940_v56 = vmax.f32 %v3373_v47, 0.0  ;;  %v19551_v47 = vld [vmem:[#allocation206_spill] sm:$0xff]  ;;  %v13956_v19 = vpop.permute.xlu1 %2425  ;;  %v3197_v42 = vadd.f32 %v19558_v7, %v2141_v5  ;;  %v19566_v7 = vld [vmem:[#allocation235_spill] sm:$0xff] }
 0x776   : > { %v7926_v41 = vpop.f32.mrf.mxu1  ;;  %v3343_v26 = vadd.f32 %v19551_v47, %v13800_v34 }
 0x777   : > { %8097 = vmatpush2.bf16.msra.mxu1 %v6402_v27  ;;  %19545 = vst [vmem:[#allocation217_spill] sm:$0xff] %v13940_v56  ;;  %v19549_v41 = vld [vmem:[#allocation142_spill] sm:$0xff]  ;;  %v3993_v55 = vmax.f32 %v3991_v9, %v13940_v56  ;;  %v19550_v27 = vld [vmem:[#allocation205_spill] sm:$0xff] }
 0x778   : > { %v13944_v59 = vpop.permute.xlu0 %2300  ;;  %6013 = vmax.xlane.f32.xlu0 %v5159_v25  ;;  %v13946_v21 = vpop.f32.mrf.mxu1  ;;  %v6401_v6 = vpack.c.bf16 %v19549_v41, %v19548_v50  ;;  %8098 = vmatprep.subr.bf16.mxu1 %v19393_v31  ;;  %v3341_v52 = vadd.f32 %v19550_v27, %v13800_v34  ;;  %v5162_v50 = vmax.f32 %v13622_v44, %v13629_v24  ;;  %v19553_v9 = vld [vmem:[#allocation222_spill] sm:$0xff]  ;;  %v19554_v41 = vld [vmem:[#allocation239_spill] sm:$0xff]  ;;  %v19556_v34 = vld [vmem:[#allocation213_spill] sm:$0xff] }
 0x779   : > { %19547 = vst [vmem:[#allocation218_spill] sm:$0xff] %v13946_v21  ;;  %v3500_v21 = vpop.f32.mrf.mxu0  ;;  %v6400_v18 = vpack.c.bf16 %v19554_v41, %v19553_v9  ;;  %v3862_v27 = vmax.f32 %v3860_v14, %v13838_v23  ;;  %19555 = vst [vmem:[#allocation142_spill] sm:$0xff] %v13967_v39  ;;  %v3351_v47 = vadd.f32 %v19556_v34, %v13776_v63  ;;  %v19561_v44 = vld [vmem:[#allocation112_spill] sm:$0xff] }
 0x77a   : > { %v7931_v25 = vpop.f32.mrf.mxu1  ;;  %v3995_v14 = vmax.f32 %v3993_v55, %v13840_v20  ;;  %v3353_v9 = vadd.f32 %v19562_v33, %v13776_v63  ;;  %v13981_v41 = vmax.f32 %v3341_v52, 0.0  ;;  %v3501_v63 = vadd.f32 %v3500_v21, %v13834_v58  ;;  %v19570_v52 = vld [vmem:[#allocation119_spill] sm:$0xff]  ;;  %v19572_v21 = vld [vmem:[#allocation120_spill] sm:$0xff] }
 0x77b   : > { %8099 = vmatpush2.bf16.msra.mxu1 %v6401_v6  ;;  %v19559_v6 = vld [vmem:[#allocation116_spill] sm:$0xff]  ;;  %v13993_v55 = vmax.f32 %v3351_v47, 0.0  ;;  %v3207_v33 = vadd.f32 %v19570_v52, %v13886_v54  ;;  %v14014_v47 = vmax.f32 %v3197_v42, 0.0  ;;  %v19576_v42 = vld [vmem:[#allocation201_spill] sm:$0xff] }
 0x77c   : > { %v2131_v0 = vpop.permute.xlu0 %2130  ;;  %6017 = vmax.xlane.f32.xlu0 %v5161_v16  ;;  %v13971_v25 = vpop.f32.mrf.mxu1  ;;  %v3199_v60 = vadd.f32 %v19559_v6, %v2141_v5  ;;  %8100 = vmatprep.subr.bf16.mxu1 %v19393_v31  ;;  %19563 = vst [vmem:[#allocation206_spill] sm:$0xff] %v13981_v41  ;;  %v13983_v16 = vmax.f32 %v3343_v26, 0.0  ;;  %v3864_v5 = vmax.f32 %v3862_v27, %v13960_v32 }
 0x77d   : > { %19557 = vst [vmem:[#allocation205_spill] sm:$0xff] %v13971_v25  ;;  %v3187_v24 = vadd.f32 %v19560_v22, %v2131_v0  ;;  %v3189_v61 = vadd.f32 %v19561_v44, %v2131_v0  ;;  %v19565_v25 = vld [vmem:[#allocation221_spill] sm:$0xff]  ;;  %v3502_v22 = vpop.f32.mrf.mxu0  ;;  %v3997_v0 = vmax.f32 %v3995_v14, %v13967_v39  ;;  %19569 = vst [vmem:[#allocation115_spill] sm:$0xff] %v13993_v55  ;;  %v13996_v26 = vpop.permute.xlu1 %2255 }
 0x77e   : > { %19564 = vst [vmem:[#allocation222_spill] sm:$0xff] %v13983_v16  ;;  %v7934_v34 = vpop.f32.mrf.mxu1  ;;  %v6399_v23 = vpack.c.bf16 %v19566_v7, %v19565_v25  ;;  %v3209_v27 = vadd.f32 %v19572_v21, %v13886_v54  ;;  %19573 = vst [vmem:[#allocation111_spill] sm:$0xff] %v14014_v47  ;;  %v14016_v25 = vmax.f32 %v3199_v60, 0.0  ;;  %v3866_v14 = vmax.f32 %v3864_v5, %v13814_v35 }
 0x77f   : > { %v13988_v6 = vmax.f32 %v3187_v24, 0.0  ;;  %v13990_v44 = vmax.f32 %v3189_v61, 0.0  ;;  %8101 = vmatpush2.bf16.msra.mxu1 %v6400_v18  ;;  %v14003_v24 = vld [vmem:[%s18428_s11 + $0x48] sm:$0xff]  ;;  %v14022_v34 = vmax.f32 %v3353_v9, 0.0  ;;  %v3503_v7 = vadd.f32 %v3502_v22, %v13834_v58 }
 0x780   : > { %6019 = vmax.xlane.f32.xlu0 %v5162_v50  ;;  %v14008_v18 = vld [vmem:[%s18428_s11 + $0x68] sm:$0xff]  ;;  %v14010_v61 = vpop.f32.mrf.mxu1  ;;  %19574 = vst [vmem:[#allocation112_spill] sm:$0xff] %v14016_v25  ;;  %8102 = vmatprep.subr.bf16.mxu1 %v19393_v31  ;;  %v5179_v52 = vmax.f32 %v13981_v41, %v13983_v16  ;;  %v3331_v54 = vadd.f32 %v19576_v42, %v13865_v40  ;;  %v14033_v9 = vmax.f32 %v3501_v63, 0.0  ;;  %v14037_v20 = vpop.permute.xlu0 %2290 }
 0x781   : > { %19567 = vst [vmem:[#allocation239_spill] sm:$0xff] %v13988_v6  ;;  %19568 = vst [vmem:[#allocation213_spill] sm:$0xff] %v13990_v44  ;;  %v5148_v50 = vmax.f32 %v13988_v6, %v13990_v44  ;;  %v10151_v60 = vcombine.high %v14003_v24, %v14008_v18  ;;  %v3999_v21 = vmax.f32 %v3997_v0, %v13816_v43  ;;  %v19578_v58 = vld [vmem:[#allocation103_spill] sm:$0xff] }
 0x782   : > { %19571 = vst [vmem:[#allocation116_spill] sm:$0xff] %v14010_v61  ;;  %19575 = vst [vmem:[#allocation214_spill] sm:$0xff] %v14022_v34  ;;  %v7939_v61 = vpop.f32.mrf.mxu1  ;;  %v3868_v5 = vmax.f32 %v3866_v14, %v13993_v55  ;;  %v3333_v22 = vadd.f32 %v19578_v58, %v13865_v40  ;;  %v5150_v0 = vmax.f32 %v14014_v47, %v14016_v25  ;;  %v14049_v14 = vmax.f32 %v3503_v7, 0.0  ;;  %v19584_v58 = vld [vmem:[#allocation83_spill] sm:$0xff] }
 0x783   : > { %5991 = vmax.xlane.f32.xlu1 %v5148_v50  ;;  %8103 = vmatpush2.bf16.msra.mxu1 %v6399_v23  ;;  %19577 = vst [vmem:[#allocation221_spill] sm:$0xff] %v14033_v9  ;;  %v3491_v61 = vadd.f32 %v13882_v49, %v13892_v10  ;;  %v14041_v50 = vmax.f32 %v3207_v33, 0.0  ;;  %v14043_v23 = vmax.f32 %v3209_v27, 0.0  ;;  %v4001_v63 = vmax.f32 %v3999_v21, %v14022_v34 }
 0x784   : > { %6053 = vmax.xlane.f32.xlu0 %v5179_v52  ;;  %8650 = vmatprep.subr.bf16.mxu1 %v19393_v31  ;;  %19581 = vst [vmem:[#allocation120_spill] sm:$0xff] %v14049_v14  ;;  %v3493_v40 = vadd.f32 %v13899_v29, %v13892_v10  ;;  %v2416_v52 = vpop.permute.xlu1 %2415  ;;  %v19582_v49 = vcombine.low %v13381_v11, %v13386_v62  ;;  %v14059_v42 = vmax.f32 %v3331_v54, 0.0  ;;  %v14064_v10 = vmax.f32 %v3333_v22, 0.0  ;;  %v19586_v29 = vld [vmem:[#allocation84_spill] sm:$0xff] }
 0x785   : > { %19579 = vst [vmem:[#allocation235_spill] sm:$0xff] %v14041_v50  ;;  %19580 = vst [vmem:[#allocation119_spill] sm:$0xff] %v14043_v23  ;;  %v5181_v33 = vmax.f32 %v13993_v55, %v14022_v34  ;;  %v3870_v27 = vmax.f32 %v3868_v5, %v13981_v41  ;;  %v3321_v21 = vadd.f32 %v19584_v58, %v13920_v13  ;;  %v6136_v54 = vld [vmem:[%s18428_s11 + $0x88] sm:$0xff] }
 0x786   : > { %8105 = vmatmul.mubr.bf16.vlgmr.msra.gmra.mxu1 %v19582_v49  ;;  %19583 = vst [vmem:[#allocation201_spill] sm:$0xff] %v14059_v42  ;;  %v4003_v7 = vmax.f32 %v4001_v63, %v13983_v16  ;;  %19585 = vst [vmem:[#allocation103_spill] sm:$0xff] %v14064_v10  ;;  %v3323_v62 = vadd.f32 %v19586_v29, %v13920_v13  ;;  %v10150_v11 = vcombine.low %v14003_v24, %v14008_v18  ;;  %v6140_v5 = vld [vmem:[%s18428_s11 + $0xa8] sm:$0xff]  ;;  %v14088_v49 = vpop.permute.xlu0 %2280 }
 0x787   : > { %5995 = vmax.xlane.f32.xlu1 %v5150_v0  ;;  %8112 = vmatprep.mubr.bf16.mxu1 %v10151_v60  ;;  %v3872_v60 = vmax.f32 %v3870_v27, %v14033_v9  ;;  %v14077_v0 = vmax.f32 %v3491_v61, 0.0  ;;  %v3481_v22 = vadd.f32 %v13798_v45, %v13956_v19  ;;  %v5152_v13 = vmax.f32 %v14041_v50, %v14043_v23  ;;  %v19590_v45 = vld [vmem:[#allocation189_spill] sm:$0xff]  ;;  %v19613_v41 = vld [vmem:[#allocation268_spill] sm:$0xff] }
 0x788   : > { %6057 = vmax.xlane.f32.xlu0 %v5181_v33  ;;  %v4005_v24 = vmax.f32 %v4003_v7, %v14049_v14  ;;  %v14084_v18 = vmax.f32 %v3493_v40, 0.0  ;;  %v3483_v63 = vadd.f32 %v13820_v37, %v13956_v19  ;;  %v5183_v33 = vmax.f32 %v13960_v32, %v13967_v39  ;;  %v19592_v19 = vld [vmem:[#allocation192_spill] sm:$0xff]  ;;  %v2246_v34 = vpop.permute.xlu1 %2245 }
 0x789   : > { %19587 = vst [vmem:[#allocation83_spill] sm:$0xff] %v14077_v0  ;;  %v3874_v61 = vmax.f32 %v3872_v60, %v14059_v42  ;;  %v14093_v27 = vmax.f32 %v3321_v21, 0.0  ;;  %v3311_v58 = vadd.f32 %v19590_v45, %v13996_v26  ;;  %v10159_v29 = vcombine.high %v6136_v54, %v6140_v5 }
 0x78a   : > { %19588 = vst [vmem:[#allocation84_spill] sm:$0xff] %v14084_v18  ;;  %v4007_v40 = vmax.f32 %v4005_v24, %v14064_v10  ;;  %v14098_v7 = vmax.f32 %v3323_v62, 0.0  ;;  %v3313_v37 = vadd.f32 %v19592_v19, %v13996_v26  ;;  %v14103_v32 = vmax.f32 %v3481_v22, 0.0  ;;  %v19596_v22 = vld [vmem:[#allocation181_spill] sm:$0xff]  ;;  %v14122_v55 = vpop.permute.xlu0 %2440 }
 0x78b   : > { %19589 = vst [vmem:[#allocation297_spill] sm:$0xff] %v14093_v27  ;;  %5999 = vmax.xlane.f32.xlu1 %v5152_v13  ;;  %v3876_v39 = vmax.f32 %v3874_v61, %v14077_v0  ;;  %v3471_v21 = vadd.f32 %v13742_v2, %v2416_v52  ;;  %v5154_v60 = vmax.f32 %v13870_v38, %v13878_v12  ;;  %v14109_v45 = vmax.f32 %v3483_v63, 0.0  ;;  %v19598_v63 = vld [vmem:[#allocation182_spill] sm:$0xff] }
 0x78c   : > { %19591 = vst [vmem:[#allocation189_spill] sm:$0xff] %v14098_v7  ;;  %6061 = vmax.xlane.f32.xlu0 %v5183_v33  ;;  %19593 = vst [vmem:[#allocation192_spill] sm:$0xff] %v14103_v32  ;;  %v4009_v13 = vmax.f32 %v4007_v40, %v14084_v18  ;;  %v3473_v62 = vadd.f32 %v13754_v8, %v2416_v52  ;;  %v5185_v26 = vmax.f32 %v13931_v28, %v13940_v56  ;;  %v6144_v8 = vld [vmem:[%s18428_s11 + $0xc8] sm:$0xff]  ;;  %v19604_v56 = vld [vmem:[#allocation270_spill] sm:$0xff] }
 0x78d   : > { %19594 = vst [vmem:[#allocation298_spill] sm:$0xff] %v14109_v45  ;;  %v3878_v24 = vmax.f32 %v3876_v39, %v14093_v27  ;;  %v14115_v33 = vmax.f32 %v3311_v58, 0.0  ;;  %v3301_v61 = vadd.f32 %v19596_v22, %v2246_v34  ;;  %v14119_v19 = vmax.f32 %v3313_v37, 0.0  ;;  %v6148_v39 = vld [vmem:[%s18428_s11 + $0xe8] sm:$0xff] }
 0x78e   : > { %8113 = vmatmul.mubr.bf16.gmra.mxu1 %v10150_v11  ;;  %v4011_v2 = vmax.f32 %v4009_v13, %v14098_v7  ;;  %v3303_v40 = vadd.f32 %v19598_v63, %v2246_v34  ;;  %v14131_v11 = vmax.f32 %v3471_v21, 0.0  ;;  %v5156_v58 = vmax.f32 %v13785_v30, %v13790_v51  ;;  %v2406_v63 = vpop.permute.xlu1 %2405 }
 0x78f   : > { %19595 = vst [vmem:[#allocation299_spill] sm:$0xff] %v14115_v33  ;;  %6003 = vmax.xlane.f32.xlu1 %v5154_v60  ;;  %8120 = vmatprep.mubr.bf16.mxu1 %v10159_v29  ;;  %19597 = vst [vmem:[#allocation181_spill] sm:$0xff] %v14119_v19  ;;  %v3880_v52 = vmax.f32 %v3878_v24, %v14103_v32  ;;  %v14136_v29 = vmax.f32 %v3473_v62, 0.0  ;;  %v5187_v37 = vmax.f32 %v13853_v15, %v13868_v3  ;;  %v19603_v62 = vld [vmem:[#allocation272_spill] sm:$0xff]  ;;  %v19607_v15 = vld [vmem:[#allocation255_spill] sm:$0xff] }
 0x790   : > { %6065 = vmax.xlane.f32.xlu0 %v5185_v26  ;;  %19599 = vst [vmem:[#allocation182_spill] sm:$0xff] %v14131_v11  ;;  %v4013_v34 = vmax.f32 %v4011_v2, %v14109_v45  ;;  %v10158_v60 = vcombine.low %v6136_v54, %v6140_v5  ;;  %v14141_v26 = vmax.f32 %v3301_v61, 0.0  ;;  %v10167_v22 = vcombine.high %v6144_v8, %v6148_v39  ;;  %v2271_v54 = vpop.permute.xlu0 %2270  ;;  %v19605_v5 = vld [vmem:[#allocation278_spill] sm:$0xff]  ;;  %v19606_v61 = vld [vmem:[#allocation128_spill] sm:$0xff] }
 0x791   : > { %19600 = vst [vmem:[#allocation300_spill] sm:$0xff] %v14136_v29  ;;  %v3882_v13 = vmax.f32 %v3880_v52, %v14115_v33  ;;  %v14144_v24 = vmax.f32 %v3303_v40, 0.0  ;;  %v5158_v28 = vmax.f32 %v19604_v56, %v19603_v62  ;;  %v5189_v52 = vmax.f32 %v19606_v61, %v19605_v5  ;;  %v6152_v40 = vld [vmem:[%s18428_s11 + $0x108] sm:$0xff] }
 0x792   : > { %19601 = vst [vmem:[#allocation301_spill] sm:$0xff] %v14141_v26  ;;  %v4015_v21 = vmax.f32 %v4013_v34, %v14119_v19  ;;  %v3461_v34 = vadd.f32 %v19607_v15, %v2406_v63  ;;  %v19609_v5 = vld [vmem:[#allocation199_spill] sm:$0xff]  ;;  %v19611_v15 = vld [vmem:[#allocation250_spill] sm:$0xff]  ;;  %v19614_v62 = vld [vmem:[#allocation132_spill] sm:$0xff]  ;;  %v10166_v51 = vcombine.low %v6144_v8, %v6148_v39  ;;  %v2236_v39 = vpop.permute.xlu1 %2235 }
 0x793   : > { %6007 = vmax.xlane.f32.xlu1 %v5156_v58  ;;  %19602 = vst [vmem:[#allocation302_spill] sm:$0xff] %v14144_v24  ;;  %v3884_v2 = vmax.f32 %v3882_v13, %v14131_v11  ;;  %v3327_v61 = vadd.f32 %v19609_v5, %v2271_v54  ;;  %v5191_v56 = vmax.f32 %v19614_v62, %v19613_v41  ;;  %v19620_v41 = vld [vmem:[#allocation243_spill] sm:$0xff] }
 0x794   : > { %6069 = vmax.xlane.f32.xlu0 %v5187_v37  ;;  %v4017_v3 = vmax.f32 %v4015_v21, %v14136_v29  ;;  %v6156_v37 = vld [vmem:[%s18428_s11 + $0x128] sm:$0xff]  ;;  %v14169_v38 = vmax.f32 %v3461_v34, 0.0 }
 0x795   : > { %v3886_v58 = vmax.f32 %v3884_v2, %v14141_v26  ;;  %v19610_v2 = vld [vmem:[#allocation99_spill] sm:$0xff]  ;;  %v10175_v30 = vcombine.high %v6152_v40, %v6156_v37 }
 0x796   : > { %8121 = vmatmul.mubr.bf16.gmra.mxu1 %v10158_v60  ;;  %v4019_v13 = vmax.f32 %v4017_v3, %v14144_v24  ;;  %v19608_v60 = vld [vmem:[#allocation261_spill] sm:$0xff]  ;;  %v3329_v16 = vadd.f32 %v19610_v2, %v2271_v54  ;;  %19615 = vst [vmem:[#allocation255_spill] sm:$0xff] %v14169_v38  ;;  %v19616_v3 = vld [vmem:[#allocation219_spill] sm:$0xff] }
 0x797   : > { %6011 = vmax.xlane.f32.xlu1 %v5158_v28  ;;  %8128 = vmatprep.mubr.bf16.mxu1 %v10167_v22  ;;  %v3463_v21 = vadd.f32 %v19608_v60, %v2406_v63  ;;  %v19612_v28 = vld [vmem:[#allocation248_spill] sm:$0xff]  ;;  %v3831_v12 = vmax.f32 %v14041_v50, %v3886_v58  ;;  %v3367_v63 = vadd.f32 %v19616_v3, %v13904_v4  ;;  %v19619_v2 = vld [vmem:[#allocation245_spill] sm:$0xff]  ;;  %v19621_v58 = vld [vmem:[#allocation203_spill] sm:$0xff]  ;;  %v14184_v3 = vmax.f32 %v3327_v61, 0.0  ;;  %v2396_v50 = vpop.permute.xlu1 %2395 }
 0x798   : > { %6073 = vmax.xlane.f32.xlu0 %v5189_v52  ;;  %v5160_v22 = vmax.f32 %v19612_v28, %v19611_v15  ;;  %v19617_v52 = vld [vmem:[#allocation220_spill] sm:$0xff]  ;;  %v3964_v54 = vmax.f32 %v14043_v23, %v4019_v13  ;;  %v5163_v8 = vmax.f32 %v19620_v41, %v19619_v2  ;;  %v3337_v34 = vadd.f32 %v19621_v58, %v14088_v49  ;;  %v19622_v62 = vld [vmem:[#allocation107_spill] sm:$0xff]  ;;  %v19626_v13 = vld [vmem:[#allocation134_spill] sm:$0xff] }
 0x799   : > { %v3369_v5 = vadd.f32 %v19617_v52, %v13904_v4  ;;  %v14176_v60 = vmax.f32 %v3463_v21, 0.0  ;;  %v3339_v15 = vadd.f32 %v19622_v62, %v14088_v49  ;;  %19623 = vst [vmem:[#allocation199_spill] sm:$0xff] %v14184_v3  ;;  %v14186_v28 = vmax.f32 %v3329_v16, 0.0  ;;  %v19625_v4 = vld [vmem:[#allocation264_spill] sm:$0xff]  ;;  %v19629_v2 = vld [vmem:[#allocation169_spill] sm:$0xff]  ;;  %v19630_v62 = vld [vmem:[#allocation170_spill] sm:$0xff] }
 0x79a   : > { %v5193_v21 = vmax.f32 %v19626_v13, %v19625_v4  ;;  %v3291_v49 = vadd.f32 %v19629_v2, %v2236_v39  ;;  %v3293_v61 = vadd.f32 %v19630_v62, %v2236_v39  ;;  %v19631_v16 = vld [vmem:[#allocation209_spill] sm:$0xff]  ;;  %v19635_v39 = vld [vmem:[#allocation260_spill] sm:$0xff]  ;;  %v14217_v13 = vpop.permute.xlu0 %2430 }
 0x79b   : > { %6015 = vmax.xlane.f32.xlu1 %v5160_v22  ;;  %19618 = vst [vmem:[#allocation261_spill] sm:$0xff] %v14176_v60  ;;  %19624 = vst [vmem:[#allocation99_spill] sm:$0xff] %v14186_v28  ;;  %v14191_v22 = vmax.f32 %v3367_v63, 0.0  ;;  %v14193_v52 = vmax.f32 %v3369_v5, 0.0  ;;  %v3966_v58 = vmax.f32 %v3964_v54, %v14176_v60  ;;  %v6164_v63 = vld [vmem:[%s18428_s11 + $0x168] sm:$0xff]  ;;  %v14208_v54 = vmax.f32 %v3337_v34, 0.0 }
 0x79c   : > { %6077 = vmax.xlane.f32.xlu0 %v5191_v56  ;;  %v3833_v56 = vmax.f32 %v3831_v12, %v14169_v38  ;;  %v6160_v12 = vld [vmem:[%s18428_s11 + $0x148] sm:$0xff]  ;;  %v14210_v2 = vmax.f32 %v3339_v15, 0.0  ;;  %v14222_v34 = vmax.f32 %v3293_v61, 0.0 }
 0x79d   : > { %19627 = vst [vmem:[#allocation219_spill] sm:$0xff] %v14191_v22  ;;  %19628 = vst [vmem:[#allocation220_spill] sm:$0xff] %v14193_v52  ;;  %v10183_v41 = vcombine.high %v6160_v12, %v6164_v63  ;;  %v3968_v23 = vmax.f32 %v3966_v58, %v14193_v52  ;;  %v19639_v15 = vld [vmem:[#allocation215_spill] sm:$0xff] }
 0x79e   : > { %8129 = vmatmul.mubr.bf16.gmra.mxu1 %v10166_v51  ;;  %v3347_v51 = vadd.f32 %v19631_v16, %v14037_v20  ;;  %19633 = vst [vmem:[#allocation203_spill] sm:$0xff] %v14208_v54  ;;  %19634 = vst [vmem:[#allocation107_spill] sm:$0xff] %v14210_v2  ;;  %v10174_v16 = vcombine.low %v6152_v40, %v6156_v37  ;;  %v3835_v4 = vmax.f32 %v3833_v56, %v14191_v22  ;;  %v19643_v58 = vld [vmem:[#allocation263_spill] sm:$0xff] }
 0x79f   : > { %6021 = vmax.xlane.f32.xlu1 %v5163_v8  ;;  %8136 = vmatprep.mubr.bf16.mxu1 %v10175_v30  ;;  %v19632_v30 = vld [vmem:[#allocation210_spill] sm:$0xff]  ;;  %v5176_v8 = vmax.f32 %v14184_v3, %v14186_v28  ;;  %19638 = vst [vmem:[#allocation170_spill] sm:$0xff] %v14222_v34 }
 0x7a0   : > { %6081 = vmax.xlane.f32.xlu0 %v5193_v21  ;;  %v3349_v5 = vadd.f32 %v19632_v30, %v14037_v20  ;;  %v19636_v21 = vld [vmem:[#allocation259_spill] sm:$0xff]  ;;  %v14220_v20 = vmax.f32 %v3291_v49, 0.0  ;;  %v3357_v30 = vadd.f32 %v19639_v15, %v13944_v59  ;;  %v14228_v37 = vmax.f32 %v3347_v51, 0.0  ;;  %v19644_v49 = vld [vmem:[#allocation262_spill] sm:$0xff] }
 0x7a1   : > { %v5194_v62 = vmax.f32 %v19636_v21, %v19635_v39  ;;  %v19640_v39 = vld [vmem:[#allocation216_spill] sm:$0xff]  ;;  %v5195_v61 = vmax.f32 %v19644_v49, %v19643_v58  ;;  %v19645_v21 = vld [vmem:[#allocation246_spill] sm:$0xff] }
 0x7a2   : > { %19637 = vst [vmem:[#allocation169_spill] sm:$0xff] %v14220_v20  ;;  %v3359_v40 = vadd.f32 %v19640_v39, %v13944_v59  ;;  %19641 = vst [vmem:[#allocation209_spill] sm:$0xff] %v14228_v37  ;;  %v14230_v56 = vmax.f32 %v3349_v5, 0.0  ;;  %v3837_v15 = vmax.f32 %v3835_v4, %v14220_v20  ;;  %v3451_v43 = vadd.f32 %v19645_v21, %v2396_v50  ;;  %v19646_v59 = vld [vmem:[#allocation136_spill] sm:$0xff]  ;;  %v2261_v4 = vpop.permute.xlu0 %2260 }
 0x7a3   : > { %6047 = vmax.xlane.f32.xlu1 %v5176_v8  ;;  %v5178_v8 = vmax.f32 %v14208_v54, %v14210_v2  ;;  %v3453_v51 = vadd.f32 %v19646_v59, %v2396_v50  ;;  %v6168_v5 = vld [vmem:[%s18428_s11 + $0x188] sm:$0xff]  ;;  %v5177_v50 = vmax.f32 %v14059_v42, %v14064_v10  ;;  %v10182_v21 = vcombine.low %v6160_v12, %v6164_v63 }
 0x7a4   : > { %6083 = vmax.xlane.f32.xlu0 %v5194_v62  ;;  %19642 = vst [vmem:[#allocation210_spill] sm:$0xff] %v14230_v56  ;;  %v3970_v62 = vmax.f32 %v3968_v23, %v14222_v34  ;;  %v6172_v39 = vld [vmem:[%s18428_s11 + $0x1a8] sm:$0xff]  ;;  %v5180_v23 = vmax.f32 %v14228_v37, %v14230_v56  ;;  %v14256_v58 = vmax.f32 %v3451_v43, 0.0  ;;  %v5175_v10 = vmax.f32 %v14093_v27, %v14098_v7 }
 0x7a6   : > { %8137 = vmatmul.mubr.bf16.gmra.mxu1 %v10174_v16  ;;  %v14246_v16 = vmax.f32 %v3357_v30, 0.0  ;;  %v3972_v59 = vmax.f32 %v3970_v62, %v14016_v25  ;;  %19649 = vst [vmem:[#allocation246_spill] sm:$0xff] %v14256_v58  ;;  %v14258_v30 = vmax.f32 %v3453_v51, 0.0  ;;  %v14264_v12 = vpop.permute.xlu0 %2420  ;;  %v19652_v51 = vld [vmem:[#allocation158_spill] sm:$0xff] }
 0x7a7   : > { %6051 = vmax.xlane.f32.xlu1 %v5178_v8  ;;  %8144 = vmatprep.mubr.bf16.mxu1 %v10183_v41  ;;  %v14248_v41 = vmax.f32 %v3359_v40, 0.0  ;;  %v10191_v8 = vcombine.high %v6168_v5, %v6172_v39  ;;  %v2226_v40 = vpop.permute.xlu1 %2225 }
 0x7a8   : > { %6085 = vmax.xlane.f32.xlu0 %v5195_v61  ;;  %19647 = vst [vmem:[#allocation215_spill] sm:$0xff] %v14246_v16  ;;  %v3839_v61 = vmax.f32 %v3837_v15, %v14014_v47  ;;  %19650 = vst [vmem:[#allocation136_spill] sm:$0xff] %v14258_v30  ;;  %v3974_v43 = vmax.f32 %v3972_v59, %v14258_v30  ;;  %v19651_v15 = vld [vmem:[#allocation155_spill] sm:$0xff] }
 0x7a9   : > { %19648 = vst [vmem:[#allocation216_spill] sm:$0xff] %v14248_v41  ;;  %v5182_v49 = vmax.f32 %v14246_v16, %v14248_v41  ;;  %v3281_v62 = vadd.f32 %v19651_v15, %v2226_v40 }
 0x7aa   : > { %v3841_v63 = vmax.f32 %v3839_v61, %v14256_v58  ;;  %v10190_v61 = vcombine.low %v6168_v5, %v6172_v39  ;;  %v2251_v7 = vpop.permute.xlu0 %2250  ;;  %v5171_v5 = vmax.f32 %v14141_v26, %v14144_v24 }
 0x7ab   : > { %6055 = vmax.xlane.f32.xlu1 %v5180_v23  ;;  %v3283_v23 = vadd.f32 %v19652_v51, %v2226_v40  ;;  %v14282_v15 = vmax.f32 %v3281_v62, 0.0  ;;  %v2386_v42 = vpop.permute.xlu1 %2385 }
 0x7ac   : > { %6049 = vmax.xlane.f32.xlu0 %v5177_v50  ;;  %v6176_v50 = vld [vmem:[%s18428_s11 + $0x1c8] sm:$0xff]  ;;  %v3843_v40 = vmax.f32 %v3841_v63, %v14246_v16 }
 0x7ad   : > { %19653 = vst [vmem:[#allocation155_spill] sm:$0xff] %v14282_v15  ;;  %v14284_v51 = vmax.f32 %v3283_v23, 0.0  ;;  %v19656_v23 = vld [vmem:[#allocation238_spill] sm:$0xff] }
 0x7ae   : > { %8145 = vmatmul.mubr.bf16.gmra.mxu1 %v10182_v21  ;;  %v6180_v21 = vld [vmem:[%s18428_s11 + $0x1e8] sm:$0xff]  ;;  %v3845_v39 = vmax.f32 %v3843_v40, %v14282_v15 }
 0x7af   : > { %6059 = vmax.xlane.f32.xlu1 %v5182_v49  ;;  %8152 = vmatprep.mubr.bf16.mxu1 %v10191_v8  ;;  %v5184_v49 = vmax.f32 %v14191_v22, %v14193_v52  ;;  %v5173_v8 = vmax.f32 %v14115_v33, %v14119_v19  ;;  %v10199_v59 = vcombine.high %v6176_v50, %v6180_v21  ;;  %v19662_v22 = vld [vmem:[#allocation274_spill] sm:$0xff] }
 0x7b0   : > { %6045 = vmax.xlane.f32.xlu0 %v5175_v10  ;;  %v3976_v10 = vmax.f32 %v3974_v43, %v14248_v41  ;;  %19654 = vst [vmem:[#allocation158_spill] sm:$0xff] %v14284_v51  ;;  %v5186_v52 = vmax.f32 %v13902_v46, %v13912_v17  ;;  %v19655_v43 = vld [vmem:[#allocation236_spill] sm:$0xff]  ;;  %v10198_v17 = vcombine.low %v6176_v50, %v6180_v21  ;;  %v2411_v46 = vpop.permute.xlu0 %2410  ;;  %v19663_v21 = vld [vmem:[#allocation258_spill] sm:$0xff] }
 0x7b1   : > { %v3441_v62 = vadd.f32 %v19655_v43, %v2386_v42  ;;  %v5207_v50 = vmax.f32 %v14103_v32, %v14109_v45  ;;  %v19670_v45 = vld [vmem:[#allocation187_spill] sm:$0xff] }
 0x7b2   : > { %v3978_v63 = vmax.f32 %v3976_v10, %v14284_v51 }
 0x7b3   : > { %6063 = vmax.xlane.f32.xlu1 %v5184_v49  ;;  %v3443_v49 = vadd.f32 %v19656_v23, %v2386_v42  ;;  %v14300_v40 = vmax.f32 %v3441_v62, 0.0  ;;  %v2216_v42 = vpop.permute.xlu1 %2215  ;;  %v19660_v23 = vld [vmem:[#allocation198_spill] sm:$0xff] }
 0x7b4   : > { %6041 = vmax.xlane.f32.xlu0 %v5173_v8  ;;  %v5188_v8 = vmax.f32 %v13823_v1, %v13828_v36  ;;  %v3319_v36 = vadd.f32 %v19660_v23, %v2261_v4  ;;  %v19661_v1 = vld [vmem:[#allocation276_spill] sm:$0xff]  ;;  %v2241_v32 = vpop.permute.xlu0 %2240 }
 0x7b5   : > { %19657 = vst [vmem:[#allocation236_spill] sm:$0xff] %v14300_v40  ;;  %v14302_v10 = vmax.f32 %v3443_v49, 0.0 }
 0x7b6   : > { %8153 = vmatmul.mubr.bf16.gmra.mxu1 %v10190_v61  ;;  %v5205_v61 = vmax.f32 %v14131_v11, %v14136_v29  ;;  %v5190_v29 = vmax.f32 %v19662_v22, %v19661_v1  ;;  %v14318_v23 = vmax.f32 %v3319_v36, 0.0 }
 0x7b7   : > { %6067 = vmax.xlane.f32.xlu1 %v5186_v52  ;;  %8160 = vmatprep.mubr.bf16.mxu1 %v10199_v59  ;;  %v3847_v52 = vmax.f32 %v3845_v39, %v13988_v6  ;;  %v3980_v59 = vmax.f32 %v3978_v63, %v13990_v44  ;;  %19658 = vst [vmem:[#allocation238_spill] sm:$0xff] %v14302_v10  ;;  %v19664_v39 = vld [vmem:[#allocation256_spill] sm:$0xff] }
 0x7b8   : > { %6037 = vmax.xlane.f32.xlu0 %v5171_v5  ;;  %v19659_v5 = vld [vmem:[#allocation195_spill] sm:$0xff]  ;;  %v5192_v63 = vmax.f32 %v19664_v39, %v19663_v21  ;;  %19668 = vst [vmem:[#allocation198_spill] sm:$0xff] %v14318_v23  ;;  %v5209_v21 = vmax.f32 %v14077_v0, %v14084_v18  ;;  %v19678_v18 = vld [vmem:[#allocation229_spill] sm:$0xff] }
 0x7b9   : > { %v3317_v43 = vadd.f32 %v19659_v5, %v2261_v4  ;;  %v3849_v62 = vmax.f32 %v3847_v52, %v14300_v40  ;;  %v3982_v49 = vmax.f32 %v3980_v59, %v14302_v10  ;;  %v19666_v5 = vld [vmem:[#allocation148_spill] sm:$0xff] }
 0x7ba   : > { %v3273_v11 = vadd.f32 %v19666_v5, %v2216_v42  ;;  %v19676_v5 = vld [vmem:[#allocation176_spill] sm:$0xff] }
 0x7bb   : > { %6071 = vmax.xlane.f32.xlu1 %v5188_v8  ;;  %v19665_v8 = vld [vmem:[#allocation145_spill] sm:$0xff]  ;;  %v14316_v4 = vmax.f32 %v3317_v43, 0.0  ;;  %v3851_v52 = vmax.f32 %v3849_v62, %v14228_v37  ;;  %v3984_v59 = vmax.f32 %v3982_v49, %v14230_v56  ;;  %v3299_v49 = vadd.f32 %v19676_v5, %v2241_v32 }
 0x7bc   : > { %6105 = vmax.xlane.f32.xlu0 %v5205_v61  ;;  %v3271_v61 = vadd.f32 %v19665_v8, %v2216_v42  ;;  %v14328_v42 = vmax.f32 %v3273_v11, 0.0  ;;  %v19680_v5 = vld [vmem:[#allocation269_spill] sm:$0xff] }
 0x7bd   : > { %19667 = vst [vmem:[#allocation195_spill] sm:$0xff] %v14316_v4  ;;  %v3469_v0 = vadd.f32 %v19680_v5, %v2411_v46 }
 0x7be   : > { %8161 = vmatmul.mubr.bf16.gmra.mxu1 %v10198_v17  ;;  %v19669_v17 = vld [vmem:[#allocation185_spill] sm:$0xff]  ;;  %v14326_v8 = vmax.f32 %v3271_v61, 0.0  ;;  %19672 = vst [vmem:[#allocation148_spill] sm:$0xff] %v14328_v42  ;;  %v14340_v61 = vpop.permute.xlu0 %2400  ;;  %v3986_v11 = vmax.f32 %v3984_v59, %v14328_v42 }
 0x7bf   : > { %6075 = vmax.xlane.f32.xlu1 %v5190_v29  ;;  %v3307_v1 = vadd.f32 %v19669_v17, %v2251_v7  ;;  %v3309_v29 = vadd.f32 %v19670_v45, %v2251_v7  ;;  %v5174_v7 = vmax.f32 %v14316_v4, %v14318_v23  ;;  %v5211_v45 = vmax.f32 %v14033_v9, %v14049_v14  ;;  %v19677_v17 = vld [vmem:[#allocation227_spill] sm:$0xff]  ;;  %v19679_v9 = vld [vmem:[#allocation265_spill] sm:$0xff] }
 0x7c0   : > { %6109 = vmax.xlane.f32.xlu0 %v5207_v50  ;;  %19671 = vst [vmem:[#allocation145_spill] sm:$0xff] %v14326_v8  ;;  %v2376_v50 = vpop.permute.xlu1 %2375  ;;  %v3988_v59 = vmax.f32 %v3986_v11, %v14210_v2 }
 0x7c1   : > { %v14330_v36 = vmax.f32 %v3307_v1, 0.0  ;;  %v14332_v43 = vmax.f32 %v3309_v29, 0.0  ;;  %v3853_v1 = vmax.f32 %v3851_v52, %v14326_v8  ;;  %v3431_v29 = vadd.f32 %v19677_v17, %v2376_v50 }
 0x7c2   : > { %v3433_v14 = vadd.f32 %v19678_v18, %v2376_v50  ;;  %v3497_v18 = vadd.f32 %v13918_v48, %v14122_v55  ;;  %v3499_v50 = vadd.f32 %v13937_v53, %v14122_v55  ;;  %v2231_v17 = vpop.permute.xlu0 %2230  ;;  %v14374_v48 = vmax.f32 %v3469_v0, 0.0 }
 0x7c3   : > { %6079 = vmax.xlane.f32.xlu1 %v5192_v63  ;;  %19673 = vst [vmem:[#allocation185_spill] sm:$0xff] %v14330_v36  ;;  %19674 = vst [vmem:[#allocation187_spill] sm:$0xff] %v14332_v43  ;;  %v19675_v63 = vld [vmem:[#allocation175_spill] sm:$0xff]  ;;  %v3855_v52 = vmax.f32 %v3853_v1, %v14208_v54  ;;  %v5201_v0 = vmax.f32 %v14256_v58, %v14258_v30 }
 0x7c4   : > { %6113 = vmax.xlane.f32.xlu0 %v5209_v21  ;;  %v3297_v62 = vadd.f32 %v19675_v63, %v2241_v32  ;;  %v5172_v21 = vmax.f32 %v14330_v36, %v14332_v43  ;;  %v5203_v63 = vmax.f32 %v14169_v38, %v14176_v60  ;;  %v3467_v32 = vadd.f32 %v19679_v9, %v2411_v46  ;;  %v19686_v1 = vld [vmem:[#allocation279_spill] sm:$0xff] }
 0x7c5   : > { %v14362_v9 = vmax.f32 %v3431_v29, 0.0  ;;  %v14364_v46 = vmax.f32 %v3433_v14, 0.0  ;;  %v3479_v11 = vadd.f32 %v19686_v1, %v14264_v12  ;;  %19688 = vst [vmem:[#allocation269_spill] sm:$0xff] %v14374_v48  ;;  %v14378_v55 = vmax.f32 %v3497_v18, 0.0 }
 0x7c6   : > { %v14380_v14 = vmax.f32 %v3499_v50, 0.0  ;;  %v2391_v50 = vpop.permute.xlu0 %2390 }
 0x7c7   : > { %6043 = vmax.xlane.f32.xlu1 %v5174_v7  ;;  %v14352_v7 = vmax.f32 %v3297_v62, 0.0  ;;  %19683 = vst [vmem:[#allocation227_spill] sm:$0xff] %v14362_v9  ;;  %19684 = vst [vmem:[#allocation229_spill] sm:$0xff] %v14364_v46  ;;  %v19685_v62 = vld [vmem:[#allocation277_spill] sm:$0xff]  ;;  %v3857_v29 = vmax.f32 %v3855_v52, %v14362_v9  ;;  %v3990_v5 = vmax.f32 %v3988_v59, %v14364_v46  ;;  %v14392_v18 = vmax.f32 %v3479_v11, 0.0 }
 0x7c8   : > { %6117 = vmax.xlane.f32.xlu0 %v5211_v45  ;;  %v14354_v45 = vmax.f32 %v3299_v49, 0.0  ;;  %v3477_v49 = vadd.f32 %v19685_v62, %v14264_v12  ;;  %19689 = vst [vmem:[#allocation277_spill] sm:$0xff] %v14378_v55  ;;  %19690 = vst [vmem:[#allocation279_spill] sm:$0xff] %v14380_v14  ;;  %v19691_v62 = vld [vmem:[#allocation285_spill] sm:$0xff]  ;;  %v5210_v60 = vmax.f32 %v14378_v55, %v14380_v14 }
 0x7c9   : > { %19681 = vst [vmem:[#allocation175_spill] sm:$0xff] %v14352_v7  ;;  %v3487_v12 = vadd.f32 %v19691_v62, %v14217_v13  ;;  %19693 = vst [vmem:[#allocation303_spill] sm:$0xff] %v14392_v18  ;;  %v3992_v62 = vmax.f32 %v3990_v5, %v14380_v14  ;;  %v19699_v14 = vld [vmem:[#allocation163_spill] sm:$0xff] }
 0x7ca   : > { %19682 = vst [vmem:[#allocation176_spill] sm:$0xff] %v14354_v45  ;;  %v5170_v53 = vmax.f32 %v14352_v7, %v14354_v45  ;;  %v14390_v1 = vmax.f32 %v3477_v49, 0.0 }
 0x7cb   : > { %6039 = vmax.xlane.f32.xlu1 %v5172_v21  ;;  %v5169_v21 = vmax.f32 %v14220_v20, %v14222_v34 }
 0x7cc   : > { %6101 = vmax.xlane.f32.xlu0 %v5203_v63  ;;  %v14372_v63 = vmax.f32 %v3467_v32, 0.0  ;;  %v3489_v32 = vadd.f32 %v13863_v57, %v14217_v13  ;;  %19692 = vst [vmem:[#allocation285_spill] sm:$0xff] %v14390_v1  ;;  %v5167_v57 = vmax.f32 %v14282_v15, %v14284_v51  ;;  %v14402_v13 = vmax.f32 %v3487_v12, 0.0 }
 0x7cd   : > { %v5206_v11 = vmax.f32 %v14390_v1, %v14392_v18 }
 0x7ce   : > { %19687 = vst [vmem:[#allocation265_spill] sm:$0xff] %v14372_v63  ;;  %v5204_v52 = vmax.f32 %v14372_v63, %v14374_v48  ;;  %19695 = vst [vmem:[#allocation305_spill] sm:$0xff] %v14402_v13  ;;  %v14404_v49 = vmax.f32 %v3489_v32, 0.0 }
 0x7cf   : > { %6035 = vmax.xlane.f32.xlu1 %v5170_v53  ;;  %v3859_v53 = vmax.f32 %v3857_v29, %v14378_v55  ;;  %v5199_v29 = vmax.f32 %v14300_v40, %v14302_v10 }
 0x7d0   : > { %6033 = vmax.xlane.f32.xlu0 %v5169_v21  ;;  %v14394_v21 = vpop.f32.mrf.mxu1  ;;  %19696 = vst [vmem:[#allocation306_spill] sm:$0xff] %v14404_v49  ;;  %v5208_v5 = vmax.f32 %v14402_v13, %v14404_v49 }
 0x7d1   : > { %19694 = vst [vmem:[#allocation304_spill] sm:$0xff] %v14394_v21  ;;  %v2221_v21 = vpop.permute.xlu0 %2220 }
 0x7d2   : > { %v7942_v59 = vpop.f32.mrf.mxu1 }
 0x7d3   : > { %6103 = vmax.xlane.f32.xlu1 %v5204_v52  ;;  %v3994_v52 = vmax.f32 %v3992_v62, %v14186_v28  ;;  %v18841_v59 = vlaneseq }
 0x7d4   : > { %6097 = vmax.xlane.f32.xlu0 %v5201_v0  ;;  %v3861_v0 = vmax.f32 %v3859_v53, %v14184_v3  ;;  %v5165_v53 = vmax.f32 %v14326_v8, %v14328_v42  ;;  %v14469_v40 = vpop.f32.mrf.mxu1 }
 0x7d5   : > { %v3996_v32 = vmax.f32 %v3994_v52, %v14404_v49  ;;  %v2381_v62 = vpop.permute.xlu0 %2380  ;;  %v19697_v52 = vld [vmem:[#allocation251_spill] sm:$0xff] }
 0x7d6   : > { %v3863_v12 = vmax.f32 %v3861_v0, %v14402_v13 }
 0x7d7   : > { %6107 = vmax.xlane.f32.xlu1 %v5206_v11  ;;  %v3998_v11 = vmax.f32 %v3996_v32, %v14318_v23  ;;  %v14429_v32 = vshrl.u32 %v18841_v59, 7  ;;  %v19704_v59 = vld [vmem:[#allocation242_spill] sm:$0xff] }
 0x7d8   : > { %6029 = vmax.xlane.f32.xlu0 %v5167_v57  ;;  %v3865_v57 = vmax.f32 %v3863_v12, %v14316_v4 }
 0x7d9   : > { %v4000_v0 = vmax.f32 %v3998_v11, %v14392_v18  ;;  %v3287_v11 = vadd.f32 %v19699_v14, %v2231_v17  ;;  %v14446_v30 = vadd.s32 8, %v14429_v32  ;;  %v14449_v14 = vadd.s32 16, %v14429_v32 }
 0x7da   : > { %v3867_v38 = vmax.f32 %v3865_v57, %v14390_v1  ;;  %v5197_v57 = vmax.f32 %v14362_v9, %v14364_v46  ;;  %v2211_v1 = vpop.permute.xlu0 %2210  ;;  %v14504_v9 = vadd.s32 56, %v14429_v32  ;;  %v14535_v22 = vadd.s32 88, %v14429_v32 }
 0x7db   : > { %6111 = vmax.xlane.f32.xlu1 %v5208_v5  ;;  %v19698_v5 = vld [vmem:[#allocation140_spill] sm:$0xff]  ;;  %v4002_v13 = vmax.f32 %v4000_v0, %v14332_v43  ;;  %v3449_v0 = vadd.f32 %v19704_v59, %v2391_v50  ;;  %19705 = vst [vmem:[#allocation163_spill] sm:$0xff] %v14446_v30  ;;  %v14538_v41 = vadd.s32 96, %v14429_v32  ;;  %v14564_v37 = vadd.s32 144, %v14429_v32 }
 0x7dc   : > { %6093 = vmax.xlane.f32.xlu0 %v5199_v29  ;;  %v3457_v29 = vadd.f32 %v19697_v52, %v14340_v61  ;;  %v3459_v12 = vadd.f32 %v19698_v5, %v14340_v61  ;;  %v3869_v49 = vmax.f32 %v3867_v38, %v14330_v36  ;;  %v19703_v5 = vld [vmem:[#allocation241_spill] sm:$0xff]  ;;  %v14567_v2 = vadd.s32 152, %v14429_v32 }
 0x7dd   : > { %v4004_v18 = vmax.f32 %v4002_v13, %v14374_v48  ;;  %v3447_v38 = vadd.f32 %v19703_v5, %v2391_v50  ;;  %v14570_v54 = vadd.s32 160, %v14429_v32  ;;  %v14573_v28 = vadd.s32 168, %v14429_v32 }
 0x7de   : > { %v3871_v52 = vmax.f32 %v3869_v49, %v14372_v63  ;;  %v14441_v61 = vmax.f32 %v3459_v12, 0.0  ;;  %v14453_v49 = vmax.f32 %v3287_v11, 0.0  ;;  %v19709_v12 = vld [vmem:[#allocation151_spill] sm:$0xff]  ;;  %v14463_v63 = vmax.f32 %v3449_v0, 0.0 }
 0x7df   : > { %6115 = vmax.xlane.f32.xlu1 %v5210_v60  ;;  %v14439_v60 = vmax.f32 %v3457_v29, 0.0  ;;  %v4006_v13 = vmax.f32 %v4004_v18, %v14354_v45  ;;  %v14461_v48 = vmax.f32 %v3447_v38, 0.0  ;;  %v19713_v11 = vld [vmem:[#allocation231_spill] sm:$0xff]  ;;  %v14579_v16 = vadd.s32 176, %v14429_v32 }
 0x7e0   : > { %6025 = vmax.xlane.f32.xlu0 %v5165_v53  ;;  %v19700_v53 = vld [vmem:[#allocation164_spill] sm:$0xff]  ;;  %19702 = vst [vmem:[#allocation140_spill] sm:$0xff] %v14441_v61  ;;  %19707 = vst [vmem:[#allocation241_spill] sm:$0xff] %v14453_v49  ;;  %v3437_v58 = vadd.f32 %v19713_v11, %v2381_v62  ;;  %v19719_v18 = vld [vmem:[#allocation143_spill] sm:$0xff]  ;;  %v14586_v19 = vadd.s32 184, %v14429_v32  ;;  %v14589_v56 = vadd.s32 192, %v14429_v32 }
 0x7e1   : > { %v3289_v55 = vadd.f32 %v19700_v53, %v2231_v17  ;;  %19701 = vst [vmem:[#allocation251_spill] sm:$0xff] %v14439_v60  ;;  %19706 = vst [vmem:[#allocation164_spill] sm:$0xff] %v14449_v14  ;;  %v3873_v17 = vmax.f32 %v3871_v52, %v14352_v7  ;;  %v19710_v53 = vld [vmem:[#allocation152_spill] sm:$0xff]  ;;  %v4008_v59 = vmax.f32 %v4006_v13, %v14441_v61  ;;  %v2371_v13 = vpop.permute.xlu0 %2370  ;;  %v14599_v43 = vadd.s32 200, %v14429_v32 }
 0x7e2   : > { %v3279_v5 = vadd.f32 %v19710_v53, %v2221_v21  ;;  %19711 = vst [vmem:[#allocation151_spill] sm:$0xff] %v14461_v48  ;;  %19712 = vst [vmem:[#allocation152_spill] sm:$0xff] %v14463_v63  ;;  %v3267_v11 = vadd.f32 %v19719_v18, %v2211_v1  ;;  %v19720_v52 = vld [vmem:[#allocation144_spill] sm:$0xff]  ;;  %v14491_v14 = vmax.f32 %v3437_v58, 0.0  ;;  %v19724_v18 = vld [vmem:[#allocation225_spill] sm:$0xff]  ;;  %v14602_v36 = vadd.s32 208, %v14429_v32 }
 0x7e3   : > { %v14455_v29 = vmax.f32 %v3289_v55, 0.0  ;;  %v3875_v50 = vmax.f32 %v3873_v17, %v14439_v60  ;;  %v19714_v55 = vld [vmem:[#allocation233_spill] sm:$0xff]  ;;  %19715 = vst [vmem:[#allocation231_spill] sm:$0xff] %v14469_v40  ;;  %v14473_v17 = vadd.s32 24, %v14429_v32  ;;  %v14484_v40 = vadd.s32 32, %v14429_v32 }
 0x7e4   : > { %6089 = vmax.xlane.f32.xlu0 %v5197_v57  ;;  %v3277_v57 = vadd.f32 %v19709_v12, %v2221_v21  ;;  %v3439_v10 = vadd.f32 %v19714_v55, %v2381_v62  ;;  %v14479_v53 = vmax.f32 %v3279_v5, 0.0  ;;  %v3269_v62 = vadd.f32 %v19720_v52, %v2211_v1  ;;  %v7947_v55 = vpop.f32.mrf.mxu1  ;;  %19721 = vst [vmem:[#allocation143_spill] sm:$0xff] %v14491_v14  ;;  %v19723_v5 = vld [vmem:[#allocation224_spill] sm:$0xff] }
 0x7e5   : > { %19708 = vst [vmem:[#allocation242_spill] sm:$0xff] %v14455_v29  ;;  %19716 = vst [vmem:[#allocation233_spill] sm:$0xff] %v14473_v17  ;;  %v3877_v38 = vmax.f32 %v3875_v50, %v14453_v49  ;;  %v4010_v0 = vmax.f32 %v4008_v59, %v14455_v29  ;;  %v14487_v21 = vadd.s32 40, %v14429_v32  ;;  %v3427_v30 = vadd.f32 %v19723_v5, %v2371_v13 }
 0x7e6   : > { %v14477_v12 = vmax.f32 %v3277_v57, 0.0  ;;  %19718 = vst [vmem:[#allocation308_spill] sm:$0xff] %v14479_v53  ;;  %v14493_v57 = vmax.f32 %v3439_v10, 0.0  ;;  %v3429_v46 = vadd.f32 %v19724_v18, %v2371_v13  ;;  %v14497_v1 = vpop.f32.mrf.mxu1  ;;  %v14501_v55 = vadd.s32 48, %v14429_v32 }
 0x7e7   : > { %v3879_v50 = vmax.f32 %v3877_v38, %v14461_v48  ;;  %v4012_v59 = vmax.f32 %v4010_v0, %v14463_v63  ;;  %19725 = vst [vmem:[#allocation224_spill] sm:$0xff] %v14497_v1  ;;  %v14507_v38 = vadd.s32 64, %v14429_v32  ;;  %v14511_v0 = vmax.f32 %v3267_v11, 0.0 }
 0x7e8   : > { %19717 = vst [vmem:[#allocation307_spill] sm:$0xff] %v14477_v12  ;;  %19722 = vst [vmem:[#allocation144_spill] sm:$0xff] %v14493_v57  ;;  %v14513_v13 = vmax.f32 %v3269_v62, 0.0  ;;  %v7950_v5 = vpop.f32.mrf.mxu1  ;;  %v14518_v1 = vadd.s32 72, %v14429_v32  ;;  %v14521_v17 = vadd.s32 80, %v14429_v32  ;;  %v14527_v11 = vmax.f32 %v3429_v46, 0.0 }
 0x7e9   : > { %v3881_v58 = vmax.f32 %v3879_v50, %v14477_v12  ;;  %v4014_v10 = vmax.f32 %v4012_v59, %v14479_v53  ;;  %19726 = vst [vmem:[#allocation225_spill] sm:$0xff] %v14511_v0  ;;  %v14525_v59 = vmax.f32 %v3427_v30, 0.0  ;;  %v14546_v5 = vadd.s32 112, %v14429_v32 }
 0x7ea   : > { %19727 = vst [vmem:[#allocation309_spill] sm:$0xff] %v14513_v13  ;;  %19729 = vst [vmem:[#allocation311_spill] sm:$0xff] %v14527_v11  ;;  %v14529_v62 = vpop.f32.mrf.mxu1  ;;  %v14549_v52 = vadd.s32 120, %v14429_v32  ;;  %v14552_v18 = vadd.s32 128, %v14429_v32  ;;  %v14605_v24 = vadd.s32 216, %v14429_v32  ;;  %v14611_v3 = vadd.s32 232, %v14429_v32 }
 0x7eb   : > { %v3883_v39 = vmax.f32 %v3881_v58, %v14491_v14  ;;  %v4016_v50 = vmax.f32 %v4014_v10, %v14493_v57  ;;  %19728 = vst [vmem:[#allocation310_spill] sm:$0xff] %v14525_v59  ;;  %19730 = vst [vmem:[#allocation312_spill] sm:$0xff] %v14529_v62  ;;  %v14541_v58 = vadd.s32 104, %v14429_v32  ;;  %v14555_v62 = vadd.s32 136, %v14429_v32 }
 0x7ec   : > { %v7955_v10 = vpop.f32.mrf.mxu1  ;;  %v14614_v23 = vadd.s32 240, %v14429_v32  ;;  %v14617_v4 = vadd.s32 248, %v14429_v32  ;;  %v14627_v20 = vadd.s32 368, %v14429_v32  ;;  %v14630_v51 = vadd.s32 336, %v14429_v32 }
 0x7ed   : > { %v3885_v30 = vmax.f32 %v3883_v39, %v14511_v0  ;;  %v4018_v46 = vmax.f32 %v4016_v50, %v14513_v13  ;;  %v14633_v15 = vadd.s32 352, %v14429_v32  ;;  %v14649_v27 = vadd.s32 304, %v14429_v32 }
 0x7ee   : > { %v14561_v10 = vpop.f32.mrf.mxu1  ;;  %19735 = vst [vmem:[#allocation317_spill] sm:$0xff] %v14627_v20  ;;  %v14659_v25 = vadd.s32 344, %v14429_v32  ;;  %v14662_v47 = vadd.s32 288, %v14429_v32  ;;  %v14665_v35 = vadd.s32 328, %v14429_v32  ;;  %v14674_v42 = vadd.s32 256, %v14429_v32 }
 0x7ef   : > { %v3887_v39 = vmax.f32 %v3885_v30, %v14525_v59  ;;  %v4020_v50 = vmax.f32 %v4018_v46, %v14527_v11  ;;  %19731 = vst [vmem:[#allocation313_spill] sm:$0xff] %v14561_v10  ;;  %v14646_v59 = vadd.s32 360, %v14429_v32  ;;  %v14687_v6 = vadd.s32 280, %v14429_v32 }
 0x7f0   : > { %v7958_v10 = vpop.f32.mrf.mxu1  ;;  %v14690_v14 = vadd.s32 480, %v14429_v32  ;;  %v14693_v57 = vadd.s32 264, %v14429_v32  ;;  %v14706_v48 = vadd.s32 504, %v14429_v32  ;;  %v14709_v8 = vadd.s32 448, %v14429_v32 }
 0x7f1   : > { %v3888_v30 = vrot.slane %v3887_v39, 4  ;;  %v4021_v46 = vrot.slane %v4020_v50, 4  ;;  %v14608_v10 = vadd.s32 224, %v14429_v32  ;;  %19736 = vst [vmem:[#allocation318_spill] sm:$0xff] %v14646_v59  ;;  %v14717_v53 = vadd.s32 488, %v14429_v32  ;;  %v19752_v59 = vld [vmem:[#allocation39_spill] sm:$0xff] }
 0x7f2   : > { %v14591_v33 = vpop.f32.mrf.mxu1  ;;  %19740 = vst [vmem:[#allocation322_spill] sm:$0xff] %v14690_v14  ;;  %19742 = vst [vmem:[#allocation324_spill] sm:$0xff] %v14706_v48  ;;  %v14720_v49 = vadd.s32 432, %v14429_v32  ;;  %v14723_v29 = vadd.s32 472, %v14429_v32  ;;  %v14726_v60 = vadd.s32 416, %v14429_v32  ;;  %v14729_v63 = vadd.s32 456, %v14429_v32 }
 0x7f3   : > { %19732 = vst [vmem:[#allocation314_spill] sm:$0xff] %v14591_v33  ;;  %v3889_v45 = vmax.f32 %v3887_v39, %v3888_v30  ;;  %v4022_v7 = vmax.f32 %v4020_v50, %v4021_v46  ;;  %v14639_v50 = vadd.s32 320, %v14429_v32  ;;  %v14671_v46 = vadd.s32 312, %v14429_v32  ;;  %19743 = vst [vmem:[#allocation325_spill] sm:$0xff] %v14709_v8 }
 0x7f4   : > { %v7963_v33 = vpop.f32.mrf.mxu1  ;;  %19744 = vst [vmem:[#allocation326_spill] sm:$0xff] %v14717_v53  ;;  %19745 = vst [vmem:[#allocation327_spill] sm:$0xff] %v14720_v49  ;;  %v14735_v12 = vadd.s32 440, %v14429_v32  ;;  %v14747_v61 = vadd.s32 424, %v14429_v32  ;;  %v14753_v20 = vadd.s32 408, %v14429_v32  ;;  %v19760_v48 = vcvt.s32.f32 %v14487_v21 }
 0x7f5   : > { %v14624_v33 = vadd.s32 376, %v14429_v32  ;;  %v3890_v26 = vrot.slane %v3889_v45, 2  ;;  %v4023_v39 = vrot.slane %v4022_v7, 2  ;;  %19746 = vst [vmem:[#allocation328_spill] sm:$0xff] %v14723_v29  ;;  %19747 = vst [vmem:[#allocation329_spill] sm:$0xff] %v14729_v63 }
 0x7f6   : > { %v14621_v34 = vpop.f32.mrf.mxu1  ;;  %19748 = vst [vmem:[#allocation330_spill] sm:$0xff] %v14735_v12  ;;  %19749 = vst [vmem:[#allocation331_spill] sm:$0xff] %v14747_v61  ;;  %v19761_v53 = vmov %v19760_v48  ;;  %v14798_v12 = vadd.s32 624, %v14429_v32 }
 0x7f7   : > { %19733 = vst [vmem:[#allocation315_spill] sm:$0xff] %v14621_v34  ;;  %19734 = vst [vmem:[#allocation316_spill] sm:$0xff] %v14624_v33  ;;  %v14677_v34 = vadd.s32 296, %v14429_v32  ;;  %v3891_v31 = vmax.f32 %v3889_v45, %v3890_v26  ;;  %v4024_v0 = vmax.f32 %v4022_v7, %v4023_v39  ;;  %v14699_v7 = vadd.s32 464, %v14429_v32 }
 0x7f8   : > { %v7966_v30 = vpop.f32.mrf.mxu1  ;;  %v14732_v39 = vadd.s32 400, %v14429_v32  ;;  %v14750_v33 = vadd.s32 632, %v14429_v32  ;;  %19764 = vst [vmem:[#allocation39_spill] sm:$0xff] %v14798_v12 }
 0x7f9   : > { %v14668_v30 = vadd.s32 272, %v14429_v32  ;;  %19741 = vst [vmem:[#allocation323_spill] sm:$0xff] %v14699_v7  ;;  %v3892_v44 = vrot.slane %v3891_v31, 1  ;;  %v4025_v26 = vrot.slane %v4024_v0, 1  ;;  %v14744_v7 = vadd.s32 384, %v14429_v32 }
 0x7fa   : > { %v14651_v11 = vpop.f32.mrf.mxu1  ;;  %19750 = vst [vmem:[#allocation332_spill] sm:$0xff] %v14750_v33 }
 0x7fb   : > { %19737 = vst [vmem:[#allocation319_spill] sm:$0xff] %v14651_v11  ;;  %v14741_v14 = vmax.f32 %v4024_v0, %v4025_v26 }
 0x7fc   : > { %v7971_v11 = vpop.f32.mrf.mxu1 }
 0x7fd   : > { %v14684_v11 = vadd.s32 496, %v14429_v32 }
 0x7fe   : > { %v14681_v13 = vpop.f32.mrf.mxu1 }
 0x7ff   : > { %19738 = vst [vmem:[#allocation320_spill] sm:$0xff] %v14681_v13  ;;  %19739 = vst [vmem:[#allocation321_spill] sm:$0xff] %v14684_v11  ;;  %v14739_v11 = vmax.f32 %v3891_v31, %v3892_v44  ;;  %v14759_v44 = vadd.s32 608, %v14429_v32  ;;  %v19754_v13 = vld [vmem:[#allocation44_spill] sm:$0xff]  ;;  %v19755_v31 = vld [vmem:[#allocation42_spill] sm:$0xff] }
 0x800   : > { %v7974_v45 = vpop.f32.mrf.mxu1  ;;  %vm4295_vm6 = vcmp.eq.f32.partialorder %v19755_v31, %v14741_v14  ;;  %v19758_v31 = vcvt.s32.f32 %v14484_v40  ;;  %v14801_v40 = vadd.s32 616, %v14429_v32 }
 0x801   : > { %19751 = vst [vmem:[#allocation333_spill] sm:$0xff] %v14759_v44  ;;  %vm4292_vm3 = vcmp.eq.f32.partialorder %v19752_v59, %v14739_v11  ;;  %v19753_v45 = vld [vmem:[#allocation37_spill] sm:$0xff]  ;;  %vm4294_vm5 = vcmp.eq.f32.partialorder %v19754_v13, %v14739_v11  ;;  %v14779_v59 = vadd.s32 392, %v14429_v32  ;;  %v4551_v33 = vsel %vm4295_vm6, %v19761_v53, 1024.0  ;;  %v19762_v44 = vld [vmem:[#allocation40_spill] sm:$0xff] }
 0x802   : > { %vm4293_vm4 = vcmp.eq.f32.partialorder %v19753_v45, %v14741_v14  ;;  %v19756_v45 = vld [vmem:[#allocation35_spill] sm:$0xff]  ;;  %v19757_v13 = vld [vmem:[#allocation33_spill] sm:$0xff]  ;;  %v4548_v0 = vsel %vm4292_vm3, %v19758_v31, 1024.0  ;;  %v19759_v26 = vmov %v19758_v31  ;;  %v4550_v8 = vsel %vm4294_vm5, %v19760_v48, 1024.0  ;;  %19765 = vst [vmem:[#allocation37_spill] sm:$0xff] %v14801_v40 }
 0x803   : > { %vm4296_vm7 = vcmp.eq.f32.partialorder %v19756_v45, %v14739_v11  ;;  %vm4297_vm8 = vcmp.eq.f32.partialorder %v19757_v13, %v14741_v14  ;;  %v4549_v29 = vsel %vm4293_vm4, %v19759_v26, 1024.0  ;;  %vm4298_vm9 = vcmp.eq.f32.partialorder %v19762_v44, %v14739_v11  ;;  %v19763_v45 = vld [vmem:[#allocation38_spill] sm:$0xff]  ;;  %v19768_v31 = vld [vmem:[#allocation31_spill] sm:$0xff]  ;;  %v19769_v44 = vld [vmem:[#allocation29_spill] sm:$0xff] }
 0x804   : > { %vm4299_vm10 = vcmp.eq.f32.partialorder %v19763_v45, %v14741_v14  ;;  %v4798_v63 = vmin.f32 %v4550_v8, %v4548_v0  ;;  %v4931_v13 = vmin.f32 %v4551_v33, %v4549_v29  ;;  %v19766_v26 = vcvt.s32.f32 %v14501_v55 }
 0x805   : > { %vm4300_vm11 = vcmp.eq.f32.partialorder %v19768_v31, %v14739_v11  ;;  %vm4301_vm12 = vcmp.eq.f32.partialorder %v19769_v44, %v14741_v14  ;;  %v14813_v0 = vadd.s32 864, %v14429_v32  ;;  %v19771_v45 = vcvt.s32.f32 %v14504_v9  ;;  %v19774_v31 = vld [vmem:[#allocation34_spill] sm:$0xff]  ;;  %v19777_v9 = vld [vmem:[#allocation27_spill] sm:$0xff] }
 0x806   : > { %v4552_v48 = vsel %vm4296_vm7, %v19766_v26, 1024.0  ;;  %v19767_v21 = vmov %v19766_v26  ;;  %vm4303_vm14 = vcmp.eq.f32.partialorder %v19774_v31, %v14741_v14  ;;  %vm4304_vm15 = vcmp.eq.f32.partialorder %v19777_v9, %v14739_v11  ;;  %v19783_v9 = vld [vmem:[#allocation30_spill] sm:$0xff] }
 0x807   : > { %v4553_v53 = vsel %vm4297_vm8, %v19767_v21, 1024.0  ;;  %v4799_v8 = vmin.f32 %v4552_v48, %v4798_v63  ;;  %19770 = vst [vmem:[#allocation44_spill] sm:$0xff] %v14813_v0  ;;  %v4554_v49 = vsel %vm4298_vm9, %v19771_v45, 1024.0  ;;  %v19772_v26 = vmov %v19771_v45  ;;  %v19773_v21 = vld [vmem:[#allocation36_spill] sm:$0xff] }
 0x808   : > { %v4932_v29 = vmin.f32 %v4553_v53, %v4931_v13  ;;  %v4555_v55 = vsel %vm4299_vm10, %v19772_v26, 1024.0  ;;  %vm4302_vm13 = vcmp.eq.f32.partialorder %v19773_v21, %v14739_v11  ;;  %v19775_v53 = vcvt.s32.f32 %v14507_v38  ;;  %v19778_v26 = vld [vmem:[#allocation25_spill] sm:$0xff] }
 0x809   : > { %v4800_v44 = vmin.f32 %v4554_v49, %v4799_v8  ;;  %vm4305_vm0 = vcmp.eq.f32.partialorder %v19778_v26, %v14741_v14  ;;  %v14835_v8 = vadd.s32 880, %v14429_v32  ;;  %vm4307_vm2 = vcmp.eq.f32.partialorder %v19783_v9, %v14741_v14  ;;  %v19788_v49 = vld [vmem:[#allocation22_spill] sm:$0xff] }
 0x80a   : > { %v4933_v63 = vmin.f32 %v4555_v55, %v4932_v29  ;;  %v4556_v33 = vsel %vm4300_vm11, %v19775_v53, 1024.0  ;;  %v19776_v45 = vmov %v19775_v53  ;;  %v19780_v29 = vcvt.s32.f32 %v14518_v1 }
 0x80b   : > { %v4557_v61 = vsel %vm4301_vm12, %v19776_v45, 1024.0  ;;  %v4801_v21 = vmin.f32 %v4556_v33, %v4800_v44  ;;  %19779 = vst [vmem:[#allocation42_spill] sm:$0xff] %v14835_v8  ;;  %v19782_v45 = vld [vmem:[#allocation32_spill] sm:$0xff]  ;;  %v14849_v44 = vadd.s32 872, %v14429_v32  ;;  %vm4308_vm3 = vcmp.eq.f32.partialorder %v19788_v49, %v14739_v11  ;;  %v19794_v49 = vld [vmem:[#allocation26_spill] sm:$0xff] }
 0x80c   : > { %v4934_v31 = vmin.f32 %v4557_v61, %v4933_v63  ;;  %v4558_v55 = vsel %vm4302_vm13, %v19780_v29, 1024.0  ;;  %v19781_v53 = vmov %v19780_v29  ;;  %vm4306_vm1 = vcmp.eq.f32.partialorder %v19782_v45, %v14739_v11  ;;  %v19789_v45 = vld [vmem:[#allocation21_spill] sm:$0xff] }
 0x80d   : > { %v4559_v38 = vsel %vm4303_vm14, %v19781_v53, 1024.0  ;;  %v4802_v26 = vmin.f32 %v4558_v55, %v4801_v21  ;;  %v14846_v61 = vadd.s32 888, %v14429_v32  ;;  %19785 = vst [vmem:[#allocation33_spill] sm:$0xff] %v14849_v44  ;;  %v19786_v63 = vcvt.s32.f32 %v14521_v17 }
 0x80e   : > { %v4935_v33 = vmin.f32 %v4559_v38, %v4934_v31  ;;  %vm4309_vm4 = vcmp.eq.f32.partialorder %v19789_v45, %v14741_v14  ;;  %v14861_v38 = vadd.s32 600, %v14429_v32  ;;  %v19791_v9 = vcvt.s32.f32 %v14535_v22  ;;  %v19797_v22 = vld [vmem:[#allocation19_spill] sm:$0xff] }
 0x80f   : > { %19784 = vst [vmem:[#allocation35_spill] sm:$0xff] %v14846_v61  ;;  %v4560_v29 = vsel %vm4304_vm15, %v19786_v63, 1024.0  ;;  %v19787_v1 = vmov %v19786_v63  ;;  %vm4311_vm6 = vcmp.eq.f32.partialorder %v19794_v49, %v14741_v14  ;;  %vm4312_vm7 = vcmp.eq.f32.partialorder %v19797_v22, %v14739_v11  ;;  %v19803_v22 = vld [vmem:[#allocation23_spill] sm:$0xff] }
 0x810   : > { %v4561_v53 = vsel %vm4305_vm0, %v19787_v1, 1024.0  ;;  %v4803_v21 = vmin.f32 %v4560_v29, %v4802_v26  ;;  %19790 = vst [vmem:[#allocation40_spill] sm:$0xff] %v14861_v38  ;;  %v4562_v13 = vsel %vm4306_vm1, %v19791_v9, 1024.0  ;;  %v19792_v63 = vmov %v19791_v9  ;;  %v19793_v1 = vld [vmem:[#allocation28_spill] sm:$0xff] }
 0x811   : > { %v4936_v31 = vmin.f32 %v4561_v53, %v4935_v33  ;;  %v4563_v17 = vsel %vm4307_vm2, %v19792_v63, 1024.0  ;;  %vm4310_vm5 = vcmp.eq.f32.partialorder %v19793_v1, %v14739_v11  ;;  %v19795_v53 = vcvt.s32.f32 %v14538_v41  ;;  %v19798_v63 = vld [vmem:[#allocation20_spill] sm:$0xff] }
 0x812   : > { %v4804_v45 = vmin.f32 %v4562_v13, %v4803_v21  ;;  %vm4313_vm8 = vcmp.eq.f32.partialorder %v19798_v63, %v14741_v14  ;;  %v14883_v21 = vadd.s32 856, %v14429_v32  ;;  %vm4314_vm9 = vcmp.eq.f32.partialorder %v19803_v22, %v14739_v11  ;;  %v19804_v63 = vld [vmem:[#allocation24_spill] sm:$0xff]  ;;  %v19809_v22 = vld [vmem:[#allocation82_spill] sm:$0xff] }
 0x813   : > { %v4937_v26 = vmin.f32 %v4563_v17, %v4936_v31  ;;  %v4564_v55 = vsel %vm4308_vm3, %v19795_v53, 1024.0  ;;  %v19796_v9 = vmov %v19795_v53  ;;  %v19800_v31 = vcvt.s32.f32 %v14541_v58 }
 0x814   : > { %v4565_v48 = vsel %vm4309_vm4, %v19796_v9, 1024.0  ;;  %v4805_v1 = vmin.f32 %v4564_v55, %v4804_v45  ;;  %19799 = vst [vmem:[#allocation38_spill] sm:$0xff] %v14883_v21  ;;  %v14889_v9 = vpop.f32.mrf.mxu1  ;;  %vm4315_vm10 = vcmp.eq.f32.partialorder %v19804_v63, %v14741_v14  ;;  %v14896_v45 = vadd.s32 592, %v14429_v32  ;;  %v19810_v63 = vld [vmem:[#allocation81_spill] sm:$0xff] }
 0x815   : > { %v4938_v49 = vmin.f32 %v4565_v48, %v4937_v26  ;;  %v4566_v17 = vsel %vm4310_vm5, %v19800_v31, 1024.0  ;;  %v19801_v53 = vmov %v19800_v31  ;;  %19802 = vst [vmem:[#allocation31_spill] sm:$0xff] %v14889_v9  ;;  %v14899_v26 = vadd.s32 584, %v14429_v32 }
 0x816   : > { %v4567_v41 = vsel %vm4311_vm6, %v19801_v53, 1024.0  ;;  %v4806_v48 = vmin.f32 %v4566_v17, %v4805_v1  ;;  %19805 = vst [vmem:[#allocation29_spill] sm:$0xff] %v14896_v45  ;;  %v19807_v31 = vcvt.s32.f32 %v14546_v5  ;;  %v7979_v29 = vpop.f32.mrf.mxu1  ;;  %vm4316_vm11 = vcmp.eq.f32.partialorder %v19809_v22, %v14739_v11  ;;  %v19815_v22 = vld [vmem:[#allocation75_spill] sm:$0xff]  ;;  %v20004_v45 = vld [vmem:[#allocation85_spill] sm:$0xff] }
 0x817   : > { %v4939_v55 = vmin.f32 %v4567_v41, %v4938_v49  ;;  %19806 = vst [vmem:[#allocation36_spill] sm:$0xff] %v14899_v26  ;;  %vm4317_vm12 = vcmp.eq.f32.partialorder %v19810_v63, %v14741_v14  ;;  %v14911_v41 = vadd.s32 848, %v14429_v32  ;;  %v19812_v13 = vcvt.s32.f32 %v14549_v52  ;;  %v19816_v63 = vld [vmem:[#allocation73_spill] sm:$0xff] }
 0x818   : > { %v4568_v58 = vsel %vm4312_vm7, %v19807_v31, 1024.0  ;;  %v19808_v53 = vmov %v19807_v31  ;;  %v14917_v29 = vpop.f32.mrf.mxu1  ;;  %vm4318_vm13 = vcmp.eq.f32.partialorder %v19815_v22, %v14739_v11  ;;  %vm4319_vm14 = vcmp.eq.f32.partialorder %v19816_v63, %v14741_v14  ;;  %v19820_v22 = vld [vmem:[#allocation77_spill] sm:$0xff] }
 0x819   : > { %v4569_v33 = vsel %vm4313_vm8, %v19808_v53, 1024.0  ;;  %v4807_v1 = vmin.f32 %v4568_v58, %v4806_v48  ;;  %19811 = vst [vmem:[#allocation34_spill] sm:$0xff] %v14911_v41  ;;  %v4570_v31 = vsel %vm4314_vm9, %v19812_v13, 1024.0  ;;  %v19813_v5 = vmov %v19812_v13  ;;  %19814 = vst [vmem:[#allocation27_spill] sm:$0xff] %v14917_v29  ;;  %v19819_v29 = vld [vmem:[#allocation79_spill] sm:$0xff]  ;;  %v19826_v58 = vld [vmem:[#allocation69_spill] sm:$0xff] }
 0x81a   : > { %v4940_v49 = vmin.f32 %v4569_v33, %v4939_v55  ;;  %v4571_v53 = vsel %vm4315_vm10, %v19813_v5, 1024.0  ;;  %v19817_v17 = vcvt.s32.f32 %v14552_v18  ;;  %v7982_v9 = vpop.f32.mrf.mxu1  ;;  %vm4320_vm15 = vcmp.eq.f32.partialorder %v19819_v29, %v14739_v11  ;;  %v19825_v55 = vld [vmem:[#allocation71_spill] sm:$0xff] }
 0x81b   : > { %v4808_v33 = vmin.f32 %v4570_v31, %v4807_v1  ;;  %vm4321_vm0 = vcmp.eq.f32.partialorder %v19820_v22, %v14741_v14  ;;  %v14935_v31 = vadd.s32 840, %v14429_v32  ;;  %vm4322_vm1 = vcmp.eq.f32.partialorder %v19825_v55, %v14739_v11 }
 0x81c   : > { %v4941_v48 = vmin.f32 %v4571_v53, %v4940_v49  ;;  %v4572_v13 = vsel %vm4316_vm11, %v19817_v17, 1024.0  ;;  %v19818_v52 = vmov %v19817_v17  ;;  %v19822_v53 = vcvt.s32.f32 %v14555_v62  ;;  %v14941_v9 = vpop.f32.mrf.mxu1 }
 0x81d   : > { %v4573_v5 = vsel %vm4317_vm12, %v19818_v52, 1024.0  ;;  %v4809_v63 = vmin.f32 %v4572_v13, %v4808_v33  ;;  %19821 = vst [vmem:[#allocation25_spill] sm:$0xff] %v14935_v31  ;;  %19824 = vst [vmem:[#allocation32_spill] sm:$0xff] %v14941_v9  ;;  %vm4323_vm2 = vcmp.eq.f32.partialorder %v19826_v58, %v14741_v14  ;;  %v14947_v13 = vpop.xlane.xlu0 %5993  ;;  %v19830_v62 = vcvt.s32.f32 %v14564_v37 }
 0x81e   : > { %v4942_v1 = vmin.f32 %v4573_v5, %v4941_v48  ;;  %v4574_v17 = vsel %vm4318_vm13, %v19822_v53, 1024.0  ;;  %v19823_v18 = vmov %v19822_v53  ;;  %19827 = vst [vmem:[#allocation30_spill] sm:$0xff] %v14947_v13  ;;  %v14950_v5 = vadd.s32 576, %v14429_v32 }
 0x81f   : > { %v4575_v52 = vsel %vm4319_vm14, %v19823_v18, 1024.0  ;;  %v4810_v33 = vmin.f32 %v4574_v17, %v4809_v63  ;;  %v14953_v53 = vadd.s32 568, %v14429_v32  ;;  %v4576_v18 = vsel %vm4320_vm15, %v19830_v62, 1024.0  ;;  %v19832_v17 = vld [vmem:[#allocation76_spill] sm:$0xff] }
 0x820   : > { %v4943_v48 = vmin.f32 %v4575_v52, %v4942_v1  ;;  %19828 = vst [vmem:[#allocation22_spill] sm:$0xff] %v14950_v5  ;;  %v19831_v49 = vmov %v19830_v62  ;;  %v7987_v1 = vpop.f32.mrf.mxu1  ;;  %vm4324_vm3 = vcmp.eq.f32.partialorder %v19832_v17, %v14739_v11  ;;  %v19833_v52 = vld [vmem:[#allocation74_spill] sm:$0xff]  ;;  %v14971_v29 = vadd.s32 832, %v14429_v32 }
 0x821   : > { %19829 = vst [vmem:[#allocation21_spill] sm:$0xff] %v14953_v53  ;;  %v4577_v63 = vsel %vm4321_vm0, %v19831_v49, 1024.0  ;;  %vm4325_vm4 = vcmp.eq.f32.partialorder %v19833_v52, %v14741_v14  ;;  %v4811_v9 = vmin.f32 %v4576_v18, %v4810_v33  ;;  %v19835_v37 = vcvt.s32.f32 %v14567_v2  ;;  %v19838_v33 = vld [vmem:[#allocation67_spill] sm:$0xff]  ;;  %v14989_v8 = vpop.xlane.xlu0 %5997 }
 0x822   : > { %v4944_v61 = vmin.f32 %v4577_v63, %v4943_v48  ;;  %19834 = vst [vmem:[#allocation28_spill] sm:$0xff] %v14971_v29  ;;  %v14983_v1 = vpop.f32.mrf.mxu1  ;;  %vm4326_vm5 = vcmp.eq.f32.partialorder %v19838_v33, %v14739_v11  ;;  %v19839_v48 = vld [vmem:[#allocation65_spill] sm:$0xff]  ;;  %v15009_v17 = vadd.s32 824, %v14429_v32  ;;  %v15030_v33 = vadd.s32 560, %v14429_v32 }
 0x823   : > { %v4578_v22 = vsel %vm4322_vm1, %v19835_v37, 1024.0  ;;  %v19836_v49 = vmov %v19835_v37  ;;  %19837 = vst [vmem:[#allocation26_spill] sm:$0xff] %v14983_v1  ;;  %vm4327_vm6 = vcmp.eq.f32.partialorder %v19839_v48, %v14741_v14  ;;  %v19840_v37 = vcvt.s32.f32 %v14570_v54 }
 0x824   : > { %v4579_v62 = vsel %vm4323_vm2, %v19836_v49, 1024.0  ;;  %v4812_v18 = vmin.f32 %v4578_v22, %v4811_v9  ;;  %v7990_v9 = vpop.f32.mrf.mxu1  ;;  %v19843_v22 = vld [vmem:[#allocation70_spill] sm:$0xff]  ;;  %19844 = vst [vmem:[#allocation19_spill] sm:$0xff] %v15009_v17  ;;  %v19845_v54 = vcvt.s32.f32 %v14573_v28  ;;  %v15033_v28 = vadd.s32 552, %v14429_v32 }
 0x825   : > { %v4945_v63 = vmin.f32 %v4579_v62, %v4944_v61  ;;  %v4580_v58 = vsel %vm4324_vm3, %v19840_v37, 1024.0  ;;  %v19841_v49 = vmov %v19840_v37  ;;  %v19842_v61 = vld [vmem:[#allocation72_spill] sm:$0xff]  ;;  %vm4329_vm8 = vcmp.eq.f32.partialorder %v19843_v22, %v14741_v14  ;;  %v15027_v2 = vpop.xlane.xlu0 %6001 }
 0x826   : > { %v4581_v1 = vsel %vm4325_vm4, %v19841_v49, 1024.0  ;;  %vm4328_vm7 = vcmp.eq.f32.partialorder %v19842_v61, %v14739_v11  ;;  %v4813_v62 = vmin.f32 %v4580_v58, %v4812_v18  ;;  %v4582_v52 = vsel %vm4326_vm5, %v19845_v54, 1024.0  ;;  %v15021_v9 = vpop.f32.mrf.mxu1  ;;  %v19849_v18 = vld [vmem:[#allocation61_spill] sm:$0xff] }
 0x827   : > { %v4946_v55 = vmin.f32 %v4581_v1, %v4945_v63  ;;  %v19846_v37 = vmov %v19845_v54  ;;  %19847 = vst [vmem:[#allocation20_spill] sm:$0xff] %v15021_v9  ;;  %v19848_v1 = vld [vmem:[#allocation63_spill] sm:$0xff]  ;;  %vm4331_vm10 = vcmp.eq.f32.partialorder %v19849_v18, %v14741_v14  ;;  %v19850_v48 = vcvt.s32.f32 %v14579_v16 }
 0x828   : > { %v4583_v49 = vsel %vm4327_vm6, %v19846_v37, 1024.0  ;;  %vm4330_vm9 = vcmp.eq.f32.partialorder %v19848_v1, %v14739_v11  ;;  %v4814_v63 = vmin.f32 %v4582_v52, %v4813_v62  ;;  %v7995_v62 = vpop.f32.mrf.mxu1  ;;  %v19852_v52 = vld [vmem:[#allocation68_spill] sm:$0xff]  ;;  %v15051_v61 = vadd.s32 816, %v14429_v32 }
 0x829   : > { %v4947_v58 = vmin.f32 %v4583_v49, %v4946_v55  ;;  %v4584_v54 = vsel %vm4328_vm7, %v19850_v48, 1024.0  ;;  %v19851_v37 = vmov %v19850_v48  ;;  %vm4332_vm11 = vcmp.eq.f32.partialorder %v19852_v52, %v14739_v11  ;;  %v19853_v49 = vld [vmem:[#allocation66_spill] sm:$0xff]  ;;  %v15069_v0 = vpop.xlane.xlu0 %6005 }
 0x82a   : > { %v4585_v55 = vsel %vm4329_vm8, %v19851_v37, 1024.0  ;;  %vm4333_vm12 = vcmp.eq.f32.partialorder %v19853_v49, %v14741_v14  ;;  %v4815_v9 = vmin.f32 %v4584_v54, %v4814_v63  ;;  %19854 = vst [vmem:[#allocation23_spill] sm:$0xff] %v15051_v61  ;;  %v19855_v16 = vcvt.s32.f32 %v14586_v19  ;;  %v15063_v62 = vpop.f32.mrf.mxu1  ;;  %v19858_v63 = vld [vmem:[#allocation59_spill] sm:$0xff] }
 0x82b   : > { %v4948_v44 = vmin.f32 %v4585_v55, %v4947_v58  ;;  %19857 = vst [vmem:[#allocation24_spill] sm:$0xff] %v15063_v62  ;;  %vm4334_vm13 = vcmp.eq.f32.partialorder %v19858_v63, %v14739_v11  ;;  %v19859_v58 = vld [vmem:[#allocation57_spill] sm:$0xff]  ;;  %v15089_v52 = vadd.s32 808, %v14429_v32  ;;  %v15110_v63 = vadd.s32 536, %v14429_v32 }
 0x82c   : > { %v4586_v22 = vsel %vm4330_vm9, %v19855_v16, 1024.0  ;;  %v19856_v48 = vmov %v19855_v16  ;;  %vm4335_vm14 = vcmp.eq.f32.partialorder %v19859_v58, %v14741_v14  ;;  %v19860_v16 = vcvt.s32.f32 %v14589_v56 }
 0x82d   : > { %v4587_v37 = vsel %vm4331_vm10, %v19856_v48, 1024.0  ;;  %v4816_v54 = vmin.f32 %v4586_v22, %v4815_v9  ;;  %v7998_v9 = vpop.f32.mrf.mxu1  ;;  %v19863_v22 = vld [vmem:[#allocation62_spill] sm:$0xff]  ;;  %19864 = vst [vmem:[#allocation82_spill] sm:$0xff] %v15089_v52  ;;  %v19865_v56 = vcvt.s32.f32 %v14599_v43  ;;  %v15107_v19 = vpop.xlane.xlu0 %6009  ;;  %v15113_v43 = vadd.s32 792, %v14429_v32 }
 0x82e   : > { %v4949_v55 = vmin.f32 %v4587_v37, %v4948_v44  ;;  %v4588_v18 = vsel %vm4332_vm11, %v19860_v16, 1024.0  ;;  %v19861_v48 = vmov %v19860_v16  ;;  %v19862_v44 = vld [vmem:[#allocation64_spill] sm:$0xff]  ;;  %vm4337_vm0 = vcmp.eq.f32.partialorder %v19863_v22, %v14741_v14 }
 0x82f   : > { %v4589_v62 = vsel %vm4333_vm12, %v19861_v48, 1024.0  ;;  %vm4336_vm15 = vcmp.eq.f32.partialorder %v19862_v44, %v14739_v11  ;;  %v4817_v37 = vmin.f32 %v4588_v18, %v4816_v54  ;;  %v4590_v49 = vsel %vm4334_vm13, %v19865_v56, 1024.0  ;;  %v15101_v9 = vpop.f32.mrf.mxu1  ;;  %v19869_v54 = vld [vmem:[#allocation53_spill] sm:$0xff]  ;;  %19870 = vst [vmem:[#allocation75_spill] sm:$0xff] %v15113_v43 }
 0x830   : > { %v4950_v1 = vmin.f32 %v4589_v62, %v4949_v55  ;;  %v19866_v16 = vmov %v19865_v56  ;;  %19867 = vst [vmem:[#allocation81_spill] sm:$0xff] %v15101_v9  ;;  %v19868_v62 = vld [vmem:[#allocation54_spill] sm:$0xff]  ;;  %vm4339_vm2 = vcmp.eq.f32.partialorder %v19869_v54, %v14741_v14  ;;  %v19871_v58 = vcvt.s32.f32 %v14602_v36 }
 0x831   : > { %v4591_v48 = vsel %vm4335_vm14, %v19866_v16, 1024.0  ;;  %vm4338_vm1 = vcmp.eq.f32.partialorder %v19868_v62, %v14739_v11  ;;  %v4818_v55 = vmin.f32 %v4590_v49, %v4817_v37  ;;  %v8003_v37 = vpop.f32.mrf.mxu1  ;;  %v19873_v49 = vld [vmem:[#allocation60_spill] sm:$0xff]  ;;  %v15131_v44 = vadd.s32 520, %v14429_v32  ;;  %v15149_v41 = vpop.xlane.xlu0 %6013 }
 0x832   : > { %v4951_v18 = vmin.f32 %v4591_v48, %v4950_v1  ;;  %v4592_v56 = vsel %vm4336_vm15, %v19871_v58, 1024.0  ;;  %v19872_v16 = vmov %v19871_v58  ;;  %vm4340_vm3 = vcmp.eq.f32.partialorder %v19873_v49, %v14739_v11  ;;  %v19874_v48 = vld [vmem:[#allocation58_spill] sm:$0xff] }
 0x833   : > { %v4593_v1 = vsel %vm4337_vm0, %v19872_v16, 1024.0  ;;  %vm4341_vm4 = vcmp.eq.f32.partialorder %v19874_v48, %v14741_v14  ;;  %v4819_v9 = vmin.f32 %v4592_v56, %v4818_v55  ;;  %v19875_v36 = vcvt.s32.f32 %v14605_v24  ;;  %v15143_v37 = vpop.f32.mrf.mxu1  ;;  %v19878_v55 = vld [vmem:[#allocation51_spill] sm:$0xff] }
 0x834   : > { %v4952_v21 = vmin.f32 %v4593_v1, %v4951_v18  ;;  %19877 = vst [vmem:[#allocation73_spill] sm:$0xff] %v15143_v37  ;;  %vm4342_vm5 = vcmp.eq.f32.partialorder %v19878_v55, %v14739_v11  ;;  %v19879_v18 = vld [vmem:[#allocation52_spill] sm:$0xff]  ;;  %v15169_v49 = vadd.s32 744, %v14429_v32  ;;  %v15190_v55 = vadd.s32 776, %v14429_v32 }
 0x835   : > { %v4594_v22 = vsel %vm4338_vm1, %v19875_v36, 1024.0  ;;  %v19876_v58 = vmov %v19875_v36  ;;  %vm4343_vm6 = vcmp.eq.f32.partialorder %v19879_v18, %v14741_v14  ;;  %v19880_v36 = vcvt.s32.f32 %v14608_v10  ;;  %v15187_v62 = vpop.xlane.xlu0 %6017 }
 0x836   : > { %v4595_v16 = vsel %vm4339_vm2, %v19876_v58, 1024.0  ;;  %v4820_v56 = vmin.f32 %v4594_v22, %v4819_v9  ;;  %v8006_v9 = vpop.f32.mrf.mxu1  ;;  %v19883_v22 = vld [vmem:[#allocation56_spill] sm:$0xff]  ;;  %19884 = vst [vmem:[#allocation79_spill] sm:$0xff] %v15169_v49  ;;  %v19885_v10 = vcvt.s32.f32 %v14611_v3  ;;  %19890 = vst [vmem:[#allocation71_spill] sm:$0xff] %v15190_v55  ;;  %v15193_v3 = vadd.s32 728, %v14429_v32 }
 0x837   : > { %v4953_v1 = vmin.f32 %v4595_v16, %v4952_v21  ;;  %v4596_v54 = vsel %vm4340_vm3, %v19880_v36, 1024.0  ;;  %v19881_v58 = vmov %v19880_v36  ;;  %v19882_v21 = vld [vmem:[#allocation55_spill] sm:$0xff]  ;;  %vm4345_vm8 = vcmp.eq.f32.partialorder %v19883_v22, %v14741_v14 }
 0x838   : > { %v4597_v37 = vsel %vm4341_vm4, %v19881_v58, 1024.0  ;;  %vm4344_vm7 = vcmp.eq.f32.partialorder %v19882_v21, %v14739_v11  ;;  %v4821_v16 = vmin.f32 %v4596_v54, %v4820_v56  ;;  %v4598_v48 = vsel %vm4342_vm5, %v19885_v10, 1024.0  ;;  %v15181_v9 = vpop.f32.mrf.mxu1  ;;  %v19889_v56 = vld [vmem:[#allocation78_spill] sm:$0xff]  ;;  %19891 = vst [vmem:[#allocation69_spill] sm:$0xff] %v15193_v3 }
 0x839   : > { %v4954_v24 = vmin.f32 %v4597_v37, %v4953_v1  ;;  %v19886_v36 = vmov %v19885_v10  ;;  %19887 = vst [vmem:[#allocation77_spill] sm:$0xff] %v15181_v9  ;;  %v19888_v37 = vld [vmem:[#allocation80_spill] sm:$0xff]  ;;  %vm4347_vm10 = vcmp.eq.f32.partialorder %v19889_v56, %v14741_v14  ;;  %v19892_v18 = vcvt.s32.f32 %v14614_v23  ;;  %v15229_v21 = vpop.xlane.xlu0 %6019 }
 0x83a   : > { %v4599_v58 = vsel %vm4343_vm6, %v19886_v36, 1024.0  ;;  %vm4346_vm9 = vcmp.eq.f32.partialorder %v19888_v37, %v14739_v11  ;;  %v4822_v1 = vmin.f32 %v4598_v48, %v4821_v16  ;;  %v8011_v16 = vpop.f32.mrf.mxu1  ;;  %v19894_v48 = vld [vmem:[#allocation146_spill] sm:$0xff]  ;;  %v15210_v29 = vadd.s32 760, %v14429_v32 }
 0x83b   : > { %v4955_v54 = vmin.f32 %v4599_v58, %v4954_v24  ;;  %v4600_v10 = vsel %vm4344_vm7, %v19892_v18, 1024.0  ;;  %v19893_v36 = vmov %v19892_v18  ;;  %vm4348_vm11 = vcmp.eq.f32.partialorder %v19894_v48, %v14739_v11  ;;  %v19895_v58 = vld [vmem:[#allocation147_spill] sm:$0xff] }
 0x83c   : > { %v4601_v24 = vsel %vm4345_vm8, %v19893_v36, 1024.0  ;;  %vm4349_vm12 = vcmp.eq.f32.partialorder %v19895_v58, %v14741_v14  ;;  %v4823_v9 = vmin.f32 %v4600_v10, %v4822_v1  ;;  %19896 = vst [vmem:[#allocation76_spill] sm:$0xff] %v15210_v29  ;;  %v19897_v23 = vcvt.s32.f32 %v14617_v4  ;;  %v15223_v16 = vpop.f32.mrf.mxu1  ;;  %v19900_v1 = vld [vmem:[#allocation156_spill] sm:$0xff] }
 0x83d   : > { %v4956_v31 = vmin.f32 %v4601_v24, %v4955_v54  ;;  %19899 = vst [vmem:[#allocation74_spill] sm:$0xff] %v15223_v16  ;;  %vm4350_vm13 = vcmp.eq.f32.partialorder %v19900_v1, %v14739_v11  ;;  %v19901_v54 = vld [vmem:[#allocation157_spill] sm:$0xff]  ;;  %v15233_v4 = vadd.s32 712, %v14429_v32  ;;  %v19903_v56 = vcvt.s32.f32 %v14674_v42  ;;  %v15273_v1 = vpop.xlane.xlu0 %6053 }
 0x83e   : > { %v4602_v22 = vsel %vm4346_vm9, %v19897_v23, 1024.0  ;;  %v19898_v18 = vmov %v19897_v23  ;;  %vm4351_vm14 = vcmp.eq.f32.partialorder %v19901_v54, %v14741_v14  ;;  %v15250_v17 = vadd.s32 696, %v14429_v32  ;;  %19914 = vst [vmem:[#allocation63_spill] sm:$0xff] %v15273_v1 }
 0x83f   : > { %v4603_v36 = vsel %vm4347_vm10, %v19898_v18, 1024.0  ;;  %v4824_v10 = vmin.f32 %v4602_v22, %v4823_v9  ;;  %19902 = vst [vmem:[#allocation67_spill] sm:$0xff] %v15233_v4  ;;  %v4604_v23 = vsel %vm4348_vm11, %v19903_v56, 1024.0  ;;  %v19904_v18 = vmov %v19903_v56  ;;  %v19905_v22 = vld [vmem:[#allocation149_spill] sm:$0xff] }
 0x840   : > { %v4957_v24 = vmin.f32 %v4603_v36, %v4956_v31  ;;  %v4605_v9 = vsel %vm4349_vm12, %v19904_v18, 1024.0  ;;  %v8014_v31 = vpop.f32.mrf.mxu1  ;;  %vm4352_vm15 = vcmp.eq.f32.partialorder %v19905_v22, %v14739_v11  ;;  %v19906_v36 = vld [vmem:[#allocation150_spill] sm:$0xff]  ;;  %19907 = vst [vmem:[#allocation65_spill] sm:$0xff] %v15250_v17  ;;  %v15253_v48 = vadd.s32 544, %v14429_v32 }
 0x841   : > { %vm4353_vm0 = vcmp.eq.f32.partialorder %v19906_v36, %v14741_v14  ;;  %v4825_v37 = vmin.f32 %v4604_v23, %v4824_v10  ;;  %v19908_v42 = vcvt.s32.f32 %v14693_v57  ;;  %v15265_v10 = vpop.xlane.xlu1 %5991  ;;  %v19912_v23 = vld [vmem:[#allocation161_spill] sm:$0xff]  ;;  %v19916_v54 = vcvt.s32.f32 %v14668_v30 }
 0x842   : > { %v4958_v16 = vmin.f32 %v4605_v9, %v4957_v24  ;;  %19910 = vst [vmem:[#allocation72_spill] sm:$0xff] %v15265_v10  ;;  %v15267_v24 = vpop.f32.mrf.mxu1  ;;  %vm4354_vm1 = vcmp.eq.f32.partialorder %v19912_v23, %v14739_v11  ;;  %v19913_v9 = vld [vmem:[#allocation162_spill] sm:$0xff]  ;;  %v15313_v23 = vpop.xlane.xlu0 %6057  ;;  %v15334_v55 = vadd.s32 664, %v14429_v32  ;;  %v19949_v3 = vcvt.s32.f32 %v14639_v50 }
 0x843   : > { %v4606_v58 = vsel %vm4350_vm13, %v19908_v42, 1024.0  ;;  %v19909_v56 = vmov %v19908_v42  ;;  %19911 = vst [vmem:[#allocation70_spill] sm:$0xff] %v15267_v24  ;;  %vm4355_vm2 = vcmp.eq.f32.partialorder %v19913_v9, %v14741_v14  ;;  %v15277_v42 = vadd.s32 680, %v14429_v32  ;;  %19925 = vst [vmem:[#allocation66_spill] sm:$0xff] %v15313_v23 }
 0x844   : > { %v4607_v18 = vsel %vm4351_vm14, %v19909_v56, 1024.0  ;;  %v4826_v31 = vmin.f32 %v4606_v58, %v4825_v37  ;;  %v4608_v56 = vsel %vm4352_vm15, %v19916_v54, 1024.0  ;;  %v19917_v24 = vmov %v19916_v54  ;;  %v19918_v58 = vld [vmem:[#allocation153_spill] sm:$0xff]  ;;  %19930 = vst [vmem:[#allocation59_spill] sm:$0xff] %v15334_v55 }
 0x845   : > { %v4959_v61 = vmin.f32 %v4607_v18, %v4958_v16  ;;  %19915 = vst [vmem:[#allocation61_spill] sm:$0xff] %v15277_v42  ;;  %v4609_v37 = vsel %vm4353_vm0, %v19917_v24, 1024.0  ;;  %v8019_v16 = vpop.f32.mrf.mxu1  ;;  %vm4356_vm3 = vcmp.eq.f32.partialorder %v19918_v58, %v14739_v11  ;;  %v19919_v18 = vld [vmem:[#allocation154_spill] sm:$0xff]  ;;  %v19920_v54 = vcvt.s32.f32 %v14687_v6 }
 0x846   : > { %vm4357_vm4 = vcmp.eq.f32.partialorder %v19919_v18, %v14741_v14  ;;  %v4827_v57 = vmin.f32 %v4608_v56, %v4826_v31  ;;  %v15305_v16 = vpop.xlane.xlu1 %5995  ;;  %v19924_v56 = vld [vmem:[#allocation168_spill] sm:$0xff]  ;;  %v19926_v9 = vcvt.s32.f32 %v14662_v47  ;;  %v15337_v58 = vadd.s32 512, %v14429_v32 }
 0x847   : > { %v4960_v52 = vmin.f32 %v4609_v37, %v4959_v61  ;;  %v4610_v30 = vsel %vm4354_vm1, %v19920_v54, 1024.0  ;;  %v19921_v36 = vmov %v19920_v54  ;;  %v15307_v31 = vpop.f32.mrf.mxu1  ;;  %v19923_v61 = vld [vmem:[#allocation167_spill] sm:$0xff]  ;;  %vm4359_vm6 = vcmp.eq.f32.partialorder %v19924_v56, %v14741_v14 }
 0x848   : > { %v4611_v24 = vsel %vm4355_vm2, %v19921_v36, 1024.0  ;;  %19922 = vst [vmem:[#allocation68_spill] sm:$0xff] %v15307_v31  ;;  %vm4358_vm5 = vcmp.eq.f32.partialorder %v19923_v61, %v14739_v11  ;;  %v4828_v37 = vmin.f32 %v4610_v30, %v4827_v57  ;;  %v15317_v54 = vadd.s32 528, %v14429_v32  ;;  %v19928_v30 = vld [vmem:[#allocation159_spill] sm:$0xff]  ;;  %v15357_v61 = vpop.xlane.xlu0 %6061 }
 0x849   : > { %v4961_v43 = vmin.f32 %v4611_v24, %v4960_v52  ;;  %v4612_v36 = vsel %vm4356_vm3, %v19926_v9, 1024.0  ;;  %v19927_v22 = vmov %v19926_v9  ;;  %v8022_v52 = vpop.f32.mrf.mxu1  ;;  %vm4360_vm7 = vcmp.eq.f32.partialorder %v19928_v30, %v14739_v11  ;;  %v19929_v24 = vld [vmem:[#allocation160_spill] sm:$0xff]  ;;  %19936 = vst [vmem:[#allocation64_spill] sm:$0xff] %v15357_v61 }
 0x84a   : > { %v4613_v57 = vsel %vm4357_vm4, %v19927_v22, 1024.0  ;;  %vm4361_vm8 = vcmp.eq.f32.partialorder %v19929_v24, %v14741_v14  ;;  %v4829_v6 = vmin.f32 %v4612_v36, %v4828_v37  ;;  %v19931_v47 = vcvt.s32.f32 %v14677_v34  ;;  %v15349_v37 = vpop.xlane.xlu1 %5999  ;;  %v19934_v36 = vld [vmem:[#allocation173_spill] sm:$0xff] }
 0x84b   : > { %v4962_v31 = vmin.f32 %v4613_v57, %v4961_v43  ;;  %v15351_v43 = vpop.f32.mrf.mxu1  ;;  %vm4362_vm9 = vcmp.eq.f32.partialorder %v19934_v36, %v14739_v11  ;;  %v19935_v57 = vld [vmem:[#allocation174_spill] sm:$0xff]  ;;  %v19938_v56 = vcvt.s32.f32 %v14649_v27  ;;  %v19946_v36 = vld [vmem:[#allocation180_spill] sm:$0xff]  ;;  %v15427_v50 = vadd.s32 752, %v14429_v32 }
 0x84c   : > { %v4614_v18 = vsel %vm4358_vm5, %v19931_v47, 1024.0  ;;  %v19932_v22 = vmov %v19931_v47  ;;  %19933 = vst [vmem:[#allocation57_spill] sm:$0xff] %v15351_v43  ;;  %vm4363_vm10 = vcmp.eq.f32.partialorder %v19935_v57, %v14741_v14  ;;  %v15361_v47 = vadd.s32 648, %v14429_v32 }
 0x84d   : > { %v4615_v9 = vsel %vm4359_vm6, %v19932_v22, 1024.0  ;;  %v4830_v52 = vmin.f32 %v4614_v18, %v4829_v6  ;;  %v4616_v22 = vsel %vm4360_vm7, %v19938_v56, 1024.0  ;;  %v19939_v43 = vmov %v19938_v56  ;;  %v19940_v18 = vld [vmem:[#allocation165_spill] sm:$0xff]  ;;  %19954 = vst [vmem:[#allocation58_spill] sm:$0xff] %v15427_v50 }
 0x84e   : > { %v4963_v49 = vmin.f32 %v4615_v9, %v4962_v31  ;;  %19937 = vst [vmem:[#allocation62_spill] sm:$0xff] %v15361_v47  ;;  %v4617_v6 = vsel %vm4361_vm8, %v19939_v43, 1024.0  ;;  %v8027_v31 = vpop.f32.mrf.mxu1  ;;  %vm4364_vm11 = vcmp.eq.f32.partialorder %v19940_v18, %v14739_v11  ;;  %v19941_v9 = vld [vmem:[#allocation166_spill] sm:$0xff]  ;;  %v19942_v56 = vcvt.s32.f32 %v14671_v46 }
 0x84f   : > { %vm4365_vm12 = vcmp.eq.f32.partialorder %v19941_v9, %v14741_v14  ;;  %v4831_v34 = vmin.f32 %v4616_v22, %v4830_v52  ;;  %v15389_v31 = vpop.xlane.xlu1 %6003  ;;  %v19945_v22 = vld [vmem:[#allocation179_spill] sm:$0xff]  ;;  %vm4367_vm14 = vcmp.eq.f32.partialorder %v19946_v36, %v14741_v14  ;;  %v15403_v57 = vadd.s32 768, %v14429_v32 }
 0x850   : > { %v4964_v29 = vmin.f32 %v4617_v6, %v4963_v49  ;;  %v4618_v27 = vsel %vm4362_vm9, %v19942_v56, 1024.0  ;;  %v19943_v24 = vmov %v19942_v56  ;;  %v15391_v52 = vpop.f32.mrf.mxu1  ;;  %v6439_v49 = vld [vmem:[%s18429_s12] sm:$0xff]  ;;  %vm4366_vm13 = vcmp.eq.f32.partialorder %v19945_v22, %v14739_v11  ;;  %v15400_v56 = vpop.xlane.xlu0 %6065 }
 0x851   : > { %v4619_v43 = vsel %vm4363_vm10, %v19943_v24, 1024.0  ;;  %19944 = vst [vmem:[#allocation54_spill] sm:$0xff] %v15391_v52  ;;  %v4832_v6 = vmin.f32 %v4618_v27, %v4831_v34  ;;  %19947 = vst [vmem:[#allocation53_spill] sm:$0xff] %v15400_v56  ;;  %v4620_v30 = vsel %vm4364_vm11, %v19949_v3, 1024.0  ;;  %v19950_v52 = vmov %v19949_v3  ;;  %v6440_v27 = vld [vmem:[%s18429_s12 + $0x8] sm:$0xff]  ;;  %v19953_v3 = vld [vmem:[#allocation226_spill] sm:$0xff] }
 0x852   : > { %v4965_v46 = vmin.f32 %v4619_v43, %v4964_v29  ;;  %19948 = vst [vmem:[#allocation60_spill] sm:$0xff] %v15403_v57  ;;  %v4621_v34 = vsel %vm4365_vm12, %v19950_v52, 1024.0  ;;  %v8030_v29 = vpop.f32.mrf.mxu1  ;;  %v19951_v43 = vld [vmem:[#allocation171_spill] sm:$0xff]  ;;  %v19952_v24 = vld [vmem:[#allocation172_spill] sm:$0xff]  ;;  %v15424_v4 = vadd.f32 %v19953_v3, %v6439_v49  ;;  %v19955_v9 = vcvt.s32.f32 %v14665_v35 }
 0x853   : > { %vm4368_vm15 = vcmp.eq.f32.partialorder %v19951_v43, %v14739_v11  ;;  %vm4369_vm0 = vcmp.eq.f32.partialorder %v19952_v24, %v14741_v14  ;;  %v4833_v57 = vmin.f32 %v4620_v30, %v4832_v6  ;;  %v15439_v30 = vpop.xlane.xlu1 %6007  ;;  %v6441_v49 = vld [vmem:[%s18429_s12 + $0x10] sm:$0xff]  ;;  %v19958_v22 = vld [vmem:[#allocation183_spill] sm:$0xff]  ;;  %v19963_v50 = vcvt.s32.f32 %v14630_v51 }
 0x854   : > { %v4966_v18 = vmin.f32 %v4621_v34, %v4965_v46  ;;  %v4622_v52 = vsel %vm4366_vm13, %v19955_v9, 1024.0  ;;  %v19956_v29 = vmov %v19955_v9  ;;  %v15441_v6 = vpop.f32.mrf.mxu1  ;;  %v6442_v46 = vld [vmem:[%s18429_s12 + $0x18] sm:$0xff]  ;;  %vm4370_vm1 = vcmp.eq.f32.partialorder %v19958_v22, %v14739_v11  ;;  %v19959_v35 = vld [vmem:[#allocation184_spill] sm:$0xff]  ;;  %v15453_v3 = vpop.xlane.xlu0 %6069 }
 0x855   : > { %v4623_v17 = vsel %vm4367_vm14, %v19956_v29, 1024.0  ;;  %19957 = vst [vmem:[#allocation51_spill] sm:$0xff] %v15441_v6  ;;  %vm4371_vm2 = vcmp.eq.f32.partialorder %v19959_v35, %v14741_v14  ;;  %v4834_v36 = vmin.f32 %v4622_v52, %v4833_v57  ;;  %19960 = vst [vmem:[#allocation52_spill] sm:$0xff] %v15453_v3  ;;  %v19961_v9 = vld [vmem:[#allocation228_spill] sm:$0xff]  ;;  %v15459_v6 = vadd.s32 736, %v14429_v32  ;;  %v19965_v52 = vld [vmem:[#allocation186_spill] sm:$0xff] }
 0x856   : > { %v4967_v34 = vmin.f32 %v4623_v17, %v4966_v18  ;;  %v15456_v29 = vadd.f32 %v19961_v9, %v6440_v27  ;;  %v4624_v42 = vsel %vm4368_vm15, %v19963_v50, 1024.0  ;;  %v19964_v55 = vmov %v19963_v50  ;;  %v8035_v57 = vpop.f32.mrf.mxu1  ;;  %v6443_v27 = vld [vmem:[%s18429_s12 + $0x20] sm:$0xff]  ;;  %v6444_v18 = vld [vmem:[%s18429_s12 + $0x28] sm:$0xff] }
 0x857   : > { %19962 = vst [vmem:[#allocation55_spill] sm:$0xff] %v15459_v6  ;;  %v4625_v17 = vsel %vm4369_vm0, %v19964_v55, 1024.0  ;;  %vm4372_vm3 = vcmp.eq.f32.partialorder %v19965_v52, %v14739_v11  ;;  %v19966_v43 = vld [vmem:[#allocation188_spill] sm:$0xff]  ;;  %v4835_v51 = vmin.f32 %v4624_v42, %v4834_v36  ;;  %v19967_v9 = vld [vmem:[#allocation230_spill] sm:$0xff]  ;;  %v19969_v6 = vcvt.s32.f32 %v14659_v25  ;;  %v15497_v42 = vpop.xlane.xlu1 %6011  ;;  %v19973_v25 = vld [vmem:[#allocation87_spill] sm:$0xff] }
 0x858   : > { %vm4373_vm4 = vcmp.eq.f32.partialorder %v19966_v43, %v14741_v14  ;;  %v4968_v50 = vmin.f32 %v4625_v17, %v4967_v34  ;;  %v15482_v24 = vadd.f32 %v19967_v9, %v6441_v49  ;;  %v19968_v55 = vld [vmem:[#allocation232_spill] sm:$0xff]  ;;  %v15499_v36 = vpop.f32.mrf.mxu1  ;;  %vm4375_vm6 = vcmp.eq.f32.partialorder %v19973_v25, %v14741_v14  ;;  %v15511_v35 = vpop.xlane.xlu0 %6073  ;;  %v19974_v34 = vld [vmem:[#allocation234_spill] sm:$0xff]  ;;  %v19975_v9 = vld [vmem:[#allocation237_spill] sm:$0xff] }
 0x859   : > { %v15485_v57 = vadd.f32 %v19968_v55, %v6442_v46  ;;  %v4626_v47 = vsel %vm4370_vm1, %v19969_v6, 1024.0  ;;  %v19970_v23 = vmov %v19969_v6  ;;  %19971 = vst [vmem:[#allocation56_spill] sm:$0xff] %v15499_v36  ;;  %v6445_v49 = vld [vmem:[%s18429_s12 + $0x30] sm:$0xff]  ;;  %v6446_v46 = vld [vmem:[%s18429_s12 + $0x38] sm:$0xff]  ;;  %v15514_v17 = vadd.f32 %v19974_v34, %v6443_v27  ;;  %v6447_v27 = vld [vmem:[%s18429_s12 + $0x40] sm:$0xff] }
 0x85a   : > { %v4627_v12 = vsel %vm4371_vm2, %v19970_v23, 1024.0  ;;  %v19972_v6 = vld [vmem:[#allocation193_spill] sm:$0xff]  ;;  %v4836_v22 = vmin.f32 %v4626_v47, %v4835_v51  ;;  %v15517_v55 = vadd.f32 %v19975_v9, %v6444_v18  ;;  %v19977_v36 = vcvt.s32.f32 %v14633_v15  ;;  %v8038_v47 = vpop.f32.mrf.mxu1  ;;  %v6448_v18 = vld [vmem:[%s18429_s12 + $0x48] sm:$0xff]  ;;  %v19985_v9 = vld [vmem:[#allocation318_spill] sm:$0xff] }
 0x85b   : > { %vm4374_vm5 = vcmp.eq.f32.partialorder %v19972_v6, %v14739_v11  ;;  %v4969_v23 = vmin.f32 %v4627_v12, %v4968_v50  ;;  %v19979_v51 = vld [vmem:[#allocation196_spill] sm:$0xff]  ;;  %v19980_v52 = vld [vmem:[#allocation197_spill] sm:$0xff]  ;;  %v19986_v47 = vcvt.s32.f32 %v19985_v9  ;;  %v19993_v9 = vld [vmem:[#allocation135_spill] sm:$0xff]  ;;  %vm4382_vm13 = vcmp.eq.f32.partialorder %v20004_v45, %v14739_v11 }
 0x85c   : > { %19976 = vst [vmem:[#allocation80_spill] sm:$0xff] %v15517_v55  ;;  %v4628_v61 = vsel %vm4372_vm3, %v19977_v36, 1024.0  ;;  %v19978_v40 = vmov %v19977_v36  ;;  %vm4376_vm7 = vcmp.eq.f32.partialorder %v19979_v51, %v14739_v11  ;;  %vm4377_vm8 = vcmp.eq.f32.partialorder %v19980_v52, %v14741_v14  ;;  %v19981_v36 = vld [vmem:[#allocation240_spill] sm:$0xff]  ;;  %v15569_v25 = vpop.xlane.xlu0 %6077 }
 0x85d   : > { %v4629_v12 = vsel %vm4373_vm4, %v19978_v40, 1024.0  ;;  %v4837_v15 = vmin.f32 %v4628_v61, %v4836_v22  ;;  %v15540_v43 = vadd.f32 %v19981_v36, %v6445_v49  ;;  %v19983_v40 = vld [vmem:[#allocation141_spill] sm:$0xff]  ;;  %v4630_v38 = vsel %vm4374_vm5, %v19986_v47, 1024.0  ;;  %v15555_v61 = vpop.xlane.xlu1 %6015  ;;  %v15557_v22 = vpop.f32.mrf.mxu1  ;;  %v6184_v6 = vld [vmem:[%s18428_s11 + $0x208] sm:$0xff] }
 0x85e   : > { %v4970_v50 = vmin.f32 %v4629_v12, %v4969_v23  ;;  %v15543_v34 = vadd.f32 %v19983_v40, %v6446_v46  ;;  %v19987_v56 = vmov %v19986_v47  ;;  %19988 = vst [vmem:[#allocation147_spill] sm:$0xff] %v15557_v22  ;;  %v19989_v49 = vld [vmem:[#allocation177_spill] sm:$0xff]  ;;  %v19990_v46 = vld [vmem:[#allocation178_spill] sm:$0xff]  ;;  %v19991_v36 = vld [vmem:[#allocation244_spill] sm:$0xff]  ;;  %v15575_v47 = vadd.f32 %v19993_v9, %v6448_v18 }
 0x85f   : > { %19982 = vst [vmem:[#allocation78_spill] sm:$0xff] %v15540_v43  ;;  %v4631_v1 = vsel %vm4375_vm6, %v19987_v56, 1024.0  ;;  %vm4378_vm9 = vcmp.eq.f32.partialorder %v19989_v49, %v14739_v11  ;;  %vm4379_vm10 = vcmp.eq.f32.partialorder %v19990_v46, %v14741_v14  ;;  %v4838_v23 = vmin.f32 %v4630_v38, %v4837_v15  ;;  %v6188_v56 = vld [vmem:[%s18428_s11 + $0x228] sm:$0xff]  ;;  %v19995_v22 = vld [vmem:[#allocation317_spill] sm:$0xff]  ;;  %v19998_v18 = vld [vmem:[#allocation190_spill] sm:$0xff] }
 0x860   : > { %19984 = vst [vmem:[#allocation146_spill] sm:$0xff] %v15543_v34  ;;  %v4971_v12 = vmin.f32 %v4631_v1, %v4970_v50  ;;  %v15572_v40 = vadd.f32 %v19991_v36, %v6447_v27  ;;  %19994 = vst [vmem:[#allocation157_spill] sm:$0xff] %v15575_v47  ;;  %v19996_v34 = vcvt.s32.f32 %v19995_v22  ;;  %v8043_v50 = vpop.f32.mrf.mxu1  ;;  %v6449_v27 = vld [vmem:[%s18429_s12 + $0x50] sm:$0xff]  ;;  %vm4380_vm11 = vcmp.eq.f32.partialorder %v19998_v18, %v14739_v11  ;;  %v19999_v36 = vld [vmem:[#allocation191_spill] sm:$0xff] }
 0x861   : > { %vm4381_vm12 = vcmp.eq.f32.partialorder %v19999_v36, %v14741_v14  ;;  %v15602_v52 = vld [vmem:[%s18428_s11 + $0x268] sm:$0xff]  ;;  %v6450_v43 = vld [vmem:[%s18429_s12 + $0x58] sm:$0xff]  ;;  %v20015_v36 = vcvt.s32.f32 %v14779_v59 }
 0x862   : > { %19992 = vst [vmem:[#allocation156_spill] sm:$0xff] %v15572_v40  ;;  %v4632_v38 = vsel %vm4376_vm7, %v19996_v34, 1024.0  ;;  %v19997_v1 = vmov %v19996_v34  ;;  %v15597_v34 = vld [vmem:[%s18428_s11 + $0x248] sm:$0xff]  ;;  %v15616_v40 = vpop.f32.mrf.mxu1  ;;  %v20005_v49 = vld [vmem:[#allocation86_spill] sm:$0xff]  ;;  %v20006_v46 = vld [vmem:[#allocation249_spill] sm:$0xff] }
 0x863   : > { %v4633_v15 = vsel %vm4377_vm8, %v19997_v1, 1024.0  ;;  %v4839_v9 = vmin.f32 %v4632_v38, %v4838_v23  ;;  %v20000_v22 = vld [vmem:[#allocation316_spill] sm:$0xff]  ;;  %v10207_v38 = vcombine.high %v6184_v6, %v6188_v56  ;;  %20003 = vst [vmem:[#allocation149_spill] sm:$0xff] %v15616_v40  ;;  %vm4383_vm14 = vcmp.eq.f32.partialorder %v20005_v49, %v14741_v14 }
 0x864   : > { %v4972_v51 = vmin.f32 %v4633_v15, %v4971_v12  ;;  %v20001_v1 = vcvt.s32.f32 %v20000_v22  ;;  %v10206_v12 = vcombine.low %v6184_v6, %v6188_v56  ;;  %v15614_v15 = vpop.xlane.xlu1 %6021  ;;  %v20008_v6 = vcvt.s32.f32 %v14744_v7  ;;  %v20012_v7 = vld [vmem:[#allocation139_spill] sm:$0xff]  ;;  %v20020_v49 = vld [vmem:[#allocation140_spill] sm:$0xff] }
 0x865   : > { %8168 = vmatprep.mubr.bf16.mxu1 %v10207_v38  ;;  %v4638_v38 = vsel %vm4382_vm13, %v20015_v36, 1024.0  ;;  %v15670_v45 = vld [vmem:[%s18428_s11 + $0x288] sm:$0xff] }
 0x866   : > { %v4634_v50 = vsel %vm4378_vm9, %v20001_v1, 1024.0  ;;  %v20002_v47 = vmov %v20001_v1  ;;  %v4636_v56 = vsel %vm4380_vm11, %v20008_v6, 1024.0  ;;  %v20009_v40 = vmov %v20008_v6  ;;  %8169 = vmatmul.mubr.bf16.gmra.mxu1 %v10206_v12  ;;  %v15675_v59 = vld [vmem:[%s18428_s11 + $0x2a8] sm:$0xff] }
 0x867   : > { %v4635_v23 = vsel %vm4379_vm10, %v20002_v47, 1024.0  ;;  %v4840_v22 = vmin.f32 %v4634_v50, %v4839_v9  ;;  %v15626_v47 = vadd.f32 %v20006_v46, %v6449_v27  ;;  %v4637_v26 = vsel %vm4381_vm12, %v20009_v40, 1024.0  ;;  %v20010_v27 = vld [vmem:[#allocation88_spill] sm:$0xff]  ;;  %v20011_v50 = vld [vmem:[#allocation194_spill] sm:$0xff]  ;;  %v15644_v46 = vpop.xlane.xlu0 %6081  ;;  %v20014_v40 = vld [vmem:[#allocation89_spill] sm:$0xff] }
 0x868   : > { %v4973_v1 = vmin.f32 %v4635_v23, %v4972_v51  ;;  %v10215_v9 = vcombine.high %v15597_v34, %v15602_v52  ;;  %v8046_v51 = vpop.f32.mrf.mxu1  ;;  %vm4384_vm15 = vcmp.eq.f32.partialorder %v20010_v27, %v14739_v11  ;;  %vm4385_vm0 = vcmp.eq.f32.partialorder %v20011_v50, %v14741_v14  ;;  %v15661_v12 = vpop.xlane.xlu1 %6047 }
 0x869   : > { %20007 = vst [vmem:[#allocation150_spill] sm:$0xff] %v15626_v47  ;;  %v4841_v23 = vmin.f32 %v4636_v56, %v4840_v22  ;;  %v15647_v6 = vadd.f32 %v20012_v7, %v6450_v43  ;;  %vm4386_vm1 = vcmp.eq.f32.partialorder %v20014_v40, %v14739_v11  ;;  %v20016_v51 = vmov %v20015_v36  ;;  %20017 = vst [vmem:[#allocation162_spill] sm:$0xff] %v15661_v12  ;;  %v20019_v22 = vld [vmem:[#allocation90_spill] sm:$0xff]  ;;  %v20022_v36 = vld [vmem:[#allocation91_spill] sm:$0xff] }
 0x86a   : > { %v4974_v18 = vmin.f32 %v4637_v26, %v4973_v1  ;;  %v4639_v26 = vsel %vm4383_vm14, %v20016_v51, 1024.0  ;;  %8176 = vmatprep.mubr.bf16.mxu1 %v10215_v9  ;;  %v15663_v43 = vpop.f32.mrf.mxu1  ;;  %vm4387_vm2 = vcmp.eq.f32.partialorder %v20019_v22, %v14741_v14  ;;  %v20021_v9 = vld [vmem:[#allocation251_spill] sm:$0xff]  ;;  %vm4388_vm3 = vcmp.eq.f32.partialorder %v20022_v36, %v14739_v11  ;;  %v20023_v51 = vld [vmem:[#allocation92_spill] sm:$0xff]  ;;  %v20027_v12 = vld [vmem:[#allocation94_spill] sm:$0xff] }
 0x86b   : > { %20013 = vst [vmem:[#allocation161_spill] sm:$0xff] %v15647_v6  ;;  %20018 = vst [vmem:[#allocation153_spill] sm:$0xff] %v15663_v43  ;;  %v4842_v1 = vmin.f32 %v4638_v38, %v4841_v23  ;;  %v5202_v7 = vmax.f32 %v20021_v9, %v20020_v49  ;;  %vm4389_vm4 = vcmp.eq.f32.partialorder %v20023_v51, %v14741_v14  ;;  %v20024_v23 = vcvt.s32.f32 %v14732_v39  ;;  %v20026_v49 = vld [vmem:[#allocation93_spill] sm:$0xff]  ;;  %v20033_v40 = vld [vmem:[#allocation242_spill] sm:$0xff] }
 0x86c   : > { %v4975_v56 = vmin.f32 %v4639_v26, %v4974_v18  ;;  %v8051_v43 = vpop.f32.mrf.mxu1  ;;  %vm4390_vm5 = vcmp.eq.f32.partialorder %v20026_v49, %v14739_v11  ;;  %v10214_v47 = vcombine.low %v15597_v34, %v15602_v52  ;;  %vm4391_vm6 = vcmp.eq.f32.partialorder %v20027_v12, %v14741_v14  ;;  %v15711_v34 = vpop.xlane.xlu1 %6051  ;;  %v20035_v22 = vld [vmem:[#allocation96_spill] sm:$0xff] }
 0x86d   : > { %v4640_v18 = vsel %vm4384_vm15, %v20024_v23, 1024.0  ;;  %v20025_v38 = vmov %v20024_v23  ;;  %6099 = vmax.xlane.f32.xlu1 %v5202_v7  ;;  %v20028_v27 = vcvt.s32.f32 %v14753_v20  ;;  %20030 = vst [vmem:[#allocation154_spill] sm:$0xff] %v15711_v34  ;;  %v15719_v20 = vpop.xlane.xlu0 %6083  ;;  %vm4393_vm8 = vcmp.eq.f32.partialorder %v20035_v22, %v14741_v14  ;;  %v20041_v36 = vld [vmem:[#allocation100_spill] sm:$0xff] }
 0x86e   : > { %v4641_v26 = vsel %vm4385_vm0, %v20025_v38, 1024.0  ;;  %v4843_v9 = vmin.f32 %v4640_v18, %v4842_v1  ;;  %v10223_v1 = vcombine.high %v15670_v45, %v15675_v59  ;;  %v15713_v52 = vpop.f32.mrf.mxu1  ;;  %v20034_v18 = vld [vmem:[#allocation241_spill] sm:$0xff]  ;;  %8177 = vmatmul.mubr.bf16.gmra.mxu1 %v10214_v47  ;;  %vm4396_vm11 = vcmp.eq.f32.partialorder %v20041_v36, %v14739_v11  ;;  %v15763_v49 = vld [vmem:[%s18428_s11 + $0x2c8] sm:$0xff] }
 0x86f   : > { %v4976_v6 = vmin.f32 %v4641_v26, %v4975_v56  ;;  %v4642_v39 = vsel %vm4386_vm1, %v20028_v27, 1024.0  ;;  %v20029_v50 = vmov %v20028_v27  ;;  %20031 = vst [vmem:[#allocation167_spill] sm:$0xff] %v15713_v52  ;;  %v20032_v56 = vld [vmem:[#allocation95_spill] sm:$0xff]  ;;  %v5168_v38 = vmax.f32 %v20034_v18, %v20033_v40  ;;  %v20036_v26 = vld [vmem:[#allocation97_spill] sm:$0xff]  ;;  %v20040_v52 = vld [vmem:[#allocation98_spill] sm:$0xff] }
 0x870   : > { %v4643_v43 = vsel %vm4387_vm2, %v20029_v50, 1024.0  ;;  %vm4392_vm7 = vcmp.eq.f32.partialorder %v20032_v56, %v14739_v11  ;;  %v4844_v7 = vmin.f32 %v4642_v39, %v4843_v9  ;;  %vm4394_vm9 = vcmp.eq.f32.partialorder %v20036_v26, %v14739_v11  ;;  %v8054_v39 = vpop.f32.mrf.mxu1  ;;  %8184 = vmatprep.mubr.bf16.mxu1 %v10223_v1  ;;  %v15754_v47 = vpop.xlane.xlu1 %6055  ;;  %v15768_v12 = vld [vmem:[%s18428_s11 + $0x2e8] sm:$0xff]  ;;  %v20057_v56 = vld [vmem:[#allocation105_spill] sm:$0xff] }
 0x871   : > { %v4977_v23 = vmin.f32 %v4643_v43, %v4976_v6  ;;  %v20037_v27 = vcvt.s32.f32 %v14726_v60  ;;  %v15736_v43 = vadd.s32 720, %v14429_v32  ;;  %vm4395_vm10 = vcmp.eq.f32.partialorder %v20040_v52, %v14741_v14  ;;  %6031 = vmax.xlane.f32.xlu1 %v5168_v38  ;;  %v20042_v60 = vld [vmem:[#allocation200_spill] sm:$0xff]  ;;  %20046 = vst [vmem:[#allocation159_spill] sm:$0xff] %v15754_v47  ;;  %v20048_v38 = vld [vmem:[#allocation101_spill] sm:$0xff]  ;;  %v6086_v3 = vpop.xlane.xlu0 %6085 }
 0x872   : > { %vm4397_vm12 = vcmp.eq.f32.partialorder %v20042_v60, %v14741_v14  ;;  %vm4398_vm13 = vcmp.eq.f32.partialorder %v20048_v38, %v14739_v11  ;;  %v20049_v1 = vld [vmem:[#allocation152_spill] sm:$0xff]  ;;  %v10222_v55 = vcombine.low %v15670_v45, %v15675_v59  ;;  %vm4402_vm1 = vcmp.eq.f32.partialorder %v20057_v56, %v14739_v11 }
 0x873   : > { %v4644_v50 = vsel %vm4388_vm3, %v20037_v27, 1024.0  ;;  %v20038_v9 = vmov %v20037_v27  ;;  %20039 = vst [vmem:[#allocation168_spill] sm:$0xff] %v15736_v43  ;;  %v20043_v27 = vld [vmem:[#allocation331_spill] sm:$0xff]  ;;  %v10231_v45 = vcombine.high %v15763_v49, %v15768_v12  ;;  %v20064_v26 = vld [vmem:[#allocation308_spill] sm:$0xff]  ;;  %v10230_v53 = vcombine.low %v15763_v49, %v15768_v12 }
 0x874   : > { %v4645_v6 = vsel %vm4389_vm4, %v20038_v9, 1024.0  ;;  %v4845_v40 = vmin.f32 %v4644_v50, %v4844_v7  ;;  %v20044_v51 = vcvt.s32.f32 %v20043_v27  ;;  %v20050_v27 = vld [vmem:[#allocation151_spill] sm:$0xff]  ;;  %v15804_v59 = vpop.xlane.xlu1 %6059  ;;  %v20067_v52 = vld [vmem:[#allocation204_spill] sm:$0xff] }
 0x875   : > { %v4978_v18 = vmin.f32 %v4645_v6, %v4977_v23  ;;  %v15756_v23 = vpop.f32.mrf.mxu1  ;;  %20061 = vst [vmem:[#allocation173_spill] sm:$0xff] %v15804_v59  ;;  %vm4405_vm4 = vcmp.eq.f32.partialorder %v20067_v52, %v14741_v14  ;;  %v20072_v36 = vld [vmem:[#allocation212_spill] sm:$0xff]  ;;  %v20102_v52 = vld [vmem:[#allocation111_spill] sm:$0xff] }
 0x876   : > { %v4646_v9 = vsel %vm4390_vm5, %v20044_v51, 1024.0  ;;  %v20045_v39 = vmov %v20044_v51  ;;  %20047 = vst [vmem:[#allocation160_spill] sm:$0xff] %v15756_v23  ;;  %v5200_v51 = vmax.f32 %v20050_v27, %v20049_v1  ;;  %v20052_v23 = vld [vmem:[#allocation104_spill] sm:$0xff]  ;;  %v20056_v1 = vld [vmem:[#allocation202_spill] sm:$0xff]  ;;  %8185 = vmatmul.mubr.bf16.gmra.mxu1 %v10222_v55 }
 0x877   : > { %v4647_v7 = vsel %vm4391_vm6, %v20045_v39, 1024.0  ;;  %v4846_v50 = vmin.f32 %v4646_v9, %v4845_v40  ;;  %v20051_v39 = vld [vmem:[#allocation102_spill] sm:$0xff]  ;;  %vm4400_vm15 = vcmp.eq.f32.partialorder %v20052_v23, %v14739_v11  ;;  %v20053_v40 = vld [vmem:[#allocation327_spill] sm:$0xff]  ;;  %v8059_v47 = vpop.f32.mrf.mxu1  ;;  %vm4401_vm0 = vcmp.eq.f32.partialorder %v20056_v1, %v14741_v14  ;;  %8192 = vmatprep.mubr.bf16.mxu1 %v10231_v45  ;;  %v20080_v45 = vld [vmem:[#allocation144_spill] sm:$0xff] }
 0x878   : > { %v4979_v6 = vmin.f32 %v4647_v7, %v4978_v18  ;;  %vm4399_vm14 = vcmp.eq.f32.partialorder %v20051_v39, %v14741_v14  ;;  %v20054_v18 = vcvt.s32.f32 %v20053_v40  ;;  %6095 = vmax.xlane.f32.xlu1 %v5200_v51  ;;  %vm4407_vm6 = vcmp.eq.f32.partialorder %v20072_v36, %v14741_v14  ;;  %v15845_v55 = vpop.xlane.xlu1 %6063  ;;  %v15854_v38 = vld [vmem:[%s18428_s11 + $0x308] sm:$0xff] }
 0x879   : > { %20077 = vst [vmem:[#allocation165_spill] sm:$0xff] %v15845_v55  ;;  %v15859_v39 = vld [vmem:[%s18428_s11 + $0x328] sm:$0xff] }
 0x87a   : > { %v4648_v9 = vsel %vm4392_vm7, %v20054_v18, 1024.0  ;;  %v20055_v7 = vmov %v20054_v18  ;;  %v20058_v18 = vld [vmem:[#allocation330_spill] sm:$0xff]  ;;  %v20088_v23 = vld [vmem:[#allocation328_spill] sm:$0xff]  ;;  %v20107_v36 = vld [vmem:[#allocation311_spill] sm:$0xff] }
 0x87b   : > { %v4649_v43 = vsel %vm4393_vm8, %v20055_v7, 1024.0  ;;  %v4847_v27 = vmin.f32 %v4648_v9, %v4846_v50  ;;  %v20059_v40 = vcvt.s32.f32 %v20058_v18  ;;  %v15806_v50 = vpop.f32.mrf.mxu1  ;;  %v20065_v7 = vld [vmem:[#allocation307_spill] sm:$0xff]  ;;  %v20066_v18 = vld [vmem:[#allocation108_spill] sm:$0xff] }
 0x87c   : > { %v4980_v34 = vmin.f32 %v4649_v43, %v4979_v6  ;;  %20062 = vst [vmem:[#allocation174_spill] sm:$0xff] %v15806_v50  ;;  %v20063_v6 = vld [vmem:[#allocation106_spill] sm:$0xff]  ;;  %vm4404_vm3 = vcmp.eq.f32.partialorder %v20066_v18, %v14739_v11  ;;  %v15896_v49 = vpop.xlane.xlu1 %6067 }
 0x87d   : > { %v4650_v22 = vsel %vm4394_vm9, %v20059_v40, 1024.0  ;;  %v20060_v47 = vmov %v20059_v40  ;;  %vm4403_vm2 = vcmp.eq.f32.partialorder %v20063_v6, %v14741_v14  ;;  %v5166_v40 = vmax.f32 %v20065_v7, %v20064_v26 }
 0x87e   : > { %v4651_v43 = vsel %vm4395_vm10, %v20060_v47, 1024.0  ;;  %v4848_v51 = vmin.f32 %v4650_v22, %v4847_v27  ;;  %v20068_v47 = vld [vmem:[#allocation325_spill] sm:$0xff]  ;;  %v8062_v27 = vpop.f32.mrf.mxu1  ;;  %v15827_v22 = vadd.s32 704, %v14429_v32  ;;  %v20095_v6 = vmov 0   ;;  %8193 = vmatmul.mubr.bf16.gmra.mxu1 %v10230_v53 }
 0x87f   : > { %v4981_v9 = vmin.f32 %v4651_v43, %v4980_v34  ;;  %v20069_v13 = vcvt.s32.f32 %v20068_v47  ;;  %v20071_v43 = vld [vmem:[#allocation211_spill] sm:$0xff]  ;;  %6027 = vmax.xlane.f32.xlu1 %v5166_v40  ;;  %v20074_v47 = vld [vmem:[#allocation329_spill] sm:$0xff] }
 0x880   : > { %vm4406_vm5 = vcmp.eq.f32.partialorder %v20071_v43, %v14739_v11  ;;  %v20075_v60 = vcvt.s32.f32 %v20074_v47  ;;  %v20081_v47 = vld [vmem:[#allocation143_spill] sm:$0xff] }
 0x881   : > { %v4652_v50 = vsel %vm4396_vm11, %v20069_v13, 1024.0  ;;  %v20070_v59 = vmov %v20069_v13  ;;  %v20073_v13 = vld [vmem:[#allocation207_spill] sm:$0xff] }
 0x882   : > { %v4653_v34 = vsel %vm4397_vm12, %v20070_v59, 1024.0  ;;  %v4849_v26 = vmin.f32 %v4652_v50, %v4848_v51  ;;  %vm4408_vm7 = vcmp.eq.f32.partialorder %v20073_v13, %v14739_v11  ;;  %v4654_v59 = vsel %vm4398_vm13, %v20075_v60, 1024.0  ;;  %v15847_v51 = vpop.f32.mrf.mxu1  ;;  %v15945_v43 = vld [vmem:[%s18428_s11 + $0x348] sm:$0xff] }
 0x883   : > { %v4982_v7 = vmin.f32 %v4653_v34, %v4981_v9  ;;  %v20076_v27 = vmov %v20075_v60  ;;  %20078 = vst [vmem:[#allocation166_spill] sm:$0xff] %v15847_v51  ;;  %v20079_v9 = vld [vmem:[#allocation208_spill] sm:$0xff]  ;;  %v5198_v60 = vmax.f32 %v20081_v47, %v20080_v45  ;;  %v20083_v51 = vld [vmem:[#allocation109_spill] sm:$0xff]  ;;  %v6414_v45 = vpack.c.bf16 %v15614_v15, %v15229_v21 }
 0x884   : > { %v4655_v50 = vsel %vm4399_vm14, %v20076_v27, 1024.0  ;;  %vm4409_vm8 = vcmp.eq.f32.partialorder %v20079_v9, %v14741_v14  ;;  %v4850_v40 = vmin.f32 %v4654_v59, %v4849_v26  ;;  %v15863_v27 = vpop.xlane.xlu0 %6049  ;;  %vm4410_vm9 = vcmp.eq.f32.partialorder %v20083_v51, %v14739_v11  ;;  %v20084_v26 = vld [vmem:[#allocation323_spill] sm:$0xff]  ;;  %v8067_v47 = vpop.f32.mrf.mxu1  ;;  %v20114_v9 = vld [vmem:[#allocation324_spill] sm:$0xff] }
 0x885   : > { %v4983_v34 = vmin.f32 %v4655_v50, %v4982_v7  ;;  %20082 = vst [vmem:[#allocation179_spill] sm:$0xff] %v15863_v27  ;;  %v20085_v7 = vcvt.s32.f32 %v20084_v26  ;;  %v20087_v27 = vld [vmem:[#allocation110_spill] sm:$0xff]  ;;  %6091 = vmax.xlane.f32.xlu1 %v5198_v60  ;;  %v10239_v15 = vcombine.high %v15854_v38, %v15859_v39  ;;  %8362 = vmatpush1.bf16.msra.mxu0 %v6414_v45  ;;  %v20093_v47 = vld [vmem:[#allocation309_spill] sm:$0xff] }
 0x886   : > { %vm4411_vm10 = vcmp.eq.f32.partialorder %v20087_v27, %v14741_v14  ;;  %v15898_v12 = vpop.f32.mrf.mxu1  ;;  %v20094_v60 = vld [vmem:[#allocation225_spill] sm:$0xff]  ;;  %8363 = vmatprep.subr.bf16.mxu0 %v20095_v6  ;;  %v20097_v45 = vld [vmem:[#allocation322_spill] sm:$0xff]  ;;  %v20119_v27 = vld [vmem:[#allocation124_spill] sm:$0xff] }
 0x887   : > { %v4656_v59 = vsel %vm4400_vm15, %v20085_v7, 1024.0  ;;  %v20086_v50 = vmov %v20085_v7  ;;  %v20089_v7 = vcvt.s32.f32 %v20088_v23  ;;  %20091 = vst [vmem:[#allocation180_spill] sm:$0xff] %v15898_v12  ;;  %v20098_v23 = vcvt.s32.f32 %v20097_v45  ;;  %v20101_v45 = vld [vmem:[#allocation126_spill] sm:$0xff]  ;;  %8200 = vmatprep.mubr.bf16.mxu1 %v10239_v15 }
 0x888   : > { %v4657_v55 = vsel %vm4401_vm0, %v20086_v50, 1024.0  ;;  %v4851_v10 = vmin.f32 %v4656_v59, %v4850_v40  ;;  %v20092_v40 = vld [vmem:[#allocation239_spill] sm:$0xff]  ;;  %v5164_v59 = vmax.f32 %v20094_v60, %v20093_v47  ;;  %v20096_v50 = vld [vmem:[#allocation213_spill] sm:$0xff]  ;;  %v15922_v18 = vpop.xlane.xlu0 %6045  ;;  %vm4415_vm14 = vcmp.eq.f32.partialorder %v20101_v45, %v14741_v14  ;;  %v20108_v15 = vld [vmem:[#allocation310_spill] sm:$0xff] }
 0x889   : > { %v4984_v5 = vmin.f32 %v4657_v55, %v4983_v34  ;;  %v4658_v1 = vsel %vm4402_vm1, %v20089_v7, 1024.0  ;;  %v20090_v26 = vmov %v20089_v7  ;;  %v6430_v55 = vpack.c.bf16 %v6086_v3, %v15719_v20  ;;  %v8070_v7 = vpop.f32.mrf.mxu1 }
 0x88a   : > { %v4659_v21 = vsel %vm4403_vm2, %v20090_v26, 1024.0  ;;  %vm4412_vm11 = vcmp.eq.f32.partialorder %v20092_v40, %v14739_v11  ;;  %v4852_v56 = vmin.f32 %v4658_v1, %v4851_v10  ;;  %vm4413_vm12 = vcmp.eq.f32.partialorder %v20096_v50, %v14741_v14  ;;  %v20100_v26 = vld [vmem:[#allocation114_spill] sm:$0xff]  ;;  %6023 = vmax.xlane.f32.xlu1 %v5164_v59  ;;  %v20110_v7 = vld [vmem:[#allocation321_spill] sm:$0xff] }
 0x88b   : > { %v4985_v34 = vmin.f32 %v4659_v21, %v4984_v5  ;;  %v4660_v3 = vsel %vm4404_vm3, %v20098_v23, 1024.0  ;;  %v20099_v20 = vmov %v20098_v23  ;;  %v6413_v10 = vpack.c.bf16 %v15187_v62, %v15555_v61  ;;  %8651 = vmatpush1.bf16.msra.mxu1 %v6430_v55  ;;  %v20103_v62 = vld [vmem:[#allocation326_spill] sm:$0xff]  ;;  %v20123_v40 = vld [vmem:[#allocation289_spill] sm:$0xff] }
 0x88c   : > { %v4661_v5 = vsel %vm4405_vm4, %v20099_v20, 1024.0  ;;  %vm4414_vm13 = vcmp.eq.f32.partialorder %v20100_v26, %v14739_v11  ;;  %v4853_v21 = vmin.f32 %v4660_v3, %v4852_v56  ;;  %vm4416_vm15 = vcmp.eq.f32.partialorder %v20102_v52, %v14739_v11  ;;  %v15938_v56 = vpop.xlane.xlu1 %6071  ;;  %v15950_v20 = vld [vmem:[%s18428_s11 + $0x368] sm:$0xff]  ;;  %8652 = vmatprep.subr.bf16.mxu1 %v20095_v6 }
 0x88d   : > { %v4986_v12 = vmin.f32 %v4661_v5, %v4985_v34  ;;  %v20104_v61 = vcvt.s32.f32 %v20103_v62  ;;  %8364 = vmatpush1.bf16.msra.mxu0 %v6413_v10  ;;  %v20106_v34 = vld [vmem:[#allocation112_spill] sm:$0xff]  ;;  %v5196_v5 = vmax.f32 %v20108_v15, %v20107_v36  ;;  %v20109_v10 = vld [vmem:[#allocation121_spill] sm:$0xff]  ;;  %v10238_v36 = vcombine.low %v15854_v38, %v15859_v39 }
 0x88e   : > { %vm4417_vm0 = vcmp.eq.f32.partialorder %v20106_v34, %v14741_v14  ;;  %8365 = vmatprep.subr.bf16.mxu0 %v20095_v6  ;;  %vm4418_vm1 = vcmp.eq.f32.partialorder %v20109_v10, %v14739_v11  ;;  %v10247_v38 = vcombine.high %v15945_v43, %v15950_v20  ;;  %v20125_v50 = vcvt.s32.f32 %v15131_v44  ;;  %v16036_v26 = vld [vmem:[%s18428_s11 + $0x388] sm:$0xff]  ;;  %v20135_v10 = vld [vmem:[#allocation130_spill] sm:$0xff] }
 0x88f   : > { %v4662_v55 = vsel %vm4406_vm5, %v20104_v61, 1024.0  ;;  %v20105_v23 = vmov %v20104_v61  ;;  %6087 = vmax.xlane.f32.xlu1 %v5196_v5  ;;  %v20118_v5 = vld [vmem:[#allocation119_spill] sm:$0xff]  ;;  %vm4422_vm5 = vcmp.eq.f32.partialorder %v20119_v27, %v14739_v11  ;;  %8201 = vmatmul.mubr.bf16.gmra.mxu1 %v10238_v36  ;;  %v20132_v34 = vcvt.s32.f32 %v15110_v63 }
 0x890   : > { %v4663_v53 = vsel %vm4407_vm6, %v20105_v23, 1024.0  ;;  %v4854_v59 = vmin.f32 %v4662_v55, %v4853_v21  ;;  %v6412_v55 = vpack.c.bf16 %v15149_v41, %v15497_v42  ;;  %v8106_v23 = vpop.f32.mrf.mxu1  ;;  %v15989_v39 = vpop.xlane.xlu1 %6075  ;;  %vm4421_vm4 = vcmp.eq.f32.partialorder %v20118_v5, %v14741_v14  ;;  %8208 = vmatprep.mubr.bf16.mxu1 %v10247_v38  ;;  %v16041_v44 = vld [vmem:[%s18428_s11 + $0x3a8] sm:$0xff]  ;;  %v20128_v38 = vld [vmem:[#allocation117_spill] sm:$0xff] }
 0x891   : > { %v4987_v3 = vmin.f32 %v4663_v53, %v4986_v12  ;;  %v20111_v12 = vcvt.s32.f32 %v20110_v7  ;;  %v15973_v13 = vadd.f32 %v8106_v23, %v15424_v4  ;;  %v20113_v7 = vld [vmem:[#allocation122_spill] sm:$0xff]  ;;  %v20141_v5 = vcvt.s32.f32 %v15033_v28  ;;  %v20144_v27 = vld [vmem:[#allocation267_spill] sm:$0xff] }
 0x892   : > { %vm4419_vm2 = vcmp.eq.f32.partialorder %v20113_v7, %v14741_v14  ;;  %8366 = vmatpush1.bf16.msra.mxu0 %v6412_v55  ;;  %v8108_v4 = vpop.f32.mrf.mxu1  ;;  %v20136_v7 = vld [vmem:[#allocation273_spill] sm:$0xff] }
 0x893   : > { %v4664_v21 = vsel %vm4408_vm7, %v20111_v12, 1024.0  ;;  %v20112_v62 = vmov %v20111_v12  ;;  %v20115_v12 = vcvt.s32.f32 %v20114_v9  ;;  %8367 = vmatprep.subr.bf16.mxu0 %v20095_v6  ;;  %vm4424_vm7 = vcmp.eq.f32.partialorder %v20123_v40, %v14739_v11 }
 0x894   : > { %v4665_v61 = vsel %vm4409_vm8, %v20112_v62, 1024.0  ;;  %v4855_v53 = vmin.f32 %v4664_v21, %v4854_v59  ;;  %v15996_v62 = vpop.xlane.xlu0 %6041  ;;  %v8109_v9 = vpop.f32.mrf.mxu1 }
 0x895   : > { %v4988_v1 = vmin.f32 %v4665_v61, %v4987_v3  ;;  %v4666_v41 = vsel %vm4410_vm9, %v20115_v12, 1024.0  ;;  %v20116_v42 = vmov %v20115_v12  ;;  %v20117_v3 = vld [vmem:[#allocation235_spill] sm:$0xff]  ;;  %v20120_v61 = vcvt.s32.f32 %v15337_v58  ;;  %v6080_v4 = vpop.xlane.xlu1 %6079 }
 0x896   : > { %v4667_v59 = vsel %vm4411_vm10, %v20116_v42, 1024.0  ;;  %vm4420_vm3 = vcmp.eq.f32.partialorder %v20117_v3, %v14739_v11  ;;  %v4856_v51 = vmin.f32 %v4666_v41, %v4855_v53  ;;  %v20122_v12 = vld [vmem:[#allocation287_spill] sm:$0xff]  ;;  %v6429_v45 = vpack.c.bf16 %v15644_v46, %v6080_v4  ;;  %v20139_v3 = vld [vmem:[#allocation270_spill] sm:$0xff] }
 0x897   : > { %v4989_v21 = vmin.f32 %v4667_v59, %v4988_v1  ;;  %v4668_v55 = vsel %vm4412_vm11, %v20120_v61, 1024.0  ;;  %v20121_v23 = vmov %v20120_v61  ;;  %v6411_v1 = vpack.c.bf16 %v15107_v19, %v15439_v30  ;;  %v20124_v58 = vld [vmem:[#allocation291_spill] sm:$0xff] }
 0x898   : > { %v4669_v53 = vsel %vm4413_vm12, %v20121_v23, 1024.0  ;;  %vm4423_vm6 = vcmp.eq.f32.partialorder %v20122_v12, %v14741_v14  ;;  %v4857_v41 = vmin.f32 %v4668_v55, %v4856_v51  ;;  %v16015_v59 = vadd.f32 %v8109_v9, %v15456_v29  ;;  %v8111_v29 = vpop.f32.mrf.mxu1  ;;  %v20127_v51 = vld [vmem:[#allocation113_spill] sm:$0xff]  ;;  %8653 = vmatpush1.bf16.msra.mxu1 %v6429_v45  ;;  %v16133_v12 = vld [vmem:[%s18428_s11 + $0x3c8] sm:$0xff] }
 0x899   : > { %v4990_v42 = vmin.f32 %v4669_v53, %v4989_v21  ;;  %vm4425_vm8 = vcmp.eq.f32.partialorder %v20124_v58, %v14741_v14  ;;  %v4670_v19 = vsel %vm4414_vm13, %v20125_v50, 1024.0  ;;  %v20126_v30 = vmov %v20125_v50  ;;  %8368 = vmatpush1.bf16.msra.mxu0 %v6411_v1  ;;  %8654 = vmatprep.subr.bf16.mxu1 %v20095_v6 }
 0x89a   : > { %v4671_v36 = vsel %vm4415_vm14, %v20126_v30, 1024.0  ;;  %vm4426_vm9 = vcmp.eq.f32.partialorder %v20127_v51, %v14739_v11  ;;  %v4858_v21 = vmin.f32 %v4670_v19, %v4857_v41  ;;  %8369 = vmatprep.subr.bf16.mxu0 %v20095_v6  ;;  %vm4427_vm10 = vcmp.eq.f32.partialorder %v20128_v38, %v14741_v14  ;;  %v8114_v41 = vpop.f32.mrf.mxu1  ;;  %v16061_v19 = vpop.xlane.xlu0 %6037  ;;  %v20153_v38 = vld [vmem:[#allocation254_spill] sm:$0xff] }
 0x89b   : > { %v4991_v61 = vmin.f32 %v4671_v36, %v4990_v42  ;;  %v20129_v55 = vcvt.s32.f32 %v15317_v54  ;;  %v6410_v9 = vpack.c.bf16 %v15069_v0, %v15389_v31  ;;  %v10246_v50 = vcombine.low %v15945_v43, %v15950_v20  ;;  %v20131_v54 = vld [vmem:[#allocation280_spill] sm:$0xff]  ;;  %v16080_v30 = vpop.xlane.xlu1 %6043  ;;  %v20134_v36 = vld [vmem:[#allocation282_spill] sm:$0xff] }
 0x89c   : > { %v16064_v52 = vadd.f32 %v8114_v41, %v15482_v24  ;;  %vm4428_vm11 = vcmp.eq.f32.partialorder %v20131_v54, %v14739_v11  ;;  %v4674_v0 = vsel %vm4418_vm1, %v20132_v34, 1024.0  ;;  %v20133_v31 = vmov %v20132_v34  ;;  %v8116_v20 = vpop.f32.mrf.mxu1  ;;  %v16138_v34 = vld [vmem:[%s18428_s11 + $0x3e8] sm:$0xff] }
 0x89d   : > { %v4672_v23 = vsel %vm4416_vm15, %v20129_v55, 1024.0  ;;  %v20130_v53 = vmov %v20129_v55  ;;  %v4675_v43 = vsel %vm4419_vm2, %v20133_v31, 1024.0  ;;  %v10255_v24 = vcombine.high %v16036_v26, %v16041_v44  ;;  %8370 = vmatpush1.bf16.msra.mxu0 %v6410_v9  ;;  %8209 = vmatmul.mubr.bf16.gmra.mxu1 %v10246_v50 }
 0x89e   : > { %v4673_v1 = vsel %vm4417_vm0, %v20130_v53, 1024.0  ;;  %v4859_v46 = vmin.f32 %v4672_v23, %v4858_v21  ;;  %vm4429_vm12 = vcmp.eq.f32.partialorder %v20134_v36, %v14741_v14  ;;  %vm4430_vm13 = vcmp.eq.f32.partialorder %v20135_v10, %v14739_v11  ;;  %8371 = vmatprep.subr.bf16.mxu0 %v20095_v6  ;;  %v8117_v23 = vpop.f32.mrf.mxu1  ;;  %v20161_v36 = vld [vmem:[#allocation137_spill] sm:$0xff] }
 0x89f   : > { %v4992_v42 = vmin.f32 %v4673_v1, %v4991_v61  ;;  %vm4431_vm14 = vcmp.eq.f32.partialorder %v20136_v7, %v14741_v14  ;;  %v20137_v4 = vcvt.s32.f32 %v15253_v48  ;;  %v6409_v55 = vpack.c.bf16 %v15027_v2, %v15349_v37  ;;  %v20140_v48 = vld [vmem:[#allocation272_spill] sm:$0xff]  ;;  %8216 = vmatprep.mubr.bf16.mxu1 %v10255_v24  ;;  %v20167_v10 = vld [vmem:[#allocation245_spill] sm:$0xff] }
 0x8a0   : > { %v4860_v63 = vmin.f32 %v4674_v0, %v4859_v46  ;;  %v6428_v9 = vpack.c.bf16 %v15569_v25, %v15989_v39  ;;  %v16105_v41 = vadd.f32 %v8117_v23, %v15485_v57  ;;  %vm4432_vm15 = vcmp.eq.f32.partialorder %v20139_v3, %v14739_v11  ;;  %v8119_v57 = vpop.f32.mrf.mxu1  ;;  %v16121_v39 = vpop.xlane.xlu1 %6039  ;;  %v16235_v7 = vld [vmem:[%s18428_s11 + $0x408] sm:$0xff]  ;;  %v20174_v3 = vld [vmem:[#allocation53_spill] sm:$0xff] }
 0x8a1   : > { %v4993_v29 = vmin.f32 %v4675_v43, %v4992_v42  ;;  %v4676_v21 = vsel %vm4420_vm3, %v20137_v4, 1024.0  ;;  %v20138_v61 = vmov %v20137_v4  ;;  %vm4433_vm0 = vcmp.eq.f32.partialorder %v20140_v48, %v14741_v14  ;;  %8372 = vmatpush1.bf16.msra.mxu0 %v6409_v55  ;;  %v20143_v42 = vld [vmem:[#allocation266_spill] sm:$0xff]  ;;  %v16141_v0 = vpop.xlane.xlu0 %6105  ;;  %v20157_v57 = vld [vmem:[#allocation72_spill] sm:$0xff] }
 0x8a2   : > { %v4677_v45 = vsel %vm4421_vm4, %v20138_v61, 1024.0  ;;  %v4861_v53 = vmin.f32 %v4676_v21, %v4860_v63  ;;  %v4678_v2 = vsel %vm4422_vm5, %v20141_v5, 1024.0  ;;  %v20142_v37 = vmov %v20141_v5  ;;  %8373 = vmatprep.subr.bf16.mxu0 %v20095_v6  ;;  %8655 = vmatpush1.bf16.msra.mxu1 %v6428_v9  ;;  %v8122_v4 = vpop.f32.mrf.mxu1  ;;  %v20147_v21 = vld [vmem:[#allocation248_spill] sm:$0xff]  ;;  %v20154_v9 = vld [vmem:[#allocation22_spill] sm:$0xff] }
 0x8a3   : > { %v4994_v1 = vmin.f32 %v4677_v45, %v4993_v29  ;;  %v4679_v25 = vsel %vm4423_vm6, %v20142_v37, 1024.0  ;;  %v16124_v46 = vadd.s32 688, %v14429_v32  ;;  %vm4434_vm1 = vcmp.eq.f32.partialorder %v20143_v42, %v14739_v11  ;;  %8656 = vmatprep.subr.bf16.mxu1 %v20095_v6  ;;  %v20148_v45 = vld [vmem:[#allocation250_spill] sm:$0xff]  ;;  %v20176_v48 = vld [vmem:[#allocation40_spill] sm:$0xff] }
 0x8a4   : > { %vm4435_vm2 = vcmp.eq.f32.partialorder %v20144_v27, %v14741_v14  ;;  %v4862_v50 = vmin.f32 %v4678_v2, %v4861_v53  ;;  %v20145_v31 = vcvt.s32.f32 %v15030_v33  ;;  %v10254_v63 = vcombine.low %v16036_v26, %v16041_v44  ;;  %v20149_v26 = vld [vmem:[#allocation21_spill] sm:$0xff] }
 0x8a5   : > { %v4995_v28 = vmin.f32 %v4679_v25, %v4994_v1  ;;  %v6408_v29 = vpack.c.bf16 %v14989_v8, %v15305_v16  ;;  %vm4436_vm3 = vcmp.eq.f32.partialorder %v20147_v21, %v14739_v11  ;;  %v6427_v33 = vpack.c.bf16 %v15511_v35, %v15938_v56  ;;  %v16179_v56 = vpop.xlane.xlu1 %6035  ;;  %v20152_v53 = vld [vmem:[#allocation253_spill] sm:$0xff]  ;;  %v16204_v54 = vpop.xlane.xlu0 %6109 }
 0x8a6   : > { %v4680_v43 = vsel %vm4424_vm7, %v20145_v31, 1024.0  ;;  %v20146_v24 = vmov %v20145_v31  ;;  %v16163_v58 = vadd.f32 %v8122_v4, %v15514_v17  ;;  %vm4437_vm4 = vcmp.eq.f32.partialorder %v20148_v45, %v14741_v14  ;;  %v8124_v17 = vpop.f32.mrf.mxu1  ;;  %8217 = vmatmul.mubr.bf16.gmra.mxu1 %v10254_v63  ;;  %v20160_v4 = vld [vmem:[#allocation80_spill] sm:$0xff]  ;;  %v20179_v27 = vld [vmem:[#allocation333_spill] sm:$0xff]  ;;  %v20188_v45 = vld [vmem:[#allocation146_spill] sm:$0xff] }
 0x8a7   : > { %v4681_v20 = vsel %vm4425_vm8, %v20146_v24, 1024.0  ;;  %v4863_v40 = vmin.f32 %v4680_v43, %v4862_v50  ;;  %v20150_v44 = vcvt.s32.f32 %v20149_v26  ;;  %v10263_v35 = vcombine.high %v16133_v12, %v16138_v34  ;;  %8374 = vmatpush1.bf16.msra.mxu0 %v6408_v29  ;;  %8657 = vmatpush1.bf16.msra.mxu1 %v6427_v33  ;;  %v20158_v50 = vld [vmem:[#allocation30_spill] sm:$0xff]  ;;  %v20163_v33 = vld [vmem:[#allocation36_spill] sm:$0xff]  ;;  %v20166_v17 = vld [vmem:[#allocation243_spill] sm:$0xff] }
 0x8a8   : > { %v4996_v61 = vmin.f32 %v4681_v20, %v4995_v28  ;;  %v16182_v23 = vadd.s32 672, %v14429_v32  ;;  %vm4438_vm5 = vcmp.eq.f32.partialorder %v20152_v53, %v14739_v11  ;;  %8375 = vmatprep.subr.bf16.mxu0 %v20095_v6  ;;  %vm4439_vm6 = vcmp.eq.f32.partialorder %v20153_v38, %v14741_v14  ;;  %v8125_v31 = vpop.f32.mrf.mxu1  ;;  %8658 = vmatprep.subr.bf16.mxu1 %v20095_v6  ;;  %v20159_v20 = vld [vmem:[#allocation52_spill] sm:$0xff] }
 0x8a9   : > { %v4682_v8 = vsel %vm4426_vm9, %v20150_v44, 1024.0  ;;  %v20151_v16 = vmov %v20150_v44  ;;  %v20155_v5 = vcvt.s32.f32 %v20154_v9  ;;  %v6407_v28 = vpack.c.bf16 %v20158_v50, %v20157_v57  ;;  %8224 = vmatprep.mubr.bf16.mxu1 %v10263_v35  ;;  %v16240_v35 = vld [vmem:[%s18428_s11 + $0x428] sm:$0xff]  ;;  %v20168_v9 = vld [vmem:[#allocation29_spill] sm:$0xff]  ;;  %v20171_v50 = vld [vmem:[#allocation154_spill] sm:$0xff] }
 0x8aa   : > { %v4683_v55 = vsel %vm4427_vm10, %v20151_v16, 1024.0  ;;  %v4864_v51 = vmin.f32 %v4682_v8, %v4863_v40  ;;  %v6426_v29 = vpack.c.bf16 %v20159_v20, %v15896_v49  ;;  %v16207_v40 = vadd.f32 %v8125_v31, %v20160_v4  ;;  %v8127_v8 = vpop.f32.mrf.mxu1  ;;  %v16223_v16 = vpop.xlane.xlu1 %6103  ;;  %v16313_v53 = vld [vmem:[%s18428_s11 + $0x10] sm:$0xff] }
 0x8ab   : > { %v4997_v1 = vmin.f32 %v4683_v55, %v4996_v61  ;;  %v4684_v2 = vsel %vm4428_vm11, %v20155_v5, 1024.0  ;;  %v20156_v37 = vmov %v20155_v5  ;;  %vm4440_vm7 = vcmp.eq.f32.partialorder %v20161_v36, %v14739_v11  ;;  %v20162_v61 = vld [vmem:[#allocation252_spill] sm:$0xff]  ;;  %8376 = vmatpush1.bf16.msra.mxu0 %v6407_v28  ;;  %v20172_v28 = vld [vmem:[#allocation63_spill] sm:$0xff] }
 0x8ac   : > { %v4685_v25 = vsel %vm4429_vm12, %v20156_v37, 1024.0  ;;  %v4865_v43 = vmin.f32 %v4684_v2, %v4864_v51  ;;  %vm4441_vm8 = vcmp.eq.f32.partialorder %v20162_v61, %v14741_v14  ;;  %v20164_v26 = vcvt.s32.f32 %v20163_v33  ;;  %8377 = vmatprep.subr.bf16.mxu0 %v20095_v6  ;;  %8659 = vmatpush1.bf16.msra.mxu1 %v6426_v29  ;;  %v20173_v29 = vld [vmem:[#allocation165_spill] sm:$0xff]  ;;  %v20175_v33 = vld [vmem:[#allocation78_spill] sm:$0xff] }
 0x8ad   : > { %v4998_v24 = vmin.f32 %v4685_v25, %v4997_v1  ;;  %v16226_v55 = vadd.s32 656, %v14429_v32  ;;  %vm4442_vm9 = vcmp.eq.f32.partialorder %v20166_v17, %v14739_v11  ;;  %vm4443_vm10 = vcmp.eq.f32.partialorder %v20167_v10, %v14741_v14  ;;  %8660 = vmatprep.subr.bf16.mxu1 %v20095_v6  ;;  %v20201_v10 = vld [vmem:[#allocation307_spill] sm:$0xff] }
 0x8ae   : > { %v4686_v63 = vsel %vm4430_vm13, %v20164_v26, 1024.0  ;;  %v20165_v44 = vmov %v20164_v26  ;;  %v20169_v5 = vcvt.s32.f32 %v20168_v9  ;;  %v10262_v57 = vcombine.low %v16133_v12, %v16138_v34 }
 0x8af   : > { %v4687_v49 = vsel %vm4431_vm14, %v20165_v44, 1024.0  ;;  %v4866_v51 = vmin.f32 %v4686_v63, %v4865_v43  ;;  %v6422_v31 = vpack.c.bf16 %v20172_v28, %v20171_v50  ;;  %v8130_v43 = vpop.f32.mrf.mxu1  ;;  %v6425_v4 = vpack.c.bf16 %v20174_v3, %v20173_v29  ;;  %v20182_v28 = vld [vmem:[#allocation37_spill] sm:$0xff] }
 0x8b0   : > { %v4999_v1 = vmin.f32 %v4687_v49, %v4998_v24  ;;  %v4688_v2 = vsel %vm4432_vm15, %v20169_v5, 1024.0  ;;  %v20170_v37 = vmov %v20169_v5  ;;  %v16261_v26 = vadd.f32 %v8130_v43, %v20175_v33  ;;  %v16284_v5 = vpop.xlane.xlu0 %6113  ;;  %8225 = vmatmul.mubr.bf16.gmra.mxu1 %v10262_v57  ;;  %v20186_v33 = vld [vmem:[#allocation173_spill] sm:$0xff] }
 0x8b1   : > { %v4689_v25 = vsel %vm4433_vm0, %v20170_v37, 1024.0  ;;  %v4867_v24 = vmin.f32 %v4688_v2, %v4866_v51  ;;  %vm4444_vm11 = vcmp.eq.f32.partialorder %v20094_v60, %v14739_v11  ;;  %v20177_v63 = vcvt.s32.f32 %v20176_v48  ;;  %8378 = vmatpush2.bf16.msra.mxu0 %v6422_v31  ;;  %v8132_v8 = vpop.f32.mrf.mxu1  ;;  %v16277_v51 = vpop.xlane.xlu1 %6107  ;;  %8661 = vmatpush1.bf16.msra.mxu1 %v6425_v4  ;;  %v20187_v48 = vld [vmem:[#allocation64_spill] sm:$0xff]  ;;  %v20206_v60 = vld [vmem:[#allocation62_spill] sm:$0xff] }
 0x8b2   : > { %v5000_v20 = vmin.f32 %v4689_v25, %v4999_v1  ;;  %v10271_v49 = vcombine.high %v16235_v7, %v16240_v35  ;;  %v16280_v1 = vadd.s32 640, %v14429_v32  ;;  %vm4445_vm12 = vcmp.eq.f32.partialorder %v20093_v47, %v14741_v14  ;;  %8379 = vmatprep.subr.bf16.mxu0 %v20095_v6  ;;  %8662 = vmatprep.subr.bf16.mxu1 %v20095_v6 }
 0x8b3   : > { %v4690_v12 = vsel %vm4434_vm1, %v20177_v63, 1024.0  ;;  %v20178_v34 = vmov %v20177_v63  ;;  %v20180_v2 = vcvt.s32.f32 %v20179_v27  ;;  %v20183_v31 = vcvt.s32.f32 %v20182_v28  ;;  %v8133_v3 = vpop.f32.mrf.mxu1 }
 0x8b4   : > { %v4691_v44 = vsel %vm4435_vm2, %v20178_v34, 1024.0  ;;  %v4868_v42 = vmin.f32 %v4690_v12, %v4867_v24  ;;  %v20184_v24 = vld [vmem:[#allocation162_spill] sm:$0xff]  ;;  %v6424_v63 = vpack.c.bf16 %v20187_v48, %v20186_v33  ;;  %v16308_v12 = vadd.f32 %v8133_v3, %v20188_v45  ;;  %v16318_v34 = vld [vmem:[%s18428_s11 + $0x30] sm:$0xff]  ;;  %8232 = vmatprep.mubr.bf16.mxu1 %v10271_v49  ;;  %v6118_v36 = vpop.xlane.xlu0 %6117 }
 0x8b5   : > { %v5001_v9 = vmin.f32 %v4691_v44, %v5000_v20  ;;  %v4692_v37 = vsel %vm4436_vm3, %v20180_v2, 1024.0  ;;  %v20181_v25 = vmov %v20180_v2  ;;  %v4694_v43 = vsel %vm4438_vm5, %v20183_v31, 1024.0  ;;  %v20185_v20 = vld [vmem:[#allocation179_spill] sm:$0xff]  ;;  %v20196_v33 = vld [vmem:[#allocation66_spill] sm:$0xff] }
 0x8b6   : > { %v4693_v50 = vsel %vm4437_vm4, %v20181_v25, 1024.0  ;;  %v6421_v29 = vpack.c.bf16 %v20185_v20, %v20184_v24  ;;  %v4869_v21 = vmin.f32 %v4692_v37, %v4868_v42  ;;  %v20189_v44 = vmov %v20183_v31  ;;  %v8135_v42 = vpop.f32.mrf.mxu1  ;;  %v20190_v25 = vld [vmem:[#allocation145_spill] sm:$0xff]  ;;  %8663 = vmatpush1.bf16.msra.mxu1 %v6424_v63  ;;  %v20197_v63 = vld [vmem:[#allocation156_spill] sm:$0xff] }
 0x8b7   : > { %v5002_v4 = vmin.f32 %v4693_v50, %v5001_v9  ;;  %v4695_v57 = vsel %vm4439_vm6, %v20189_v44, 1024.0  ;;  %v6420_v8 = vpack.c.bf16 %v15922_v18, %v16080_v30  ;;  %v16327_v9 = vpop.xlane.xlu1 %6111  ;;  %v10144_v27 = vcombine.low %v16313_v53, %v16318_v34  ;;  %v16339_v18 = vld [vmem:[%s18428_s11 + $0x448] sm:$0xff]  ;;  %8664 = vmatprep.subr.bf16.mxu1 %v20095_v6 }
 0x8b8   : > { %8380 = vmatpush2.bf16.msra.mxu0 %v6421_v29  ;;  %v10145_v2 = vcombine.high %v16313_v53, %v16318_v34  ;;  %v4236_v37 = vcvt.s32.f32 %v16280_v1  ;;  %vm4446_vm13 = vcmp.eq.f32.partialorder %v20190_v25, %v14739_v11  ;;  %v4870_v38 = vmin.f32 %v4694_v43, %v4869_v21  ;;  %v16344_v30 = vld [vmem:[%s18428_s11 + $0x468] sm:$0xff]  ;;  %v8138_v29 = vpop.f32.mrf.mxu1 }
 0x8b9   : > { %v5003_v49 = vmin.f32 %v4695_v57, %v5002_v4  ;;  %8381 = vmatprep.subr.bf16.mxu0 %v20095_v6  ;;  %v20191_v1 = vld [vmem:[#allocation148_spill] sm:$0xff]  ;;  %v20192_v50 = vld [vmem:[#allocation39_spill] sm:$0xff]  ;;  %v10270_v20 = vcombine.low %v16235_v7, %v16240_v35  ;;  %v16365_v45 = vadd.f32 %v8138_v29, %v20197_v63  ;;  %v10279_v42 = vcombine.high %v16339_v18, %v16344_v30 }
 0x8ba   : > { %vm4447_vm14 = vcmp.eq.f32.partialorder %v20191_v1, %v14741_v14  ;;  %v20193_v28 = vcvt.s32.f32 %v20192_v50  ;;  %8393 = vmatprep.mubr.bf16.mxu0 %v10145_v2  ;;  %v20195_v4 = vld [vmem:[#allocation159_spill] sm:$0xff]  ;;  %v20198_v44 = vld [vmem:[#allocation332_spill] sm:$0xff]  ;;  %v6419_v2 = vpack.c.bf16 %v15996_v62, %v16121_v39  ;;  %v4238_v50 = vcvt.s32.f32 %v16226_v55 }
 0x8bb   : > { %v6423_v48 = vpack.c.bf16 %v20196_v33, %v20195_v4  ;;  %v20199_v57 = vcvt.s32.f32 %v20198_v44  ;;  %vm4448_vm15 = vcmp.eq.f32.partialorder %v20201_v10, %v14739_v11  ;;  %v4700_v62 = vsel %vm4444_vm11, %v4236_v37, 1024.0  ;;  %8233 = vmatmul.mubr.bf16.gmra.mxu1 %v10270_v20  ;;  %v20205_v4 = vld [vmem:[#allocation158_spill] sm:$0xff]  ;;  %v20209_v44 = vld [vmem:[#allocation241_spill] sm:$0xff]  ;;  %v16424_v1 = vld [vmem:[%s18428_s11 + $0x4a8] sm:$0xff] }
 0x8bc   : > { %v4696_v31 = vsel %vm4440_vm7, %v20193_v28, 1024.0  ;;  %v20194_v43 = vmov %v20193_v28  ;;  %8382 = vmatpush2.bf16.msra.mxu0 %v6420_v8  ;;  %v4701_v39 = vsel %vm4445_vm12, %v4236_v37, 1024.0  ;;  %v20203_v8 = vld [vmem:[#allocation155_spill] sm:$0xff]  ;;  %vm4451_vm2 = vcmp.eq.f32.partialorder %v20205_v4, %v14741_v14  ;;  %8240 = vmatprep.mubr.bf16.mxu1 %v10279_v42 }
 0x8bd   : > { %v4697_v24 = vsel %vm4441_vm8, %v20194_v43, 1024.0  ;;  %v4871_v3 = vmin.f32 %v4696_v31, %v4870_v38  ;;  %v4698_v61 = vsel %vm4442_vm9, %v20199_v57, 1024.0  ;;  %v20200_v7 = vmov %v20199_v57  ;;  %v8140_v38 = vpop.f32.mrf.mxu1  ;;  %8383 = vmatprep.subr.bf16.mxu0 %v20095_v6  ;;  %8665 = vmatpush1.bf16.msra.mxu1 %v6423_v48  ;;  %v20202_v43 = vld [vmem:[#allocation308_spill] sm:$0xff] }
 0x8be   : > { %v5004_v21 = vmin.f32 %v4697_v24, %v5003_v49  ;;  %v4699_v35 = vsel %vm4443_vm10, %v20200_v7, 1024.0  ;;  %v6116_v49 = vpop.xlane.xlu1 %6115  ;;  %vm4449_vm0 = vcmp.eq.f32.partialorder %v20202_v43, %v14741_v14  ;;  %8666 = vmatprep.subr.bf16.mxu1 %v20095_v6  ;;  %vm4450_vm1 = vcmp.eq.f32.partialorder %v20203_v8, %v14739_v11  ;;  %v6451_v43 = vld [vmem:[%s18429_s12 + $0x60] sm:$0xff]  ;;  %v6372_v53 = vld [vmem:[%s18428_s11 + $0x7e8] sm:$0xff] }
 0x8bf   : > { %v4872_v28 = vmin.f32 %v4698_v61, %v4871_v3  ;;  %v6438_v31 = vpack.c.bf16 %v6118_v36, %v6116_v49  ;;  %v8141_v55 = vpop.f32.mrf.mxu1  ;;  %v20204_v3 = vld [vmem:[#allocation157_spill] sm:$0xff]  ;;  %v20207_v33 = vcvt.s32.f32 %v20206_v60  ;;  %v6418_v20 = vpack.c.bf16 %v16061_v19, %v16179_v56  ;;  %v16419_v61 = vld [vmem:[%s18428_s11 + $0x488] sm:$0xff]  ;;  %v20210_v19 = vld [vmem:[#allocation242_spill] sm:$0xff] }
 0x8c0   : > { %v5005_v17 = vmin.f32 %v4699_v35, %v5004_v21  ;;  %v16397_v21 = vadd.f32 %v8141_v55, %v20204_v3  ;;  %8384 = vmatpush2.bf16.msra.mxu0 %v6419_v2  ;;  %v4240_v63 = vcvt.s32.f32 %v16182_v23  ;;  %vm4452_vm3 = vcmp.eq.f32.partialorder %v20209_v44, %v14739_v11  ;;  %v20211_v49 = vld [vmem:[#allocation150_spill] sm:$0xff]  ;;  %v20221_v44 = vld [vmem:[#allocation301_spill] sm:$0xff] }
 0x8c1   : > { %v4873_v24 = vmin.f32 %v4700_v62, %v4872_v28  ;;  %v4702_v47 = vsel %vm4446_vm13, %v20207_v33, 1024.0  ;;  %v20208_v37 = vmov %v20207_v33  ;;  %v8143_v36 = vpop.f32.mrf.mxu1  ;;  %8385 = vmatprep.subr.bf16.mxu0 %v20095_v6  ;;  %8667 = vmatpush2.bf16.msra.mxu1 %v6438_v31  ;;  %vm4453_vm4 = vcmp.eq.f32.partialorder %v20210_v19, %v14741_v14  ;;  %v20213_v31 = vld [vmem:[#allocation59_spill] sm:$0xff] }
 0x8c2   : > { %v5006_v29 = vmin.f32 %v4701_v39, %v5005_v17  ;;  %v4703_v48 = vsel %vm4447_vm14, %v20208_v37, 1024.0  ;;  %v4704_v56 = vsel %vm4448_vm15, %v4238_v50, 1024.0  ;;  %v4705_v23 = vsel %vm4449_vm0, %v4238_v50, 1024.0  ;;  %8668 = vmatprep.subr.bf16.mxu1 %v20095_v6  ;;  %v20212_v17 = vld [vmem:[#allocation169_spill] sm:$0xff]  ;;  %v20216_v39 = vld [vmem:[#allocation170_spill] sm:$0xff] }
 0x8c3   : > { %v4874_v57 = vmin.f32 %v4702_v47, %v4873_v24  ;;  %v10278_v7 = vcombine.low %v16339_v18, %v16344_v30  ;;  %v8146_v35 = vpop.f32.mrf.mxu1  ;;  %v6437_v38 = vpack.c.bf16 %v16284_v5, %v16327_v9  ;;  %vm4454_vm5 = vcmp.eq.f32.partialorder %v20212_v17, %v14739_v11  ;;  %v20217_v24 = vld [vmem:[#allocation175_spill] sm:$0xff]  ;;  %v20219_v37 = vld [vmem:[#allocation161_spill] sm:$0xff] }
 0x8c4   : > { %v5007_v25 = vmin.f32 %v4703_v48, %v5006_v29  ;;  %v16441_v28 = vadd.f32 %v8146_v35, %v20211_v49  ;;  %v20214_v10 = vcvt.s32.f32 %v20213_v31  ;;  %v10287_v5 = vcombine.high %v16419_v61, %v16424_v1  ;;  %8386 = vmatpush2.bf16.msra.mxu0 %v6418_v20  ;;  %v20218_v29 = vld [vmem:[#allocation176_spill] sm:$0xff]  ;;  %v20220_v20 = vld [vmem:[#allocation138_spill] sm:$0xff]  ;;  %v20227_v49 = vld [vmem:[#allocation187_spill] sm:$0xff] }
 0x8c5   : > { %v4875_v42 = vmin.f32 %v4704_v56, %v4874_v57  ;;  %v8148_v9 = vpop.f32.mrf.mxu1  ;;  %v4242_v62 = vcvt.s32.f32 %v16124_v46  ;;  %vm4455_vm6 = vcmp.eq.f32.partialorder %v20216_v39, %v14741_v14  ;;  %8669 = vmatpush2.bf16.msra.mxu1 %v6437_v38  ;;  %8387 = vmatprep.subr.bf16.mxu0 %v20095_v6  ;;  %vm4456_vm7 = vcmp.eq.f32.partialorder %v20217_v24, %v14739_v11  ;;  %v20222_v57 = vld [vmem:[#allocation61_spill] sm:$0xff]  ;;  %v6452_v56 = vld [vmem:[%s18429_s12 + $0x68] sm:$0xff] }
 0x8c6   : > { %v5008_v2 = vmin.f32 %v4705_v23, %v5007_v25  ;;  %v4706_v18 = vsel %vm4450_vm1, %v20214_v10, 1024.0  ;;  %v20215_v30 = vmov %v20214_v10  ;;  %vm4457_vm8 = vcmp.eq.f32.partialorder %v20218_v29, %v14741_v14  ;;  %8670 = vmatprep.subr.bf16.mxu1 %v20095_v6  ;;  %8241 = vmatmul.mubr.bf16.gmra.mxu1 %v10278_v7  ;;  %v20225_v23 = vld [vmem:[#allocation302_spill] sm:$0xff]  ;;  %v20226_v7 = vld [vmem:[#allocation185_spill] sm:$0xff]  ;;  %v16508_v38 = vld [vmem:[%s18428_s11 + $0x4e8] sm:$0xff] }
 0x8c7   : > { %v4707_v50 = vsel %vm4451_vm2, %v20215_v30, 1024.0  ;;  %v4876_v55 = vmin.f32 %v4706_v18, %v4875_v42  ;;  %v4708_v3 = vsel %vm4452_vm3, %v4240_v63, 1024.0  ;;  %v4709_v46 = vsel %vm4453_vm4, %v4240_v63, 1024.0  ;;  %v8149_v4 = vpop.f32.mrf.mxu1  ;;  %8248 = vmatprep.mubr.bf16.mxu1 %v10287_v5  ;;  %v20232_v29 = vld [vmem:[#allocation299_spill] sm:$0xff] }
 0x8c8   : > { %v5009_v8 = vmin.f32 %v4707_v50, %v5008_v2  ;;  %v6436_v47 = vpack.c.bf16 %v16204_v54, %v16277_v51  ;;  %v16478_v48 = vadd.f32 %v8149_v4, %v20219_v37  ;;  %v7866_v36 = vadd.f32 %v20220_v20, %v6451_v43  ;;  %v16503_v2 = vld [vmem:[%s18428_s11 + $0x4c8] sm:$0xff]  ;;  %v20228_v43 = vld [vmem:[#allocation257_spill] sm:$0xff] }
 0x8c9   : > { %v4877_v60 = vmin.f32 %v4708_v3, %v4876_v55  ;;  %vm4458_vm9 = vcmp.eq.f32.partialorder %v20221_v44, %v14739_v11  ;;  %v20223_v25 = vcvt.s32.f32 %v20222_v57  ;;  %v8151_v51 = vpop.f32.mrf.mxu1  ;;  %vm4459_vm10 = vcmp.eq.f32.partialorder %v20225_v23, %v14741_v14  ;;  %v20229_v55 = vld [vmem:[#allocation65_spill] sm:$0xff]  ;;  %v20240_v23 = vld [vmem:[#allocation55_spill] sm:$0xff] }
 0x8ca   : > { %v5010_v33 = vmin.f32 %v4709_v46, %v5009_v8  ;;  %vm4460_vm11 = vcmp.eq.f32.partialorder %v20226_v7, %v14739_v11  ;;  %8671 = vmatpush2.bf16.msra.mxu1 %v6436_v47  ;;  %vm4461_vm12 = vcmp.eq.f32.partialorder %v20227_v49, %v14741_v14  ;;  %v4712_v17 = vsel %vm4456_vm7, %v4242_v62, 1024.0  ;;  %v20233_v3 = vld [vmem:[#allocation181_spill] sm:$0xff]  ;;  %v20235_v47 = vld [vmem:[#allocation195_spill] sm:$0xff] }
 0x8cb   : > { %v4710_v63 = vsel %vm4454_vm5, %v20223_v25, 1024.0  ;;  %v20224_v19 = vmov %v20223_v25  ;;  %v4713_v31 = vsel %vm4457_vm8, %v4242_v62, 1024.0  ;;  %v10286_v10 = vcombine.low %v16419_v61, %v16424_v1  ;;  %v8154_v18 = vpop.f32.mrf.mxu1  ;;  %8672 = vmatprep.subr.bf16.mxu1 %v20095_v6  ;;  %v20238_v25 = vld [vmem:[#allocation198_spill] sm:$0xff]  ;;  %v20239_v51 = vld [vmem:[#allocation133_spill] sm:$0xff] }
 0x8cc   : > { %v4711_v54 = vsel %vm4455_vm6, %v20224_v19, 1024.0  ;;  %v4878_v35 = vmin.f32 %v4710_v63, %v4877_v60  ;;  %v6435_v5 = vpack.c.bf16 %v16141_v0, %v16223_v16  ;;  %v16523_v9 = vadd.f32 %v8154_v18, %v7866_v36  ;;  %v6453_v16 = vld [vmem:[%s18429_s12 + $0x70] sm:$0xff] }
 0x8cd   : > { %v5011_v42 = vmin.f32 %v4711_v54, %v5010_v33  ;;  %v7869_v39 = vadd.f32 %v20228_v43, %v6452_v56  ;;  %v20230_v8 = vcvt.s32.f32 %v20229_v55  ;;  %v10295_v24 = vcombine.high %v16503_v2, %v16508_v38  ;;  %v8156_v0 = vpop.f32.mrf.mxu1  ;;  %v20234_v60 = vld [vmem:[#allocation168_spill] sm:$0xff]  ;;  %v20244_v18 = vld [vmem:[#allocation297_spill] sm:$0xff]  ;;  %v20246_v55 = vld [vmem:[#allocation199_spill] sm:$0xff] }
 0x8ce   : > { %v4879_v30 = vmin.f32 %v4712_v17, %v4878_v35  ;;  %vm4462_vm13 = vcmp.eq.f32.partialorder %v20232_v29, %v14739_v11  ;;  %vm4463_vm14 = vcmp.eq.f32.partialorder %v20233_v3, %v14741_v14  ;;  %8673 = vmatpush2.bf16.msra.mxu1 %v6435_v5  ;;  %v4246_v33 = vcvt.s32.f32 %v20234_v60  ;;  %v16585_v43 = vld [vmem:[%s18428_s11 + $0x508] sm:$0xff] }
 0x8cf   : > { %v5012_v50 = vmin.f32 %v4713_v31, %v5011_v42  ;;  %v4714_v62 = vsel %vm4458_vm9, %v20230_v8, 1024.0  ;;  %v20231_v61 = vmov %v20230_v8  ;;  %vm4464_vm15 = vcmp.eq.f32.partialorder %v20235_v47, %v14739_v11  ;;  %v8157_v57 = vpop.f32.mrf.mxu1  ;;  %8674 = vmatprep.subr.bf16.mxu1 %v20095_v6  ;;  %8249 = vmatmul.mubr.bf16.gmra.mxu1 %v10286_v10  ;;  %v6454_v10 = vld [vmem:[%s18429_s12 + $0x78] sm:$0xff]  ;;  %v20247_v8 = vld [vmem:[#allocation99_spill] sm:$0xff] }
 0x8d0   : > { %v4715_v1 = vsel %vm4459_vm10, %v20231_v61, 1024.0  ;;  %v4880_v46 = vmin.f32 %v4714_v62, %v4879_v30  ;;  %v20236_v37 = vcvt.s32.f32 %v15827_v22  ;;  %vm4465_vm0 = vcmp.eq.f32.partialorder %v20238_v25, %v14741_v14  ;;  %v20241_v22 = vld [vmem:[#allocation67_spill] sm:$0xff]  ;;  %8256 = vmatprep.mubr.bf16.mxu1 %v10295_v24  ;;  %v20245_v30 = vld [vmem:[#allocation189_spill] sm:$0xff]  ;;  %v20254_v25 = vld [vmem:[#allocation58_spill] sm:$0xff] }
 0x8d1   : > { %v5013_v4 = vmin.f32 %v4715_v1, %v5012_v50  ;;  %v16561_v54 = vadd.f32 %v8157_v57, %v7869_v39  ;;  %v7874_v56 = vadd.f32 %v20239_v51, %v6453_v16  ;;  %v4248_v7 = vcvt.s32.f32 %v20240_v23  ;;  %v8159_v31 = vpop.f32.mrf.mxu1  ;;  %v16590_v39 = vld [vmem:[%s18428_s11 + $0x528] sm:$0xff] }
 0x8d2   : > { %v4716_v20 = vsel %vm4460_vm11, %v20236_v37, 1024.0  ;;  %v20237_v36 = vmov %v20236_v37  ;;  %v20242_v35 = vcvt.s32.f32 %v20241_v22  ;;  %vm4466_vm1 = vcmp.eq.f32.partialorder %v20244_v18, %v14739_v11  ;;  %v20248_v3 = vld [vmem:[#allocation131_spill] sm:$0xff] }
 0x8d3   : > { %v4717_v44 = vsel %vm4461_vm12, %v20237_v36, 1024.0  ;;  %v4881_v63 = vmin.f32 %v4716_v20, %v4880_v46  ;;  %vm4467_vm2 = vcmp.eq.f32.partialorder %v20245_v30, %v14741_v14  ;;  %vm4468_vm3 = vcmp.eq.f32.partialorder %v20246_v55, %v14739_v11  ;;  %v8162_v1 = vpop.f32.mrf.mxu1  ;;  %v20253_v36 = vld [vmem:[#allocation103_spill] sm:$0xff] }
 0x8d4   : > { %v5014_v19 = vmin.f32 %v4717_v44, %v5013_v4  ;;  %v4718_v42 = vsel %vm4462_vm13, %v20242_v35, 1024.0  ;;  %v20243_v49 = vmov %v20242_v35  ;;  %vm4469_vm4 = vcmp.eq.f32.partialorder %v20247_v8, %v14741_v14  ;;  %v20249_v4 = vld [vmem:[#allocation69_spill] sm:$0xff]  ;;  %v20256_v22 = vld [vmem:[#allocation107_spill] sm:$0xff]  ;;  %v20261_v8 = vld [vmem:[#allocation206_spill] sm:$0xff] }
 0x8d5   : > { %v4719_v17 = vsel %vm4463_vm14, %v20243_v49, 1024.0  ;;  %v4882_v50 = vmin.f32 %v4718_v42, %v4881_v63  ;;  %v4720_v62 = vsel %vm4464_vm15, %v4246_v33, 1024.0  ;;  %v4721_v61 = vsel %vm4465_vm0, %v4246_v33, 1024.0  ;;  %v20258_v18 = vld [vmem:[#allocation79_spill] sm:$0xff] }
 0x8d6   : > { %v5015_v5 = vmin.f32 %v4719_v17, %v5014_v19  ;;  %v10294_v16 = vcombine.low %v16503_v2, %v16508_v38  ;;  %v16604_v29 = vadd.f32 %v8162_v1, %v7874_v56  ;;  %v7877_v46 = vadd.f32 %v20248_v3, %v6454_v10  ;;  %v8164_v2 = vpop.f32.mrf.mxu1  ;;  %v20252_v38 = vld [vmem:[#allocation201_spill] sm:$0xff]  ;;  %v20255_v19 = vld [vmem:[#allocation203_spill] sm:$0xff]  ;;  %v20257_v17 = vld [vmem:[#allocation76_spill] sm:$0xff] }
 0x8d7   : > { %v4883_v24 = vmin.f32 %v4720_v62, %v4882_v50  ;;  %v20250_v60 = vcvt.s32.f32 %v20249_v4  ;;  %v10303_v20 = vcombine.high %v16585_v43, %v16590_v39  ;;  %vm4470_vm5 = vcmp.eq.f32.partialorder %v20252_v38, %v14739_v11  ;;  %v20262_v62 = vld [vmem:[#allocation222_spill] sm:$0xff]  ;;  %v20266_v2 = vld [vmem:[#allocation71_spill] sm:$0xff] }
 0x8d8   : > { %v5016_v0 = vmin.f32 %v4721_v61, %v5015_v5  ;;  %vm4471_vm6 = vcmp.eq.f32.partialorder %v20253_v36, %v14741_v14  ;;  %v4250_v63 = vcvt.s32.f32 %v20254_v25  ;;  %vm4472_vm7 = vcmp.eq.f32.partialorder %v20255_v19, %v14739_v11  ;;  %v8165_v23 = vpop.f32.mrf.mxu1  ;;  %8257 = vmatmul.mubr.bf16.gmra.mxu1 %v10294_v16  ;;  %v20263_v16 = vld [vmem:[#allocation60_spill] sm:$0xff]  ;;  %v20267_v25 = vld [vmem:[#allocation115_spill] sm:$0xff]  ;;  %v20268_v19 = vld [vmem:[#allocation214_spill] sm:$0xff] }
 0x8d9   : > { %v4722_v47 = vsel %vm4466_vm1, %v20250_v60, 1024.0  ;;  %v20251_v37 = vmov %v20250_v60  ;;  %v4724_v51 = vsel %vm4468_vm3, %v4248_v7, 1024.0  ;;  %v4725_v56 = vsel %vm4469_vm4, %v4248_v7, 1024.0  ;;  %8264 = vmatprep.mubr.bf16.mxu1 %v10303_v20 }
 0x8da   : > { %v4723_v33 = vsel %vm4467_vm2, %v20251_v37, 1024.0  ;;  %v4884_v44 = vmin.f32 %v4722_v47, %v4883_v24  ;;  %vm4473_vm8 = vcmp.eq.f32.partialorder %v20256_v22, %v14741_v14  ;;  %v16634_v49 = vadd.f32 %v8165_v23, %v7877_v46  ;;  %v8167_v55 = vpop.f32.mrf.mxu1  ;;  %v6288_v24 = vld [vmem:[%s18428_s11 + $0x548] sm:$0xff]  ;;  %v20264_v46 = vld [vmem:[#allocation209_spill] sm:$0xff]  ;;  %v20265_v47 = vld [vmem:[#allocation210_spill] sm:$0xff] }
 0x8db   : > { %v5017_v57 = vmin.f32 %v4723_v33, %v5016_v0  ;;  %v4251_v31 = vcvt.s32.f32 %v20257_v17  ;;  %v4126_v10 = vadd.s32 784, %v14429_v32  ;;  %v20259_v30 = vcvt.s32.f32 %v20258_v18  ;;  %v6292_v0 = vld [vmem:[%s18428_s11 + $0x568] sm:$0xff] }
 0x8dc   : > { %v4885_v35 = vmin.f32 %v4724_v51, %v4884_v44  ;;  %vm4474_vm9 = vcmp.eq.f32.partialorder %v20261_v8, %v14739_v11  ;;  %vm4475_vm10 = vcmp.eq.f32.partialorder %v20262_v62, %v14741_v14  ;;  %v4252_v3 = vcvt.s32.f32 %v20263_v16  ;;  %v20269_v22 = vld [vmem:[#allocation215_spill] sm:$0xff] }
 0x8dd   : > { %v5018_v42 = vmin.f32 %v4725_v56, %v5017_v57  ;;  %v4726_v50 = vsel %vm4470_vm5, %v20259_v30, 1024.0  ;;  %v20260_v7 = vmov %v20259_v30  ;;  %vm4476_vm11 = vcmp.eq.f32.partialorder %v20264_v46, %v14739_v11  ;;  %v6296_v8 = vld [vmem:[%s18428_s11 + $0x588] sm:$0xff] }
 0x8de   : > { %v4727_v5 = vsel %vm4471_vm6, %v20260_v7, 1024.0  ;;  %v4886_v61 = vmin.f32 %v4726_v50, %v4885_v35  ;;  %v4728_v4 = vsel %vm4472_vm7, %v4250_v63, 1024.0  ;;  %v4729_v60 = vsel %vm4473_vm8, %v4250_v63, 1024.0  ;;  %v20270_v35 = vld [vmem:[#allocation216_spill] sm:$0xff]  ;;  %v20271_v50 = vld [vmem:[#allocation223_spill] sm:$0xff]  ;;  %v20272_v7 = vld [vmem:[#allocation142_spill] sm:$0xff] }
 0x8df   : > { %v5019_v1 = vmin.f32 %v4727_v5, %v5018_v42  ;;  %vm4477_vm12 = vcmp.eq.f32.partialorder %v20265_v47, %v14741_v14  ;;  %v10302_v20 = vcombine.low %v16585_v43, %v16590_v39  ;;  %v4253_v38 = vcvt.s32.f32 %v20266_v2  ;;  %v6300_v62 = vld [vmem:[%s18428_s11 + $0x5a8] sm:$0xff] }
 0x8e0   : > { %v4887_v37 = vmin.f32 %v4728_v4, %v4886_v61  ;;  %v4730_v36 = vsel %vm4474_vm9, %v4251_v31, 1024.0  ;;  %v4731_v44 = vsel %vm4475_vm10, %v4251_v31, 1024.0  ;;  %v10311_v57 = vcombine.high %v6288_v24, %v6292_v0  ;;  %v20274_v46 = vld [vmem:[#allocation220_spill] sm:$0xff] }
 0x8e1   : > { %v5020_v33 = vmin.f32 %v4729_v60, %v5019_v1  ;;  %vm4478_vm13 = vcmp.eq.f32.partialorder %v20267_v25, %v14739_v11  ;;  %vm4479_vm14 = vcmp.eq.f32.partialorder %v20268_v19, %v14741_v14  ;;  %v4128_v56 = vadd.s32 800, %v14429_v32  ;;  %8265 = vmatmul.mubr.bf16.gmra.mxu1 %v10302_v20  ;;  %v20273_v1 = vld [vmem:[#allocation219_spill] sm:$0xff]  ;;  %v20279_v25 = vld [vmem:[#allocation217_spill] sm:$0xff] }
 0x8e2   : > { %v4888_v63 = vmin.f32 %v4730_v36, %v4887_v37  ;;  %v4254_v23 = vcvt.s32.f32 %v4126_v10  ;;  %v4732_v43 = vsel %vm4476_vm11, %v4252_v3, 1024.0  ;;  %v4733_v39 = vsel %vm4477_vm12, %v4252_v3, 1024.0  ;;  %8272 = vmatprep.mubr.bf16.mxu1 %v10311_v57  ;;  %v20278_v57 = vld [vmem:[#allocation247_spill] sm:$0xff] }
 0x8e3   : > { %v5021_v51 = vmin.f32 %v4731_v44, %v5020_v33  ;;  %vm4480_vm15 = vcmp.eq.f32.partialorder %v20269_v22, %v14739_v11  ;;  %vm4481_vm0 = vcmp.eq.f32.partialorder %v20270_v35, %v14741_v14  ;;  %v16685_v31 = vadd.s32 1016, %v14429_v32  ;;  %v20275_v33 = vld [vmem:[#allocation75_spill] sm:$0xff] }
 0x8e4   : > { %v4889_v42 = vmin.f32 %v4732_v43, %v4888_v63  ;;  %v16688_v18 = vadd.s32 1000, %v14429_v32  ;;  %v4734_v10 = vsel %vm4478_vm13, %v4253_v38, 1024.0  ;;  %v4735_v30 = vsel %vm4479_vm14, %v4253_v38, 1024.0  ;;  %v20281_v43 = vld [vmem:[#allocation295_spill] sm:$0xff] }
 0x8e5   : > { %v5022_v17 = vmin.f32 %v4733_v39, %v5021_v51  ;;  %vm4482_vm1 = vcmp.eq.f32.partialorder %v20271_v50, %v14739_v11  ;;  %vm4483_vm2 = vcmp.eq.f32.partialorder %v20272_v7, %v14741_v14  ;;  %v4256_v61 = vcvt.s32.f32 %v4128_v56 }
 0x8e6   : > { %v4890_v5 = vmin.f32 %v4734_v10, %v4889_v42  ;;  %vm4484_vm3 = vcmp.eq.f32.partialorder %v20273_v1, %v14739_v11  ;;  %v4736_v16 = vsel %vm4480_vm15, %v4254_v23, 1024.0  ;;  %v4737_v3 = vsel %vm4481_vm0, %v4254_v23, 1024.0  ;;  %v20280_v23 = vld [vmem:[#allocation293_spill] sm:$0xff] }
 0x8e7   : > { %v5023_v55 = vmin.f32 %v4735_v30, %v5022_v17  ;;  %vm4485_vm4 = vcmp.eq.f32.partialorder %v20274_v46, %v14741_v14  ;;  %v10310_v47 = vcombine.low %v6288_v24, %v6292_v0  ;;  %v16711_v37 = vadd.s32 984, %v14429_v32  ;;  %v20282_v17 = vld [vmem:[#allocation82_spill] sm:$0xff] }
 0x8e8   : > { %v4891_v4 = vmin.f32 %v4736_v16, %v4890_v5  ;;  %v20276_v20 = vcvt.s32.f32 %v20275_v33  ;;  %v10319_v44 = vcombine.high %v6296_v8, %v6300_v62  ;;  %vm4486_vm5 = vcmp.eq.f32.partialorder %v20278_v57, %v14739_v11  ;;  %v20285_v5 = vld [vmem:[#allocation286_spill] sm:$0xff]  ;;  %v6304_v16 = vld [vmem:[%s18428_s11 + $0x5c8] sm:$0xff] }
 0x8e9   : > { %v5024_v60 = vmin.f32 %v4737_v3, %v5023_v55  ;;  %vm4487_vm6 = vcmp.eq.f32.partialorder %v20279_v25, %v14741_v14  ;;  %v4283_v24 = vcvt.s32.f32 %v16685_v31  ;;  %v4281_v0 = vcvt.s32.f32 %v16688_v18  ;;  %8273 = vmatmul.mubr.bf16.gmra.mxu1 %v10310_v47  ;;  %v20286_v55 = vld [vmem:[#allocation288_spill] sm:$0xff] }
 0x8ea   : > { %v4738_v2 = vsel %vm4482_vm1, %v20276_v20, 1024.0  ;;  %v20277_v38 = vmov %v20276_v20  ;;  %v4740_v51 = vsel %vm4484_vm3, %v4256_v61, 1024.0  ;;  %v4741_v56 = vsel %vm4485_vm4, %v4256_v61, 1024.0  ;;  %8280 = vmatprep.mubr.bf16.mxu1 %v10319_v44  ;;  %v6308_v3 = vld [vmem:[%s18428_s11 + $0x5e8] sm:$0xff] }
 0x8eb   : > { %v4739_v36 = vsel %vm4483_vm2, %v20277_v38, 1024.0  ;;  %v4892_v19 = vmin.f32 %v4738_v2, %v4891_v4  ;;  %vm4488_vm7 = vcmp.eq.f32.partialorder %v20280_v23, %v14739_v11  ;;  %vm4489_vm8 = vcmp.eq.f32.partialorder %v20281_v43, %v14741_v14  ;;  %v20287_v4 = vld [vmem:[#allocation118_spill] sm:$0xff]  ;;  %v20291_v38 = vld [vmem:[#allocation284_spill] sm:$0xff] }
 0x8ec   : > { %v5025_v63 = vmin.f32 %v4739_v36, %v5024_v60  ;;  %v4279_v35 = vcvt.s32.f32 %v16711_v37  ;;  %v16732_v42 = vadd.s32 968, %v14429_v32  ;;  %v20283_v10 = vcvt.s32.f32 %v20282_v17  ;;  %v20288_v60 = vld [vmem:[#allocation23_spill] sm:$0xff]  ;;  %v20296_v43 = vld [vmem:[#allocation278_spill] sm:$0xff]  ;;  %v20370_v37 = vld [vmem:[#allocation221_spill] sm:$0xff] }
 0x8ed   : > { %v4893_v39 = vmin.f32 %v4740_v51, %v4892_v19  ;;  %vm4490_vm9 = vcmp.eq.f32.partialorder %v20285_v5, %v14739_v11  ;;  %vm4491_vm10 = vcmp.eq.f32.partialorder %v20286_v55, %v14741_v14  ;;  %v16749_v46 = vadd.s32 952, %v14429_v32  ;;  %v20292_v19 = vld [vmem:[#allocation19_spill] sm:$0xff] }
 0x8ee   : > { %v5026_v22 = vmin.f32 %v4741_v56, %v5025_v63  ;;  %v4742_v30 = vsel %vm4486_vm5, %v20283_v10, 1024.0  ;;  %v20284_v50 = vmov %v20283_v10  ;;  %vm4492_vm11 = vcmp.eq.f32.partialorder %v20287_v4, %v14739_v11  ;;  %v6352_v18 = vld [vmem:[%s18428_s11 + $0x748] sm:$0xff] }
 0x8ef   : > { %v4743_v7 = vsel %vm4487_vm6, %v20284_v50, 1024.0  ;;  %v4894_v61 = vmin.f32 %v4742_v30, %v4893_v39  ;;  %v20289_v47 = vcvt.s32.f32 %v20288_v60  ;;  %vm4493_vm12 = vcmp.eq.f32.partialorder %v20291_v38, %v14741_v14  ;;  %v20297_v30 = vld [vmem:[#allocation28_spill] sm:$0xff] }
 0x8f0   : > { %v5027_v1 = vmin.f32 %v4743_v7, %v5026_v22  ;;  %v10318_v57 = vcombine.low %v6296_v8, %v6300_v62  ;;  %v16766_v25 = vadd.s32 936, %v14429_v32  ;;  %v20293_v63 = vcvt.s32.f32 %v20292_v19  ;;  %v20295_v22 = vld [vmem:[#allocation128_spill] sm:$0xff] }
 0x8f1   : > { %v4744_v33 = vsel %vm4488_vm7, %v20289_v47, 1024.0  ;;  %v20290_v20 = vmov %v20289_v47  ;;  %v10327_v39 = vcombine.high %v6304_v16, %v6308_v3  ;;  %vm4494_vm13 = vcmp.eq.f32.partialorder %v20295_v22, %v14739_v11  ;;  %v20305_v19 = vld [vmem:[#allocation132_spill] sm:$0xff] }
 0x8f2   : > { %v4745_v2 = vsel %vm4489_vm8, %v20290_v20, 1024.0  ;;  %v4895_v36 = vmin.f32 %v4744_v33, %v4894_v61  ;;  %v4746_v51 = vsel %vm4490_vm9, %v20293_v63, 1024.0  ;;  %v20294_v56 = vmov %v20293_v63  ;;  %v20300_v61 = vld [vmem:[#allocation274_spill] sm:$0xff]  ;;  %8281 = vmatmul.mubr.bf16.gmra.mxu1 %v10318_v57  ;;  %v20306_v63 = vld [vmem:[#allocation268_spill] sm:$0xff] }
 0x8f3   : > { %v5028_v44 = vmin.f32 %v4745_v2, %v5027_v1  ;;  %v4747_v23 = vsel %vm4491_vm10, %v20294_v56, 1024.0  ;;  %vm4495_vm14 = vcmp.eq.f32.partialorder %v20296_v43, %v14741_v14  ;;  %v4277_v8 = vcvt.s32.f32 %v16732_v42  ;;  %v20301_v1 = vld [vmem:[#allocation276_spill] sm:$0xff]  ;;  %v20302_v2 = vld [vmem:[#allocation25_spill] sm:$0xff]  ;;  %8288 = vmatprep.mubr.bf16.mxu1 %v10327_v39  ;;  %v20308_v43 = vld [vmem:[#allocation34_spill] sm:$0xff] }
 0x8f4   : > { %v4896_v17 = vmin.f32 %v4746_v51, %v4895_v36  ;;  %v4275_v62 = vcvt.s32.f32 %v16749_v46  ;;  %v20298_v50 = vcvt.s32.f32 %v20297_v30  ;;  %vm4496_vm15 = vcmp.eq.f32.partialorder %v20300_v61, %v14739_v11  ;;  %v6312_v56 = vld [vmem:[%s18428_s11 + $0x608] sm:$0xff] }
 0x8f5   : > { %v5029_v10 = vmin.f32 %v4747_v23, %v5028_v44  ;;  %vm4497_vm0 = vcmp.eq.f32.partialorder %v20301_v1, %v14741_v14  ;;  %v4273_v33 = vcvt.s32.f32 %v16766_v25  ;;  %v16791_v20 = vadd.s32 920, %v14429_v32  ;;  %v6316_v23 = vld [vmem:[%s18428_s11 + $0x628] sm:$0xff] }
 0x8f6   : > { %v4748_v7 = vsel %vm4492_vm11, %v20298_v50, 1024.0  ;;  %v20299_v5 = vmov %v20298_v50  ;;  %v20303_v4 = vcvt.s32.f32 %v20302_v2  ;;  %vm4498_vm1 = vcmp.eq.f32.partialorder %v20305_v19, %v14739_v11  ;;  %v20307_v39 = vld [vmem:[#allocation256_spill] sm:$0xff]  ;;  %v20312_v2 = vld [vmem:[#allocation38_spill] sm:$0xff] }
 0x8f7   : > { %v4749_v55 = vsel %vm4493_vm12, %v20299_v5, 1024.0  ;;  %v4897_v60 = vmin.f32 %v4748_v7, %v4896_v17  ;;  %vm4499_vm2 = vcmp.eq.f32.partialorder %v20306_v63, %v14741_v14  ;;  %v16808_v22 = vadd.s32 904, %v14429_v32  ;;  %v20311_v7 = vld [vmem:[#allocation258_spill] sm:$0xff]  ;;  %v20316_v1 = vld [vmem:[#allocation264_spill] sm:$0xff] }
 0x8f8   : > { %v5030_v47 = vmin.f32 %v4749_v55, %v5029_v10  ;;  %v4750_v38 = vsel %vm4494_vm13, %v20303_v4, 1024.0  ;;  %v20304_v36 = vmov %v20303_v4  ;;  %vm4500_vm3 = vcmp.eq.f32.partialorder %v20307_v39, %v14739_v11  ;;  %v20315_v19 = vld [vmem:[#allocation134_spill] sm:$0xff]  ;;  %v16980_v25 = vld [vmem:[%s18428_s11 + $0x6e8] sm:$0xff] }
 0x8f9   : > { %v4751_v44 = vsel %vm4495_vm14, %v20304_v36, 1024.0  ;;  %v4898_v51 = vmin.f32 %v4750_v38, %v4897_v60  ;;  %v20309_v17 = vcvt.s32.f32 %v20308_v43  ;;  %vm4501_vm4 = vcmp.eq.f32.partialorder %v20311_v7, %v14741_v14  ;;  %v20321_v7 = vld [vmem:[#allocation260_spill] sm:$0xff] }
 0x8fa   : > { %v5031_v57 = vmin.f32 %v4751_v44, %v5030_v47  ;;  %v10326_v60 = vcombine.low %v6304_v16, %v6308_v3  ;;  %v4271_v47 = vcvt.s32.f32 %v16791_v20  ;;  %v20313_v4 = vcvt.s32.f32 %v20312_v2  ;;  %v20317_v3 = vld [vmem:[#allocation44_spill] sm:$0xff] }
 0x8fb   : > { %v4752_v10 = vsel %vm4496_vm15, %v20309_v17, 1024.0  ;;  %v20310_v30 = vmov %v20309_v17  ;;  %v10335_v44 = vcombine.high %v6312_v56, %v6316_v23  ;;  %vm4502_vm5 = vcmp.eq.f32.partialorder %v20315_v19, %v14739_v11  ;;  %v20325_v19 = vld [vmem:[#allocation262_spill] sm:$0xff]  ;;  %v17055_v42 = vld [vmem:[%s18428_s11 + $0x728] sm:$0xff] }
 0x8fc   : > { %v4753_v50 = vsel %vm4497_vm0, %v20310_v30, 1024.0  ;;  %v4899_v5 = vmin.f32 %v4752_v10, %v4898_v51  ;;  %v4754_v38 = vsel %vm4498_vm1, %v20313_v4, 1024.0  ;;  %v20314_v61 = vmov %v20313_v4  ;;  %8289 = vmatmul.mubr.bf16.gmra.mxu1 %v10326_v60  ;;  %v20322_v4 = vld [vmem:[#allocation33_spill] sm:$0xff] }
 0x8fd   : > { %v5032_v55 = vmin.f32 %v4753_v50, %v5031_v57  ;;  %v4755_v36 = vsel %vm4499_vm2, %v20314_v61, 1024.0  ;;  %vm4503_vm6 = vcmp.eq.f32.partialorder %v20316_v1, %v14741_v14  ;;  %v4269_v51 = vcvt.s32.f32 %v16808_v22  ;;  %v20320_v50 = vld [vmem:[#allocation259_spill] sm:$0xff]  ;;  %8296 = vmatprep.mubr.bf16.mxu1 %v10335_v44  ;;  %v20327_v44 = vld [vmem:[#allocation42_spill] sm:$0xff] }
 0x8fe   : > { %v4900_v63 = vmin.f32 %v4754_v38, %v4899_v5  ;;  %v4140_v16 = vadd.s32 896, %v14429_v32  ;;  %v20318_v57 = vcvt.s32.f32 %v20317_v3  ;;  %vm4504_vm7 = vcmp.eq.f32.partialorder %v20320_v50, %v14739_v11  ;;  %v20326_v1 = vld [vmem:[#allocation263_spill] sm:$0xff] }
 0x8ff   : > { %v5033_v43 = vmin.f32 %v4755_v36, %v5032_v55  ;;  %vm4505_vm8 = vcmp.eq.f32.partialorder %v20321_v7, %v14741_v14  ;;  %v16847_v22 = vadd.s32 1008, %v14429_v32  ;;  %v4142_v2 = vadd.s32 912, %v14429_v32  ;;  %v16866_v3 = vld [vmem:[%s18428_s11 + $0x668] sm:$0xff] }
 0x900   : > { %v4756_v17 = vsel %vm4500_vm3, %v20318_v57, 1024.0  ;;  %v20319_v10 = vmov %v20318_v57  ;;  %v20323_v39 = vcvt.s32.f32 %v20322_v4  ;;  %vm4506_vm9 = vcmp.eq.f32.partialorder %v20325_v19, %v14739_v11  ;;  %v20334_v7 = vld [vmem:[#allocation227_spill] sm:$0xff] }
 0x901   : > { %v4757_v30 = vsel %vm4501_vm4, %v20319_v10, 1024.0  ;;  %v4901_v5 = vmin.f32 %v4756_v17, %v4900_v63  ;;  %vm4507_vm10 = vcmp.eq.f32.partialorder %v20326_v1, %v14741_v14  ;;  %v4268_v57 = vcvt.s32.f32 %v4140_v16 }
 0x902   : > { %v5034_v55 = vmin.f32 %v4757_v30, %v5033_v43  ;;  %v4758_v38 = vsel %vm4502_vm5, %v20323_v39, 1024.0  ;;  %v20324_v61 = vmov %v20323_v39  ;;  %v16861_v43 = vld [vmem:[%s18428_s11 + $0x648] sm:$0xff]  ;;  %vm4508_vm11 = vcmp.eq.f32.partialorder %v20108_v15, %v14739_v11  ;;  %v16905_v15 = vpop.xlane.xlu0 %6101 }
 0x903   : > { %v4759_v36 = vsel %vm4503_vm6, %v20324_v61, 1024.0  ;;  %v4902_v63 = vmin.f32 %v4758_v38, %v4901_v5  ;;  %v20328_v17 = vcvt.s32.f32 %v20327_v44  ;;  %v10334_v39 = vcombine.low %v6312_v56, %v6316_v23  ;;  %v20331_v61 = vld [vmem:[#allocation35_spill] sm:$0xff] }
 0x904   : > { %v5035_v60 = vmin.f32 %v4759_v36, %v5034_v55  ;;  %v20330_v55 = vld [vmem:[#allocation311_spill] sm:$0xff]  ;;  %v4282_v38 = vcvt.s32.f32 %v16847_v22  ;;  %v20332_v36 = vcvt.s32.f32 %v20331_v61  ;;  %v10343_v44 = vcombine.high %v16861_v43, %v16866_v3 }
 0x905   : > { %v4760_v10 = vsel %vm4504_vm7, %v20328_v17, 1024.0  ;;  %v20329_v30 = vmov %v20328_v17  ;;  %vm4509_vm12 = vcmp.eq.f32.partialorder %v20330_v55, %v14741_v14  ;;  %vm4510_vm13 = vcmp.eq.f32.partialorder %v20334_v7, %v14739_v11  ;;  %v20335_v17 = vld [vmem:[#allocation229_spill] sm:$0xff]  ;;  %v20337_v55 = vld [vmem:[#allocation144_spill] sm:$0xff]  ;;  %8297 = vmatmul.mubr.bf16.gmra.mxu1 %v10334_v39 }
 0x906   : > { %v4761_v5 = vsel %vm4505_vm8, %v20329_v30, 1024.0  ;;  %v4903_v4 = vmin.f32 %v4760_v10, %v4902_v63  ;;  %v4762_v19 = vsel %vm4506_vm9, %v20332_v36, 1024.0  ;;  %v20333_v50 = vmov %v20332_v36  ;;  %8304 = vmatprep.mubr.bf16.mxu1 %v10343_v44  ;;  %v16914_v39 = vld [vmem:[%s18428_s11 + $0x688] sm:$0xff] }
 0x907   : > { %v5036_v16 = vmin.f32 %v4761_v5, %v5035_v60  ;;  %v4763_v1 = vsel %vm4507_vm10, %v20333_v50, 1024.0  ;;  %vm4511_vm14 = vcmp.eq.f32.partialorder %v20335_v17, %v14741_v14  ;;  %v4144_v56 = vadd.s32 928, %v14429_v32  ;;  %v20336_v5 = vld [vmem:[#allocation143_spill] sm:$0xff]  ;;  %v20339_v50 = vld [vmem:[#allocation238_spill] sm:$0xff] }
 0x908   : > { %v4904_v63 = vmin.f32 %v4762_v19, %v4903_v4  ;;  %v4270_v23 = vcvt.s32.f32 %v4142_v2  ;;  %v4764_v10 = vsel %vm4508_vm11, %v4268_v57, 1024.0  ;;  %v4765_v30 = vsel %vm4509_vm12, %v4268_v57, 1024.0  ;;  %v20338_v57 = vld [vmem:[#allocation236_spill] sm:$0xff]  ;;  %v20340_v17 = vld [vmem:[#allocation151_spill] sm:$0xff] }
 0x909   : > { %v5037_v60 = vmin.f32 %v4763_v1, %v5036_v16  ;;  %vm4512_vm15 = vcmp.eq.f32.partialorder %v20336_v5, %v14739_v11  ;;  %vm4513_vm0 = vcmp.eq.f32.partialorder %v20337_v55, %v14741_v14  ;;  %v16902_v4 = vadd.s32 992, %v14429_v32  ;;  %v20342_v55 = vld [vmem:[#allocation246_spill] sm:$0xff] }
 0x90a   : > { %v4905_v61 = vmin.f32 %v4764_v10, %v4904_v63  ;;  %v4146_v16 = vadd.s32 944, %v14429_v32  ;;  %v4766_v2 = vsel %vm4510_vm13, %v4269_v51, 1024.0  ;;  %v4767_v19 = vsel %vm4511_vm14, %v4269_v51, 1024.0  ;;  %v16919_v51 = vld [vmem:[%s18428_s11 + $0x6a8] sm:$0xff] }
 0x90b   : > { %v5038_v36 = vmin.f32 %v4765_v30, %v5037_v60  ;;  %vm4514_vm1 = vcmp.eq.f32.partialorder %v20338_v57, %v14739_v11  ;;  %vm4515_vm2 = vcmp.eq.f32.partialorder %v20339_v50, %v14741_v14  ;;  %v4272_v44 = vcvt.s32.f32 %v4144_v56  ;;  %v20341_v10 = vld [vmem:[#allocation152_spill] sm:$0xff] }
 0x90c   : > { %v4906_v1 = vmin.f32 %v4766_v2, %v4905_v61  ;;  %vm4516_vm3 = vcmp.eq.f32.partialorder %v20340_v17, %v14739_v11  ;;  %v4768_v63 = vsel %vm4512_vm15, %v4270_v23, 1024.0  ;;  %v4769_v60 = vsel %vm4513_vm0, %v4270_v23, 1024.0 }
 0x90d   : > { %v5039_v7 = vmin.f32 %v4767_v19, %v5038_v36  ;;  %vm4517_vm4 = vcmp.eq.f32.partialorder %v20341_v10, %v14741_v14  ;;  %v10342_v36 = vcombine.low %v16861_v43, %v16866_v3  ;;  %v16934_v56 = vadd.s32 976, %v14429_v32  ;;  %v20343_v19 = vld [vmem:[#allocation136_spill] sm:$0xff] }
 0x90e   : > { %v4907_v30 = vmin.f32 %v4768_v63, %v4906_v1  ;;  %v4770_v2 = vsel %vm4514_vm1, %v4271_v47, 1024.0  ;;  %v4771_v5 = vsel %vm4515_vm2, %v4271_v47, 1024.0  ;;  %v10351_v23 = vcombine.high %v16914_v39, %v16919_v51  ;;  %v16950_v47 = vpop.xlane.xlu0 %6033  ;;  %v20345_v63 = vld [vmem:[#allocation140_spill] sm:$0xff] }
 0x90f   : > { %v5040_v61 = vmin.f32 %v4769_v60, %v5039_v7  ;;  %vm4518_vm5 = vcmp.eq.f32.partialorder %v20342_v55, %v14739_v11  ;;  %vm4519_vm6 = vcmp.eq.f32.partialorder %v20343_v19, %v14741_v14  ;;  %v4148_v3 = vadd.s32 960, %v14429_v32  ;;  %v20344_v7 = vld [vmem:[#allocation251_spill] sm:$0xff]  ;;  %8305 = vmatmul.mubr.bf16.gmra.mxu1 %v10342_v36  ;;  %v20347_v36 = vld [vmem:[#allocation261_spill] sm:$0xff] }
 0x910   : > { %v4908_v57 = vmin.f32 %v4770_v2, %v4907_v30  ;;  %v4274_v50 = vcvt.s32.f32 %v4146_v16  ;;  %v4772_v1 = vsel %vm4516_vm3, %v4272_v44, 1024.0  ;;  %v4773_v20 = vsel %vm4517_vm4, %v4272_v44, 1024.0  ;;  %8312 = vmatprep.mubr.bf16.mxu1 %v10351_v23  ;;  %v20348_v23 = vld [vmem:[#allocation265_spill] sm:$0xff] }
 0x911   : > { %v5041_v43 = vmin.f32 %v4771_v5, %v5040_v61  ;;  %vm4520_vm7 = vcmp.eq.f32.partialorder %v20344_v7, %v14739_v11  ;;  %vm4521_vm8 = vcmp.eq.f32.partialorder %v20345_v63, %v14741_v14  ;;  %v4280_v30 = vcvt.s32.f32 %v16902_v4  ;;  %v20346_v61 = vld [vmem:[#allocation255_spill] sm:$0xff] }
 0x912   : > { %v4909_v60 = vmin.f32 %v4772_v1, %v4908_v57  ;;  %v4278_v16 = vcvt.s32.f32 %v16934_v56  ;;  %v4774_v44 = vsel %vm4518_vm5, %v4273_v33, 1024.0  ;;  %v4775_v17 = vsel %vm4519_vm6, %v4273_v33, 1024.0  ;;  %v16975_v5 = vld [vmem:[%s18428_s11 + $0x6c8] sm:$0xff]  ;;  %v20349_v57 = vld [vmem:[#allocation269_spill] sm:$0xff]  ;;  %v17002_v63 = vpop.xlane.xlu0 %6097 }
 0x913   : > { %v5042_v10 = vmin.f32 %v4773_v20, %v5041_v43  ;;  %vm4522_vm9 = vcmp.eq.f32.partialorder %v20346_v61, %v14739_v11  ;;  %vm4523_vm10 = vcmp.eq.f32.partialorder %v20347_v36, %v14741_v14  ;;  %v4276_v33 = vcvt.s32.f32 %v4148_v3  ;;  %v20350_v3 = vld [vmem:[#allocation47_spill] sm:$0xff]  ;;  %v20355_v61 = vld [vmem:[#allocation49_spill] sm:$0xff] }
 0x914   : > { %v4910_v56 = vmin.f32 %v4774_v44, %v4909_v60  ;;  %vm4524_vm11 = vcmp.eq.f32.partialorder %v20348_v23, %v14739_v11  ;;  %v4776_v55 = vsel %vm4520_vm7, %v4274_v50, 1024.0  ;;  %v4777_v19 = vsel %vm4521_vm8, %v4274_v50, 1024.0  ;;  %v20351_v44 = vld [vmem:[#allocation45_spill] sm:$0xff] }
 0x915   : > { %v5043_v2 = vmin.f32 %v4775_v17, %v5042_v10  ;;  %vm4525_vm12 = vcmp.eq.f32.partialorder %v20349_v57, %v14741_v14  ;;  %v10350_v20 = vcombine.low %v16914_v39, %v16919_v51  ;;  %vm4284_vm13 = vcmp.eq.f32.partialorder %v20350_v3, %v14739_v11  ;;  %v6100_v10 = vpop.xlane.xlu1 %6099  ;;  %v20352_v39 = vld [vmem:[#allocation50_spill] sm:$0xff]  ;;  %v20354_v17 = vld [vmem:[#allocation300_spill] sm:$0xff] }
 0x916   : > { %v4911_v43 = vmin.f32 %v4776_v55, %v4910_v56  ;;  %v4778_v60 = vsel %vm4522_vm9, %v4275_v62, 1024.0  ;;  %v4779_v7 = vsel %vm4523_vm10, %v4275_v62, 1024.0  ;;  %v10359_v50 = vcombine.high %v16975_v5, %v16980_v25  ;;  %v20353_v51 = vld [vmem:[#allocation182_spill] sm:$0xff]  ;;  %v20356_v55 = vld [vmem:[#allocation43_spill] sm:$0xff]  ;;  %v20360_v57 = vld [vmem:[#allocation48_spill] sm:$0xff] }
 0x917   : > { %v5044_v1 = vmin.f32 %v4777_v19, %v5043_v2  ;;  %vm4285_vm14 = vcmp.eq.f32.partialorder %v20351_v44, %v14741_v14  ;;  %vm4286_vm15 = vcmp.eq.f32.partialorder %v20352_v39, %v14739_v11  ;;  %vm4526_vm0 = vcmp.eq.f32.partialorder %v20353_v51, %v14739_v11  ;;  %v20357_v19 = vld [vmem:[#allocation41_spill] sm:$0xff]  ;;  %8313 = vmatmul.mubr.bf16.gmra.mxu1 %v10350_v20  ;;  %v17050_v51 = vld [vmem:[%s18428_s11 + $0x708] sm:$0xff] }
 0x918   : > { %vm4527_vm1 = vcmp.eq.f32.partialorder %v20354_v17, %v14741_v14  ;;  %v4912_v46 = vmin.f32 %v4778_v60, %v4911_v43  ;;  %vm4287_vm2 = vcmp.eq.f32.partialorder %v20355_v61, %v14741_v14  ;;  %v4780_v36 = vsel %vm4524_vm11, %v4276_v33, 1024.0  ;;  %v20358_v43 = vld [vmem:[#allocation285_spill] sm:$0xff]  ;;  %8320 = vmatprep.mubr.bf16.mxu1 %v10359_v50  ;;  %v20365_v17 = vld [vmem:[#allocation306_spill] sm:$0xff] }
 0x919   : > { %v5045_v62 = vmin.f32 %v4779_v7, %v5044_v1  ;;  %v4781_v56 = vsel %vm4525_vm12, %v4276_v33, 1024.0  ;;  %v6434_v2 = vpack.c.bf16 %v16905_v15, %v6100_v10  ;;  %vm4288_vm3 = vcmp.eq.f32.partialorder %v20356_v55, %v14739_v11  ;;  %v20359_v1 = vld [vmem:[#allocation303_spill] sm:$0xff]  ;;  %v20361_v15 = vld [vmem:[#allocation192_spill] sm:$0xff]  ;;  %v6032_v20 = vpop.xlane.xlu1 %6031  ;;  %v20362_v10 = vld [vmem:[#allocation46_spill] sm:$0xff] }
 0x91a   : > { %vm4289_vm4 = vcmp.eq.f32.partialorder %v20357_v19, %v14741_v14  ;;  %vm4528_vm5 = vcmp.eq.f32.partialorder %v20358_v43, %v14739_v11  ;;  %vm4529_vm6 = vcmp.eq.f32.partialorder %v20359_v1, %v14741_v14  ;;  %v4913_v23 = vmin.f32 %v4780_v36, %v4912_v46  ;;  %v20363_v46 = vld [vmem:[#allocation298_spill] sm:$0xff]  ;;  %v20364_v50 = vld [vmem:[#allocation305_spill] sm:$0xff] }
 0x91b   : > { %v5046_v60 = vmin.f32 %v4781_v56, %v5045_v62  ;;  %vm4290_vm7 = vcmp.eq.f32.partialorder %v20360_v57, %v14739_v11  ;;  %vm4530_vm8 = vcmp.eq.f32.partialorder %v20361_v15, %v14739_v11  ;;  %v4782_v33 = vsel %vm4526_vm0, %v4277_v8, 1024.0  ;;  %8675 = vmatpush2.bf16.msra.mxu1 %v6434_v2  ;;  %v20380_v55 = vld [vmem:[#allocation233_spill] sm:$0xff] }
 0x91c   : > { %v4783_v7 = vsel %vm4527_vm1, %v4277_v8, 1024.0  ;;  %vm4291_vm9 = vcmp.eq.f32.partialorder %v20362_v10, %v14741_v14  ;;  %vm4531_vm10 = vcmp.eq.f32.partialorder %v20363_v46, %v14741_v14  ;;  %v4914_v62 = vmin.f32 %v4782_v33, %v4913_v23  ;;  %8676 = vmatprep.subr.bf16.mxu1 %v20095_v6  ;;  %v6030_v23 = vpop.xlane.xlu0 %6029 }
 0x91d   : > { %v5047_v36 = vmin.f32 %v4783_v7, %v5046_v60  ;;  %v6417_v8 = vpack.c.bf16 %v16950_v47, %v6032_v20  ;;  %vm4532_vm11 = vcmp.eq.f32.partialorder %v20364_v50, %v14739_v11  ;;  %vm4533_vm12 = vcmp.eq.f32.partialorder %v20365_v17, %v14741_v14  ;;  %v20366_v60 = vld [vmem:[#allocation83_spill] sm:$0xff]  ;;  %v20367_v20 = vld [vmem:[#allocation84_spill] sm:$0xff] }
 0x91e   : > { %v4784_v56 = vsel %vm4528_vm5, %v4278_v16, 1024.0  ;;  %v4785_v2 = vsel %vm4529_vm6, %v4278_v16, 1024.0  ;;  %vm4534_vm0 = vcmp.eq.f32.partialorder %v20366_v60, %v14739_v11  ;;  %v10358_v7 = vcombine.low %v16975_v5, %v16980_v25  ;;  %v6096_v5 = vpop.xlane.xlu1 %6095  ;;  %v20368_v25 = vld [vmem:[#allocation277_spill] sm:$0xff]  ;;  %v20374_v17 = vld [vmem:[#allocation163_spill] sm:$0xff] }
 0x91f   : > { %v4915_v47 = vmin.f32 %v4784_v56, %v4914_v62  ;;  %v5048_v33 = vmin.f32 %v4785_v2, %v5047_v36  ;;  %8388 = vmatpush2.bf16.msra.mxu0 %v6417_v8  ;;  %vm4535_vm1 = vcmp.eq.f32.partialorder %v20367_v20, %v14741_v14  ;;  %v4786_v43 = vsel %vm4530_vm8, %v4279_v35, 1024.0  ;;  %v20369_v62 = vld [vmem:[#allocation279_spill] sm:$0xff]  ;;  %v20371_v56 = vld [vmem:[#allocation120_spill] sm:$0xff] }
 0x920   : > { %v4787_v16 = vsel %vm4531_vm10, %v4279_v35, 1024.0  ;;  %v10367_v1 = vcombine.high %v17050_v51, %v17055_v42  ;;  %8389 = vmatprep.subr.bf16.mxu0 %v20095_v6  ;;  %vm4536_vm5 = vcmp.eq.f32.partialorder %v20368_v25, %v14739_v11  ;;  %vm4537_vm6 = vcmp.eq.f32.partialorder %v20369_v62, %v14741_v14  ;;  %8321 = vmatmul.mubr.bf16.gmra.mxu1 %v10358_v7  ;;  %v6094_v44 = vpop.xlane.xlu0 %6093  ;;  %v20377_v20 = vld [vmem:[#allocation164_spill] sm:$0xff] }
 0x921   : > { %v4916_v15 = vmin.f32 %v4786_v43, %v4915_v47  ;;  %v5049_v36 = vmin.f32 %v4787_v16, %v5048_v33  ;;  %vm4538_vm8 = vcmp.eq.f32.partialorder %v20370_v37, %v14739_v11  ;;  %v4788_v35 = vsel %vm4532_vm11, %v4280_v30, 1024.0 }
 0x922   : > { %v4789_v46 = vsel %vm4533_vm12, %v4280_v30, 1024.0  ;;  %v6433_v8 = vpack.c.bf16 %v17002_v63, %v6096_v5  ;;  %vm4539_vm10 = vcmp.eq.f32.partialorder %v20371_v56, %v14741_v14  ;;  %v20372_v2 = vcvt.s32.f32 %v14429_v32  ;;  %8328 = vmatprep.mubr.bf16.mxu1 %v10367_v1  ;;  %v6028_v16 = vpop.xlane.xlu1 %6027  ;;  %v6129_v14 = vld [vmem:[%s18428_s11 + $0x50] sm:$0xff] }
 0x923   : > { %v4917_v33 = vmin.f32 %v4788_v35, %v4916_v15  ;;  %v5050_v50 = vmin.f32 %v4789_v46, %v5049_v36  ;;  %v20375_v63 = vcvt.s32.f32 %v20374_v17  ;;  %v4790_v3 = vsel %vm4534_vm0, %v4281_v0, 1024.0 }
 0x924   : > { %v4540_v47 = vsel %vm4284_vm13, %v20372_v2, 1024.0  ;;  %v20373_v4 = vmov %v20372_v2  ;;  %v4791_v7 = vsel %vm4535_vm1, %v4281_v0, 1024.0  ;;  %8677 = vmatpush2.bf16.msra.mxu1 %v6433_v8  ;;  %v6356_v0 = vld [vmem:[%s18428_s11 + $0x768] sm:$0xff]  ;;  %v6416_v60 = vpack.c.bf16 %v6030_v23, %v6028_v16 }
 0x925   : > { %v4541_v30 = vsel %vm4285_vm14, %v20373_v4, 1024.0  ;;  %v4542_v43 = vsel %vm4286_vm15, %v20375_v63, 1024.0  ;;  %v20376_v5 = vmov %v20375_v63  ;;  %v4918_v15 = vmin.f32 %v4790_v3, %v4917_v33  ;;  %8678 = vmatprep.subr.bf16.mxu1 %v20095_v6  ;;  %v6026_v3 = vpop.xlane.xlu0 %6025 }
 0x926   : > { %v4543_v39 = vsel %vm4287_vm2, %v20376_v5, 1024.0  ;;  %v5051_v36 = vmin.f32 %v4791_v7, %v5050_v50  ;;  %v20378_v1 = vcvt.s32.f32 %v20377_v20  ;;  %v4792_v23 = vsel %vm4536_vm5, %v4282_v38, 1024.0  ;;  %8390 = vmatpush2.bf16.msra.mxu0 %v6416_v60 }
 0x927   : > { %v4793_v8 = vsel %vm4537_vm6, %v4282_v38, 1024.0  ;;  %v20381_v2 = vcvt.s32.f32 %v20380_v55  ;;  %v4919_v19 = vmin.f32 %v4792_v23, %v4918_v15  ;;  %v10366_v4 = vcombine.low %v17050_v51, %v17055_v42  ;;  %v6092_v42 = vpop.xlane.xlu1 %6091  ;;  %8391 = vmatprep.subr.bf16.mxu0 %v20095_v6 }
 0x928   : > { %v4544_v61 = vsel %vm4288_vm3, %v20378_v1, 1024.0  ;;  %v20379_v35 = vmov %v20378_v1  ;;  %v5052_v50 = vmin.f32 %v4793_v8, %v5051_v36  ;;  %v4794_v38 = vsel %vm4538_vm8, %v4283_v24, 1024.0 }
 0x929   : > { %v4545_v46 = vsel %vm4289_vm4, %v20379_v35, 1024.0  ;;  %v4546_v33 = vsel %vm4290_vm7, %v20381_v2, 1024.0  ;;  %v20382_v25 = vmov %v20381_v2  ;;  %v4795_v57 = vsel %vm4539_vm10, %v4283_v24, 1024.0  ;;  %8329 = vmatmul.mubr.bf16.gmra.mxu1 %v10366_v4  ;;  %v6133_v24 = vld [vmem:[%s18428_s11 + $0x70] sm:$0xff]  ;;  %v6090_v20 = vpop.xlane.xlu0 %6089 }
 0x92a   : > { %v4547_v22 = vsel %vm4291_vm9, %v20382_v25, 1024.0  ;;  %v10375_v51 = vcombine.high %v6352_v18, %v6356_v0  ;;  %v4920_v62 = vmin.f32 %v4794_v38, %v4919_v19  ;;  %v5053_v17 = vmin.f32 %v4795_v57, %v5052_v50 }
 0x92b   : > { %v4796_v10 = vmin.f32 %v4540_v47, %v4544_v61  ;;  %v4929_v63 = vmin.f32 %v4541_v30, %v4545_v46  ;;  %v6432_v7 = vpack.c.bf16 %v6094_v44, %v6092_v42  ;;  %v4797_v5 = vmin.f32 %v4542_v43, %v4546_v33  ;;  %v6024_v31 = vpop.xlane.xlu1 %6023  ;;  %v6360_v30 = vld [vmem:[%s18428_s11 + $0x788] sm:$0xff] }
 0x92c   : > { %v4930_v37 = vmin.f32 %v4543_v39, %v4547_v22  ;;  %8336 = vmatprep.mubr.bf16.mxu1 %v10375_v51  ;;  %v6364_v43 = vld [vmem:[%s18428_s11 + $0x7a8] sm:$0xff]  ;;  %v6415_v44 = vpack.c.bf16 %v6026_v3, %v6024_v31  ;;  %v10374_v39 = vcombine.low %v6352_v18, %v6356_v0  ;;  %v10153_v15 = vcombine.high %v6129_v14, %v6133_v24  ;;  %v6141_v18 = vld [vmem:[%s18428_s11 + $0xb0] sm:$0xff]  ;;  %v6126_v3 = vld [vmem:[%s18428_s11 + $0x38] sm:$0xff] }
 0x92d   : > { %v4921_v16 = vmin.f32 %v4796_v10, %v4920_v62  ;;  %v5054_v11 = vmin.f32 %v4929_v63, %v5053_v17  ;;  %8679 = vmatpush2.bf16.msra.mxu1 %v6432_v7  ;;  %v10383_v1 = vcombine.high %v6360_v30, %v6364_v43  ;;  %v6368_v0 = vld [vmem:[%s18428_s11 + $0x7c8] sm:$0xff]  ;;  %v10152_v2 = vcombine.low %v6129_v14, %v6133_v24  ;;  %v6145_v17 = vld [vmem:[%s18428_s11 + $0xd0] sm:$0xff]  ;;  %v6122_v63 = vld [vmem:[%s18428_s11 + $0x18] sm:$0xff] }
 0x92e   : > { %8680 = vmatprep.subr.bf16.mxu1 %v20095_v6  ;;  %8392 = vmatpush2.bf16.msra.mxu0 %v6415_v44  ;;  %v6137_v6 = vld [vmem:[%s18428_s11 + $0x90] sm:$0xff]  ;;  %v10382_v33 = vcombine.low %v6360_v30, %v6364_v43  ;;  %v10391_v25 = vcombine.high %v6368_v0, %v6372_v53  ;;  %v11135_v42 = vmov 1966171168   ;;  %v20383_v44 = vlaneseq }
 0x92f   : > { %v4922_v56 = vmin.f32 %v4797_v5, %v4921_v16  ;;  %v5055_v47 = vmin.f32 %v4930_v37, %v5054_v11  ;;  %v6088_v61 = vpop.xlane.xlu1 %6087  ;;  %v10161_v19 = vcombine.high %v6137_v6, %v6141_v18  ;;  %v5066_v62 = vunpack.c.l.s4 %v11135_v42  ;;  %v6149_v10 = vld [vmem:[%s18428_s11 + $0xf0] sm:$0xff] }
 0x930   : > { %v6431_v35 = vpack.c.bf16 %v6090_v20, %v6088_v61  ;;  %v10160_v11 = vcombine.low %v6137_v6, %v6141_v18  ;;  %v10390_v37 = vcombine.low %v6368_v0, %v6372_v53  ;;  %v10169_v31 = vcombine.high %v6145_v17, %v6149_v10  ;;  %v6153_v43 = vld [vmem:[%s18428_s11 + $0x110] sm:$0xff]  ;;  %v6138_v53 = vld [vmem:[%s18428_s11 + $0x98] sm:$0xff] }
 0x931   : > { %v4923_v36 = vrot.slane %v4922_v56, 4  ;;  %v5056_v60 = vrot.slane %v5055_v47, 4  ;;  %8394 = vmatmul.mubr.bf16.vlgmr.msra.gmra.mxu0 %v10144_v27  ;;  %8337 = vmatmul.mubr.bf16.gmra.mxu1 %v10374_v39  ;;  %v5067_v5 = vunpack.c.0.s8 %v5066_v62  ;;  %vm5081_vm13 = vcmp.lt.s32.totalorder %v20383_v44, 256  ;;  %v6130_v39 = vld [vmem:[%s18428_s11 + $0x58] sm:$0xff]  ;;  %v6161_v6 = vld [vmem:[%s18428_s11 + $0x150] sm:$0xff] }
 0x932   : > { %8401 = vmatprep.mubr.bf16.mxu0 %v10153_v15  ;;  %8344 = vmatprep.mubr.bf16.mxu1 %v10383_v1  ;;  %v6134_v15 = vld [vmem:[%s18428_s11 + $0x78] sm:$0xff]  ;;  %v10146_v20 = vcombine.low %v6122_v63, %v6126_v3  ;;  %v6165_v18 = vld [vmem:[%s18428_s11 + $0x170] sm:$0xff] }
 0x933   : > { %v4924_v46 = vmin.f32 %v4922_v56, %v4923_v36  ;;  %v5057_v23 = vmin.f32 %v5055_v47, %v5056_v60  ;;  %8681 = vmatpush2.bf16.msra.mxu1 %v6431_v35  ;;  %v5070_v24 = vsub.s32 %v5067_v5, %v14429_v32  ;;  %v10147_v56 = vcombine.high %v6122_v63, %v6126_v3  ;;  %v6157_v32 = vld [vmem:[%s18428_s11 + $0x130] sm:$0xff]  ;;  %v6455_v60 = vld [vmem:[%s18429_s12 + $0x80] sm:$0xff]  ;;  %v6458_v62 = vld [vmem:[%s18429_s12 + $0x98] sm:$0xff] }
 0x934   : > { %v10168_v36 = vcombine.low %v6145_v17, %v6149_v10  ;;  %v10177_v1 = vcombine.high %v6153_v43, %v6157_v32  ;;  %v10155_v61 = vcombine.high %v6130_v39, %v6134_v15  ;;  %v20384_v35 = vld [vmem:[#allocation271_spill] sm:$0xff]  ;;  %v6169_v63 = vld [vmem:[%s18428_s11 + $0x190] sm:$0xff]  ;;  %v6150_v5 = vld [vmem:[%s18428_s11 + $0xf8] sm:$0xff] }
 0x935   : > { %v4925_v8 = vrot.slane %v4924_v46, 2  ;;  %v5058_v55 = vrot.slane %v5057_v23, 2  ;;  %v6173_v3 = vld [vmem:[%s18428_s11 + $0x1b0] sm:$0xff] }
 0x936   : > { %v20388_v44 = vld [vmem:[#allocation281_spill] sm:$0xff] }
 0x937   : > { %v4926_v34 = vmin.f32 %v4924_v46, %v4925_v8  ;;  %v5059_v27 = vmin.f32 %v5057_v23, %v5058_v55  ;;  %v7882_v46 = vadd.f32 %v20384_v35, %v6455_v60  ;;  %v6456_v23 = vld [vmem:[%s18429_s12 + $0x88] sm:$0xff]  ;;  %v8170_v8 = vpop.f32.mrf.mxu1  ;;  %v6154_v35 = vld [vmem:[%s18428_s11 + $0x118] sm:$0xff] }
 0x939   : > { %v4927_v50 = vrot.slane %v4926_v34, 1  ;;  %v5060_v4 = vrot.slane %v5059_v27, 1  ;;  %8402 = vmatmul.mubr.bf16.gmra.mxu0 %v10152_v2  ;;  %8345 = vmatmul.mubr.bf16.gmra.mxu1 %v10382_v33  ;;  %v17256_v55 = vadd.f32 %v8170_v8, %v7882_v46  ;;  %v8172_v0 = vpop.f32.mrf.mxu1  ;;  %v10176_v33 = vcombine.low %v6153_v43, %v6157_v32  ;;  %v6158_v46 = vld [vmem:[%s18428_s11 + $0x138] sm:$0xff] }
 0x93a   : > { %8409 = vmatprep.mubr.bf16.mxu0 %v10161_v19  ;;  %8352 = vmatprep.mubr.bf16.mxu1 %v10391_v25  ;;  %v6457_v19 = vld [vmem:[%s18429_s12 + $0x90] sm:$0xff]  ;;  %v10185_v25 = vcombine.high %v6161_v6, %v6165_v18 }
 0x93b   : > { %v4928_v22 = vmin.f32 %v4926_v34, %v4927_v50  ;;  %v5061_v38 = vmin.f32 %v5059_v27, %v5060_v4  ;;  %v6142_v34 = vld [vmem:[%s18428_s11 + $0xb8] sm:$0xff]  ;;  %v8173_v50 = vpop.f32.mrf.mxu1  ;;  %v10154_v4 = vcombine.low %v6130_v39, %v6134_v15  ;;  %v6460_v15 = vld [vmem:[%s18429_s12 + $0xa8] sm:$0xff] }
 0x93c   : > { %v20385_v27 = vld [vmem:[#allocation129_spill] sm:$0xff] }
 0x93d   : > { %v10722_v57 = vtrunc.f32 %v4928_v22  ;;  %v10724_v51 = vtrunc.f32 %v5061_v38  ;;  %v7885_v2 = vadd.f32 %v20385_v27, %v6456_v23  ;;  %v10163_v38 = vcombine.high %v6138_v53, %v6142_v34  ;;  %v20389_v23 = vld [vmem:[#allocation125_spill] sm:$0xff] }
 0x93e   : > { %v7901_v8 = vadd.f32 %v20389_v23, %v6460_v15  ;;  %v6197_v15 = vld [vmem:[%s18428_s11 + $0x270] sm:$0xff] }
 0x93f   : > { %v10723_v7 = vcvt.f32.s32 %v10722_v57  ;;  %v10725_v16 = vcvt.f32.s32 %v10724_v51  ;;  %v17274_v22 = vadd.f32 %v8173_v50, %v7885_v2  ;;  %v8175_v57 = vpop.f32.mrf.mxu1  ;;  %v20386_v51 = vld [vmem:[#allocation275_spill] sm:$0xff]  ;;  %v10179_v2 = vcombine.high %v6154_v35, %v6158_v46  ;;  %v6465_v23 = vld [vmem:[%s18429_s12 + $0xd0] sm:$0xff] }
 0x940   : > { %v7890_v42 = vadd.f32 %v20386_v51, %v6457_v19  ;;  %v20390_v19 = vld [vmem:[#allocation283_spill] sm:$0xff]  ;;  %v6185_v57 = vld [vmem:[%s18428_s11 + $0x210] sm:$0xff] }
 0x941   : > { %v5064_v14 = vcombine.low %v10723_v7, %v10725_v16  ;;  %8410 = vmatmul.mubr.bf16.gmra.mxu0 %v10160_v11  ;;  %8353 = vmatmul.mubr.bf16.gmra.mxu1 %v10390_v37  ;;  %v8178_v17 = vpop.f32.mrf.mxu1  ;;  %v6146_v16 = vld [vmem:[%s18428_s11 + $0xd8] sm:$0xff]  ;;  %v20387_v11 = vld [vmem:[#allocation127_spill] sm:$0xff]  ;;  %v6189_v51 = vld [vmem:[%s18428_s11 + $0x230] sm:$0xff] }
 0x942   : > { %8417 = vmatprep.mubr.bf16.mxu0 %v10169_v31  ;;  %8682 = vmatprep.mubr.bf16.mxu1 %v10147_v56  ;;  %v17280_v10 = vadd.f32 %v8178_v17, %v7890_v42  ;;  %v7893_v37 = vadd.f32 %v20387_v11, %v6458_v62  ;;  %v10184_v31 = vcombine.low %v6161_v6, %v6165_v18  ;;  %v6461_v18 = vld [vmem:[%s18429_s12 + $0xb0] sm:$0xff]  ;;  %v6162_v62 = vld [vmem:[%s18428_s11 + $0x158] sm:$0xff] }
 0x943   : > { %v5071_v47 = vrot.slane %v5064_v14, %v5070_v24  ;;  %v8180_v7 = vpop.f32.mrf.mxu1  ;;  %v6459_v14 = vld [vmem:[%s18429_s12 + $0xa0] sm:$0xff]  ;;  %v10162_v56 = vcombine.low %v6138_v53, %v6142_v34  ;;  %v10171_v43 = vcombine.high %v6146_v16, %v6150_v5  ;;  %v10192_v6 = vcombine.low %v6169_v63, %v6173_v3  ;;  %v6166_v17 = vld [vmem:[%s18428_s11 + $0x178] sm:$0xff] }
 0x944   : > { %v7898_v39 = vadd.f32 %v20388_v44, %v6459_v14  ;;  %v10170_v53 = vcombine.low %v6146_v16, %v6150_v5  ;;  %v7906_v50 = vadd.f32 %v20390_v19, %v6461_v18  ;;  %v6463_v16 = vld [vmem:[%s18429_s12 + $0xc0] sm:$0xff]  ;;  %v10178_v11 = vcombine.low %v6154_v35, %v6158_v46  ;;  %v6466_v19 = vld [vmem:[%s18429_s12 + $0xd8] sm:$0xff] }
 0x945   : > { %v5078_v30 = vrot.slane %v5071_v47, %v5070_v24  ;;  %v8181_v24 = vpop.f32.mrf.mxu1  ;;  %v10193_v47 = vcombine.high %v6169_v63, %v6173_v3  ;;  %v20391_v63 = vld [vmem:[#allocation123_spill] sm:$0xff]  ;;  %v10187_v14 = vcombine.high %v6162_v62, %v6166_v17  ;;  %v10208_v46 = vcombine.low %v6185_v57, %v6189_v51 }
 0x947   : > { %5083 = vst.msk [vmem:[%s19035_s26] sm:$0x3] %vm5081_vm13, %v5078_v30  ;;  %v17298_v30 = vadd.f32 %v8181_v24, %v7893_v37  ;;  %v8183_v32 = vpop.f32.mrf.mxu1  ;;  %v10209_v37 = vcombine.high %v6185_v57, %v6189_v51  ;;  %v6205_v57 = vld [vmem:[%s18428_s11 + $0x2b0] sm:$0xff]  ;;  %s9881_s26 = scalar_lea.sflag [#allocation5], %s20483_s23 }
 0x949   : > { %8418 = vmatmul.mubr.bf16.gmra.mxu0 %v10168_v36  ;;  %8683 = vmatmul.mubr.bf16.vlgmr.msra.gmra.mxu1 %v10146_v20  ;;  %v8186_v36 = vpop.f32.mrf.mxu1  ;;  %v6177_v20 = vld [vmem:[%s18428_s11 + $0x1d0] sm:$0xff] }
 0x94a   : > { %8425 = vmatprep.mubr.bf16.mxu0 %v10177_v1  ;;  %8690 = vmatprep.mubr.bf16.mxu1 %v10155_v61  ;;  %v17304_v60 = vadd.f32 %v8186_v36, %v7898_v39  ;;  %v6181_v1 = vld [vmem:[%s18428_s11 + $0x1f0] sm:$0xff] }
 0x94b   : > { %v8188_v61 = vpop.f32.mrf.mxu1  ;;  %v10201_v34 = vcombine.high %v6177_v20, %v6181_v1  ;;  %v10200_v7 = vcombine.low %v6177_v20, %v6181_v1  ;;  %v6193_v39 = vld [vmem:[%s18428_s11 + $0x250] sm:$0xff]  ;;  %v6170_v20 = vld [vmem:[%s18428_s11 + $0x198] sm:$0xff] }
 0x94c   : > { %v6174_v1 = vld [vmem:[%s18428_s11 + $0x1b8] sm:$0xff]  ;;  %v20393_v61 = vld [vmem:[#allocation292_spill] sm:$0xff]  ;;  %v10217_v18 = vcombine.high %v6193_v39, %v6197_v15 }
 0x94d   : > { %v8189_v0 = vpop.f32.mrf.mxu1 }
 0x94e   : > { %v17322_v27 = vadd.f32 %v8189_v0, %v7901_v8 }
 0x951   : > { %8426 = vmatmul.mubr.bf16.gmra.mxu0 %v10176_v33  ;;  %8691 = vmatmul.mubr.bf16.gmra.mxu1 %v10154_v4  ;;  %v8191_v33 = vpop.f32.mrf.mxu1  ;;  %v6462_v4 = vld [vmem:[%s18429_s12 + $0xb8] sm:$0xff] }
 0x952   : > { %8433 = vmatprep.mubr.bf16.mxu0 %v10185_v25  ;;  %8698 = vmatprep.mubr.bf16.mxu1 %v10163_v38  ;;  %v7909_v3 = vadd.f32 %v20391_v63, %v6462_v4 }
 0x953   : > { %v8194_v25 = vpop.f32.mrf.mxu1 }
 0x954   : > { %v17328_v38 = vadd.f32 %v8194_v25, %v7906_v50  ;;  %v6201_v25 = vld [vmem:[%s18428_s11 + $0x290] sm:$0xff] }
 0x955   : > { %v8196_v42 = vpop.f32.mrf.mxu1 }
 0x956   : > { %v6178_v42 = vld [vmem:[%s18428_s11 + $0x1d8] sm:$0xff] }
 0x957   : > { %v8197_v5 = vpop.f32.mrf.mxu1 }
 0x959   : > { %8434 = vmatmul.mubr.bf16.gmra.mxu0 %v10184_v31  ;;  %8699 = vmatmul.mubr.bf16.gmra.mxu1 %v10162_v56  ;;  %v17346_v31 = vadd.f32 %v8197_v5, %v7909_v3  ;;  %v8199_v24 = vpop.f32.mrf.mxu1  ;;  %v20392_v56 = vld [vmem:[#allocation290_spill] sm:$0xff]  ;;  %v10216_v3 = vcombine.low %v6193_v39, %v6197_v15  ;;  %v10194_v5 = vcombine.low %v6170_v20, %v6174_v1  ;;  %v6209_v15 = vld [vmem:[%s18428_s11 + $0x2d0] sm:$0xff] }
 0x95a   : > { %8441 = vmatprep.mubr.bf16.mxu0 %v10193_v47  ;;  %8706 = vmatprep.mubr.bf16.mxu1 %v10171_v43  ;;  %v7914_v47 = vadd.f32 %v20392_v56, %v6463_v16  ;;  %v6464_v43 = vld [vmem:[%s18429_s12 + $0xc8] sm:$0xff]  ;;  %v20396_v56 = vld [vmem:[#allocation218_spill] sm:$0xff] }
 0x95b   : > { %v8202_v32 = vpop.f32.mrf.mxu1  ;;  %v7917_v35 = vadd.f32 %v20393_v61, %v6464_v43  ;;  %v6468_v43 = vld [vmem:[%s18429_s12 + $0xe8] sm:$0xff]  ;;  %v6190_v61 = vld [vmem:[%s18428_s11 + $0x238] sm:$0xff] }
 0x95c   : > { %v17352_v44 = vadd.f32 %v8202_v32, %v7914_v47 }
 0x95d   : > { %v8204_v36 = vpop.f32.mrf.mxu1 }
 0x95e   : > { %v6213_v36 = vld [vmem:[%s18428_s11 + $0x2f0] sm:$0xff] }
 0x95f   : > { %v8205_v8 = vpop.f32.mrf.mxu1 }
 0x960   : > { %v17370_v0 = vadd.f32 %v8205_v8, %v7917_v35  ;;  %v20397_v35 = vld [vmem:[#allocation205_spill] sm:$0xff] }
 0x961   : > { %8442 = vmatmul.mubr.bf16.gmra.mxu0 %v10192_v6  ;;  %8707 = vmatmul.mubr.bf16.gmra.mxu1 %v10170_v53  ;;  %v10186_v6 = vcombine.low %v6162_v62, %v6166_v17  ;;  %v10195_v53 = vcombine.high %v6170_v20, %v6174_v1  ;;  %v6182_v62 = vld [vmem:[%s18428_s11 + $0x1f8] sm:$0xff]  ;;  %v20395_v17 = vld [vmem:[#allocation296_spill] sm:$0xff] }
 0x962   : > { %8449 = vmatprep.mubr.bf16.mxu0 %v10201_v34  ;;  %8714 = vmatprep.mubr.bf16.mxu1 %v10179_v2  ;;  %v8207_v34 = vpop.f32.mrf.mxu1  ;;  %v20394_v2 = vld [vmem:[#allocation294_spill] sm:$0xff]  ;;  %v7925_v63 = vadd.f32 %v20395_v17, %v6466_v19  ;;  %v6469_v8 = vld [vmem:[%s18429_s12 + $0xf0] sm:$0xff] }
 0x963   : > { %v7922_v33 = vadd.f32 %v20394_v2, %v6465_v23  ;;  %v6186_v1 = vld [vmem:[%s18428_s11 + $0x218] sm:$0xff]  ;;  %v10224_v23 = vcombine.low %v6201_v25, %v6205_v57  ;;  %v20398_v19 = vld [vmem:[#allocation116_spill] sm:$0xff] }
 0x964   : > { %v8210_v50 = vpop.f32.mrf.mxu1  ;;  %v10211_v2 = vcombine.high %v6186_v1, %v6190_v61 }
 0x965   : > { %v17376_v4 = vadd.f32 %v8210_v50, %v7922_v33  ;;  %v7938_v50 = vadd.f32 %v20398_v19, %v6469_v8  ;;  %v6233_v8 = vld [vmem:[%s18428_s11 + $0x390] sm:$0xff] }
 0x966   : > { %v8212_v51 = vpop.f32.mrf.mxu1 }
 0x968   : > { %v8213_v16 = vpop.f32.mrf.mxu1 }
 0x969   : > { %8450 = vmatmul.mubr.bf16.gmra.mxu0 %v10200_v7  ;;  %8715 = vmatmul.mubr.bf16.gmra.mxu1 %v10178_v11  ;;  %v6467_v7 = vld [vmem:[%s18429_s12 + $0xe0] sm:$0xff]  ;;  %v10225_v11 = vcombine.high %v6201_v25, %v6205_v57  ;;  %v6217_v25 = vld [vmem:[%s18428_s11 + $0x310] sm:$0xff] }
 0x96a   : > { %8457 = vmatprep.mubr.bf16.mxu0 %v10209_v37  ;;  %8722 = vmatprep.mubr.bf16.mxu1 %v10187_v14  ;;  %v17394_v37 = vadd.f32 %v8213_v16, %v7925_v63  ;;  %v10203_v14 = vcombine.high %v6178_v42, %v6182_v62  ;;  %v8215_v24 = vpop.f32.mrf.mxu1  ;;  %v7930_v47 = vadd.f32 %v20396_v56, %v6467_v7  ;;  %v6221_v57 = vld [vmem:[%s18428_s11 + $0x330] sm:$0xff]  ;;  %v6198_v63 = vld [vmem:[%s18428_s11 + $0x278] sm:$0xff] }
 0x96b   : > { %v10210_v16 = vcombine.low %v6186_v1, %v6190_v61  ;;  %v6225_v56 = vld [vmem:[%s18428_s11 + $0x350] sm:$0xff] }
 0x96c   : > { %v8218_v32 = vpop.f32.mrf.mxu1 }
 0x96d   : > { %v17400_v39 = vadd.f32 %v8218_v32, %v7930_v47  ;;  %v6229_v47 = vld [vmem:[%s18428_s11 + $0x370] sm:$0xff]  ;;  %v6202_v32 = vld [vmem:[%s18428_s11 + $0x298] sm:$0xff] }
 0x96e   : > { %v8220_v20 = vpop.f32.mrf.mxu1  ;;  %v10249_v61 = vcombine.high %v6225_v56, %v6229_v47 }
 0x971   : > { %8458 = vmatmul.mubr.bf16.gmra.mxu0 %v10208_v46  ;;  %8723 = vmatmul.mubr.bf16.gmra.mxu1 %v10186_v6  ;;  %v7933_v46 = vadd.f32 %v20397_v35, %v6468_v43  ;;  %v8221_v6 = vpop.f32.mrf.mxu1 }
 0x972   : > { %8465 = vmatprep.mubr.bf16.mxu0 %v10217_v18  ;;  %8730 = vmatprep.mubr.bf16.mxu1 %v10195_v53  ;;  %v10202_v18 = vcombine.low %v6178_v42, %v6182_v62  ;;  %v10233_v53 = vcombine.high %v6209_v15, %v6213_v36  ;;  %v6194_v62 = vld [vmem:[%s18428_s11 + $0x258] sm:$0xff] }
 0x973   : > { %v17418_v34 = vadd.f32 %v8221_v6, %v7933_v46  ;;  %v8223_v33 = vpop.f32.mrf.mxu1  ;;  %v10218_v1 = vcombine.low %v6194_v62, %v6198_v63  ;;  %v6237_v6 = vld [vmem:[%s18428_s11 + $0x3b0] sm:$0xff] }
 0x974   : > { %v10248_v33 = vcombine.low %v6225_v56, %v6229_v47 }
 0x975   : > { %v8226_v51 = vpop.f32.mrf.mxu1 }
 0x976   : > { %v17421_v17 = vadd.f32 %v8226_v51, %v7938_v50  ;;  %v10257_v51 = vcombine.high %v6233_v8, %v6237_v6 }
 0x977   : > { %v8228_v42 = vpop.f32.mrf.mxu1 }
 0x979   : > { %8466 = vmatmul.mubr.bf16.gmra.mxu0 %v10216_v3  ;;  %8731 = vmatmul.mubr.bf16.gmra.mxu1 %v10194_v5  ;;  %v10232_v3 = vcombine.low %v6209_v15, %v6213_v36  ;;  %v17435_v7 = vpop.f32.mrf.mxu1  ;;  %v10241_v5 = vcombine.high %v6217_v25, %v6221_v57  ;;  %v6206_v15 = vld [vmem:[%s18428_s11 + $0x2b8] sm:$0xff]  ;;  %v10240_v36 = vcombine.low %v6217_v25, %v6221_v57 }
 0x97a   : > { %8473 = vmatprep.mubr.bf16.mxu0 %v10225_v11  ;;  %8738 = vmatprep.mubr.bf16.mxu1 %v10203_v14  ;;  %v10219_v11 = vcombine.high %v6194_v62, %v6198_v63  ;;  %v10227_v35 = vcombine.high %v6202_v32, %v6206_v15  ;;  %v10226_v50 = vcombine.low %v6202_v32, %v6206_v15  ;;  %v6241_v62 = vld [vmem:[%s18428_s11 + $0x3d0] sm:$0xff] }
 0x97b   : > { %v8231_v14 = vpop.f32.mrf.mxu1  ;;  %v6245_v63 = vld [vmem:[%s18428_s11 + $0x3f0] sm:$0xff] }
 0x97c   : > { %v10265_v47 = vcombine.high %v6241_v62, %v6245_v63 }
 0x97d   : > { %v17437_v24 = vpop.f32.mrf.mxu1 }
 0x97f   : > { %v8236_v43 = vpop.f32.mrf.mxu1 }
 0x981   : > { %8474 = vmatmul.mubr.bf16.gmra.mxu0 %v10224_v23  ;;  %8739 = vmatmul.mubr.bf16.gmra.mxu1 %v10202_v18  ;;  %v17451_v20 = vpop.f32.mrf.mxu1 }
 0x982   : > { %8481 = vmatprep.mubr.bf16.mxu0 %v10233_v53  ;;  %8746 = vmatprep.mubr.bf16.mxu1 %v10211_v2  ;;  %v6210_v53 = vld [vmem:[%s18428_s11 + $0x2d8] sm:$0xff] }
 0x983   : > { %v8239_v46 = vpop.f32.mrf.mxu1  ;;  %v6214_v2 = vld [vmem:[%s18428_s11 + $0x2f8] sm:$0xff] }
 0x984   : > { %v10235_v25 = vcombine.high %v6210_v53, %v6214_v2  ;;  %v10234_v56 = vcombine.low %v6210_v53, %v6214_v2  ;;  %v6230_v46 = vld [vmem:[%s18428_s11 + $0x378] sm:$0xff] }
 0x986   : > { %v17453_v23 = vpop.f32.mrf.mxu1 }
 0x988   : > { %v8244_v18 = vpop.f32.mrf.mxu1 }
 0x989   : > { %8482 = vmatmul.mubr.bf16.gmra.mxu0 %v10232_v3  ;;  %8747 = vmatmul.mubr.bf16.gmra.mxu1 %v10210_v16  ;;  %v6218_v16 = vld [vmem:[%s18428_s11 + $0x318] sm:$0xff] }
 0x98a   : > { %8489 = vmatprep.mubr.bf16.mxu0 %v10241_v5  ;;  %8754 = vmatprep.mubr.bf16.mxu1 %v10219_v11  ;;  %v17467_v19 = vpop.f32.mrf.mxu1  ;;  %v6222_v5 = vld [vmem:[%s18428_s11 + $0x338] sm:$0xff]  ;;  %v10256_v11 = vcombine.low %v6233_v8, %v6237_v6  ;;  %v10264_v8 = vcombine.low %v6241_v62, %v6245_v63 }
 0x98b   : > { %v10243_v43 = vcombine.high %v6218_v16, %v6222_v5  ;;  %v10242_v18 = vcombine.low %v6218_v16, %v6222_v5  ;;  %v6234_v62 = vld [vmem:[%s18428_s11 + $0x398] sm:$0xff] }
 0x98c   : > { %v8247_v57 = vpop.f32.mrf.mxu1  ;;  %v6238_v63 = vld [vmem:[%s18428_s11 + $0x3b8] sm:$0xff] }
 0x98f   : > { %v17469_v42 = vpop.f32.mrf.mxu1 }
 0x991   : > { %8490 = vmatmul.mubr.bf16.gmra.mxu0 %v10240_v36  ;;  %8755 = vmatmul.mubr.bf16.gmra.mxu1 %v10218_v1  ;;  %v8252_v3 = vpop.f32.mrf.mxu1  ;;  %v6249_v36 = vld [vmem:[%s18428_s11 + $0x410] sm:$0xff] }
 0x992   : > { %8497 = vmatprep.mubr.bf16.mxu0 %v10249_v61  ;;  %8762 = vmatprep.mubr.bf16.mxu1 %v10227_v35  ;;  %v6253_v1 = vld [vmem:[%s18428_s11 + $0x430] sm:$0xff]  ;;  %v6226_v35 = vld [vmem:[%s18428_s11 + $0x358] sm:$0xff] }
 0x993   : > { %v17483_v14 = vpop.f32.mrf.mxu1  ;;  %v10273_v53 = vcombine.high %v6249_v36, %v6253_v1  ;;  %v10251_v2 = vcombine.high %v6226_v35, %v6230_v46  ;;  %v10272_v3 = vcombine.low %v6249_v36, %v6253_v1  ;;  %v10250_v5 = vcombine.low %v6226_v35, %v6230_v46  ;;  %v6265_v36 = vld [vmem:[%s18428_s11 + $0x490] sm:$0xff]  ;;  %v6242_v35 = vld [vmem:[%s18428_s11 + $0x3d8] sm:$0xff] }
 0x994   : > { %v6269_v1 = vld [vmem:[%s18428_s11 + $0x4b0] sm:$0xff]  ;;  %v6246_v46 = vld [vmem:[%s18428_s11 + $0x3f8] sm:$0xff] }
 0x995   : > { %v8255_v32 = vpop.f32.mrf.mxu1 }
 0x998   : > { %v17485_v15 = vpop.f32.mrf.mxu1 }
 0x999   : > { %8498 = vmatmul.mubr.bf16.gmra.mxu0 %v10248_v33  ;;  %8763 = vmatmul.mubr.bf16.gmra.mxu1 %v10226_v50 }
 0x99a   : > { %8505 = vmatprep.mubr.bf16.mxu0 %v10257_v51  ;;  %8770 = vmatprep.mubr.bf16.mxu1 %v10235_v25  ;;  %v8260_v61 = vpop.f32.mrf.mxu1  ;;  %v6257_v51 = vld [vmem:[%s18428_s11 + $0x450] sm:$0xff] }
 0x99b   : > { %v6261_v25 = vld [vmem:[%s18428_s11 + $0x470] sm:$0xff] }
 0x99c   : > { %v17499_v6 = vpop.f32.mrf.mxu1 }
 0x99e   : > { %v8263_v33 = vpop.f32.mrf.mxu1 }
 0x9a1   : > { %8506 = vmatmul.mubr.bf16.gmra.mxu0 %v10256_v11  ;;  %8771 = vmatmul.mubr.bf16.gmra.mxu1 %v10234_v56  ;;  %v17501_v50 = vpop.f32.mrf.mxu1  ;;  %v10281_v11 = vcombine.high %v6257_v51, %v6261_v25  ;;  %v10259_v56 = vcombine.high %v6234_v62, %v6238_v63 }
 0x9a2   : > { %8513 = vmatprep.mubr.bf16.mxu0 %v10265_v47  ;;  %8778 = vmatprep.mubr.bf16.mxu1 %v10243_v43  ;;  %20399 = vst [vmem:[#allocation171_spill] sm:$0xff] %v17501_v50  ;;  %v6482_v43 = vld [vmem:[%s18429_s12 + $0x158] sm:$0xff] }
 0x9a3   : > { %v8268_v57 = vpop.f32.mrf.mxu1 }
 0x9a4   : > { %v10258_v57 = vcombine.low %v6234_v62, %v6238_v63  ;;  %v6277_v62 = vld [vmem:[%s18428_s11 + $0x4f0] sm:$0xff] }
 0x9a5   : > { %v17515_v16 = vpop.f32.mrf.mxu1 }
 0x9a6   : > { %20400 = vst [vmem:[#allocation172_spill] sm:$0xff] %v17515_v16  ;;  %v20436_v16 = vld [vmem:[#allocation160_spill] sm:$0xff] }
 0x9a7   : > { %v8271_v47 = vpop.f32.mrf.mxu1 }
 0x9a8   : > { %v20404_v47 = vld [vmem:[#allocation20_spill] sm:$0xff] }
 0x9a9   : > { %8514 = vmatmul.mubr.bf16.gmra.mxu0 %v10264_v8  ;;  %8779 = vmatmul.mubr.bf16.gmra.mxu1 %v10242_v18  ;;  %v17520_v32 = vpop.f32.mrf.mxu1  ;;  %v20402_v8 = vld [vmem:[#allocation26_spill] sm:$0xff] }
 0x9aa   : > { %8521 = vmatprep.mubr.bf16.mxu0 %v10273_v53  ;;  %8786 = vmatprep.mubr.bf16.mxu1 %v10251_v2  ;;  %20401 = vst [vmem:[#allocation226_spill] sm:$0xff] %v17520_v32  ;;  %v7989_v18 = vadd.f32 %v20402_v8, %v6482_v43  ;;  %v10280_v53 = vcombine.low %v6257_v51, %v6261_v25  ;;  %v6483_v2 = vld [vmem:[%s18429_s12 + $0x160] sm:$0xff]  ;;  %v6484_v32 = vld [vmem:[%s18429_s12 + $0x168] sm:$0xff]  ;;  %v6273_v25 = vld [vmem:[%s18428_s11 + $0x4d0] sm:$0xff] }
 0x9ab   : > { %v8276_v61 = vpop.f32.mrf.mxu1  ;;  %v6250_v8 = vld [vmem:[%s18428_s11 + $0x418] sm:$0xff] }
 0x9ac   : > { %v7994_v61 = vadd.f32 %v20404_v47, %v6483_v2 }
 0x9ad   : > { %v8277_v33 = vpop.f32.mrf.mxu1 }
 0x9b1   : > { %8522 = vmatmul.mubr.bf16.gmra.mxu0 %v10272_v3  ;;  %8787 = vmatmul.mubr.bf16.gmra.mxu1 %v10250_v5  ;;  %v10289_v3 = vcombine.high %v6265_v36, %v6269_v1  ;;  %v17538_v5 = vadd.f32 %v8277_v33, %v7989_v18  ;;  %v6254_v18 = vld [vmem:[%s18428_s11 + $0x438] sm:$0xff]  ;;  %v10288_v33 = vcombine.low %v6265_v36, %v6269_v1  ;;  %v6281_v1 = vld [vmem:[%s18428_s11 + $0x510] sm:$0xff] }
 0x9b2   : > { %8529 = vmatprep.mubr.bf16.mxu0 %v10281_v11  ;;  %8794 = vmatprep.mubr.bf16.mxu1 %v10259_v56  ;;  %v10267_v11 = vcombine.high %v6242_v35, %v6246_v46  ;;  %v8279_v56 = vpop.f32.mrf.mxu1 }
 0x9b3   : > { %20403 = vst [vmem:[#allocation183_spill] sm:$0xff] %v17538_v5  ;;  %v10297_v56 = vcombine.high %v6273_v25, %v6277_v62  ;;  %v6486_v5 = vld [vmem:[%s18429_s12 + $0x178] sm:$0xff] }
 0x9b4   : > { %v8282_v43 = vpop.f32.mrf.mxu1 }
 0x9b5   : > { %v17544_v51 = vadd.f32 %v8282_v43, %v7994_v61  ;;  %v10275_v61 = vcombine.high %v6250_v8, %v6254_v18 }
 0x9b6   : > { %v8284_v63 = vpop.f32.mrf.mxu1 }
 0x9b7   : > { %20405 = vst [vmem:[#allocation184_spill] sm:$0xff] %v17544_v51  ;;  %v20408_v63 = vld [vmem:[#allocation81_spill] sm:$0xff] }
 0x9b9   : > { %8530 = vmatmul.mubr.bf16.gmra.mxu0 %v10280_v53  ;;  %8795 = vmatmul.mubr.bf16.gmra.mxu1 %v10258_v57  ;;  %v20406_v53 = vld [vmem:[#allocation24_spill] sm:$0xff] }
 0x9ba   : > { %8537 = vmatprep.mubr.bf16.mxu0 %v10289_v3  ;;  %8802 = vmatprep.mubr.bf16.mxu1 %v10267_v11  ;;  %v7997_v2 = vadd.f32 %v20406_v53, %v6484_v32  ;;  %v6485_v57 = vld [vmem:[%s18429_s12 + $0x170] sm:$0xff]  ;;  %v8285_v3 = vpop.f32.mrf.mxu1  ;;  %v10266_v11 = vcombine.low %v6242_v35, %v6246_v46  ;;  %v6258_v53 = vld [vmem:[%s18428_s11 + $0x458] sm:$0xff] }
 0x9bb   : > { %v8002_v51 = vadd.f32 %v20408_v63, %v6485_v57  ;;  %v6285_v35 = vld [vmem:[%s18428_s11 + $0x530] sm:$0xff]  ;;  %v10296_v57 = vcombine.low %v6273_v25, %v6277_v62 }
 0x9bc   : > { %v17562_v47 = vadd.f32 %v8285_v3, %v7997_v2  ;;  %v8287_v43 = vpop.f32.mrf.mxu1  ;;  %v6262_v2 = vld [vmem:[%s18428_s11 + $0x478] sm:$0xff]  ;;  %v6487_v3 = vld [vmem:[%s18429_s12 + $0x180] sm:$0xff]  ;;  %v6289_v62 = vld [vmem:[%s18428_s11 + $0x550] sm:$0xff] }
 0x9bd   : > { %v10283_v63 = vcombine.high %v6258_v53, %v6262_v2 }
 0x9be   : > { %20407 = vst [vmem:[#allocation228_spill] sm:$0xff] %v17562_v47  ;;  %v8290_v32 = vpop.f32.mrf.mxu1  ;;  %v6488_v47 = vld [vmem:[%s18429_s12 + $0x188] sm:$0xff] }
 0x9bf   : > { %v17568_v36 = vadd.f32 %v8290_v32, %v8002_v51  ;;  %v20410_v51 = vld [vmem:[#allocation73_spill] sm:$0xff] }
 0x9c0   : > { %v8292_v46 = vpop.f32.mrf.mxu1 }
 0x9c1   : > { %8538 = vmatmul.mubr.bf16.gmra.mxu0 %v10288_v33  ;;  %8803 = vmatmul.mubr.bf16.gmra.mxu1 %v10266_v11  ;;  %20409 = vst [vmem:[#allocation186_spill] sm:$0xff] %v17568_v36  ;;  %v8005_v33 = vadd.f32 %v20410_v51, %v6486_v5  ;;  %v20412_v46 = vld [vmem:[#allocation77_spill] sm:$0xff] }
 0x9c2   : > { %8545 = vmatprep.mubr.bf16.mxu0 %v10297_v56  ;;  %8810 = vmatprep.mubr.bf16.mxu1 %v10275_v61  ;;  %v8293_v11 = vpop.f32.mrf.mxu1  ;;  %v10274_v56 = vcombine.low %v6250_v8, %v6254_v18  ;;  %v10305_v61 = vcombine.high %v6281_v1, %v6285_v35  ;;  %v8010_v36 = vadd.f32 %v20412_v46, %v6487_v3  ;;  %v6293_v8 = vld [vmem:[%s18428_s11 + $0x570] sm:$0xff]  ;;  %v6266_v51 = vld [vmem:[%s18428_s11 + $0x498] sm:$0xff] }
 0x9c3   : > { %v17586_v43 = vadd.f32 %v8293_v11, %v8005_v33  ;;  %v6270_v33 = vld [vmem:[%s18428_s11 + $0x4b8] sm:$0xff]  ;;  %v10304_v3 = vcombine.low %v6281_v1, %v6285_v35  ;;  %v6489_v11 = vld [vmem:[%s18429_s12 + $0x190] sm:$0xff] }
 0x9c4   : > { %v8295_v32 = vpop.f32.mrf.mxu1  ;;  %v10291_v46 = vcombine.high %v6266_v51, %v6270_v33  ;;  %v6297_v35 = vld [vmem:[%s18428_s11 + $0x590] sm:$0xff] }
 0x9c5   : > { %20411 = vst [vmem:[#allocation188_spill] sm:$0xff] %v17586_v43  ;;  %v6490_v43 = vld [vmem:[%s18429_s12 + $0x198] sm:$0xff] }
 0x9c6   : > { %v8298_v5 = vpop.f32.mrf.mxu1 }
 0x9c7   : > { %v17592_v25 = vadd.f32 %v8298_v5, %v8010_v36  ;;  %v20414_v36 = vld [vmem:[#allocation74_spill] sm:$0xff] }
 0x9c8   : > { %v8300_v18 = vpop.f32.mrf.mxu1 }
 0x9c9   : > { %8546 = vmatmul.mubr.bf16.gmra.mxu0 %v10296_v57  ;;  %8811 = vmatmul.mubr.bf16.gmra.mxu1 %v10274_v56  ;;  %20413 = vst [vmem:[#allocation230_spill] sm:$0xff] %v17592_v25  ;;  %v8013_v57 = vadd.f32 %v20414_v36, %v6488_v47  ;;  %v20416_v18 = vld [vmem:[#allocation70_spill] sm:$0xff] }
 0x9ca   : > { %8553 = vmatprep.mubr.bf16.mxu0 %v10305_v61  ;;  %8818 = vmatprep.mubr.bf16.mxu1 %v10283_v63  ;;  %v8301_v56 = vpop.f32.mrf.mxu1  ;;  %v10282_v61 = vcombine.low %v6258_v53, %v6262_v2  ;;  %v10313_v63 = vcombine.high %v6289_v62, %v6293_v8  ;;  %v8018_v25 = vadd.f32 %v20416_v18, %v6489_v11  ;;  %v6301_v53 = vld [vmem:[%s18428_s11 + $0x5b0] sm:$0xff]  ;;  %v6274_v36 = vld [vmem:[%s18428_s11 + $0x4d8] sm:$0xff] }
 0x9cb   : > { %v17610_v32 = vadd.f32 %v8301_v56, %v8013_v57  ;;  %v6278_v57 = vld [vmem:[%s18428_s11 + $0x4f8] sm:$0xff]  ;;  %v10312_v11 = vcombine.low %v6289_v62, %v6293_v8  ;;  %v6491_v56 = vld [vmem:[%s18429_s12 + $0x1a0] sm:$0xff]  ;;  %v6305_v8 = vld [vmem:[%s18428_s11 + $0x5d0] sm:$0xff] }
 0x9cc   : > { %v8303_v5 = vpop.f32.mrf.mxu1  ;;  %v10299_v18 = vcombine.high %v6274_v36, %v6278_v57 }
 0x9cd   : > { %20415 = vst [vmem:[#allocation232_spill] sm:$0xff] %v17610_v32  ;;  %v6492_v32 = vld [vmem:[%s18429_s12 + $0x1a8] sm:$0xff] }
 0x9cf   : > { %v8306_v47 = vpop.f32.mrf.mxu1 }
 0x9d0   : > { %v17616_v1 = vadd.f32 %v8306_v47, %v8018_v25  ;;  %v20418_v25 = vld [vmem:[#allocation68_spill] sm:$0xff] }
 0x9d1   : > { %8554 = vmatmul.mubr.bf16.gmra.mxu0 %v10304_v3  ;;  %8819 = vmatmul.mubr.bf16.gmra.mxu1 %v10282_v61  ;;  %v8308_v2 = vpop.f32.mrf.mxu1  ;;  %v8021_v3 = vadd.f32 %v20418_v25, %v6490_v43  ;;  %v6282_v25 = vld [vmem:[%s18428_s11 + $0x518] sm:$0xff] }
 0x9d2   : > { %8561 = vmatprep.mubr.bf16.mxu0 %v10313_v63  ;;  %20417 = vst [vmem:[#allocation193_spill] sm:$0xff] %v17616_v1  ;;  %8826 = vmatprep.mubr.bf16.mxu1 %v10291_v46  ;;  %v10290_v63 = vcombine.low %v6266_v51, %v6270_v33  ;;  %v10321_v46 = vcombine.high %v6297_v35, %v6301_v53  ;;  %v20420_v2 = vld [vmem:[#allocation57_spill] sm:$0xff] }
 0x9d3   : > { %v8309_v61 = vpop.f32.mrf.mxu1  ;;  %v8026_v1 = vadd.f32 %v20420_v2, %v6491_v56  ;;  %v6309_v51 = vld [vmem:[%s18428_s11 + $0x5f0] sm:$0xff]  ;;  %v10320_v56 = vcombine.low %v6297_v35, %v6301_v53 }
 0x9d4   : > { %v17634_v5 = vadd.f32 %v8309_v61, %v8021_v3  ;;  %v6286_v3 = vld [vmem:[%s18428_s11 + $0x538] sm:$0xff]  ;;  %v6493_v61 = vld [vmem:[%s18429_s12 + $0x1b0] sm:$0xff] }
 0x9d5   : > { %v8311_v47 = vpop.f32.mrf.mxu1  ;;  %v10307_v2 = vcombine.high %v6282_v25, %v6286_v3  ;;  %v6313_v53 = vld [vmem:[%s18428_s11 + $0x610] sm:$0xff] }
 0x9d6   : > { %20419 = vst [vmem:[#allocation87_spill] sm:$0xff] %v17634_v5  ;;  %v6494_v5 = vld [vmem:[%s18429_s12 + $0x1b8] sm:$0xff] }
 0x9d7   : > { %v8314_v43 = vpop.f32.mrf.mxu1 }
 0x9d8   : > { %v17640_v62 = vadd.f32 %v8314_v43, %v8026_v1  ;;  %v20422_v1 = vld [vmem:[#allocation54_spill] sm:$0xff] }
 0x9d9   : > { %8562 = vmatmul.mubr.bf16.gmra.mxu0 %v10312_v11  ;;  %8827 = vmatmul.mubr.bf16.gmra.mxu1 %v10290_v63  ;;  %v8316_v33 = vpop.f32.mrf.mxu1  ;;  %v8029_v11 = vadd.f32 %v20422_v1, %v6492_v32  ;;  %v6290_v1 = vld [vmem:[%s18428_s11 + $0x558] sm:$0xff] }
 0x9da   : > { %8569 = vmatprep.mubr.bf16.mxu0 %v10321_v46  ;;  %20421 = vst [vmem:[#allocation234_spill] sm:$0xff] %v17640_v62  ;;  %8834 = vmatprep.mubr.bf16.mxu1 %v10299_v18  ;;  %v10298_v46 = vcombine.low %v6274_v36, %v6278_v57  ;;  %v10329_v18 = vcombine.high %v6305_v8, %v6309_v51  ;;  %v20424_v33 = vld [vmem:[#allocation51_spill] sm:$0xff]  ;;  %v6317_v36 = vld [vmem:[%s18428_s11 + $0x630] sm:$0xff] }
 0x9db   : > { %v8317_v63 = vpop.f32.mrf.mxu1  ;;  %v8034_v62 = vadd.f32 %v20424_v33, %v6493_v61  ;;  %v10328_v61 = vcombine.low %v6305_v8, %v6309_v51  ;;  %v6321_v51 = vld [vmem:[%s18428_s11 + $0x650] sm:$0xff] }
 0x9dc   : > { %v17658_v47 = vadd.f32 %v8317_v63, %v8029_v11  ;;  %v6294_v11 = vld [vmem:[%s18428_s11 + $0x578] sm:$0xff]  ;;  %v6495_v63 = vld [vmem:[%s18429_s12 + $0x1c0] sm:$0xff] }
 0x9dd   : > { %v8319_v43 = vpop.f32.mrf.mxu1  ;;  %v10315_v33 = vcombine.high %v6290_v1, %v6294_v11 }
 0x9de   : > { %20423 = vst [vmem:[#allocation237_spill] sm:$0xff] %v17658_v47  ;;  %v6496_v47 = vld [vmem:[%s18429_s12 + $0x1c8] sm:$0xff] }
 0x9e0   : > { %v8322_v32 = vpop.f32.mrf.mxu1 }
 0x9e1   : > { %8570 = vmatmul.mubr.bf16.gmra.mxu0 %v10320_v56  ;;  %8835 = vmatmul.mubr.bf16.gmra.mxu1 %v10298_v46  ;;  %v17664_v35 = vadd.f32 %v8322_v32, %v8034_v62  ;;  %v20426_v62 = vld [vmem:[#allocation56_spill] sm:$0xff] }
 0x9e2   : > { %8577 = vmatprep.mubr.bf16.mxu0 %v10329_v18  ;;  %8842 = vmatprep.mubr.bf16.mxu1 %v10307_v2  ;;  %v8324_v57 = vpop.f32.mrf.mxu1  ;;  %v8037_v56 = vadd.f32 %v20426_v62, %v6494_v5  ;;  %v10306_v18 = vcombine.low %v6282_v25, %v6286_v3  ;;  %v10337_v2 = vcombine.high %v6313_v53, %v6317_v36  ;;  %v6325_v25 = vld [vmem:[%s18428_s11 + $0x670] sm:$0xff]  ;;  %v6298_v62 = vld [vmem:[%s18428_s11 + $0x598] sm:$0xff] }
 0x9e3   : > { %20425 = vst [vmem:[#allocation196_spill] sm:$0xff] %v17664_v35  ;;  %v20428_v57 = vld [vmem:[#allocation147_spill] sm:$0xff] }
 0x9e4   : > { %v8325_v46 = vpop.f32.mrf.mxu1  ;;  %v8042_v35 = vadd.f32 %v20428_v57, %v6495_v63  ;;  %v10336_v63 = vcombine.low %v6313_v53, %v6317_v36 }
 0x9e5   : > { %v17682_v43 = vadd.f32 %v8325_v46, %v8037_v56  ;;  %v6302_v56 = vld [vmem:[%s18428_s11 + $0x5b8] sm:$0xff]  ;;  %v6497_v46 = vld [vmem:[%s18429_s12 + $0x1d0] sm:$0xff] }
 0x9e6   : > { %v8327_v32 = vpop.f32.mrf.mxu1  ;;  %v10323_v57 = vcombine.high %v6298_v62, %v6302_v56 }
 0x9e7   : > { %20427 = vst [vmem:[#allocation197_spill] sm:$0xff] %v17682_v43 }
 0x9e9   : > { %8578 = vmatmul.mubr.bf16.gmra.mxu0 %v10328_v61  ;;  %v8330_v5 = vpop.f32.mrf.mxu1  ;;  %8843 = vmatmul.mubr.bf16.gmra.mxu1 %v10306_v18 }
 0x9ea   : > { %8585 = vmatprep.mubr.bf16.mxu0 %v10337_v2  ;;  %v17688_v8 = vadd.f32 %v8330_v5, %v8042_v35  ;;  %8850 = vmatprep.mubr.bf16.mxu1 %v10315_v33  ;;  %v20430_v35 = vld [vmem:[#allocation149_spill] sm:$0xff]  ;;  %v10314_v2 = vcombine.low %v6290_v1, %v6294_v11  ;;  %v10345_v33 = vcombine.high %v6321_v51, %v6325_v25 }
 0x9eb   : > { %v8332_v3 = vpop.f32.mrf.mxu1  ;;  %v8045_v61 = vadd.f32 %v20430_v35, %v6496_v47  ;;  %v6498_v47 = vld [vmem:[%s18429_s12 + $0x1d8] sm:$0xff]  ;;  %v6329_v35 = vld [vmem:[%s18428_s11 + $0x690] sm:$0xff] }
 0x9ec   : > { %20429 = vst [vmem:[#allocation240_spill] sm:$0xff] %v17688_v8  ;;  %v20432_v3 = vld [vmem:[#allocation153_spill] sm:$0xff] }
 0x9ed   : > { %v8333_v18 = vpop.f32.mrf.mxu1  ;;  %v8050_v8 = vadd.f32 %v20432_v3, %v6497_v46  ;;  %v6306_v46 = vld [vmem:[%s18428_s11 + $0x5d8] sm:$0xff] }
 0x9ee   : > { %v17706_v32 = vadd.f32 %v8333_v18, %v8045_v61  ;;  %v6333_v61 = vld [vmem:[%s18428_s11 + $0x6b0] sm:$0xff] }
 0x9ef   : > { %v8335_v5 = vpop.f32.mrf.mxu1 }
 0x9f0   : > { %20431 = vst [vmem:[#allocation141_spill] sm:$0xff] %v17706_v32  ;;  %v10322_v5 = vcombine.low %v6298_v62, %v6302_v56 }
 0x9f1   : > { %v8395_v43 = vpop.f32.mrf.mxu0  ;;  %8586 = vmatmul.mubr.bf16.gmra.mxu0 %v10336_v63  ;;  %v8338_v53 = vpop.f32.mrf.mxu1  ;;  %8851 = vmatmul.mubr.bf16.gmra.mxu1 %v10314_v2  ;;  %v10344_v2 = vcombine.low %v6321_v51, %v6325_v25  ;;  %v6500_v51 = vld [vmem:[%s18429_s12 + $0x1e8] sm:$0xff] }
 0x9f2   : > { %v17713_v36 = vadd.f32 %v8395_v43, %v15973_v13  ;;  %8593 = vmatprep.mubr.bf16.mxu0 %v10345_v33  ;;  %v17715_v1 = vadd.f32 %v8338_v53, %v8050_v8  ;;  %8858 = vmatprep.mubr.bf16.mxu1 %v10323_v57  ;;  %v6310_v13 = vld [vmem:[%s18428_s11 + $0x5f8] sm:$0xff]  ;;  %v20434_v43 = vld [vmem:[#allocation167_spill] sm:$0xff]  ;;  %v10353_v53 = vcombine.high %v6329_v35, %v6333_v61 }
 0x9f3   : > { %v8397_v11 = vpop.f32.mrf.mxu0  ;;  %v8340_v63 = vpop.f32.mrf.mxu1  ;;  %v8053_v8 = vadd.f32 %v20434_v43, %v6498_v47  ;;  %v6499_v33 = vld [vmem:[%s18429_s12 + $0x1e0] sm:$0xff]  ;;  %v6314_v43 = vld [vmem:[%s18428_s11 + $0x618] sm:$0xff] }
 0x9f4   : > { %20433 = vst [vmem:[#allocation318_spill] sm:$0xff] %v17715_v1  ;;  %v10331_v63 = vcombine.high %v6306_v46, %v6310_v13  ;;  %v8058_v50 = vadd.f32 %v20436_v16, %v6499_v33  ;;  %v6337_v16 = vld [vmem:[%s18428_s11 + $0x6d0] sm:$0xff] }
 0x9f5   : > { %v8398_v18 = vpop.f32.mrf.mxu0  ;;  %v8341_v57 = vpop.f32.mrf.mxu1  ;;  %v6501_v33 = vld [vmem:[%s18429_s12 + $0x1f0] sm:$0xff] }
 0x9f6   : > { %v17734_v3 = vadd.f32 %v8398_v18, %v16015_v59  ;;  %v17736_v11 = vadd.f32 %v8341_v57, %v8053_v8 }
 0x9f7   : > { %v8400_v1 = vpop.f32.mrf.mxu0  ;;  %v8343_v32 = vpop.f32.mrf.mxu1 }
 0x9f8   : > { %20435 = vst [vmem:[#allocation177_spill] sm:$0xff] %v17736_v11  ;;  %v6341_v32 = vld [vmem:[%s18428_s11 + $0x6f0] sm:$0xff] }
 0x9f9   : > { %v8403_v47 = vpop.f32.mrf.mxu0  ;;  %8594 = vmatmul.mubr.bf16.gmra.mxu0 %v10344_v2  ;;  %v8346_v25 = vpop.f32.mrf.mxu1  ;;  %8859 = vmatmul.mubr.bf16.gmra.mxu1 %v10322_v5  ;;  %v10352_v2 = vcombine.low %v6329_v35, %v6333_v61  ;;  %v10330_v5 = vcombine.low %v6306_v46, %v6310_v13  ;;  %v6502_v35 = vld [vmem:[%s18429_s12 + $0x1f8] sm:$0xff] }
 0x9fa   : > { %v17743_v62 = vadd.f32 %v8403_v47, %v16064_v52  ;;  %8601 = vmatprep.mubr.bf16.mxu0 %v10353_v53  ;;  %v17745_v59 = vadd.f32 %v8346_v25, %v8058_v50  ;;  %8866 = vmatprep.mubr.bf16.mxu1 %v10331_v63  ;;  %v6318_v52 = vld [vmem:[%s18428_s11 + $0x638] sm:$0xff]  ;;  %v10361_v63 = vcombine.high %v6337_v16, %v6341_v32 }
 0x9fb   : > { %v8405_v56 = vpop.f32.mrf.mxu0  ;;  %v8348_v1 = vpop.f32.mrf.mxu1  ;;  %v20438_v50 = vld [vmem:[#allocation174_spill] sm:$0xff]  ;;  %v10339_v25 = vcombine.high %v6314_v43, %v6318_v52 }
 0x9fc   : > { %20437 = vst [vmem:[#allocation178_spill] sm:$0xff] %v17745_v59  ;;  %v8061_v8 = vadd.f32 %v20438_v50, %v6500_v51  ;;  %v20440_v59 = vld [vmem:[#allocation166_spill] sm:$0xff]  ;;  %v6349_v50 = vld [vmem:[%s18428_s11 + $0x730] sm:$0xff] }
 0x9fd   : > { %v8406_v18 = vpop.f32.mrf.mxu0  ;;  %v8349_v57 = vpop.f32.mrf.mxu1  ;;  %v8066_v11 = vadd.f32 %v20440_v59, %v6501_v33  ;;  %v6345_v59 = vld [vmem:[%s18428_s11 + $0x710] sm:$0xff] }
 0x9fe   : > { %v17764_v53 = vadd.f32 %v8406_v18, %v16105_v41  ;;  %v17766_v47 = vadd.f32 %v8349_v57, %v8061_v8  ;;  %v6322_v18 = vld [vmem:[%s18428_s11 + $0x658] sm:$0xff]  ;;  %v10360_v57 = vcombine.low %v6337_v16, %v6341_v32 }
 0x9ff   : > { %v8408_v56 = vpop.f32.mrf.mxu0  ;;  %v8351_v1 = vpop.f32.mrf.mxu1 }
 0xa00   : > { %20439 = vst [vmem:[#allocation244_spill] sm:$0xff] %v17766_v47  ;;  %v10369_v56 = vcombine.high %v6345_v59, %v6349_v50 }
 0xa01   : > { %v8411_v51 = vpop.f32.mrf.mxu0  ;;  %8602 = vmatmul.mubr.bf16.gmra.mxu0 %v10352_v2  ;;  %v8354_v61 = vpop.f32.mrf.mxu1  ;;  %8867 = vmatmul.mubr.bf16.gmra.mxu1 %v10330_v5 }
 0xa02   : > { %v17773_v46 = vadd.f32 %v8411_v51, %v16163_v58  ;;  %8609 = vmatprep.mubr.bf16.mxu0 %v10361_v63  ;;  %v17775_v41 = vadd.f32 %v8354_v61, %v8066_v11  ;;  %8874 = vmatprep.mubr.bf16.mxu1 %v10339_v25  ;;  %v6326_v58 = vld [vmem:[%s18428_s11 + $0x678] sm:$0xff]  ;;  %v20442_v11 = vld [vmem:[#allocation180_spill] sm:$0xff]  ;;  %v10338_v63 = vcombine.low %v6314_v43, %v6318_v52 }
 0xa03   : > { %v8413_v13 = vpop.f32.mrf.mxu0  ;;  %v8356_v8 = vpop.f32.mrf.mxu1  ;;  %v8069_v2 = vadd.f32 %v20442_v11, %v6502_v35  ;;  %v10347_v51 = vcombine.high %v6322_v18, %v6326_v58  ;;  %v6357_v43 = vld [vmem:[%s18428_s11 + $0x770] sm:$0xff]  ;;  %v6330_v35 = vld [vmem:[%s18428_s11 + $0x698] sm:$0xff] }
 0xa04   : > { %20441 = vst [vmem:[#allocation135_spill] sm:$0xff] %v17775_v41 }
 0xa05   : > { %v8414_v33 = vpop.f32.mrf.mxu0  ;;  %v8357_v5 = vpop.f32.mrf.mxu1 }
 0xa06   : > { %v17791_v25 = vadd.f32 %v8414_v33, %v16207_v40  ;;  %v17793_v1 = vadd.f32 %v8357_v5, %v8069_v2  ;;  %v6353_v40 = vld [vmem:[%s18428_s11 + $0x750] sm:$0xff]  ;;  %v10346_v2 = vcombine.low %v6322_v18, %v6326_v58 }
 0xa07   : > { %v8416_v61 = vpop.f32.mrf.mxu0  ;;  %v8359_v13 = vpop.f32.mrf.mxu1  ;;  %v6365_v18 = vld [vmem:[%s18428_s11 + $0x7b0] sm:$0xff] }
 0xa09   : > { %v8419_v8 = vpop.f32.mrf.mxu0  ;;  %8610 = vmatmul.mubr.bf16.gmra.mxu0 %v10360_v57  ;;  %v8684_v41 = vpop.f32.mrf.mxu1  ;;  %8875 = vmatmul.mubr.bf16.gmra.mxu1 %v10338_v63  ;;  %v10377_v57 = vcombine.high %v6353_v40, %v6357_v43 }
 0xa0a   : > { %v17796_v47 = vadd.f32 %v8419_v8, %v16261_v26  ;;  %8617 = vmatprep.mubr.bf16.mxu0 %v10369_v56  ;;  %v8685_v16 = vadd.f32 %v8684_v41, %v17713_v36  ;;  %8882 = vmatprep.mubr.bf16.mxu1 %v10347_v51  ;;  %v6334_v26 = vld [vmem:[%s18428_s11 + $0x6b8] sm:$0xff]  ;;  %v10368_v41 = vcombine.low %v6345_v59, %v6349_v50 }
 0xa0b   : > { %v8421_v32 = vpop.f32.mrf.mxu0  ;;  %v8686_v52 = vpop.f32.mrf.mxu1  ;;  %v10355_v63 = vcombine.high %v6330_v35, %v6334_v26 }
 0xa0c   : > { %v8939_v61 = vmax.f32 %v8685_v16, 0.0  ;;  %v6342_v16 = vld [vmem:[%s18428_s11 + $0x6f8] sm:$0xff] }
 0xa0d   : > { %v8422_v36 = vpop.f32.mrf.mxu0  ;;  %v8687_v11 = vpop.f32.mrf.mxu1 }
 0xa0e   : > { %v17812_v33 = vadd.f32 %v8422_v36, %v16308_v12  ;;  %v8688_v5 = vadd.f32 %v8687_v11, %v17734_v3  ;;  %v6361_v3 = vld [vmem:[%s18428_s11 + $0x790] sm:$0xff]  ;;  %v10376_v36 = vcombine.low %v6353_v40, %v6357_v43  ;;  %v10354_v11 = vcombine.low %v6330_v35, %v6334_v26 }
 0xa0f   : > { %v8424_v56 = vpop.f32.mrf.mxu0  ;;  %v8689_v51 = vpop.f32.mrf.mxu1  ;;  %v6373_v35 = vld [vmem:[%s18428_s11 + $0x7f0] sm:$0xff] }
 0xa10   : > { %v8940_v13 = vmax.f32 %v8688_v5, 0.0 }
 0xa11   : > { %v8427_v8 = vpop.f32.mrf.mxu0  ;;  %8618 = vmatmul.mubr.bf16.gmra.mxu0 %v10368_v41  ;;  %v8692_v32 = vpop.f32.mrf.mxu1  ;;  %8883 = vmatmul.mubr.bf16.gmra.mxu1 %v10346_v2 }
 0xa12   : > { %v17816_v52 = vadd.f32 %v8427_v8, %v16365_v45  ;;  %8625 = vmatprep.mubr.bf16.mxu0 %v10377_v57  ;;  %v17818_v59 = vpack.c.bf16 %v8940_v13, %v8939_v61  ;;  %v8693_v12 = vadd.f32 %v8692_v32, %v17743_v62  ;;  %8890 = vmatprep.mubr.bf16.mxu1 %v10355_v63  ;;  %v6338_v45 = vld [vmem:[%s18428_s11 + $0x6d8] sm:$0xff] }
 0xa13   : > { %v8429_v50 = vpop.f32.mrf.mxu0  ;;  %v8694_v58 = vpop.f32.mrf.mxu1  ;;  %v10385_v57 = vcombine.high %v6361_v3, %v6365_v18  ;;  %v10363_v63 = vcombine.high %v6338_v45, %v6342_v16 }
 0xa14   : > { %v8941_v61 = vmax.f32 %v8693_v12, 0.0  ;;  %v6350_v12 = vld [vmem:[%s18428_s11 + $0x738] sm:$0xff]  ;;  %v10384_v58 = vcombine.low %v6361_v3, %v6365_v18 }
 0xa15   : > { %v8430_v62 = vpop.f32.mrf.mxu0  ;;  %v8695_v41 = vpop.f32.mrf.mxu1 }
 0xa16   : > { %v17834_v2 = vadd.f32 %v8430_v62, %v16397_v21  ;;  %v8696_v5 = vadd.f32 %v8695_v41, %v17764_v53  ;;  %v6369_v53 = vld [vmem:[%s18428_s11 + $0x7d0] sm:$0xff] }
 0xa17   : > { %v8432_v56 = vpop.f32.mrf.mxu0  ;;  %v8697_v51 = vpop.f32.mrf.mxu1 }
 0xa18   : > { %v8942_v13 = vmax.f32 %v8696_v5, 0.0 }
 0xa19   : > { %v8435_v8 = vpop.f32.mrf.mxu0  ;;  %8626 = vmatmul.mubr.bf16.gmra.mxu0 %v10376_v36  ;;  %v8700_v32 = vpop.f32.mrf.mxu1  ;;  %8891 = vmatmul.mubr.bf16.gmra.mxu1 %v10354_v11  ;;  %v10362_v36 = vcombine.low %v6338_v45, %v6342_v16  ;;  %v10393_v11 = vcombine.high %v6369_v53, %v6373_v35  ;;  %v6354_v45 = vld [vmem:[%s18428_s11 + $0x758] sm:$0xff] }
 0xa1a   : > { %v17838_v50 = vadd.f32 %v8435_v8, %v16441_v28  ;;  %8633 = vmatprep.mubr.bf16.mxu0 %v10385_v57  ;;  %v17840_v40 = vpack.c.bf16 %v8942_v13, %v8941_v61  ;;  %v8701_v21 = vadd.f32 %v8700_v32, %v17773_v46  ;;  %8898 = vmatprep.mubr.bf16.mxu1 %v10363_v63  ;;  %v6346_v28 = vld [vmem:[%s18428_s11 + $0x718] sm:$0xff] }
 0xa1b   : > { %v8437_v43 = vpop.f32.mrf.mxu0  ;;  %v8702_v26 = vpop.f32.mrf.mxu1  ;;  %v10371_v5 = vcombine.high %v6346_v28, %v6350_v12  ;;  %v6358_v16 = vld [vmem:[%s18428_s11 + $0x778] sm:$0xff] }
 0xa1c   : > { %v8943_v51 = vmax.f32 %v8701_v21, 0.0  ;;  %v10392_v43 = vcombine.low %v6369_v53, %v6373_v35  ;;  %v10370_v26 = vcombine.low %v6346_v28, %v6350_v12  ;;  %v6366_v28 = vld [vmem:[%s18428_s11 + $0x7b8] sm:$0xff] }
 0xa1d   : > { %v8438_v46 = vpop.f32.mrf.mxu0  ;;  %v8703_v62 = vpop.f32.mrf.mxu1 }
 0xa1e   : > { %v17856_v41 = vadd.f32 %v8438_v46, %v16478_v48  ;;  %v8704_v57 = vadd.f32 %v8703_v62, %v17791_v25 }
 0xa1f   : > { %v8440_v63 = vpop.f32.mrf.mxu0  ;;  %v8705_v56 = vpop.f32.mrf.mxu1 }
 0xa20   : > { %v8944_v61 = vmax.f32 %v8704_v57, 0.0 }
 0xa21   : > { %v8443_v13 = vpop.f32.mrf.mxu0  ;;  %8634 = vmatmul.mubr.bf16.gmra.mxu0 %v10384_v58  ;;  %v8708_v8 = vpop.f32.mrf.mxu1  ;;  %8899 = vmatmul.mubr.bf16.gmra.mxu1 %v10362_v36  ;;  %v10379_v58 = vcombine.high %v6354_v45, %v6358_v16 }
 0xa22   : > { %v17860_v32 = vadd.f32 %v8443_v13, %v16523_v9  ;;  %8641 = vmatprep.mubr.bf16.mxu0 %v10393_v11  ;;  %v17862_v3 = vpack.c.bf16 %v8944_v61, %v8943_v51  ;;  %v8709_v48 = vadd.f32 %v8708_v8, %v17796_v47  ;;  %8906 = vmatprep.mubr.bf16.mxu1 %v10371_v5 }
 0xa23   : > { %v8445_v18 = vpop.f32.mrf.mxu0  ;;  %v8710_v25 = vpop.f32.mrf.mxu1  ;;  %v10378_v13 = vcombine.low %v6354_v45, %v6358_v16 }
 0xa24   : > { %v8945_v11 = vmax.f32 %v8709_v48, 0.0 }
 0xa25   : > { %v8446_v21 = vpop.f32.mrf.mxu0  ;;  %v8711_v9 = vpop.f32.mrf.mxu1 }
 0xa26   : > { %v17872_v46 = vadd.f32 %v8446_v21, %v16561_v54  ;;  %v8712_v47 = vadd.f32 %v8711_v9, %v17812_v33  ;;  %v6362_v33 = vld [vmem:[%s18428_s11 + $0x798] sm:$0xff] }
 0xa27   : > { %v8448_v62 = vpop.f32.mrf.mxu0  ;;  %v8713_v36 = vpop.f32.mrf.mxu1  ;;  %v10387_v48 = vcombine.high %v6362_v33, %v6366_v28 }
 0xa28   : > { %v8946_v57 = vmax.f32 %v8712_v47, 0.0 }
 0xa29   : > { %v8451_v5 = vpop.f32.mrf.mxu0  ;;  %8642 = vmatmul.mubr.bf16.gmra.mxu0 %v10392_v43  ;;  %v8716_v63 = vpop.f32.mrf.mxu1  ;;  %8907 = vmatmul.mubr.bf16.gmra.mxu1 %v10370_v26 }
 0xa2a   : > { %v8452_v56 = vadd.f32 %v8451_v5, %v16604_v29  ;;  %v17876_v51 = vpack.c.bf16 %v8946_v57, %v8945_v11  ;;  %v8717_v53 = vadd.f32 %v8716_v63, %v17816_v52  ;;  %8914 = vmatprep.mubr.bf16.mxu1 %v10379_v58  ;;  %v10386_v11 = vcombine.low %v6362_v33, %v6366_v28 }
 0xa2b   : > { %v8453_v54 = vpop.f32.mrf.mxu0  ;;  %v8718_v35 = vpop.f32.mrf.mxu1 }
 0xa2c   : > { %v8947_v25 = vmax.f32 %v8717_v53, 0.0 }
 0xa2d   : > { %v8454_v12 = vpop.f32.mrf.mxu0  ;;  %v8719_v61 = vpop.f32.mrf.mxu1 }
 0xa2e   : > { %v8455_v29 = vadd.f32 %v8454_v12, %v16634_v49  ;;  %v8720_v8 = vadd.f32 %v8719_v61, %v17834_v2  ;;  %v6370_v49 = vld [vmem:[%s18428_s11 + $0x7d8] sm:$0xff] }
 0xa2f   : > { %v8456_v52 = vpop.f32.mrf.mxu0  ;;  %v8721_v18 = vpop.f32.mrf.mxu1  ;;  %v6374_v2 = vld [vmem:[%s18428_s11 + $0x7f8] sm:$0xff] }
 0xa30   : > { %v8948_v21 = vmax.f32 %v8720_v8, 0.0  ;;  %v10395_v5 = vcombine.high %v6370_v49, %v6374_v2 }
 0xa31   : > { %v8459_v43 = vpop.f32.mrf.mxu0  ;;  %v8724_v9 = vpop.f32.mrf.mxu1  ;;  %8915 = vmatmul.mubr.bf16.gmra.mxu1 %v10378_v13 }
 0xa32   : > { %v8460_v26 = vadd.f32 %v8459_v43, %v17256_v55  ;;  %v17888_v47 = vpack.c.bf16 %v8948_v21, %v8947_v25  ;;  %v8725_v58 = vadd.f32 %v8724_v9, %v17838_v50  ;;  %8922 = vmatprep.mubr.bf16.mxu1 %v10387_v48 }
 0xa33   : > { %v8461_v45 = vpop.f32.mrf.mxu0  ;;  %v8726_v16 = vpop.f32.mrf.mxu1 }
 0xa34   : > { %v8949_v53 = vmax.f32 %v8725_v58, 0.0 }
 0xa35   : > { %v8462_v62 = vpop.f32.mrf.mxu0  ;;  %v8727_v36 = vpop.f32.mrf.mxu1 }
 0xa36   : > { %v8463_v55 = vadd.f32 %v8462_v62, %v17274_v22  ;;  %v8728_v57 = vadd.f32 %v8727_v36, %v17856_v41  ;;  %v10394_v41 = vcombine.low %v6370_v49, %v6374_v2 }
 0xa37   : > { %v8464_v50 = vpop.f32.mrf.mxu0  ;;  %v8729_v63 = vpop.f32.mrf.mxu1 }
 0xa38   : > { %v8950_v54 = vmax.f32 %v8728_v57, 0.0 }
 0xa39   : > { %v8467_v35 = vpop.f32.mrf.mxu0  ;;  %v8732_v12 = vpop.f32.mrf.mxu1  ;;  %8923 = vmatmul.mubr.bf16.gmra.mxu1 %v10386_v11 }
 0xa3a   : > { %v8468_v61 = vadd.f32 %v8467_v35, %v17280_v10  ;;  %v17900_v13 = vpack.c.bf16 %v8950_v54, %v8949_v53  ;;  %v8733_v8 = vadd.f32 %v8732_v12, %v17860_v32  ;;  %8930 = vmatprep.mubr.bf16.mxu1 %v10395_v5 }
 0xa3b   : > { %v8469_v33 = vpop.f32.mrf.mxu0  ;;  %v8734_v28 = vpop.f32.mrf.mxu1 }
 0xa3c   : > { %v8951_v43 = vmax.f32 %v8733_v8, 0.0 }
 0xa3d   : > { %v8470_v22 = vpop.f32.mrf.mxu0  ;;  %v8735_v48 = vpop.f32.mrf.mxu1 }
 0xa3e   : > { %v8471_v52 = vadd.f32 %v8470_v22, %v17298_v30  ;;  %v8736_v18 = vadd.f32 %v8735_v48, %v17872_v46 }
 0xa3f   : > { %v8472_v25 = vpop.f32.mrf.mxu0  ;;  %v8737_v21 = vpop.f32.mrf.mxu1 }
 0xa40   : > { %v8952_v9 = vmax.f32 %v8736_v18, 0.0 }
 0xa41   : > { %v8475_v58 = vpop.f32.mrf.mxu0  ;;  %v8740_v10 = vpop.f32.mrf.mxu1  ;;  %8931 = vmatmul.mubr.bf16.gmra.mxu1 %v10394_v41 }
 0xa42   : > { %v8476_v45 = vadd.f32 %v8475_v58, %v17304_v60  ;;  %v17906_v32 = vpack.c.bf16 %v8952_v9, %v8951_v43  ;;  %v8741_v16 = vadd.f32 %v8740_v10, %v8452_v56 }
 0xa43   : > { %v8477_v62 = vpop.f32.mrf.mxu0  ;;  %v8742_v36 = vpop.f32.mrf.mxu1 }
 0xa44   : > { %v8953_v5 = vmax.f32 %v8741_v16, 0.0 }
 0xa45   : > { %v8478_v11 = vpop.f32.mrf.mxu0  ;;  %v8743_v49 = vpop.f32.mrf.mxu1 }
 0xa46   : > { %v8479_v30 = vadd.f32 %v8478_v11, %v17322_v27  ;;  %v8744_v2 = vadd.f32 %v8743_v49, %v8455_v29 }
 0xa47   : > { %v8480_v46 = vpop.f32.mrf.mxu0  ;;  %v8745_v57 = vpop.f32.mrf.mxu1 }
 0xa48   : > { %v8954_v50 = vmax.f32 %v8744_v2, 0.0 }
 0xa49   : > { %v8483_v63 = vpop.f32.mrf.mxu0  ;;  %v8748_v53 = vpop.f32.mrf.mxu1 }
 0xa4a   : > { %v8484_v54 = vadd.f32 %v8483_v63, %v17328_v38  ;;  %v17910_v35 = vpack.c.bf16 %v8954_v50, %v8953_v5  ;;  %v8749_v60 = vadd.f32 %v8748_v53, %v8460_v26 }
 0xa4b   : > { %v8485_v12 = vpop.f32.mrf.mxu0  ;;  %v8750_v56 = vpop.f32.mrf.mxu1 }
 0xa4c   : > { %v8955_v48 = vmax.f32 %v8749_v60, 0.0 }
 0xa4d   : > { %v8486_v8 = vpop.f32.mrf.mxu0  ;;  %v8751_v33 = vpop.f32.mrf.mxu1 }
 0xa4e   : > { %v8487_v28 = vadd.f32 %v8486_v8, %v17346_v31  ;;  %v8752_v22 = vadd.f32 %v8751_v33, %v8463_v55 }
 0xa4f   : > { %v8488_v27 = vpop.f32.mrf.mxu0  ;;  %v8753_v29 = vpop.f32.mrf.mxu1 }
 0xa50   : > { %v8956_v41 = vmax.f32 %v8752_v22, 0.0 }
 0xa51   : > { %v8491_v18 = vpop.f32.mrf.mxu0  ;;  %v8756_v25 = vpop.f32.mrf.mxu1 }
 0xa52   : > { %v17913_v21 = vpack.c.bf16 %v8956_v41, %v8955_v48  ;;  %v8757_v43 = vadd.f32 %v8756_v25, %v8468_v61 }
 0xa53   : > { %v8493_v38 = vpop.f32.mrf.mxu0  ;;  %v8758_v9 = vpop.f32.mrf.mxu1 }
 0xa54   : > { %v8957_v36 = vmax.f32 %v8757_v43, 0.0 }
 0xa55   : > { %v8494_v58 = vpop.f32.mrf.mxu0  ;;  %v8759_v26 = vpop.f32.mrf.mxu1 }
 0xa56   : > { %v8760_v10 = vadd.f32 %v8759_v26, %v8471_v52  ;;  %v6471_v26 = vld [vmem:[%s18429_s12 + $0x100] sm:$0xff] }
 0xa57   : > { %v8496_v16 = vpop.f32.mrf.mxu0  ;;  %v8761_v62 = vpop.f32.mrf.mxu1 }
 0xa58   : > { %v8958_v11 = vmax.f32 %v8760_v10, 0.0  ;;  %v8492_v10 = vadd.f32 %v8491_v18, %v17352_v44 }
 0xa59   : > { %v8499_v31 = vpop.f32.mrf.mxu0  ;;  %v8764_v55 = vpop.f32.mrf.mxu1 }
 0xa5a   : > { %v17915_v49 = vpack.c.bf16 %v8958_v11, %v8957_v36  ;;  %v8765_v57 = vadd.f32 %v8764_v55, %v8476_v45  ;;  %v8495_v36 = vadd.f32 %v8494_v58, %v17370_v0  ;;  %v20443_v55 = vld [vmem:[#allocation231_spill] sm:$0xff] }
 0xa5b   : > { %v8501_v2 = vpop.f32.mrf.mxu0  ;;  %v8766_v46 = vpop.f32.mrf.mxu1 }
 0xa5c   : > { %v8959_v60 = vmax.f32 %v8765_v57, 0.0  ;;  %v7946_v2 = vadd.f32 %v20443_v55, %v6471_v26  ;;  %v6472_v57 = vld [vmem:[%s18429_s12 + $0x108] sm:$0xff] }
 0xa5d   : > { %v8502_v5 = vpop.f32.mrf.mxu0  ;;  %v8767_v50 = vpop.f32.mrf.mxu1 }
 0xa5e   : > { %v8768_v63 = vadd.f32 %v8767_v50, %v8479_v30  ;;  %v8235_v44 = vadd.f32 %v17437_v24, %v7946_v2 }
 0xa5f   : > { %v8504_v61 = vpop.f32.mrf.mxu0  ;;  %v8769_v53 = vpop.f32.mrf.mxu1 }
 0xa60   : > { %v8960_v12 = vmax.f32 %v8768_v63, 0.0 }
 0xa61   : > { %v8507_v56 = vpop.f32.mrf.mxu0  ;;  %v8772_v52 = vpop.f32.mrf.mxu1 }
 0xa62   : > { %v17917_v8 = vpack.c.bf16 %v8960_v12, %v8959_v60  ;;  %v8773_v27 = vadd.f32 %v8772_v52, %v8484_v54  ;;  %v20444_v12 = vld [vmem:[#allocation224_spill] sm:$0xff] }
 0xa63   : > { %v8509_v33 = vpop.f32.mrf.mxu0  ;;  %v8774_v22 = vpop.f32.mrf.mxu1  ;;  %v7949_v0 = vadd.f32 %v20444_v12, %v6472_v57  ;;  %v6475_v57 = vld [vmem:[%s18429_s12 + $0x120] sm:$0xff]  ;;  %v6470_v12 = vld [vmem:[%s18429_s12 + $0xf8] sm:$0xff] }
 0xa64   : > { %v8961_v45 = vmax.f32 %v8773_v27, 0.0  ;;  %v6473_v33 = vld [vmem:[%s18429_s12 + $0x110] sm:$0xff]  ;;  %v8500_v22 = vadd.f32 %v8499_v31, %v17376_v4 }
 0xa65   : > { %v8510_v29 = vpop.f32.mrf.mxu0  ;;  %v8775_v48 = vpop.f32.mrf.mxu1  ;;  %v8238_v24 = vadd.f32 %v17451_v20, %v7949_v0  ;;  %v20447_v0 = vld [vmem:[#allocation314_spill] sm:$0xff] }
 0xa66   : > { %v8776_v41 = vadd.f32 %v8775_v48, %v8487_v28 }
 0xa67   : > { %v8512_v25 = vpop.f32.mrf.mxu0  ;;  %v8777_v43 = vpop.f32.mrf.mxu1 }
 0xa68   : > { %v8962_v38 = vmax.f32 %v8776_v41, 0.0  ;;  %v8503_v25 = vadd.f32 %v8502_v5, %v17394_v37  ;;  %v20446_v37 = vld [vmem:[#allocation313_spill] sm:$0xff] }
 0xa69   : > { %v17919_v9 = vpop.f32.mrf.mxu0  ;;  %v8780_v30 = vpop.f32.mrf.mxu1 }
 0xa6a   : > { %v17925_v16 = vpack.c.bf16 %v8962_v38, %v8961_v45  ;;  %v8781_v28 = vadd.f32 %v8780_v30, %v8492_v10  ;;  %v20445_v38 = vld [vmem:[#allocation312_spill] sm:$0xff] }
 0xa6b   : > { %v8517_v62 = vpop.f32.mrf.mxu0  ;;  %v8782_v54 = vpop.f32.mrf.mxu1  ;;  %v7954_v30 = vadd.f32 %v20445_v38, %v6473_v33 }
 0xa6c   : > { %v8963_v61 = vmax.f32 %v8781_v28, 0.0  ;;  %v6474_v62 = vld [vmem:[%s18429_s12 + $0x118] sm:$0xff] }
 0xa6d   : > { %v17928_v11 = vpop.f32.mrf.mxu0  ;;  %v8783_v46 = vpop.f32.mrf.mxu1  ;;  %v8243_v54 = vadd.f32 %v17453_v23, %v7954_v30  ;;  %v7957_v5 = vadd.f32 %v20446_v37, %v6474_v62  ;;  %v6477_v62 = vld [vmem:[%s18429_s12 + $0x130] sm:$0xff] }
 0xa6e   : > { %v8784_v50 = vadd.f32 %v8783_v46, %v8495_v36 }
 0xa6f   : > { %v8520_v63 = vpop.f32.mrf.mxu0  ;;  %v8785_v18 = vpop.f32.mrf.mxu1  ;;  %v8246_v23 = vadd.f32 %v17467_v19, %v7957_v5  ;;  %v20450_v5 = vld [vmem:[#allocation319_spill] sm:$0xff] }
 0xa70   : > { %v8964_v53 = vmax.f32 %v8784_v50, 0.0  ;;  %v8508_v50 = vadd.f32 %v8507_v56, %v17400_v39  ;;  %v6476_v39 = vld [vmem:[%s18429_s12 + $0x128] sm:$0xff] }
 0xa71   : > { %v8523_v60 = vpop.f32.mrf.mxu0  ;;  %v8788_v58 = vpop.f32.mrf.mxu1 }
 0xa72   : > { %v17936_v52 = vadd.f32 %v8523_v60, %v8235_v44  ;;  %v17942_v27 = vpack.c.bf16 %v8964_v53, %v8963_v61  ;;  %v8789_v43 = vadd.f32 %v8788_v58, %v8500_v22  ;;  %v8511_v61 = vadd.f32 %v8510_v29, %v17418_v34  ;;  %v20448_v29 = vld [vmem:[#allocation304_spill] sm:$0xff] }
 0xa73   : > { %v8525_v48 = vpop.f32.mrf.mxu0  ;;  %v8790_v41 = vpop.f32.mrf.mxu1  ;;  %v7962_v58 = vadd.f32 %v20447_v0, %v6475_v57  ;;  %v6479_v0 = vld [vmem:[%s18429_s12 + $0x140] sm:$0xff] }
 0xa74   : > { %v8965_v20 = vmax.f32 %v8789_v43, 0.0 }
 0xa75   : > { %v8526_v45 = vpop.f32.mrf.mxu0  ;;  %v8791_v26 = vpop.f32.mrf.mxu1  ;;  %v8251_v48 = vadd.f32 %v17469_v42, %v7962_v58  ;;  %v8516_v42 = vadd.f32 %v17919_v9, %v17421_v17 }
 0xa76   : > { %v17947_v10 = vadd.f32 %v8526_v45, %v8238_v24  ;;  %v8792_v4 = vadd.f32 %v8791_v26, %v8503_v25  ;;  %v7941_v24 = vadd.f32 %v20448_v29, %v6470_v12  ;;  %v20449_v45 = vld [vmem:[#allocation315_spill] sm:$0xff] }
 0xa77   : > { %v8528_v31 = vpop.f32.mrf.mxu0  ;;  %v8793_v36 = vpop.f32.mrf.mxu1  ;;  %v7965_v38 = vadd.f32 %v20449_v45, %v6476_v39 }
 0xa78   : > { %v8966_v28 = vmax.f32 %v8792_v4, 0.0  ;;  %v8230_v4 = vadd.f32 %v17435_v7, %v7941_v24  ;;  %v6478_v7 = vld [vmem:[%s18429_s12 + $0x138] sm:$0xff] }
 0xa79   : > { %v8531_v55 = vpop.f32.mrf.mxu0  ;;  %v8796_v2 = vpop.f32.mrf.mxu1  ;;  %v8254_v36 = vadd.f32 %v17483_v14, %v7965_v38 }
 0xa7a   : > { %v17954_v46 = vadd.f32 %v8531_v55, %v8243_v54  ;;  %v17960_v63 = vpack.c.bf16 %v8966_v28, %v8965_v20  ;;  %v8797_v53 = vadd.f32 %v8796_v2, %v8508_v50  ;;  %v8519_v28 = vadd.f32 %v17928_v11, %v8230_v4  ;;  %v20451_v11 = vld [vmem:[#allocation320_spill] sm:$0xff]  ;;  %v20454_v4 = vld [vmem:[#allocation27_spill] sm:$0xff] }
 0xa7b   : > { %v8533_v44 = vpop.f32.mrf.mxu0  ;;  %v8798_v18 = vpop.f32.mrf.mxu1  ;;  %v7970_v2 = vadd.f32 %v20450_v5, %v6477_v62 }
 0xa7c   : > { %v8967_v41 = vmax.f32 %v8797_v53, 0.0  ;;  %v7973_v53 = vadd.f32 %v20451_v11, %v6478_v7 }
 0xa7d   : > { %v8534_v60 = vpop.f32.mrf.mxu0  ;;  %v8799_v33 = vpop.f32.mrf.mxu1  ;;  %v8259_v9 = vadd.f32 %v17485_v15, %v7970_v2  ;;  %v20456_v2 = vld [vmem:[#allocation32_spill] sm:$0xff] }
 0xa7e   : > { %v17968_v22 = vadd.f32 %v8534_v60, %v8246_v23  ;;  %v8800_v56 = vadd.f32 %v8799_v33, %v8511_v61 }
 0xa7f   : > { %v8536_v19 = vpop.f32.mrf.mxu0  ;;  %v8801_v34 = vpop.f32.mrf.mxu1 }
 0xa80   : > { %v8968_v25 = vmax.f32 %v8800_v56, 0.0  ;;  %v8262_v56 = vadd.f32 %v17499_v6, %v7973_v53 }
 0xa81   : > { %v8539_v43 = vpop.f32.mrf.mxu0  ;;  %v8804_v30 = vpop.f32.mrf.mxu1 }
 0xa82   : > { %v17976_v26 = vadd.f32 %v8539_v43, %v8251_v48  ;;  %v9081_v31 = vpack.c.bf16 %v8968_v25, %v8967_v41  ;;  %v8805_v55 = vadd.f32 %v8804_v30, %v8516_v42  ;;  %v20452_v48 = vld [vmem:[#allocation31_spill] sm:$0xff] }
 0xa83   : > { %v8541_v54 = vpop.f32.mrf.mxu0  ;;  %v8806_v20 = vpop.f32.mrf.mxu1  ;;  %v7978_v34 = vadd.f32 %v20452_v48, %v6479_v0  ;;  %v6480_v41 = vld [vmem:[%s18429_s12 + $0x148] sm:$0xff] }
 0xa84   : > { %v8969_v14 = vmax.f32 %v8805_v55, 0.0  ;;  %v20453_v43 = vld [vmem:[#allocation171_spill] sm:$0xff]  ;;  %v7981_v42 = vadd.f32 %v20454_v4, %v6480_v41 }
 0xa85   : > { %v8542_v37 = vpop.f32.mrf.mxu0  ;;  %v8807_v57 = vpop.f32.mrf.mxu1  ;;  %v8267_v6 = vadd.f32 %v20453_v43, %v7978_v34 }
 0xa86   : > { %v17987_v50 = vadd.f32 %v8542_v37, %v8254_v36  ;;  %v8808_v44 = vadd.f32 %v8807_v57, %v8519_v28  ;;  %v6481_v36 = vld [vmem:[%s18429_s12 + $0x150] sm:$0xff] }
 0xa87   : > { %v8544_v17 = vpop.f32.mrf.mxu0  ;;  %v8809_v23 = vpop.f32.mrf.mxu1  ;;  %v20455_v28 = vld [vmem:[#allocation172_spill] sm:$0xff]  ;;  %v7986_v57 = vadd.f32 %v20456_v2, %v6481_v36 }
 0xa88   : > { %v8970_v18 = vmax.f32 %v8808_v44, 0.0  ;;  %v8270_v55 = vadd.f32 %v20455_v28, %v7981_v42  ;;  %v10894_v42 = vld [vmem:[#allocation6] ss:$16 sps:$4 sm:$0xff]   ;;  %v10902_v28 = vld [vmem:[#allocation6 + $0x24] ss:$16 sps:$4 sm:$0xff]  }
 0xa89   : > { %v8547_v61 = vpop.f32.mrf.mxu0  ;;  %v8812_v60 = vpop.f32.mrf.mxu1 }
 0xa8a   : > { %v17994_v12 = vadd.f32 %v8547_v61, %v8259_v9  ;;  %v9082_v58 = vpack.c.bf16 %v8970_v18, %v8969_v14  ;;  %v8813_v33 = vadd.f32 %v8812_v60, %v17936_v52 }
 0xa8b   : > { %v8549_v39 = vpop.f32.mrf.mxu0  ;;  %v8814_v15 = vpop.f32.mrf.mxu1 }
 0xa8c   : > { %10468 = vmatprep.subr.bf16.mxu0 %v9082_v58  ;;  %v8971_v38 = vmax.f32 %v8813_v33, 0.0  ;;  %v20458_v58 = vld [vmem:[#allocation183_spill] sm:$0xff] }
 0xa8d   : > { %v8550_v19 = vpop.f32.mrf.mxu0  ;;  %v8815_v29 = vpop.f32.mrf.mxu1  ;;  %10469 = vmatpush3.bf16.msra.mxu0 %v17910_v35 }
 0xa8e   : > { %v18003_v24 = vadd.f32 %v8550_v19, %v8262_v56  ;;  %v8816_v25 = vadd.f32 %v8815_v29, %v17947_v10  ;;  %10470 = vmatprep.subr.bf16.mxu0 %v9081_v31 }
 0xa8f   : > { %v8552_v52 = vpop.f32.mrf.mxu0  ;;  %v8817_v45 = vpop.f32.mrf.mxu1 }
 0xa90   : > { %v8972_v30 = vmax.f32 %v8816_v25, 0.0  ;;  %v20460_v52 = vld [vmem:[#allocation228_spill] sm:$0xff] }
 0xa91   : > { %v8555_v62 = vpop.f32.mrf.mxu0  ;;  %v8820_v54 = vpop.f32.mrf.mxu1  ;;  %10471 = vmatpush3.bf16.msra.mxu0 %v17906_v32 }
 0xa92   : > { %v18012_v35 = vadd.f32 %v8555_v62, %v8267_v6  ;;  %v18017_v10 = vpack.c.bf16 %v8972_v30, %v8971_v38  ;;  %v8821_v31 = vadd.f32 %v8820_v54, %v17954_v46  ;;  %10472 = vmatprep.subr.bf16.mxu0 %v17960_v63  ;;  %v20457_v46 = vld [vmem:[#allocation226_spill] sm:$0xff] }
 0xa93   : > { %v8557_v20 = vpop.f32.mrf.mxu0  ;;  %v8822_v37 = vpop.f32.mrf.mxu1  ;;  %v8275_v9 = vadd.f32 %v20457_v46, %v7986_v57 }
 0xa94   : > { %v8973_v23 = vmax.f32 %v8821_v31, 0.0  ;;  %v10899_v31 = vld [vmem:[#allocation6 + $0xc] ss:$16 sps:$4 sm:$0xff]  }
 0xa95   : > { %v8558_v5 = vpop.f32.mrf.mxu0  ;;  %v8823_v32 = vpop.f32.mrf.mxu1  ;;  %10473 = vmatpush3.bf16.msra.mxu0 %v17900_v13  ;;  %9644 = vmatprep.mubr.bf16.mxu1 %v10899_v31  ;;  %v20462_v37 = vld [vmem:[#allocation188_spill] sm:$0xff] }
 0xa96   : > { %v18024_v7 = vadd.f32 %v8558_v5, %v8270_v55  ;;  %v8824_v44 = vadd.f32 %v8823_v32, %v17968_v22  ;;  %10474 = vmatprep.subr.bf16.mxu0 %v17942_v27 }
 0xa97   : > { %v8560_v17 = vpop.f32.mrf.mxu0  ;;  %v8825_v63 = vpop.f32.mrf.mxu1 }
 0xa98   : > { %v8974_v14 = vmax.f32 %v8824_v44, 0.0 }
 0xa99   : > { %v8563_v18 = vpop.f32.mrf.mxu0  ;;  %v8828_v61 = vpop.f32.mrf.mxu1  ;;  %10475 = vmatpush3.bf16.msra.mxu0 %v17888_v47 }
 0xa9a   : > { %v18030_v11 = vadd.f32 %v8563_v18, %v8275_v9  ;;  %v18032_v53 = vpack.c.bf16 %v8974_v14, %v8973_v23  ;;  %v8829_v13 = vadd.f32 %v8828_v61, %v17976_v26  ;;  %10476 = vmatprep.subr.bf16.mxu0 %v17925_v16  ;;  %v20459_v16 = vld [vmem:[#allocation184_spill] sm:$0xff]  ;;  %v20463_v9 = vld [vmem:[#allocation230_spill] sm:$0xff] }
 0xa9b   : > { %v8565_v22 = vpop.f32.mrf.mxu0  ;;  %v8830_v27 = vpop.f32.mrf.mxu1 }
 0xa9c   : > { %v8975_v15 = vmax.f32 %v8829_v13, 0.0  ;;  %v10908_v22 = vld [vmem:[#allocation6 + $0x44] ss:$16 sps:$4 sm:$0xff]   ;;  %v20464_v27 = vld [vmem:[#allocation232_spill] sm:$0xff] }
 0xa9d   : > { %v8566_v60 = vpop.f32.mrf.mxu0  ;;  %v8831_v0 = vpop.f32.mrf.mxu1  ;;  %10477 = vmatpush3.bf16.msra.mxu0 %v17876_v51 }
 0xa9e   : > { %v18038_v33 = vadd.f32 %v8566_v60, %v20458_v58  ;;  %v8832_v39 = vadd.f32 %v8831_v0, %v17987_v50  ;;  %10478 = vmatprep.subr.bf16.mxu0 %v17917_v8 }
 0xa9f   : > { %v8568_v47 = vpop.f32.mrf.mxu0  ;;  %v8833_v56 = vpop.f32.mrf.mxu1 }
 0xaa0   : > { %v8976_v19 = vmax.f32 %v8832_v39, 0.0 }
 0xaa1   : > { %v8571_v26 = vpop.f32.mrf.mxu0  ;;  %v8836_v48 = vpop.f32.mrf.mxu1  ;;  %10479 = vmatpush3.bf16.msra.mxu0 %v17862_v3 }
 0xaa2   : > { %v18044_v34 = vadd.f32 %v8571_v26, %v20459_v16  ;;  %v18046_v29 = vpack.c.bf16 %v8976_v19, %v8975_v15  ;;  %v8837_v51 = vadd.f32 %v8836_v48, %v17994_v12  ;;  %10480 = vmatprep.subr.bf16.mxu0 %v17915_v49  ;;  %v20461_v49 = vld [vmem:[#allocation186_spill] sm:$0xff]  ;;  %v20465_v48 = vld [vmem:[#allocation193_spill] sm:$0xff] }
 0xaa3   : > { %v8573_v50 = vpop.f32.mrf.mxu0  ;;  %v8838_v41 = vpop.f32.mrf.mxu1  ;;  %v10906_v19 = vld [vmem:[#allocation6 + $0x40] ss:$16 sps:$4 sm:$0xff]  }
 0xaa4   : > { %v8977_v38 = vmax.f32 %v8837_v51, 0.0 }
 0xaa5   : > { %v8574_v8 = vpop.f32.mrf.mxu0  ;;  %v8839_v25 = vpop.f32.mrf.mxu1  ;;  %10481 = vmatpush3.bf16.msra.mxu0 %v17840_v40  ;;  %v10896_v40 = vld [vmem:[#allocation6 + $0x4] ss:$16 sps:$4 sm:$0xff]  }
 0xaa6   : > { %v18052_v43 = vadd.f32 %v8574_v8, %v20460_v52  ;;  %v8840_v3 = vadd.f32 %v8839_v25, %v18003_v24  ;;  %10482 = vmatprep.subr.bf16.mxu0 %v17913_v21  ;;  %9483 = vmatprep.mubr.bf16.mxu0 %v10896_v40  ;;  %v10914_v25 = vld [vmem:[#allocation6 + $0x64] ss:$16 sps:$4 sm:$0xff]   ;;  %v20467_v40 = vld [vmem:[#allocation234_spill] sm:$0xff] }
 0xaa7   : > { %v8576_v6 = vpop.f32.mrf.mxu0  ;;  %v8841_v45 = vpop.f32.mrf.mxu1  ;;  %v20466_v52 = vld [vmem:[#allocation87_spill] sm:$0xff] }
 0xaa8   : > { %v8978_v30 = vmax.f32 %v8840_v3, 0.0 }
 0xaa9   : > { %v8579_v12 = vpop.f32.mrf.mxu0  ;;  %v8844_v62 = vpop.f32.mrf.mxu1  ;;  %10483 = vmatpush3.bf16.msra.mxu0 %v17818_v59 }
 0xaaa   : > { %v18058_v4 = vadd.f32 %v8579_v12, %v20461_v49  ;;  %v18060_v54 = vpack.c.bf16 %v8978_v30, %v8977_v38  ;;  %v8845_v36 = vadd.f32 %v8844_v62, %v18012_v35  ;;  %v10900_v35 = vld [vmem:[#allocation6 + $0x20] ss:$16 sps:$4 sm:$0xff]  }
 0xaab   : > { %v8581_v24 = vpop.f32.mrf.mxu0  ;;  %v8846_v21 = vpop.f32.mrf.mxu1  ;;  %v10912_v49 = vld [vmem:[#allocation6 + $0x60] ss:$16 sps:$4 sm:$0xff]  }
 0xaac   : > { %9484 = vmatmul.mubr.bf16.vlgmr.msra.gmra.mxu0 %v10894_v42  ;;  %v8979_v32 = vmax.f32 %v8845_v36, 0.0 }
 0xaad   : > { %v8582_v20 = vpop.f32.mrf.mxu0  ;;  %v8847_v55 = vpop.f32.mrf.mxu1  ;;  %9491 = vmatprep.mubr.bf16.mxu0 %v10902_v28  ;;  %v10920_v28 = vld [vmem:[#allocation6 + $0x84] ss:$16 sps:$4 sm:$0xff]  }
 0xaae   : > { %v8583_v59 = vadd.f32 %v8582_v20, %v20462_v37  ;;  %v8848_v5 = vadd.f32 %v8847_v55, %v18024_v7  ;;  %v20468_v55 = vld [vmem:[#allocation237_spill] sm:$0xff] }
 0xaaf   : > { %v8584_v2 = vpop.f32.mrf.mxu0  ;;  %v8849_v57 = vpop.f32.mrf.mxu1 }
 0xab0   : > { %v8980_v44 = vmax.f32 %v8848_v5, 0.0 }
 0xab1   : > { %v8587_v17 = vpop.f32.mrf.mxu0  ;;  %v8852_v46 = vpop.f32.mrf.mxu1 }
 0xab2   : > { %v8588_v63 = vadd.f32 %v8587_v17, %v20463_v9  ;;  %v18066_v23 = vpack.c.bf16 %v8980_v44, %v8979_v32  ;;  %v8853_v14 = vadd.f32 %v8852_v46, %v18030_v11  ;;  %v20469_v9 = vld [vmem:[#allocation196_spill] sm:$0xff] }
 0xab3   : > { %v8589_v18 = vpop.f32.mrf.mxu0  ;;  %v8854_v61 = vpop.f32.mrf.mxu1 }
 0xab4   : > { %9492 = vmatmul.mubr.bf16.gmra.mxu0 %v10900_v35  ;;  %v8981_v47 = vmax.f32 %v8853_v14, 0.0  ;;  %v10918_v35 = vld [vmem:[#allocation6 + $0x80] ss:$16 sps:$4 sm:$0xff]  }
 0xab5   : > { %v8590_v13 = vpop.f32.mrf.mxu0  ;;  %v8855_v7 = vpop.f32.mrf.mxu1  ;;  %9499 = vmatprep.mubr.bf16.mxu0 %v10908_v22 }
 0xab6   : > { %v8591_v60 = vadd.f32 %v8590_v13, %v20464_v27  ;;  %v8856_v0 = vadd.f32 %v8855_v7, %v18038_v33  ;;  %v10926_v7 = vld [vmem:[#allocation6 + $0xa4] ss:$16 sps:$4 sm:$0xff]  }
 0xab7   : > { %v8592_v58 = vpop.f32.mrf.mxu0  ;;  %v8857_v39 = vpop.f32.mrf.mxu1 }
 0xab8   : > { %v8982_v56 = vmax.f32 %v8856_v0, 0.0 }
 0xab9   : > { %v8595_v15 = vpop.f32.mrf.mxu0  ;;  %v8860_v26 = vpop.f32.mrf.mxu1 }
 0xaba   : > { %v8596_v11 = vadd.f32 %v8595_v15, %v20465_v48  ;;  %v18072_v16 = vpack.c.bf16 %v8982_v56, %v8981_v47  ;;  %v8861_v51 = vadd.f32 %v8860_v26, %v18044_v34  ;;  %v10924_v26 = vld [vmem:[#allocation6 + $0xa0] ss:$16 sps:$4 sm:$0xff]  }
 0xabb   : > { %v8597_v50 = vpop.f32.mrf.mxu0  ;;  %v8862_v41 = vpop.f32.mrf.mxu1 }
 0xabc   : > { %9500 = vmatmul.mubr.bf16.gmra.mxu0 %v10906_v19  ;;  %v8983_v30 = vmax.f32 %v8861_v51, 0.0 }
 0xabd   : > { %v8598_v8 = vpop.f32.mrf.mxu0  ;;  %v8863_v33 = vpop.f32.mrf.mxu1  ;;  %9507 = vmatprep.mubr.bf16.mxu0 %v10914_v25  ;;  %v10932_v25 = vld [vmem:[#allocation6 + $0xc4] ss:$16 sps:$4 sm:$0xff]  }
 0xabe   : > { %v8599_v3 = vadd.f32 %v8598_v8, %v20466_v52  ;;  %v8864_v6 = vadd.f32 %v8863_v33, %v18052_v43 }
 0xabf   : > { %v8600_v45 = vpop.f32.mrf.mxu0  ;;  %v8865_v38 = vpop.f32.mrf.mxu1 }
 0xac0   : > { %v8984_v12 = vmax.f32 %v8864_v6, 0.0 }
 0xac1   : > { %v8603_v62 = vpop.f32.mrf.mxu0  ;;  %v8868_v42 = vpop.f32.mrf.mxu1 }
 0xac2   : > { %v8604_v34 = vadd.f32 %v8603_v62, %v20467_v40  ;;  %v18078_v36 = vpack.c.bf16 %v8984_v12, %v8983_v30  ;;  %v8869_v24 = vadd.f32 %v8868_v42, %v18058_v4  ;;  %v10930_v12 = vld [vmem:[#allocation6 + $0xc0] ss:$16 sps:$4 sm:$0xff]  }
 0xac3   : > { %v8605_v31 = vpop.f32.mrf.mxu0  ;;  %v8870_v21 = vpop.f32.mrf.mxu1 }
 0xac4   : > { %9508 = vmatmul.mubr.bf16.gmra.mxu0 %v10912_v49  ;;  %v8985_v32 = vmax.f32 %v8869_v24, 0.0  ;;  %v10938_v31 = vld [vmem:[#allocation6 + $0xe4] ss:$16 sps:$4 sm:$0xff]  }
 0xac5   : > { %v8606_v20 = vpop.f32.mrf.mxu0  ;;  %v8871_v43 = vpop.f32.mrf.mxu1  ;;  %9515 = vmatprep.mubr.bf16.mxu0 %v10920_v28 }
 0xac6   : > { %v8607_v37 = vadd.f32 %v8606_v20, %v20468_v55  ;;  %v8872_v5 = vadd.f32 %v8871_v43, %v8583_v59  ;;  %v20470_v59 = vld [vmem:[#allocation197_spill] sm:$0xff] }
 0xac7   : > { %v8608_v2 = vpop.f32.mrf.mxu0  ;;  %v8873_v57 = vpop.f32.mrf.mxu1 }
 0xac8   : > { %v8986_v44 = vmax.f32 %v8872_v5, 0.0  ;;  %v10936_v2 = vld [vmem:[#allocation6 + $0xe0] ss:$16 sps:$4 sm:$0xff]  }
 0xac9   : > { %v8611_v17 = vpop.f32.mrf.mxu0  ;;  %v8876_v46 = vpop.f32.mrf.mxu1 }
 0xaca   : > { %v8612_v14 = vadd.f32 %v8611_v17, %v20469_v9  ;;  %v18083_v4 = vpack.c.bf16 %v8986_v44, %v8985_v32  ;;  %v8877_v18 = vadd.f32 %v8876_v46, %v8588_v63 }
 0xacb   : > { %v8613_v61 = vpop.f32.mrf.mxu0  ;;  %v8878_v13 = vpop.f32.mrf.mxu1 }
 0xacc   : > { %9516 = vmatmul.mubr.bf16.gmra.mxu0 %v10918_v35  ;;  %v8987_v56 = vmax.f32 %v8877_v18, 0.0 }
 0xacd   : > { %v8614_v22 = vpop.f32.mrf.mxu0  ;;  %v8879_v27 = vpop.f32.mrf.mxu1  ;;  %9523 = vmatprep.mubr.bf16.mxu0 %v10926_v7 }
 0xace   : > { %v8615_v0 = vadd.f32 %v8614_v22, %v20470_v59  ;;  %v8880_v58 = vadd.f32 %v8879_v27, %v8591_v60  ;;  %v10942_v27 = vld [vmem:[#allocation6 + $0x100] ss:$16 sps:$4 sm:$0xff]  }
 0xacf   : > { %v8616_v39 = vpop.f32.mrf.mxu0  ;;  %v8881_v47 = vpop.f32.mrf.mxu1 }
 0xad0   : > { %v8988_v15 = vmax.f32 %v8880_v58, 0.0  ;;  %v20471_v58 = vld [vmem:[#allocation240_spill] sm:$0xff] }
 0xad1   : > { %v8619_v19 = vpop.f32.mrf.mxu0  ;;  %v8884_v48 = vpop.f32.mrf.mxu1 }
 0xad2   : > { %v18086_v51 = vpack.c.bf16 %v8988_v15, %v8987_v56  ;;  %v8885_v63 = vadd.f32 %v8884_v48, %v8596_v11  ;;  %v8620_v39 = vadd.f32 %v8619_v19, %v20471_v58  ;;  %v20473_v19 = vld [vmem:[#allocation318_spill] sm:$0xff] }
 0xad3   : > { %v8621_v50 = vpop.f32.mrf.mxu0  ;;  %v8886_v41 = vpop.f32.mrf.mxu1 }
 0xad4   : > { %9524 = vmatmul.mubr.bf16.gmra.mxu0 %v10924_v26  ;;  %v8989_v45 = vmax.f32 %v8885_v63, 0.0 }
 0xad5   : > { %v8622_v8 = vpop.f32.mrf.mxu0  ;;  %v8887_v33 = vpop.f32.mrf.mxu1  ;;  %9531 = vmatprep.mubr.bf16.mxu0 %v10932_v25 }
 0xad6   : > { %v8888_v52 = vadd.f32 %v8887_v33, %v8599_v3 }
 0xad7   : > { %v8624_v6 = vpop.f32.mrf.mxu0  ;;  %v8889_v60 = vpop.f32.mrf.mxu1 }
 0xad8   : > { %v8990_v38 = vmax.f32 %v8888_v52, 0.0  ;;  %v10948_v60 = vld [vmem:[#allocation6 + $0x120] ss:$16 sps:$4 sm:$0xff]  }
 0xad9   : > { %v8627_v30 = vpop.f32.mrf.mxu0  ;;  %v8892_v62 = vpop.f32.mrf.mxu1 }
 0xada   : > { %v18088_v49 = vpack.c.bf16 %v8990_v38, %v8989_v45  ;;  %v8893_v11 = vadd.f32 %v8892_v62, %v8604_v34  ;;  %v10944_v34 = vld [vmem:[#allocation6 + $0x104] ss:$16 sps:$4 sm:$0xff]   ;;  %v8628_v38 = vadd.f32 %v8627_v30, %v20473_v19  ;;  %v20476_v30 = vld [vmem:[#allocation244_spill] sm:$0xff]  ;;  %v10939_v19 = vld [vmem:[#allocation6 + $0xe8] ss:$16 sps:$4 sm:$0xff]  }
 0xadb   : > { %v8629_v42 = vpop.f32.mrf.mxu0  ;;  %v8894_v40 = vpop.f32.mrf.mxu1 }
 0xadc   : > { %9532 = vmatmul.mubr.bf16.gmra.mxu0 %v10930_v12  ;;  %v8991_v43 = vmax.f32 %v8893_v11, 0.0  ;;  %v20474_v42 = vld [vmem:[#allocation177_spill] sm:$0xff] }
 0xadd   : > { %v8630_v24 = vpop.f32.mrf.mxu0  ;;  %v8895_v21 = vpop.f32.mrf.mxu1  ;;  %9539 = vmatprep.mubr.bf16.mxu0 %v10938_v31  ;;  %v10956_v11 = vld [vmem:[#allocation6 + $0x144] ss:$16 sps:$4 sm:$0xff]  }
 0xade   : > { %v8896_v20 = vadd.f32 %v8895_v21, %v8607_v37  ;;  %v8631_v40 = vadd.f32 %v8630_v24, %v20474_v42  ;;  %v10962_v24 = vld [vmem:[#allocation6 + $0x164] ss:$16 sps:$4 sm:$0xff]  }
 0xadf   : > { %v8632_v28 = vpop.f32.mrf.mxu0  ;;  %v8897_v3 = vpop.f32.mrf.mxu1 }
 0xae0   : > { %v8992_v55 = vmax.f32 %v8896_v20, 0.0 }
 0xae1   : > { %v8635_v5 = vpop.f32.mrf.mxu0  ;;  %v8900_v57 = vpop.f32.mrf.mxu1 }
 0xae2   : > { %v18090_v32 = vpack.c.bf16 %v8992_v55, %v8991_v43  ;;  %v8901_v35 = vadd.f32 %v8900_v57, %v8612_v14  ;;  %v20472_v14 = vld [vmem:[#allocation141_spill] sm:$0xff]  ;;  %v10954_v43 = vld [vmem:[#allocation6 + $0x140] ss:$16 sps:$4 sm:$0xff]  }
 0xae3   : > { %v8637_v44 = vpop.f32.mrf.mxu0  ;;  %v8902_v17 = vpop.f32.mrf.mxu1  ;;  %v8623_v26 = vadd.f32 %v8622_v8, %v20472_v14 }
 0xae4   : > { %9540 = vmatmul.mubr.bf16.gmra.mxu0 %v10936_v2  ;;  %v8993_v13 = vmax.f32 %v8901_v35, 0.0  ;;  %v20475_v2 = vld [vmem:[#allocation178_spill] sm:$0xff] }
 0xae5   : > { %v8638_v46 = vpop.f32.mrf.mxu0  ;;  %v8903_v9 = vpop.f32.mrf.mxu1  ;;  %9547 = vmatprep.mubr.bf16.mxu0 %v10944_v34  ;;  %v8636_v57 = vadd.f32 %v8635_v5, %v20475_v2 }
 0xae6   : > { %v8904_v18 = vadd.f32 %v8903_v9, %v8615_v0  ;;  %v10950_v0 = vld [vmem:[#allocation6 + $0x124] ss:$16 sps:$4 sm:$0xff]   ;;  %v8639_v35 = vadd.f32 %v8638_v46, %v20476_v30 }
 0xae7   : > { %v8640_v61 = vpop.f32.mrf.mxu0  ;;  %v8905_v37 = vpop.f32.mrf.mxu1  ;;  %v10968_v46 = vld [vmem:[#allocation6 + $0x184] ss:$16 sps:$4 sm:$0xff]  }
 0xae8   : > { %v8994_v22 = vmax.f32 %v8904_v18, 0.0 }
 0xae9   : > { %v8643_v7 = vpop.f32.mrf.mxu0  ;;  %v8908_v59 = vpop.f32.mrf.mxu1 }
 0xaea   : > { %v18093_v47 = vpack.c.bf16 %v8994_v22, %v8993_v13  ;;  %v8909_v48 = vadd.f32 %v8908_v59, %v8620_v39  ;;  %v10960_v22 = vld [vmem:[#allocation6 + $0x160] ss:$16 sps:$4 sm:$0xff]   ;;  %v20477_v59 = vld [vmem:[#allocation135_spill] sm:$0xff] }
 0xaeb   : > { %v8645_v56 = vpop.f32.mrf.mxu0  ;;  %v8910_v15 = vpop.f32.mrf.mxu1  ;;  %v8644_v58 = vadd.f32 %v8643_v7, %v20477_v59  ;;  %v10972_v7 = vld [vmem:[#allocation6 + $0x1a0] ss:$16 sps:$4 sm:$0xff]   ;;  %v10977_v59 = vld [vmem:[#allocation6 + $0x1ac] ss:$16 sps:$4 sm:$0xff]  }
 0xaec   : > { %9548 = vmatmul.mubr.bf16.gmra.mxu0 %v10942_v27  ;;  %v8995_v52 = vmax.f32 %v8909_v48, 0.0 }
 0xaed   : > { %v8646_v63 = vpop.f32.mrf.mxu0  ;;  %v8911_v50 = vpop.f32.mrf.mxu1  ;;  %9555 = vmatprep.mubr.bf16.mxu0 %v10950_v0 }
 0xaee   : > { %v8912_v41 = vadd.f32 %v8911_v50, %v8623_v26  ;;  %v8647_v5 = vadd.f32 %v8646_v63, %v17793_v1  ;;  %v10980_v1 = vld [vmem:[#allocation6 + $0x1c4] ss:$16 sps:$4 sm:$0xff]   ;;  %v10978_v63 = vld [vmem:[#allocation6 + $0x1c0] ss:$16 sps:$4 sm:$0xff]  }
 0xaef   : > { %v8648_v25 = vpop.f32.mrf.mxu0  ;;  %v8913_v33 = vpop.f32.mrf.mxu1 }
 0xaf0   : > { %v8996_v6 = vmax.f32 %v8912_v41, 0.0  ;;  %v10966_v41 = vld [vmem:[#allocation6 + $0x180] ss:$16 sps:$4 sm:$0xff]   ;;  %v10974_v33 = vld [vmem:[#allocation6 + $0x1a4] ss:$16 sps:$4 sm:$0xff]  }
 0xaf1   : > { %v8916_v45 = vpop.f32.mrf.mxu1 }
 0xaf2   : > { %v9095_v12 = vpack.c.bf16 %v8996_v6, %v8995_v52  ;;  %v8917_v8 = vadd.f32 %v8916_v45, %v8628_v38  ;;  %v10986_v52 = vld [vmem:[#allocation6 + $0x1e4] ss:$16 sps:$4 sm:$0xff]   ;;  %v10935_v6 = vld [vmem:[#allocation6 + $0xcc] ss:$16 sps:$4 sm:$0xff]  }
 0xaf3   : > { %v8918_v62 = vpop.f32.mrf.mxu1  ;;  %v10941_v45 = vld [vmem:[#allocation6 + $0xec] ss:$16 sps:$4 sm:$0xff]  }
 0xaf4   : > { %9556 = vmatmul.mubr.bf16.gmra.mxu0 %v10948_v60  ;;  %v8997_v28 = vmax.f32 %v8917_v8, 0.0  ;;  %v10933_v60 = vld [vmem:[#allocation6 + $0xc8] ss:$16 sps:$4 sm:$0xff]   ;;  %v10947_v38 = vld [vmem:[#allocation6 + $0x10c] ss:$16 sps:$4 sm:$0xff]  }
 0xaf5   : > { %v8919_v31 = vpop.f32.mrf.mxu1  ;;  %9563 = vmatprep.mubr.bf16.mxu0 %v10956_v11  ;;  %v10953_v62 = vld [vmem:[#allocation6 + $0x12c] ss:$16 sps:$4 sm:$0xff]   ;;  %v10951_v11 = vld [vmem:[#allocation6 + $0x128] ss:$16 sps:$4 sm:$0xff]  }
 0xaf6   : > { %v8920_v21 = vadd.f32 %v8919_v31, %v8631_v40 }
 0xaf7   : > { %v8921_v20 = vpop.f32.mrf.mxu1 }
 0xaf8   : > { %v8998_v3 = vmax.f32 %v8920_v21, 0.0  ;;  %v10959_v21 = vld [vmem:[#allocation6 + $0x14c] ss:$16 sps:$4 sm:$0xff]  }
 0xaf9   : > { %v8924_v55 = vpop.f32.mrf.mxu1 }
 0xafa   : > { %v9096_v44 = vpack.c.bf16 %v8998_v3, %v8997_v28  ;;  %v8925_v34 = vadd.f32 %v8924_v55, %v8636_v57  ;;  %v10965_v55 = vld [vmem:[#allocation6 + $0x16c] ss:$16 sps:$4 sm:$0xff]  }
 0xafb   : > { %v8926_v17 = vpop.f32.mrf.mxu1 }
 0xafc   : > { %9564 = vmatmul.mubr.bf16.gmra.mxu0 %v10954_v43  ;;  %v8999_v37 = vmax.f32 %v8925_v34, 0.0  ;;  %v10957_v43 = vld [vmem:[#allocation6 + $0x148] ss:$16 sps:$4 sm:$0xff]  }
 0xafd   : > { %v8927_v9 = vpop.f32.mrf.mxu1  ;;  %9571 = vmatprep.mubr.bf16.mxu0 %v10962_v24  ;;  %v10963_v34 = vld [vmem:[#allocation6 + $0x168] ss:$16 sps:$4 sm:$0xff]   ;;  %v10971_v24 = vld [vmem:[#allocation6 + $0x18c] ss:$16 sps:$4 sm:$0xff]  }
 0xafe   : > { %v8928_v18 = vadd.f32 %v8927_v9, %v8639_v35 }
 0xaff   : > { %v8929_v61 = vpop.f32.mrf.mxu1 }
 0xb00   : > { %v9000_v13 = vmax.f32 %v8928_v18, 0.0 }
 0xb01   : > { %v8932_v27 = vpop.f32.mrf.mxu1 }
 0xb02   : > { %v9097_v39 = vpack.c.bf16 %v9000_v13, %v8999_v37  ;;  %v8933_v15 = vadd.f32 %v8932_v27, %v8644_v58  ;;  %v10969_v27 = vld [vmem:[#allocation6 + $0x188] ss:$16 sps:$4 sm:$0xff]  }
 0xb03   : > { %v8934_v56 = vpop.f32.mrf.mxu1 }
 0xb04   : > { %9572 = vmatmul.mubr.bf16.gmra.mxu0 %v10960_v22  ;;  %v9001_v0 = vmax.f32 %v8933_v15, 0.0 }
 0xb05   : > { %v8935_v14 = vpop.f32.mrf.mxu1  ;;  %9579 = vmatprep.mubr.bf16.mxu0 %v10968_v46 }
 0xb06   : > { %v8936_v26 = vadd.f32 %v8935_v14, %v8647_v5  ;;  %v10975_v14 = vld [vmem:[#allocation6 + $0x1a8] ss:$16 sps:$4 sm:$0xff]  }
 0xb07   : > { %v8937_v48 = vpop.f32.mrf.mxu1 }
 0xb08   : > { %v9002_v50 = vmax.f32 %v8936_v26, 0.0  ;;  %v10983_v26 = vld [vmem:[#allocation6 + $0x1cc] ss:$16 sps:$4 sm:$0xff]  }
 0xb0a   : > { %v9098_v25 = vpack.c.bf16 %v9002_v50, %v9001_v0 }
 0xb0c   : > { %10580 = vmatprep.subr.bf16.mxu1 %v9098_v25  ;;  %9580 = vmatmul.mubr.bf16.gmra.mxu0 %v10966_v41 }
 0xb0d   : > { %10581 = vmatpush3.bf16.msra.mxu1 %v18083_v4  ;;  %9587 = vmatprep.mubr.bf16.mxu0 %v10974_v33  ;;  %v10911_v4 = vld [vmem:[#allocation6 + $0x4c] ss:$16 sps:$4 sm:$0xff]  }
 0xb0e   : > { %10582 = vmatprep.subr.bf16.mxu1 %v9097_v39 }
 0xb11   : > { %10583 = vmatpush3.bf16.msra.mxu1 %v18078_v36  ;;  %v10984_v36 = vld [vmem:[#allocation6 + $0x1e0] ss:$16 sps:$4 sm:$0xff]  }
 0xb12   : > { %10584 = vmatprep.subr.bf16.mxu1 %v9096_v44 }
 0xb14   : > { %9588 = vmatmul.mubr.bf16.gmra.mxu0 %v10972_v7  ;;  %v10981_v7 = vld [vmem:[#allocation6 + $0x1c8] ss:$16 sps:$4 sm:$0xff]  }
 0xb15   : > { %10585 = vmatpush3.bf16.msra.mxu1 %v18072_v16  ;;  %9595 = vmatprep.mubr.bf16.mxu0 %v10980_v1  ;;  %v10905_v16 = vld [vmem:[#allocation6 + $0x2c] ss:$16 sps:$4 sm:$0xff]  }
 0xb16   : > { %10586 = vmatprep.subr.bf16.mxu1 %v9095_v12  ;;  %v10945_v12 = vld [vmem:[#allocation6 + $0x108] ss:$16 sps:$4 sm:$0xff]   ;;  %v10989_v1 = vld [vmem:[#allocation6 + $0x1ec] ss:$16 sps:$4 sm:$0xff]  }
 0xb19   : > { %10587 = vmatpush3.bf16.msra.mxu1 %v18066_v23  ;;  %v10897_v23 = vld [vmem:[#allocation6 + $0x8] ss:$16 sps:$4 sm:$0xff]  }
 0xb1a   : > { %10588 = vmatprep.subr.bf16.mxu1 %v18093_v47  ;;  %v10917_v47 = vld [vmem:[#allocation6 + $0x6c] ss:$16 sps:$4 sm:$0xff]  }
 0xb1c   : > { %9596 = vmatmul.mubr.bf16.gmra.mxu0 %v10978_v63 }
 0xb1d   : > { %10589 = vmatpush3.bf16.msra.mxu1 %v18060_v54  ;;  %9603 = vmatprep.mubr.bf16.mxu0 %v10986_v52  ;;  %v10903_v54 = vld [vmem:[#allocation6 + $0x28] ss:$16 sps:$4 sm:$0xff]  }
 0xb1e   : > { %10590 = vmatprep.subr.bf16.mxu1 %v18090_v32  ;;  %v10909_v32 = vld [vmem:[#allocation6 + $0x48] ss:$16 sps:$4 sm:$0xff]  }
 0xb21   : > { %10591 = vmatpush3.bf16.msra.mxu1 %v18046_v29  ;;  %v10915_v29 = vld [vmem:[#allocation6 + $0x68] ss:$16 sps:$4 sm:$0xff]  }
 0xb22   : > { %10592 = vmatprep.subr.bf16.mxu1 %v18088_v49  ;;  %v10923_v49 = vld [vmem:[#allocation6 + $0x8c] ss:$16 sps:$4 sm:$0xff]  }
 0xb24   : > { %9604 = vmatmul.mubr.bf16.gmra.mxu0 %v10984_v36 }
 0xb25   : > { %10593 = vmatpush3.bf16.msra.mxu1 %v18032_v53  ;;  %v10921_v53 = vld [vmem:[#allocation6 + $0x88] ss:$16 sps:$4 sm:$0xff]  }
 0xb26   : > { %10594 = vmatprep.subr.bf16.mxu1 %v18086_v51  ;;  %v10929_v51 = vld [vmem:[#allocation6 + $0xac] ss:$16 sps:$4 sm:$0xff]  }
 0xb29   : > { %10595 = vmatpush3.bf16.msra.mxu1 %v18017_v10  ;;  %v10927_v10 = vld [vmem:[#allocation6 + $0xa8] ss:$16 sps:$4 sm:$0xff]  }
 0xb2c   : > { %9645 = vmatmul.mubr.bf16.vlgmr.msra.gmra.mxu1 %v10897_v23 }
 0xb2d   : > { %9652 = vmatprep.mubr.bf16.mxu1 %v10905_v16 }
 0xb34   : > { %9653 = vmatmul.mubr.bf16.gmra.mxu1 %v10903_v54 }
 0xb35   : > { %9660 = vmatprep.mubr.bf16.mxu1 %v10911_v4  ;;  %v10987_v4 = vld [vmem:[#allocation6 + $0x1e8] ss:$16 sps:$4 sm:$0xff]  }
 0xb3c   : > { %9661 = vmatmul.mubr.bf16.gmra.mxu1 %v10909_v32 }
 0xb3d   : > { %9668 = vmatprep.mubr.bf16.mxu1 %v10917_v47 }
 0xb44   : > { %9669 = vmatmul.mubr.bf16.gmra.mxu1 %v10915_v29 }
 0xb45   : > { %9676 = vmatprep.mubr.bf16.mxu1 %v10923_v49 }
 0xb4c   : > { %9677 = vmatmul.mubr.bf16.gmra.mxu1 %v10921_v53 }
 0xb4d   : > { %9684 = vmatprep.mubr.bf16.mxu1 %v10929_v51 }
 0xb54   : > { %9685 = vmatmul.mubr.bf16.gmra.mxu1 %v10927_v10 }
 0xb55   : > { %9692 = vmatprep.mubr.bf16.mxu1 %v10935_v6 }
 0xb5c   : > { %9693 = vmatmul.mubr.bf16.gmra.mxu1 %v10933_v60 }
 0xb5d   : > { %9700 = vmatprep.mubr.bf16.mxu1 %v10941_v45 }
 0xb64   : > { %9701 = vmatmul.mubr.bf16.gmra.mxu1 %v10939_v19 }
 0xb65   : > { %9708 = vmatprep.mubr.bf16.mxu1 %v10947_v38 }
 0xb6c   : > { %9709 = vmatmul.mubr.bf16.gmra.mxu1 %v10945_v12  ;;  %v10484_v42 = vpop.f32.mrf.mxu0 }
 0xb6d   : > { %9716 = vmatprep.mubr.bf16.mxu1 %v10953_v62 }
 0xb6e   : > { %v10485_v40 = vpop.f32.mrf.mxu0 }
 0xb6f   : > { %v18114_v8 = vadd.f32 %v10485_v40, %v10484_v42 }
 0xb70   : > { %v10487_v31 = vpop.f32.mrf.mxu0 }
 0xb72   : > { %v10488_v20 = vpop.f32.mrf.mxu0 }
 0xb73   : > { %v18116_v28 = vadd.f32 %v10488_v20, %v10487_v31 }
 0xb74   : > { %9717 = vmatmul.mubr.bf16.gmra.mxu1 %v10951_v11  ;;  %v10490_v3 = vpop.f32.mrf.mxu0 }
 0xb75   : > { %9724 = vmatprep.mubr.bf16.mxu1 %v10959_v21 }
 0xb76   : > { %v10491_v2 = vpop.f32.mrf.mxu0 }
 0xb77   : > { %v18118_v57 = vadd.f32 %v10491_v2, %v10490_v3  ;;  %v9099_v2 = vld [vmem:[%s18431_s14] sm:$0xff] }
 0xb78   : > { %v10493_v44 = vpop.f32.mrf.mxu0 }
 0xb7a   : > { %v10494_v17 = vpop.f32.mrf.mxu0 }
 0xb7b   : > { %v18120_v30 = vadd.f32 %v10494_v17, %v10493_v44 }
 0xb7c   : > { %9725 = vmatmul.mubr.bf16.gmra.mxu1 %v10957_v43  ;;  %v10496_v35 = vpop.f32.mrf.mxu0 }
 0xb7d   : > { %9732 = vmatprep.mubr.bf16.mxu1 %v10965_v55 }
 0xb7e   : > { %v10497_v9 = vpop.f32.mrf.mxu0 }
 0xb7f   : > { %v18122_v18 = vadd.f32 %v10497_v9, %v10496_v35  ;;  %v9486_v35 = vadd.f32 %v18114_v8, %v9099_v2 }
 0xb80   : > { %v10499_v61 = vpop.f32.mrf.mxu0 }
 0xb82   : > { %v10500_v37 = vpop.f32.mrf.mxu0 }
 0xb83   : > { %v18124_v13 = vadd.f32 %v10500_v37, %v10499_v61 }
 0xb84   : > { %9733 = vmatmul.mubr.bf16.gmra.mxu1 %v10963_v34  ;;  %v10502_v22 = vpop.f32.mrf.mxu0 }
 0xb85   : > { %9740 = vmatprep.mubr.bf16.mxu1 %v10971_v24  ;;  %v9100_v24 = vld [vmem:[%s18431_s14 + $0x8] sm:$0xff] }
 0xb86   : > { %v10503_v58 = vpop.f32.mrf.mxu0 }
 0xb87   : > { %v18126_v39 = vadd.f32 %v10503_v58, %v10502_v22  ;;  %v9489_v22 = vadd.f32 %v18116_v28, %v9100_v24 }
 0xb88   : > { %v10505_v56 = vpop.f32.mrf.mxu0 }
 0xb8a   : > { %v10506_v5 = vpop.f32.mrf.mxu0 }
 0xb8b   : > { %v18128_v15 = vadd.f32 %v10506_v5, %v10505_v56 }
 0xb8c   : > { %9741 = vmatmul.mubr.bf16.gmra.mxu1 %v10969_v27  ;;  %v10508_v46 = vpop.f32.mrf.mxu0 }
 0xb8d   : > { %9748 = vmatprep.mubr.bf16.mxu1 %v10977_v59  ;;  %v9101_v59 = vld [vmem:[%s18431_s14 + $0x10] sm:$0xff] }
 0xb8e   : > { %v10509_v48 = vpop.f32.mrf.mxu0 }
 0xb8f   : > { %v18130_v0 = vadd.f32 %v10509_v48, %v10508_v46  ;;  %v9102_v48 = vld [vmem:[%s18431_s14 + $0x18] sm:$0xff] }
 0xb90   : > { %v10511_v50 = vpop.f32.mrf.mxu0 }
 0xb92   : > { %v10512_v41 = vpop.f32.mrf.mxu0 }
 0xb93   : > { %v18132_v25 = vadd.f32 %v10512_v41, %v10511_v50 }
 0xb94   : > { %9749 = vmatmul.mubr.bf16.gmra.mxu1 %v10975_v14  ;;  %v10514_v33 = vpop.f32.mrf.mxu0  ;;  %v9494_v14 = vadd.f32 %v18118_v57, %v9101_v59 }
 0xb95   : > { %9756 = vmatprep.mubr.bf16.mxu1 %v10983_v26 }
 0xb96   : > { %v10515_v63 = vpop.f32.mrf.mxu0 }
 0xb97   : > { %v18134_v52 = vadd.f32 %v10515_v63, %v10514_v33  ;;  %v9103_v63 = vld [vmem:[%s18431_s14 + $0x20] sm:$0xff] }
 0xb98   : > { %v10517_v36 = vpop.f32.mrf.mxu0 }
 0xb9a   : > { %v10518_v23 = vpop.f32.mrf.mxu0 }
 0xb9b   : > { %v18136_v16 = vadd.f32 %v10518_v23, %v10517_v36 }
 0xb9c   : > { %9757 = vmatmul.mubr.bf16.gmra.mxu1 %v10981_v7  ;;  %v10520_v54 = vpop.f32.mrf.mxu0  ;;  %v9497_v7 = vadd.f32 %v18120_v30, %v9102_v48 }
 0xb9d   : > { %9764 = vmatprep.mubr.bf16.mxu1 %v10989_v1 }
 0xb9e   : > { %v10521_v32 = vpop.f32.mrf.mxu0 }
 0xb9f   : > { %v18138_v47 = vadd.f32 %v10521_v32, %v10520_v54  ;;  %v9502_v32 = vadd.f32 %v18122_v18, %v9103_v63 }
 0xba0   : > { %v10523_v29 = vpop.f32.mrf.mxu0 }
 0xba2   : > { %v10524_v49 = vpop.f32.mrf.mxu0 }
 0xba3   : > { %v18140_v53 = vadd.f32 %v10524_v49, %v10523_v29  ;;  %v9104_v49 = vld [vmem:[%s18431_s14 + $0x28] sm:$0xff] }
 0xba4   : > { %9765 = vmatmul.mubr.bf16.gmra.mxu1 %v10987_v4  ;;  %v10526_v51 = vpop.f32.mrf.mxu0 }
 0xba6   : > { %v10527_v10 = vpop.f32.mrf.mxu0 }
 0xba7   : > { %v18142_v6 = vadd.f32 %v10527_v10, %v10526_v51 }
 0xba8   : > { %v10529_v60 = vpop.f32.mrf.mxu0 }
 0xbaa   : > { %v10530_v45 = vpop.f32.mrf.mxu0 }
 0xbab   : > { %v18144_v19 = vadd.f32 %v10530_v45, %v10529_v60  ;;  %v9505_v45 = vadd.f32 %v18124_v13, %v9104_v49 }
 0xbac   : > { %v10532_v38 = vpop.f32.mrf.mxu0 }
 0xbae   : > { %v10533_v12 = vpop.f32.mrf.mxu0 }
 0xbaf   : > { %v18146_v62 = vadd.f32 %v10533_v12, %v10532_v38  ;;  %v9105_v12 = vld [vmem:[%s18431_s14 + $0x30] sm:$0xff] }
 0xbb0   : > { %v10535_v42 = vpop.f32.mrf.mxu0 }
 0xbb2   : > { %v10536_v40 = vpop.f32.mrf.mxu0 }
 0xbb3   : > { %v18148_v11 = vadd.f32 %v10536_v40, %v10535_v42 }
 0xbb4   : > { %v10538_v31 = vpop.f32.mrf.mxu0 }
 0xbb6   : > { %v10539_v21 = vpop.f32.mrf.mxu0 }
 0xbb7   : > { %v18150_v20 = vadd.f32 %v10539_v21, %v10538_v31 }
 0xbb8   : > { %v10541_v3 = vpop.f32.mrf.mxu0 }
 0xbba   : > { %v10542_v43 = vpop.f32.mrf.mxu0 }
 0xbbb   : > { %v18152_v55 = vadd.f32 %v10542_v43, %v10541_v3  ;;  %v9510_v3 = vadd.f32 %v18126_v39, %v9105_v12  ;;  %v9107_v39 = vld [vmem:[%s18431_s14 + $0x40] sm:$0xff] }
 0xbbc   : > { %v18186_v2 = vpop.f32.mrf.mxu0 }
 0xbec   : > { %v10596_v44 = vpop.f32.mrf.mxu1 }
 0xbee   : > { %v10597_v17 = vpop.f32.mrf.mxu1 }
 0xbef   : > { %v10598_v34 = vadd.f32 %v10597_v17, %v10596_v44  ;;  %v9106_v44 = vld [vmem:[%s18431_s14 + $0x38] sm:$0xff] }
 0xbf0   : > { %v10599_v9 = vpop.f32.mrf.mxu1  ;;  %v9513_v24 = vadd.f32 %v18128_v15, %v9106_v44  ;;  %v9108_v15 = vld [vmem:[%s18431_s14 + $0x48] sm:$0xff] }
 0xbf1   : > { %v9647_v61 = vadd.f32 %v10598_v34, %v9486_v35 }
 0xbf2   : > { %v10600_v37 = vpop.f32.mrf.mxu1 }
 0xbf3   : > { %v10601_v27 = vadd.f32 %v10600_v37, %v10599_v9  ;;  %v9773_v46 = vmax.f32 %v9647_v61, 0.0  ;;  %v18194_v61 = vpop.f32.mrf.mxu0 }
 0xbf4   : > { %v10602_v58 = vpop.f32.mrf.mxu1 }
 0xbf5   : > { %v9650_v56 = vadd.f32 %v10601_v27, %v9489_v22 }
 0xbf6   : > { %v10603_v5 = vpop.f32.mrf.mxu1 }
 0xbf7   : > { %v9774_v8 = vmax.f32 %v9650_v56, 0.0  ;;  %v10604_v26 = vadd.f32 %v10603_v5, %v10602_v58  ;;  %v9518_v56 = vadd.f32 %v18130_v0, %v9107_v39 }
 0xbf8   : > { %v10605_v50 = vpop.f32.mrf.mxu1 }
 0xbf9   : > { %v18169_v41 = vpack.c.bf16 %v9774_v8, %v9773_v46  ;;  %v9655_v28 = vadd.f32 %v10604_v26, %v9494_v14  ;;  %v18200_v46 = vpop.f32.mrf.mxu0  ;;  %v18208_v14 = vld.sshfl [vmem:[%s18432_s15] sm:$0x33 pattern:$0x76325410] }
 0xbfa   : > { %v10606_v33 = vpop.f32.mrf.mxu1  ;;  %20479 = vst [vmem:[#allocation190_spill] sm:$0xff] %v18208_v14 }
 0xbfb   : > { %20478 = vst [vmem:[#allocation317_spill] sm:$0xff] %v18169_v41  ;;  %v10607_v1 = vadd.f32 %v10606_v33, %v10605_v50  ;;  %v9775_v54 = vmax.f32 %v9655_v28, 0.0  ;;  %v9831_v50 = vcombine.high %v18208_v14, %v18208_v14  ;;  %v9521_v28 = vadd.f32 %v18132_v25, %v9108_v15  ;;  %v9110_v25 = vld [vmem:[%s18431_s14 + $0x58] sm:$0xff] }
 0xbfc   : > { %v10608_v36 = vpop.f32.mrf.mxu1 }
 0xbfd   : > { %v9658_v23 = vadd.f32 %v10607_v1, %v9497_v7  ;;  %v18215_v7 = vpop.f32.mrf.mxu0  ;;  %9866 = vmatprep.mubr.bf16.mxu0 %v9831_v50  ;;  %v9109_v1 = vld [vmem:[%s18431_s14 + $0x50] sm:$0xff] }
 0xbfe   : > { %v10609_v57 = vpop.f32.mrf.mxu1 }
 0xbff   : > { %v9776_v4 = vmax.f32 %v9658_v23, 0.0  ;;  %v10610_v29 = vadd.f32 %v10609_v57, %v10608_v36 }
 0xc00   : > { %v10611_v51 = vpop.f32.mrf.mxu1 }
 0xc01   : > { %v18179_v10 = vpack.c.bf16 %v9776_v4, %v9775_v54  ;;  %v9663_v30 = vadd.f32 %v10610_v29, %v9502_v32  ;;  %v9526_v4 = vadd.f32 %v18134_v52, %v9109_v1  ;;  %v18221_v29 = vpop.f32.mrf.mxu0  ;;  %v9111_v52 = vld [vmem:[%s18431_s14 + $0x60] sm:$0xff] }
 0xc02   : > { %v10612_v60 = vpop.f32.mrf.mxu1 }
 0xc03   : > { %v10613_v38 = vadd.f32 %v10612_v60, %v10611_v51  ;;  %v9777_v31 = vmax.f32 %v9663_v30, 0.0  ;;  %v18229_v12 = vpop.f32.mrf.mxu0 }
 0xc04   : > { %v10614_v42 = vpop.f32.mrf.mxu1 }
 0xc05   : > { %v9666_v40 = vadd.f32 %v10613_v38, %v9505_v45  ;;  %v9529_v45 = vadd.f32 %v18136_v16, %v9110_v25  ;;  %v18235_v44 = vpop.f32.mrf.mxu0  ;;  %v9112_v16 = vld [vmem:[%s18431_s14 + $0x68] sm:$0xff] }
 0xc06   : > { %v10615_v18 = vpop.f32.mrf.mxu1 }
 0xc07   : > { %v9778_v21 = vmax.f32 %v9666_v40, 0.0  ;;  %v10616_v43 = vadd.f32 %v10615_v18, %v10614_v42 }
 0xc08   : > { %v10617_v13 = vpop.f32.mrf.mxu1 }
 0xc09   : > { %v18191_v17 = vpack.c.bf16 %v9778_v21, %v9777_v31  ;;  %v9671_v35 = vadd.f32 %v10616_v43, %v9510_v3  ;;  %v9534_v3 = vadd.f32 %v18138_v47, %v9111_v52  ;;  %v9113_v47 = vld [vmem:[%s18431_s14 + $0x70] sm:$0xff] }
 0xc0a   : > { %v10618_v34 = vpop.f32.mrf.mxu1 }
 0xc0b   : > { %v10619_v9 = vadd.f32 %v10618_v34, %v10617_v13  ;;  %v9779_v59 = vmax.f32 %v9671_v35, 0.0 }
 0xc0c   : > { %v10620_v37 = vpop.f32.mrf.mxu1 }
 0xc0d   : > { %v9674_v22 = vadd.f32 %v10619_v9, %v9513_v24  ;;  %v9537_v9 = vadd.f32 %v18140_v53, %v9112_v16  ;;  %v9114_v53 = vld [vmem:[%s18431_s14 + $0x78] sm:$0xff] }
 0xc0e   : > { %v10621_v27 = vpop.f32.mrf.mxu1 }
 0xc0f   : > { %v9780_v58 = vmax.f32 %v9674_v22, 0.0  ;;  %v10622_v5 = vadd.f32 %v10621_v27, %v10620_v37  ;;  %v18243_v37 = vpop.f32.mrf.mxu0 }
 0xc10   : > { %v10623_v8 = vpop.f32.mrf.mxu1 }
 0xc11   : > { %v18210_v26 = vpack.c.bf16 %v9780_v58, %v9779_v59  ;;  %v9679_v48 = vadd.f32 %v10622_v5, %v9518_v56  ;;  %v9542_v5 = vadd.f32 %v18142_v6, %v9113_v47  ;;  %v9115_v6 = vld [vmem:[%s18431_s14 + $0x80] sm:$0xff] }
 0xc12   : > { %v10624_v0 = vpop.f32.mrf.mxu1 }
 0xc13   : > { %v10625_v33 = vadd.f32 %v10624_v0, %v10623_v8  ;;  %v9781_v57 = vmax.f32 %v9679_v48, 0.0  ;;  %v18249_v8 = vpop.f32.mrf.mxu0 }
 0xc14   : > { %v10626_v63 = vpop.f32.mrf.mxu1 }
 0xc15   : > { %v9682_v36 = vadd.f32 %v10625_v33, %v9521_v28  ;;  %v9545_v33 = vadd.f32 %v18144_v19, %v9114_v53  ;;  %v9116_v19 = vld [vmem:[%s18431_s14 + $0x88] sm:$0xff] }
 0xc16   : > { %v10627_v23 = vpop.f32.mrf.mxu1  ;;  %v9553_v52 = vadd.f32 %v18148_v11, %v9116_v19  ;;  %v9118_v11 = vld [vmem:[%s18431_s14 + $0x98] sm:$0xff] }
 0xc17   : > { %v9782_v54 = vmax.f32 %v9682_v36, 0.0  ;;  %v10628_v32 = vadd.f32 %v10627_v23, %v10626_v63  ;;  %v18257_v63 = vpop.f32.mrf.mxu0 }
 0xc18   : > { %v10629_v49 = vpop.f32.mrf.mxu1 }
 0xc19   : > { %v18226_v51 = vpack.c.bf16 %v9782_v54, %v9781_v57  ;;  %v9687_v30 = vadd.f32 %v10628_v32, %v9526_v4  ;;  %v9550_v32 = vadd.f32 %v18146_v62, %v9115_v6  ;;  %v9117_v62 = vld [vmem:[%s18431_s14 + $0x90] sm:$0xff] }
 0xc1a   : > { %v10630_v60 = vpop.f32.mrf.mxu1  ;;  %v9558_v16 = vadd.f32 %v18150_v20, %v9117_v62  ;;  %v9119_v20 = vld [vmem:[%s18431_s14 + $0xa0] sm:$0xff] }
 0xc1b   : > { %v10631_v38 = vadd.f32 %v10630_v60, %v10629_v49  ;;  %v9783_v31 = vmax.f32 %v9687_v30, 0.0  ;;  %v18263_v49 = vpop.f32.mrf.mxu0 }
 0xc1c   : > { %v10632_v42 = vpop.f32.mrf.mxu1 }
 0xc1d   : > { %v9690_v40 = vadd.f32 %v10631_v38, %v9529_v45 }
 0xc1e   : > { %v10633_v18 = vpop.f32.mrf.mxu1 }
 0xc1f   : > { %v9784_v21 = vmax.f32 %v9690_v40, 0.0  ;;  %v10634_v43 = vadd.f32 %v10633_v18, %v10632_v42  ;;  %v18271_v40 = vpop.f32.mrf.mxu0 }
 0xc20   : > { %v10635_v13 = vpop.f32.mrf.mxu1 }
 0xc21   : > { %v18240_v35 = vpack.c.bf16 %v9784_v21, %v9783_v31  ;;  %v9695_v34 = vadd.f32 %v10634_v43, %v9534_v3 }
 0xc22   : > { %v10636_v24 = vpop.f32.mrf.mxu1 }
 0xc23   : > { %v10637_v39 = vadd.f32 %v10636_v24, %v10635_v13  ;;  %v9785_v58 = vmax.f32 %v9695_v34, 0.0  ;;  %v18277_v34 = vpop.f32.mrf.mxu0 }
 0xc24   : > { %v10638_v22 = vpop.f32.mrf.mxu1 }
 0xc25   : > { %v9698_v27 = vadd.f32 %v10637_v39, %v9537_v9 }
 0xc26   : > { %v10639_v59 = vpop.f32.mrf.mxu1 }
 0xc27   : > { %v9786_v56 = vmax.f32 %v9698_v27, 0.0  ;;  %v10640_v15 = vadd.f32 %v10639_v59, %v10638_v22  ;;  %v9561_v22 = vadd.f32 %v18152_v55, %v9118_v11  ;;  %v10546_v59 = vadd.f32 %v18194_v61, %v18186_v2 }
 0xc28   : > { %v10641_v48 = vpop.f32.mrf.mxu1 }
 0xc29   : > { %v18254_v50 = vpack.c.bf16 %v9786_v56, %v9785_v58  ;;  %v9703_v0 = vadd.f32 %v10640_v15, %v9542_v5  ;;  %v10563_v58 = vpop.f32.mrf.mxu0 }
 0xc2a   : > { %v10642_v28 = vpop.f32.mrf.mxu1 }
 0xc2b   : > { %v10643_v1 = vadd.f32 %v10642_v28, %v10641_v48  ;;  %v9787_v54 = vmax.f32 %v9703_v0, 0.0  ;;  %v9566_v0 = vadd.f32 %v10546_v59, %v9119_v20  ;;  %v9128_v20 = vld [vmem:[%s18431_s14 + $0xe8] sm:$0xff] }
 0xc2c   : > { %v10644_v36 = vpop.f32.mrf.mxu1 }
 0xc2d   : > { %v9706_v23 = vadd.f32 %v10643_v1, %v9545_v33  ;;  %v10565_v33 = vpop.f32.mrf.mxu0 }
 0xc2e   : > { %v10645_v57 = vpop.f32.mrf.mxu1 }
 0xc2f   : > { %v9788_v4 = vmax.f32 %v9706_v23, 0.0  ;;  %v10646_v25 = vadd.f32 %v10645_v57, %v10644_v36  ;;  %v10566_v61 = vpop.f32.mrf.mxu0 }
 0xc30   : > { %v10647_v30 = vpop.f32.mrf.mxu1 }
 0xc31   : > { %v18268_v60 = vpack.c.bf16 %v9788_v4, %v9787_v54  ;;  %v9711_v45 = vadd.f32 %v10646_v25, %v9550_v32  ;;  %v10568_v57 = vpop.f32.mrf.mxu0 }
 0xc32   : > { %v10648_v38 = vpop.f32.mrf.mxu1 }
 0xc33   : > { %v10649_v42 = vadd.f32 %v10648_v38, %v10647_v30  ;;  %v9789_v3 = vmax.f32 %v9711_v45, 0.0  ;;  %v10569_v32 = vpop.f32.mrf.mxu0 }
 0xc34   : > { %v10650_v18 = vpop.f32.mrf.mxu1  ;;  %v10570_v59 = vadd.f32 %v10569_v32, %v10568_v57  ;;  %v10567_v32 = vadd.f32 %v10566_v61, %v10565_v33  ;;  %v10561_v61 = vadd.f32 %v18271_v40, %v18263_v49 }
 0xc35   : > { %v9714_v31 = vadd.f32 %v10649_v42, %v9553_v52  ;;  %v10571_v30 = vpop.f32.mrf.mxu0 }
 0xc36   : > { %v10651_v21 = vpop.f32.mrf.mxu1 }
 0xc37   : > { %v9790_v43 = vmax.f32 %v9714_v31, 0.0  ;;  %v10652_v13 = vadd.f32 %v10651_v21, %v10650_v18  ;;  %v10572_v52 = vpop.f32.mrf.mxu0 }
 0xc38   : > { %v10653_v24 = vpop.f32.mrf.mxu1 }
 0xc39   : > { %v9719_v9 = vadd.f32 %v10652_v13, %v9558_v16  ;;  %v18282_v39 = vpack.c.bf16 %v9790_v43, %v9789_v3  ;;  %v10574_v18 = vpop.f32.mrf.mxu0 }
 0xc3a   : > { %v10654_v47 = vpop.f32.mrf.mxu1 }
 0xc3b   : > { %v10655_v27 = vadd.f32 %v10654_v47, %v10653_v24  ;;  %v9791_v53 = vmax.f32 %v9719_v9, 0.0  ;;  %v10575_v3 = vpop.f32.mrf.mxu0 }
 0xc3c   : > { %v10656_v56 = vpop.f32.mrf.mxu1 }
 0xc3d   : > { %v9722_v5 = vadd.f32 %v10655_v27, %v9561_v22  ;;  %v10577_v13 = vpop.f32.mrf.mxu0  ;;  %v10573_v22 = vadd.f32 %v10572_v52, %v10571_v30  ;;  %v10576_v27 = vadd.f32 %v10575_v3, %v10574_v18  ;;  %v10564_v3 = vadd.f32 %v10563_v58, %v18277_v34  ;;  %v9124_v34 = vld [vmem:[%s18431_s14 + $0xc8] sm:$0xff] }
 0xc3e   : > { %v10657_v15 = vpop.f32.mrf.mxu1 }
 0xc3f   : > { %v9792_v48 = vmax.f32 %v9722_v5, 0.0  ;;  %v10658_v28 = vadd.f32 %v10657_v15, %v10656_v56  ;;  %v10578_v9 = vpop.f32.mrf.mxu0  ;;  %v9129_v56 = vld [vmem:[%s18431_s14 + $0xf0] sm:$0xff]  ;;  %v9601_v52 = vadd.f32 %v10573_v22, %v9128_v20 }
 0xc40   : > { %v18290_v1 = vpop.f32.mrf.mxu1  ;;  %v10579_v15 = vadd.f32 %v10578_v9, %v10577_v13  ;;  %v9606_v18 = vadd.f32 %v10576_v27, %v9129_v56  ;;  %v9126_v13 = vld [vmem:[%s18431_s14 + $0xd8] sm:$0xff]  ;;  %v10558_v27 = vadd.f32 %v18257_v63, %v18249_v8  ;;  %v10555_v56 = vadd.f32 %v18243_v37, %v18235_v44 }
 0xc41   : > { %v18292_v55 = vadd.f32 %v10658_v28, %v9566_v0  ;;  %v18294_v6 = vpack.c.bf16 %v9792_v48, %v9791_v53  ;;  %v9127_v53 = vld [vmem:[%s18431_s14 + $0xe0] sm:$0xff]  ;;  %v9130_v28 = vld [vmem:[%s18431_s14 + $0xf8] sm:$0xff]  ;;  %v10552_v8 = vadd.f32 %v18229_v12, %v18221_v29 }
 0xc42   : > { %v18296_v2 = vpop.f32.mrf.mxu1  ;;  %v9598_v9 = vadd.f32 %v10570_v59, %v9127_v53  ;;  %v9609_v14 = vadd.f32 %v10579_v15, %v9130_v28  ;;  %v9122_v63 = vld [vmem:[%s18431_s14 + $0xb8] sm:$0xff] }
 0xc43   : > { %v9577_v12 = vadd.f32 %v10555_v56, %v9122_v63 }
 0xc44   : > { %v18298_v36 = vpop.f32.mrf.mxu1 }
 0xc46   : > { %v18300_v23 = vpop.f32.mrf.mxu1 }
 0xc47   : > { %v10664_v29 = vadd.f32 %v18300_v23, %v18298_v36 }
 0xc48   : > { %v18302_v54 = vpop.f32.mrf.mxu1 }
 0xc4a   : > { %v18304_v4 = vpop.f32.mrf.mxu1 }
 0xc4b   : > { %v10667_v44 = vadd.f32 %v18304_v4, %v18302_v54  ;;  %v9120_v54 = vld [vmem:[%s18431_s14 + $0xa8] sm:$0xff] }
 0xc4c   : > { %v10668_v25 = vpop.f32.mrf.mxu1 }
 0xc4e   : > { %v10669_v19 = vpop.f32.mrf.mxu1 }
 0xc50   : > { %v10671_v45 = vpop.f32.mrf.mxu1 }
 0xc52   : > { %v10672_v38 = vpop.f32.mrf.mxu1 }
 0xc53   : > { %v10673_v59 = vadd.f32 %v10672_v38, %v10671_v45  ;;  %v9121_v38 = vld [vmem:[%s18431_s14 + $0xb0] sm:$0xff] }
 0xc54   : > { %v10674_v42 = vpop.f32.mrf.mxu1  ;;  %v9574_v4 = vadd.f32 %v10552_v8, %v9121_v38 }
 0xc56   : > { %v10675_v62 = vpop.f32.mrf.mxu1 }
 0xc57   : > { %v10676_v58 = vadd.f32 %v10675_v62, %v10674_v42  ;;  %v9585_v42 = vadd.f32 %v10561_v61, %v9124_v34  ;;  %v10670_v62 = vadd.f32 %v10669_v19, %v10668_v25 }
 0xc58   : > { %v10677_v31 = vpop.f32.mrf.mxu1 }
 0xc59   : > { %v9746_v37 = vadd.f32 %v10673_v59, %v9585_v42 }
 0xc5a   : > { %v10678_v21 = vpop.f32.mrf.mxu1 }
 0xc5c   : > { %v10680_v43 = vpop.f32.mrf.mxu1 }
 0xc5e   : > { %v10681_v16 = vpop.f32.mrf.mxu1 }
 0xc5f   : > { %v10682_v30 = vadd.f32 %v10681_v16, %v10680_v43  ;;  %v9593_v43 = vadd.f32 %v10567_v32, %v9126_v13  ;;  %v9738_v32 = vadd.f32 %v10667_v44, %v9577_v12 }
 0xc60   : > { %v10683_v11 = vpop.f32.mrf.mxu1 }
 0xc61   : > { %v9759_v16 = vadd.f32 %v10682_v30, %v9598_v9  ;;  %v9798_v30 = vmax.f32 %v9746_v37, 0.0 }
 0xc62   : > { %v10684_v24 = vpop.f32.mrf.mxu1 }
 0xc63   : > { %v10685_v48 = vadd.f32 %v10684_v24, %v10683_v11  ;;  %v9125_v11 = vld [vmem:[%s18431_s14 + $0xd0] sm:$0xff]  ;;  %v10679_v24 = vadd.f32 %v10678_v21, %v10677_v31 }
 0xc64   : > { %v10686_v47 = vpop.f32.mrf.mxu1  ;;  %v9590_v20 = vadd.f32 %v10564_v3, %v9125_v11 }
 0xc65   : > { %v9754_v31 = vadd.f32 %v10679_v24, %v9593_v43 }
 0xc66   : > { %v10687_v5 = vpop.f32.mrf.mxu1  ;;  %v9751_v15 = vadd.f32 %v10676_v58, %v9590_v20 }
 0xc67   : > { %v10688_v0 = vadd.f32 %v10687_v5, %v10686_v47  ;;  %v9762_v47 = vadd.f32 %v10685_v48, %v9601_v52  ;;  %v9800_v25 = vmax.f32 %v9754_v31, 0.0  ;;  %v10549_v48 = vadd.f32 %v18215_v7, %v18200_v46 }
 0xc68   : > { %v10689_v57 = vpop.f32.mrf.mxu1  ;;  %v9799_v28 = vmax.f32 %v9751_v15, 0.0  ;;  %v9796_v52 = vmax.f32 %v9738_v32, 0.0 }
 0xc69   : > { %v9767_v5 = vadd.f32 %v10688_v0, %v9606_v18  ;;  %v9802_v21 = vmax.f32 %v9762_v47, 0.0  ;;  %v9569_v7 = vadd.f32 %v10549_v48, %v9120_v54 }
 0xc6a   : > { %v10690_v41 = vpop.f32.mrf.mxu1  ;;  %v9819_v46 = vpack.c.bf16 %v9800_v25, %v9799_v28 }
 0xc6b   : > { %v10691_v33 = vadd.f32 %v10690_v41, %v10689_v57  ;;  %v9123_v41 = vld [vmem:[%s18431_s14 + $0xc0] sm:$0xff]  ;;  %v9803_v49 = vmax.f32 %v9767_v5, 0.0  ;;  %v10661_v57 = vadd.f32 %v18296_v2, %v18290_v1 }
 0xc6c   : > { %v9582_v45 = vadd.f32 %v10558_v27, %v9123_v41 }
 0xc6d   : > { %v9770_v22 = vadd.f32 %v10691_v33, %v9609_v14  ;;  %v9801_v14 = vmax.f32 %v9759_v16, 0.0  ;;  %v9730_v23 = vadd.f32 %v10661_v57, %v9569_v7 }
 0xc6e   : > { %v9743_v0 = vadd.f32 %v10670_v62, %v9582_v45 }
 0xc6f   : > { %v9804_v40 = vmax.f32 %v9770_v22, 0.0  ;;  %v9820_v19 = vpack.c.bf16 %v9802_v21, %v9801_v14  ;;  %v9794_v13 = vmax.f32 %v9730_v23, 0.0 }
 0xc70   : > { %v9797_v36 = vmax.f32 %v9743_v0, 0.0 }
 0xc71   : > { %v9821_v53 = vpack.c.bf16 %v9804_v40, %v9803_v49 }
 0xc72   : > { %v9818_v18 = vpack.c.bf16 %v9798_v30, %v9797_v36 }
 0xc73   : > { %10692 = vmatprep.subr.bf16.mxu0 %v9821_v53 }
 0xc74   : > { %10693 = vmatpush3.bf16.msra.mxu0 %v18268_v60  ;;  %v9735_v60 = vadd.f32 %v10664_v29, %v9574_v4 }
 0xc75   : > { %10694 = vmatprep.subr.bf16.mxu0 %v9820_v19 }
 0xc76   : > { %v9795_v3 = vmax.f32 %v9735_v60, 0.0 }
 0xc78   : > { %10695 = vmatpush3.bf16.msra.mxu0 %v18254_v50  ;;  %v9817_v1 = vpack.c.bf16 %v9796_v52, %v9795_v3  ;;  %v9793_v50 = vmax.f32 %v18292_v55, 0.0 }
 0xc79   : > { %10696 = vmatprep.subr.bf16.mxu0 %v9819_v46 }
 0xc7a   : > { %v9816_v2 = vpack.c.bf16 %v9794_v13, %v9793_v50 }
 0xc7c   : > { %10697 = vmatpush3.bf16.msra.mxu0 %v18240_v35  ;;  %v20480_v35 = vld [vmem:[#allocation317_spill] sm:$0xff] }
 0xc7d   : > { %10698 = vmatprep.subr.bf16.mxu0 %v9818_v18 }
 0xc80   : > { %10699 = vmatpush3.bf16.msra.mxu0 %v18226_v51  ;;  %v20481_v51 = vld [vmem:[#allocation190_spill] sm:$0xff] }
 0xc81   : > { %10700 = vmatprep.subr.bf16.mxu0 %v9817_v1 }
 0xc84   : > { %10701 = vmatpush3.bf16.msra.mxu0 %v18210_v26 }
 0xc85   : > { %10702 = vmatprep.subr.bf16.mxu0 %v9816_v2 }
 0xc88   : > { %10703 = vmatpush3.bf16.msra.mxu0 %v18191_v17 }
 0xc89   : > { %10704 = vmatprep.subr.bf16.mxu0 %v18294_v6 }
 0xc8c   : > { %10705 = vmatpush3.bf16.msra.mxu0 %v18179_v10 }
 0xc8d   : > { %10706 = vmatprep.subr.bf16.mxu0 %v18282_v39 }
 0xc90   : > { %10707 = vmatpush3.bf16.msra.mxu0 %v20480_v35 }
 0xc93   : > { %9867 = vmatmul.mubr.bf16.vlgmr.msra.gmra.mxu0 %v20481_v51 }
 0xc94   : > { %11055 = shalt.err (!%p11052_p9)
}
 0xc95   : > { %s11056_s30 = scalar_lea.hbm %s9898_s29, 32  ;;  %s11060_s1 = scalar_lea.hbm %s18435_s18, 64 }
 0xc96   : > { %p11057_p12 = scmp.ne.s32.totalorder %s9898_s29, %s11056_s30  ;;  %p11061_p5 = scmp.lt.s32.totalorder %s9898_s29, %s18435_s18 }
 0xc97   : > { %p11062_p3 = scmp.lt.s32.totalorder %s11060_s1, %s11056_s30 }
 0xc98   : > { %p11058_p1 = pnand %p11057_p12, %p20484_p10 }
 0xc99   : > { %p11063_p4 = por %p11062_p3, %p11061_p5 }
 0xc9a   : > { %p11059_p2 = pneg %p11058_p1 }
 0xc9c   : > { %p11064_p8 = pnand %p11063_p4, %p11059_p2 }
 0xc9e   : > { %11067 = shalt.err (!%p11064_p8)
}
 0xc9f   : > { %10734 = dma.vmem_to_hbm [thread:$0]  (%p20484_p10), %s9901_s27, 32, %s9898_s29, %s9881_s26   ;;  %vm9874_vm14 = vcmask 2048  }
 0xca0   : > { %s10034_s3 = sshll.u32 %s11335_s16, 2  ;;  %s20485_s19 = sld [smem:[#allocation339_spill]] }
 0xca1   : > { %s20486_s22 = sld [smem:[#allocation340_spill]] }
 0xca6   : > { %v9822_v17 = vld [vmem:[%s20485_s19] sm:$0x7] }
 0xca7   : > { %s644_s17 = scalar_lea.vmem %s20486_s22, %s10034_s3 }
 0xd53   : > { %v10708_v10 = vpop.f32.mrf.mxu0 }
 0xd55   : > { %v10709_v26 = vpop.f32.mrf.mxu0 }
 0xd56   : > { %v10710_v39 = vadd.f32 %v10709_v26, %v10708_v10 }
 0xd57   : > { %v10711_v55 = vpop.f32.mrf.mxu0 }
 0xd58   : > { %v9869_v6 = vadd.f32 %v10710_v39, %v9822_v17 }
 0xd59   : > { %v10712_v9 = vpop.f32.mrf.mxu0 }
 0xd5a   : > { %9875 = vst.msk [vmem:[%s644_s17] sm:$0x7] %vm9874_vm14, %v9869_v6 }
 0xd5b PF: > { %s20487_s2 = sld [smem:[#allocation15_spill]] }
 0xd5c   : > { %s20488_s29 = sld [smem:[#allocation12_spill]] }
 0xd5d   : > { %s20489_s27 = sld [smem:[#allocation17_spill]] }
 0xd61   : > { %p10751_p10 = scmp.ge.s32.totalorder %s20487_s2, 2 }
 0xd62   : > { %s9919_s16 = sand.u32 1, %s20488_s29  }
 0xd63   : > { %p20490_p11 = scmp.ne.s32.totalorder %s20489_s27, 0  ;;  %s9920_s26 = scalar_lea.sflag [#allocation5], %s9919_s16 }
 0xd65   : > { %p10744_p13 = pnand %p10751_p10, %p20490_p11 }
 0xd67   : > { %p10745_p0 = pneg %p10744_p13 }
 0xd69   : > { %11101 = dma.done.wait (%p10745_p0), %s9920_s26, 32  }
 0xd6a   : > { %11103 = vsyncadd (%p10745_p0), %s9920_s26, 4294967264  ;;  %s34_s19 = sadd.s32 1, %s20487_s2   ;;  %s20491_s30 = sld [smem:[#allocation13_spill]] }
 0xd6b   : > { %p31_p6 = scmp.ge.s32.totalorder %s34_s19, 4   ;;  %s20492_s29 = sld [smem:[#allocation18_spill]] }
 0xd6c   : > { %s20493_s1 = sld [smem:[#allocation14_spill]]  ;;  %s20495_s27 = smov %s11110_s28 }
 0xd6d   : > { %s20494_s0 = sld [smem:[#allocation16_spill]] }
 0xd6e   :  { %33 = sbr.rel (!%p31_p6) target bundleno = 14 (0xe), region = 156 }
 0xd70   : > { %s20496_s28 = smov %s20491_s30 }
 0xd72   : > { %s20497_s30 = smov %s20493_s1 }
 0xd73   :  { %9925 = vsyncpa [#allocation4], 1 }
 0xd74   :  { %9927 = vsyncpa [#allocation4 + $0x1], 1 }
 0xd75   :  { %9928 = vsyncpa [#allocation7], 1 }
 0xd76   :  { %9929 = vsyncpa [#allocation5], 1 }
 0xd77   :  { %9931 = vsyncpa [#allocation5 + $0x1], 1 }

</bundles_post_ra>
